<compile_context>
chip_gen: v5e
topology: v5e:2x2
jax: 0.10.0
libtpu: 0.0.40
codegen_flags: <defaults>
</compile_context>

<pallas_src>
import functools

import jax
import jax.numpy as jnp
import numpy as np
from jax import lax
from jax.experimental import pallas as pl
from jax.experimental.pallas import tpu as pltpu


# ---- exact (erf-based) GELU, built from guaranteed-lowerable primitives -------------------
_ERF_P = 0.3275911
_ERF_A1 = 0.254829592
_ERF_A2 = -0.284496736
_ERF_A3 = 1.421413741
_ERF_A4 = -1.453152027
_ERF_A5 = 1.061405429
_INV_SQRT2 = 0.7071067811865476


def _erf_approx(x):
    # Abramowitz & Stegun 7.1.26: |erf(x) - approx| <= 1.5e-7
    a = jnp.abs(x)
    t = 1.0 / (1.0 + _ERF_P * a)
    poly = t * (_ERF_A1 + t * (_ERF_A2 + t * (_ERF_A3 + t * (_ERF_A4 + t * _ERF_A5))))
    y = 1.0 - poly * jnp.exp(-a * a)
    return jnp.where(x < 0.0, -y, y)


def _gelu_kernel(x):
    # matches nn.GELU() default (exact, erf-based) to f32 precision
    return 0.5 * x * (1.0 + _erf_approx(x * _INV_SQRT2))


def block_kernel(x_ref, w1_ref, b1_ref, wdw_ref, bdw_ref, w3_ref, b3_ref, o_ref, *, width):
    # x_ref: (bn, Cin, H*W) — bn images per grid step, channels on sublanes, spatial on lanes.
    bn, cin, hw = x_ref.shape
    cmid = w1_ref.shape[0]

    w1 = w1_ref[...]            # (Cmid, Cin)   bn1 scale folded in
    b1 = b1_ref[...]            # (Cmid, 1)
    wdw = wdw_ref[...]          # (Cmid, 9)     bn2 scale folded in, taps row-major (ky, kx)
    bdw = bdw_ref[...]          # (Cmid, 1)     s2*conv2_bias + bn2 shift
    w3 = w3_ref[...]            # (Cout, Cmid)  bn3 scale folded in
    b3 = b3_ref[...]            # (Cout, 1)

    # Edge-validity masks for the 9 depthwise taps (hoisted, shared by all images in the block).
    pos = lax.broadcasted_iota(jnp.int32, (cmid, hw), 1)
    if (width & (width - 1)) == 0:
        col = jnp.bitwise_and(pos, width - 1)
    else:
        col = pos % width
    col_ok = {-1: col >= 1, 0: None, 1: col <= width - 2}
    row_ok = {-1: pos >= width, 0: None, 1: pos < hw - width}
    masks = {}
    for dy in (-1, 0, 1):
        for dx in (-1, 0, 1):
            m, c = row_ok[dy], col_ok[dx]
            if m is None:
                m = c
            elif c is not None:
                m = m & c
            masks[(dy, dx)] = m

    taps = [wdw[:, k:k + 1] for k in range(9)]      # (Cmid, 1) columns, hoisted

    for b in range(bn):
        x = x_ref[b]                                                        # (Cin, HW)

        # ---- conv1 (1x1, bias-free) + bn1 (folded) -> gelu (MXU + VPU/EUP) ----
        h = jnp.dot(w1, x, preferred_element_type=jnp.float32) + b1         # (Cmid, HW)
        h = _gelu_kernel(h)

        # ---- conv2: depthwise 3x3, stride=1, padding=1, groups=Cmid + bn2 (folded) ----
        # tap (dy, dx): t[:, p] = h[:, p + dy*W + dx] where valid, else 0 (zero padding).
        acc = jnp.zeros((cmid, hw), jnp.float32)
        for ky in range(3):
            dy = ky - 1
            for kx in range(3):
                dx = kx - 1
                off = dy * width + dx
                t = h if off == 0 else pltpu.roll(h, (-off) % hw, 1)        # XLU lane rotate
                m = masks[(dy, dx)]
                if m is not None:
                    t = jnp.where(m, t, 0.0)
                acc = acc + t * taps[ky * 3 + kx]
        h2 = _gelu_kernel(acc + bdw)                                        # (Cmid, HW)

        # ---- conv3 (1x1, bias-free) + bn3 (folded) -> residual add -> gelu ----
        y = jnp.dot(w3, h2, preferred_element_type=jnp.float32) + b3        # (Cout, HW)
        o_ref[b] = _gelu_kernel(y + x).astype(o_ref.dtype)


def _fold_params(params):
    """Fold BN scales into conv weights and shifts into per-channel bias columns."""
    f32 = jnp.float32
    cmid = params["w1"].shape[0]
    s1, b1 = params["s1"].astype(f32), params["b1"].astype(f32)
    s2, b2 = params["s2"].astype(f32), params["b2"].astype(f32)
    s3, b3 = params["s3"].astype(f32), params["b3"].astype(f32)
    w1f = params["w1"].astype(f32) * s1[:, None]                       # (Cmid, Cin)
    wdwf = params["wdw"].astype(f32).reshape(cmid, 9) * s2[:, None]    # (Cmid, 9)
    bdwf = (s2 * params["bdw"].astype(f32) + b2)[:, None]              # (Cmid, 1)
    w3f = params["w3"].astype(f32) * s3[:, None]                       # (Cout, Cmid)
    return w1f, b1[:, None], wdwf, bdwf, w3f, b3[:, None]


def block_forward(x_nchw, params, *, max_images_per_step=8):
    """x_nchw: (N, Cin, H, W) float32 (PyTorch layout).  Returns (N, Cout, H, W)."""
    x = x_nchw.astype(jnp.float32)
    n, cin, hgt, wid = x.shape
    hw = hgt * wid
    cmid = params["w1"].shape[0]
    cout = params["w3"].shape[0]
    assert cout == cin, "identity_downsample=None requires in_channels == 4*intermediate_channels"

    # Images per grid step: largest divisor of N up to max_images_per_step
    # (amortizes per-step pipeline overhead across several small images).
    bn = 1
    for d in range(1, min(n, max_images_per_step) + 1):
        if n % d == 0:
            bn = d

    x2 = x.reshape(n, cin, hw)                       # free reshape: NCHW with spatial flattened
    w1f, b1f, wdwf, bdwf, w3f, b3f = _fold_params(params)

    def const_spec(shape):
        return pl.BlockSpec(shape, lambda i: (0,) * len(shape))

    flops = n * hw * (2 * cmid * (cin + cout) + 18 * cmid + 12 * (2 * cmid + cout))
    transcendentals = n * hw * (2 * cmid + cout)
    bytes_accessed = 4 * (n * hw * (cin + cout) + cmid * (cin + cout + 11) + cout)

    out2 = pl.pallas_call(
        functools.partial(block_kernel, width=wid),
        out_shape=jax.ShapeDtypeStruct((n, cout, hw), jnp.float32),
        grid_spec=pltpu.PrefetchScalarGridSpec(
            num_scalar_prefetch=0,
            grid=(n // bn,),
            in_specs=[
                pl.BlockSpec((bn, cin, hw), lambda i: (i, 0, 0)),   # x  (bn images / step)
                const_spec((cmid, cin)),                            # conv1 weight (bn1 folded)
                const_spec((cmid, 1)),                              # bn1 shift
                const_spec((cmid, 9)),                              # depthwise taps (bn2 folded)
                const_spec((cmid, 1)),                              # depthwise/bn2 bias
                const_spec((cout, cmid)),                           # conv3 weight (bn3 folded)
                const_spec((cout, 1)),                              # bn3 shift
            ],
            out_specs=pl.BlockSpec((bn, cout, hw), lambda i: (i, 0, 0)),
        ),
        compiler_params=pltpu.CompilerParams(
            dimension_semantics=("parallel",),
        ),
        cost_estimate=pl.CostEstimate(
            flops=flops, transcendentals=transcendentals, bytes_accessed=bytes_accessed),
    )(x2, w1f, b1f, wdwf, bdwf, w3f, b3f)

    return out2.reshape(n, cout, hgt, wid)


def block_reference(x_nchw, params):
    """Pure-JAX reference (unfolded BN, true erf GELU, NCHW)."""
    x = x_nchw.astype(jnp.float32)
    _, _, hgt, wid = x.shape
    gelu = lambda v: jax.nn.gelu(v, approximate=False)

    def cvec(v):
        return v[None, :, None, None]

    h = jnp.einsum("nchw,mc->nmhw", x, params["w1"])
    h = gelu(h * cvec(params["s1"]) + cvec(params["b1"]))
    hp = jnp.pad(h, ((0, 0), (0, 0), (1, 1), (1, 1)))
    acc = jnp.zeros_like(h)
    for ky in range(3):
        for kx in range(3):
            acc = acc + hp[:, :, ky:ky + hgt, kx:kx + wid] * cvec(params["wdw"][:, ky, kx])
    acc = acc + cvec(params["bdw"])
    h2 = gelu(acc * cvec(params["s2"]) + cvec(params["b2"]))
    y = jnp.einsum("nchw,mc->nmhw", h2, params["w3"])
    y = y * cvec(params["s3"]) + cvec(params["b3"])
    return gelu(y + x)


if __name__ == "__main__":
    # Small shapes consistent with the module: in_channels = 4 * intermediate_channels
    # so the residual add works with identity_downsample=None, stride=1.
    N, Cin, H, W = 2, 128, 16, 16
    Cmid = 32
    Cout = 4 * Cmid  # expansion = 4  (== Cin)

    key = jax.random.PRNGKey(0)
    ks = jax.random.split(key, 17)

    def bn_fold(kg, kb, km, kv, C):
        gamma = 1.0 + 0.1 * jax.random.normal(kg, (C,), jnp.float32)
        beta = 0.1 * jax.random.normal(kb, (C,), jnp.float32)
        mean = 0.1 * jax.random.normal(km, (C,), jnp.float32)
        var = jax.random.uniform(kv, (C,), jnp.float32, minval=0.5, maxval=1.5)
        scale = gamma / jnp.sqrt(var + 1e-5)
        shift = beta - mean * scale
        return scale, shift

    params = {}
    params["w1"] = jax.random.normal(ks[0], (Cmid, Cin), jnp.float32) / np.sqrt(Cin)
    params["s1"], params["b1"] = bn_fold(ks[1], ks[2], ks[3], ks[4], Cmid)
    params["wdw"] = jax.random.normal(ks[5], (Cmid, 3, 3), jnp.float32) / 3.0
    params["bdw"] = 0.05 * jax.random.normal(ks[6], (Cmid,), jnp.float32)
    params["s2"], params["b2"] = bn_fold(ks[7], ks[8], ks[9], ks[10], Cmid)
    params["w3"] = jax.random.normal(ks[11], (Cout, Cmid), jnp.float32) / np.sqrt(Cmid)
    params["s3"], params["b3"] = bn_fold(ks[12], ks[13], ks[14], ks[15], Cout)

    # torch.rand -> uniform [0, 1), NCHW input
    x = jax.random.uniform(ks[16], (N, Cin, H, W), jnp.float32)

    fwd = jax.jit(block_forward)
    out = jax.block_until_ready(fwd(x, params))
    ref = jax.block_until_ready(block_reference(x, params))
    np.testing.assert_allclose(np.array(out), np.array(ref), rtol=2e-3, atol=2e-3)
    print("KERNEL_OK")
</pallas_src>

<mosaic_0001>
module attributes {stable_mosaic.version = 11 : i64} {
  func.func @block_kernel(%arg0: i32, %arg1: memref<2x128x256xf32, #tpu.memory_space<vmem>>, %arg2: memref<32x128xf32, #tpu.memory_space<vmem>>, %arg3: memref<32x1xf32, #tpu.memory_space<vmem>>, %arg4: memref<32x9xf32, #tpu.memory_space<vmem>>, %arg5: memref<32x1xf32, #tpu.memory_space<vmem>>, %arg6: memref<128x32xf32, #tpu.memory_space<vmem>>, %arg7: memref<128x1xf32, #tpu.memory_space<vmem>>, %arg8: memref<2x128x256xf32, #tpu.memory_space<vmem>>) attributes {dimension_semantics = [#tpu.dimension_semantics<parallel>], iteration_bounds = array<i64: 1>, scalar_prefetch = 0 : i64, scratch_operands = 0 : i64, tpu.core_type = #tpu.core_type<tc>, window_params = [{transform_indices = @transform_0, window_bounds = array<i64: 2, 128, 256>}, {pipeline_mode = #tpu.pipeline_mode<synchronous>, transform_indices = @transform_1, window_bounds = array<i64: 32, 128>}, {pipeline_mode = #tpu.pipeline_mode<synchronous>, transform_indices = @transform_2, window_bounds = array<i64: 32, 1>}, {pipeline_mode = #tpu.pipeline_mode<synchronous>, transform_indices = @transform_3, window_bounds = array<i64: 32, 9>}, {pipeline_mode = #tpu.pipeline_mode<synchronous>, transform_indices = @transform_4, window_bounds = array<i64: 32, 1>}, {pipeline_mode = #tpu.pipeline_mode<synchronous>, transform_indices = @transform_5, window_bounds = array<i64: 128, 32>}, {pipeline_mode = #tpu.pipeline_mode<synchronous>, transform_indices = @transform_6, window_bounds = array<i64: 128, 1>}, {transform_indices = @transform_7, window_bounds = array<i64: 2, 128, 256>}]} {
    %c0 = arith.constant 0 : index
    %c0_0 = arith.constant 0 : index
    %0 = vector.load %arg2[%c0, %c0_0] : memref<32x128xf32, #tpu.memory_space<vmem>>, vector<32x128xf32>
    %c0_1 = arith.constant 0 : index
    %c0_2 = arith.constant 0 : index
    %1 = vector.load %arg3[%c0_1, %c0_2] : memref<32x1xf32, #tpu.memory_space<vmem>>, vector<32x1xf32>
    %c0_3 = arith.constant 0 : index
    %c0_4 = arith.constant 0 : index
    %2 = vector.load %arg4[%c0_3, %c0_4] : memref<32x9xf32, #tpu.memory_space<vmem>>, vector<32x9xf32>
    %c0_5 = arith.constant 0 : index
    %c0_6 = arith.constant 0 : index
    %3 = vector.load %arg5[%c0_5, %c0_6] : memref<32x1xf32, #tpu.memory_space<vmem>>, vector<32x1xf32>
    %c0_7 = arith.constant 0 : index
    %c0_8 = arith.constant 0 : index
    %4 = vector.load %arg6[%c0_7, %c0_8] : memref<128x32xf32, #tpu.memory_space<vmem>>, vector<128x32xf32>
    %c0_9 = arith.constant 0 : index
    %c0_10 = arith.constant 0 : index
    %5 = vector.load %arg7[%c0_9, %c0_10] : memref<128x1xf32, #tpu.memory_space<vmem>>, vector<128x1xf32>
    %6 = tpu.iota {dimensions = array<i32: 1>} : vector<32x256xi32>
    %c15_i32 = arith.constant 15 : i32
    %7 = vector.broadcast %c15_i32 : i32 to vector<32x256xi32>
    %8 = arith.andi %6, %7 : vector<32x256xi32>
    %c1_i32 = arith.constant 1 : i32
    %9 = vector.broadcast %c1_i32 : i32 to vector<32x256xi32>
    %10 = arith.cmpi sge, %8, %9 : vector<32x256xi32>
    %c14_i32 = arith.constant 14 : i32
    %11 = vector.broadcast %c14_i32 : i32 to vector<32x256xi32>
    %12 = arith.cmpi sle, %8, %11 : vector<32x256xi32>
    %c16_i32 = arith.constant 16 : i32
    %13 = vector.broadcast %c16_i32 : i32 to vector<32x256xi32>
    %14 = arith.cmpi sge, %6, %13 : vector<32x256xi32>
    %c240_i32 = arith.constant 240 : i32
    %15 = vector.broadcast %c240_i32 : i32 to vector<32x256xi32>
    %16 = arith.cmpi slt, %6, %15 : vector<32x256xi32>
    %17 = arith.andi %14, %10 : vector<32x256xi1>
    %18 = arith.andi %14, %12 : vector<32x256xi1>
    %19 = arith.andi %16, %10 : vector<32x256xi1>
    %20 = arith.andi %16, %12 : vector<32x256xi1>
    %21 = vector.extract_strided_slice %2 {offsets = [0, 0], sizes = [32, 1], strides = [1, 1]} : vector<32x9xf32> to vector<32x1xf32>
    %22 = vector.extract_strided_slice %2 {offsets = [0, 1], sizes = [32, 1], strides = [1, 1]} : vector<32x9xf32> to vector<32x1xf32>
    %23 = vector.extract_strided_slice %2 {offsets = [0, 2], sizes = [32, 1], strides = [1, 1]} : vector<32x9xf32> to vector<32x1xf32>
    %24 = vector.extract_strided_slice %2 {offsets = [0, 3], sizes = [32, 1], strides = [1, 1]} : vector<32x9xf32> to vector<32x1xf32>
    %25 = vector.extract_strided_slice %2 {offsets = [0, 4], sizes = [32, 1], strides = [1, 1]} : vector<32x9xf32> to vector<32x1xf32>
    %26 = vector.extract_strided_slice %2 {offsets = [0, 5], sizes = [32, 1], strides = [1, 1]} : vector<32x9xf32> to vector<32x1xf32>
    %27 = vector.extract_strided_slice %2 {offsets = [0, 6], sizes = [32, 1], strides = [1, 1]} : vector<32x9xf32> to vector<32x1xf32>
    %28 = vector.extract_strided_slice %2 {offsets = [0, 7], sizes = [32, 1], strides = [1, 1]} : vector<32x9xf32> to vector<32x1xf32>
    %29 = vector.extract_strided_slice %2 {offsets = [0, 8], sizes = [32, 1], strides = [1, 1]} : vector<32x9xf32> to vector<32x1xf32>
    %c0_11 = arith.constant 0 : index
    %c0_12 = arith.constant 0 : index
    %c0_13 = arith.constant 0 : index
    %30 = vector.load %arg1[%c0_11, %c0_12, %c0_13] : memref<2x128x256xf32, #tpu.memory_space<vmem>>, vector<1x128x256xf32>
    %31 = vector.shape_cast %30 : vector<1x128x256xf32> to vector<128x256xf32>
    %cst = arith.constant dense<0.000000e+00> : vector<32x256xf32>
    %32 = tpu.matmul %0, %31, %cst {dimension_numbers = #tpu.dot_dimension_numbers<[1], [0], [0], [1], [0, 0, 1, 1], [], []>} : vector<32x128xf32>, vector<128x256xf32>, vector<32x256xf32> -> vector<32x256xf32>
    %33 = vector.broadcast %1 : vector<32x1xf32> to vector<32x256xf32>
    %34 = arith.addf %32, %33 : vector<32x256xf32>
    %cst_14 = arith.constant 5.000000e-01 : f32
    %35 = vector.broadcast %cst_14 : f32 to vector<32x256xf32>
    %36 = arith.mulf %35, %34 : vector<32x256xf32>
    %cst_15 = arith.constant 0.707106769 : f32
    %37 = vector.broadcast %cst_15 : f32 to vector<32x256xf32>
    %38 = arith.mulf %34, %37 : vector<32x256xf32>
    %39 = math.absf %38 : vector<32x256xf32>
    %cst_16 = arith.constant 0.327591091 : f32
    %40 = vector.broadcast %cst_16 : f32 to vector<32x256xf32>
    %41 = arith.mulf %40, %39 : vector<32x256xf32>
    %cst_17 = arith.constant 1.000000e+00 : f32
    %42 = vector.broadcast %cst_17 : f32 to vector<32x256xf32>
    %43 = arith.addf %42, %41 : vector<32x256xf32>
    %cst_18 = arith.constant 1.000000e+00 : f32
    %44 = vector.broadcast %cst_18 : f32 to vector<32x256xf32>
    %45 = arith.divf %44, %43 : vector<32x256xf32>
    %cst_19 = arith.constant 1.06140542 : f32
    %46 = vector.broadcast %cst_19 : f32 to vector<32x256xf32>
    %47 = arith.mulf %45, %46 : vector<32x256xf32>
    %cst_20 = arith.constant -1.45315206 : f32
    %48 = vector.broadcast %cst_20 : f32 to vector<32x256xf32>
    %49 = arith.addf %48, %47 : vector<32x256xf32>
    %50 = arith.mulf %45, %49 : vector<32x256xf32>
    %cst_21 = arith.constant 1.42141378 : f32
    %51 = vector.broadcast %cst_21 : f32 to vector<32x256xf32>
    %52 = arith.addf %51, %50 : vector<32x256xf32>
    %53 = arith.mulf %45, %52 : vector<32x256xf32>
    %cst_22 = arith.constant -0.284496725 : f32
    %54 = vector.broadcast %cst_22 : f32 to vector<32x256xf32>
    %55 = arith.addf %54, %53 : vector<32x256xf32>
    %56 = arith.mulf %45, %55 : vector<32x256xf32>
    %cst_23 = arith.constant 0.254829586 : f32
    %57 = vector.broadcast %cst_23 : f32 to vector<32x256xf32>
    %58 = arith.addf %57, %56 : vector<32x256xf32>
    %59 = arith.mulf %45, %58 : vector<32x256xf32>
    %cst_24 = arith.constant 0.000000e+00 : f32
    %60 = vector.broadcast %cst_24 : f32 to vector<32x256xf32>
    %61 = arith.subf %60, %39 : vector<32x256xf32>
    %62 = arith.mulf %61, %39 : vector<32x256xf32>
    %63 = math.exp %62 : vector<32x256xf32>
    %64 = arith.mulf %59, %63 : vector<32x256xf32>
    %cst_25 = arith.constant 1.000000e+00 : f32
    %65 = vector.broadcast %cst_25 : f32 to vector<32x256xf32>
    %66 = arith.subf %65, %64 : vector<32x256xf32>
    %cst_26 = arith.constant 0.000000e+00 : f32
    %67 = vector.broadcast %cst_26 : f32 to vector<32x256xf32>
    %68 = arith.cmpf olt, %38, %67 : vector<32x256xf32>
    %cst_27 = arith.constant 0.000000e+00 : f32
    %69 = vector.broadcast %cst_27 : f32 to vector<32x256xf32>
    %70 = arith.subf %69, %66 : vector<32x256xf32>
    %71 = arith.select %68, %70, %66 : vector<32x256xi1>, vector<32x256xf32>
    %cst_28 = arith.constant 1.000000e+00 : f32
    %72 = vector.broadcast %cst_28 : f32 to vector<32x256xf32>
    %73 = arith.addf %72, %71 : vector<32x256xf32>
    %74 = arith.mulf %36, %73 : vector<32x256xf32>
    %cst_29 = arith.constant 0.000000e+00 : f32
    %75 = vector.broadcast %cst_29 : f32 to vector<32x256xf32>
    %c17_i32 = arith.constant 17 : i32
    %76 = tpu.dynamic_rotate %74 by %c17_i32 dim 1 : vector<32x256xf32>, i32 -> vector<32x256xf32>
    %cst_30 = arith.constant 0.000000e+00 : f32
    %77 = vector.broadcast %cst_30 : f32 to vector<32x256xf32>
    %78 = arith.select %17, %76, %77 : vector<32x256xi1>, vector<32x256xf32>
    %79 = vector.broadcast %21 : vector<32x1xf32> to vector<32x256xf32>
    %80 = arith.mulf %78, %79 : vector<32x256xf32>
    %81 = arith.addf %75, %80 : vector<32x256xf32>
    %c16_i32_31 = arith.constant 16 : i32
    %82 = tpu.dynamic_rotate %74 by %c16_i32_31 dim 1 : vector<32x256xf32>, i32 -> vector<32x256xf32>
    %cst_32 = arith.constant 0.000000e+00 : f32
    %83 = vector.broadcast %cst_32 : f32 to vector<32x256xf32>
    %84 = arith.select %14, %82, %83 : vector<32x256xi1>, vector<32x256xf32>
    %85 = vector.broadcast %22 : vector<32x1xf32> to vector<32x256xf32>
    %86 = arith.mulf %84, %85 : vector<32x256xf32>
    %87 = arith.addf %81, %86 : vector<32x256xf32>
    %c15_i32_33 = arith.constant 15 : i32
    %88 = tpu.dynamic_rotate %74 by %c15_i32_33 dim 1 : vector<32x256xf32>, i32 -> vector<32x256xf32>
    %cst_34 = arith.constant 0.000000e+00 : f32
    %89 = vector.broadcast %cst_34 : f32 to vector<32x256xf32>
    %90 = arith.select %18, %88, %89 : vector<32x256xi1>, vector<32x256xf32>
    %91 = vector.broadcast %23 : vector<32x1xf32> to vector<32x256xf32>
    %92 = arith.mulf %90, %91 : vector<32x256xf32>
    %93 = arith.addf %87, %92 : vector<32x256xf32>
    %c1_i32_35 = arith.constant 1 : i32
    %94 = tpu.dynamic_rotate %74 by %c1_i32_35 dim 1 : vector<32x256xf32>, i32 -> vector<32x256xf32>
    %cst_36 = arith.constant 0.000000e+00 : f32
    %95 = vector.broadcast %cst_36 : f32 to vector<32x256xf32>
    %96 = arith.select %10, %94, %95 : vector<32x256xi1>, vector<32x256xf32>
    %97 = vector.broadcast %24 : vector<32x1xf32> to vector<32x256xf32>
    %98 = arith.mulf %96, %97 : vector<32x256xf32>
    %99 = arith.addf %93, %98 : vector<32x256xf32>
    %100 = vector.broadcast %25 : vector<32x1xf32> to vector<32x256xf32>
    %101 = arith.mulf %74, %100 : vector<32x256xf32>
    %102 = arith.addf %99, %101 : vector<32x256xf32>
    %c255_i32 = arith.constant 255 : i32
    %103 = tpu.dynamic_rotate %74 by %c255_i32 dim 1 : vector<32x256xf32>, i32 -> vector<32x256xf32>
    %cst_37 = arith.constant 0.000000e+00 : f32
    %104 = vector.broadcast %cst_37 : f32 to vector<32x256xf32>
    %105 = arith.select %12, %103, %104 : vector<32x256xi1>, vector<32x256xf32>
    %106 = vector.broadcast %26 : vector<32x1xf32> to vector<32x256xf32>
    %107 = arith.mulf %105, %106 : vector<32x256xf32>
    %108 = arith.addf %102, %107 : vector<32x256xf32>
    %c241_i32 = arith.constant 241 : i32
    %109 = tpu.dynamic_rotate %74 by %c241_i32 dim 1 : vector<32x256xf32>, i32 -> vector<32x256xf32>
    %cst_38 = arith.constant 0.000000e+00 : f32
    %110 = vector.broadcast %cst_38 : f32 to vector<32x256xf32>
    %111 = arith.select %19, %109, %110 : vector<32x256xi1>, vector<32x256xf32>
    %112 = vector.broadcast %27 : vector<32x1xf32> to vector<32x256xf32>
    %113 = arith.mulf %111, %112 : vector<32x256xf32>
    %114 = arith.addf %108, %113 : vector<32x256xf32>
    %c240_i32_39 = arith.constant 240 : i32
    %115 = tpu.dynamic_rotate %74 by %c240_i32_39 dim 1 : vector<32x256xf32>, i32 -> vector<32x256xf32>
    %cst_40 = arith.constant 0.000000e+00 : f32
    %116 = vector.broadcast %cst_40 : f32 to vector<32x256xf32>
    %117 = arith.select %16, %115, %116 : vector<32x256xi1>, vector<32x256xf32>
    %118 = vector.broadcast %28 : vector<32x1xf32> to vector<32x256xf32>
    %119 = arith.mulf %117, %118 : vector<32x256xf32>
    %120 = arith.addf %114, %119 : vector<32x256xf32>
    %c239_i32 = arith.constant 239 : i32
    %121 = tpu.dynamic_rotate %74 by %c239_i32 dim 1 : vector<32x256xf32>, i32 -> vector<32x256xf32>
    %cst_41 = arith.constant 0.000000e+00 : f32
    %122 = vector.broadcast %cst_41 : f32 to vector<32x256xf32>
    %123 = arith.select %20, %121, %122 : vector<32x256xi1>, vector<32x256xf32>
    %124 = vector.broadcast %29 : vector<32x1xf32> to vector<32x256xf32>
    %125 = arith.mulf %123, %124 : vector<32x256xf32>
    %126 = arith.addf %120, %125 : vector<32x256xf32>
    %127 = vector.broadcast %3 : vector<32x1xf32> to vector<32x256xf32>
    %128 = arith.addf %126, %127 : vector<32x256xf32>
    %cst_42 = arith.constant 5.000000e-01 : f32
    %129 = vector.broadcast %cst_42 : f32 to vector<32x256xf32>
    %130 = arith.mulf %129, %128 : vector<32x256xf32>
    %cst_43 = arith.constant 0.707106769 : f32
    %131 = vector.broadcast %cst_43 : f32 to vector<32x256xf32>
    %132 = arith.mulf %128, %131 : vector<32x256xf32>
    %133 = math.absf %132 : vector<32x256xf32>
    %cst_44 = arith.constant 0.327591091 : f32
    %134 = vector.broadcast %cst_44 : f32 to vector<32x256xf32>
    %135 = arith.mulf %134, %133 : vector<32x256xf32>
    %cst_45 = arith.constant 1.000000e+00 : f32
    %136 = vector.broadcast %cst_45 : f32 to vector<32x256xf32>
    %137 = arith.addf %136, %135 : vector<32x256xf32>
    %cst_46 = arith.constant 1.000000e+00 : f32
    %138 = vector.broadcast %cst_46 : f32 to vector<32x256xf32>
    %139 = arith.divf %138, %137 : vector<32x256xf32>
    %cst_47 = arith.constant 1.06140542 : f32
    %140 = vector.broadcast %cst_47 : f32 to vector<32x256xf32>
    %141 = arith.mulf %139, %140 : vector<32x256xf32>
    %cst_48 = arith.constant -1.45315206 : f32
    %142 = vector.broadcast %cst_48 : f32 to vector<32x256xf32>
    %143 = arith.addf %142, %141 : vector<32x256xf32>
    %144 = arith.mulf %139, %143 : vector<32x256xf32>
    %cst_49 = arith.constant 1.42141378 : f32
    %145 = vector.broadcast %cst_49 : f32 to vector<32x256xf32>
    %146 = arith.addf %145, %144 : vector<32x256xf32>
    %147 = arith.mulf %139, %146 : vector<32x256xf32>
    %cst_50 = arith.constant -0.284496725 : f32
    %148 = vector.broadcast %cst_50 : f32 to vector<32x256xf32>
    %149 = arith.addf %148, %147 : vector<32x256xf32>
    %150 = arith.mulf %139, %149 : vector<32x256xf32>
    %cst_51 = arith.constant 0.254829586 : f32
    %151 = vector.broadcast %cst_51 : f32 to vector<32x256xf32>
    %152 = arith.addf %151, %150 : vector<32x256xf32>
    %153 = arith.mulf %139, %152 : vector<32x256xf32>
    %cst_52 = arith.constant 0.000000e+00 : f32
    %154 = vector.broadcast %cst_52 : f32 to vector<32x256xf32>
    %155 = arith.subf %154, %133 : vector<32x256xf32>
    %156 = arith.mulf %155, %133 : vector<32x256xf32>
    %157 = math.exp %156 : vector<32x256xf32>
    %158 = arith.mulf %153, %157 : vector<32x256xf32>
    %cst_53 = arith.constant 1.000000e+00 : f32
    %159 = vector.broadcast %cst_53 : f32 to vector<32x256xf32>
    %160 = arith.subf %159, %158 : vector<32x256xf32>
    %cst_54 = arith.constant 0.000000e+00 : f32
    %161 = vector.broadcast %cst_54 : f32 to vector<32x256xf32>
    %162 = arith.cmpf olt, %132, %161 : vector<32x256xf32>
    %cst_55 = arith.constant 0.000000e+00 : f32
    %163 = vector.broadcast %cst_55 : f32 to vector<32x256xf32>
    %164 = arith.subf %163, %160 : vector<32x256xf32>
    %165 = arith.select %162, %164, %160 : vector<32x256xi1>, vector<32x256xf32>
    %cst_56 = arith.constant 1.000000e+00 : f32
    %166 = vector.broadcast %cst_56 : f32 to vector<32x256xf32>
    %167 = arith.addf %166, %165 : vector<32x256xf32>
    %168 = arith.mulf %130, %167 : vector<32x256xf32>
    %cst_57 = arith.constant dense<0.000000e+00> : vector<128x256xf32>
    %169 = tpu.matmul %4, %168, %cst_57 {dimension_numbers = #tpu.dot_dimension_numbers<[1], [0], [0], [1], [0, 0, 1, 1], [], []>} : vector<128x32xf32>, vector<32x256xf32>, vector<128x256xf32> -> vector<128x256xf32>
    %170 = vector.broadcast %5 : vector<128x1xf32> to vector<128x256xf32>
    %171 = arith.addf %169, %170 : vector<128x256xf32>
    %172 = arith.addf %171, %31 : vector<128x256xf32>
    %cst_58 = arith.constant 5.000000e-01 : f32
    %173 = vector.broadcast %cst_58 : f32 to vector<128x256xf32>
    %174 = arith.mulf %173, %172 : vector<128x256xf32>
    %cst_59 = arith.constant 0.707106769 : f32
    %175 = vector.broadcast %cst_59 : f32 to vector<128x256xf32>
    %176 = arith.mulf %172, %175 : vector<128x256xf32>
    %177 = math.absf %176 : vector<128x256xf32>
    %cst_60 = arith.constant 0.327591091 : f32
    %178 = vector.broadcast %cst_60 : f32 to vector<128x256xf32>
    %179 = arith.mulf %178, %177 : vector<128x256xf32>
    %cst_61 = arith.constant 1.000000e+00 : f32
    %180 = vector.broadcast %cst_61 : f32 to vector<128x256xf32>
    %181 = arith.addf %180, %179 : vector<128x256xf32>
    %cst_62 = arith.constant 1.000000e+00 : f32
    %182 = vector.broadcast %cst_62 : f32 to vector<128x256xf32>
    %183 = arith.divf %182, %181 : vector<128x256xf32>
    %cst_63 = arith.constant 1.06140542 : f32
    %184 = vector.broadcast %cst_63 : f32 to vector<128x256xf32>
    %185 = arith.mulf %183, %184 : vector<128x256xf32>
    %cst_64 = arith.constant -1.45315206 : f32
    %186 = vector.broadcast %cst_64 : f32 to vector<128x256xf32>
    %187 = arith.addf %186, %185 : vector<128x256xf32>
    %188 = arith.mulf %183, %187 : vector<128x256xf32>
    %cst_65 = arith.constant 1.42141378 : f32
    %189 = vector.broadcast %cst_65 : f32 to vector<128x256xf32>
    %190 = arith.addf %189, %188 : vector<128x256xf32>
    %191 = arith.mulf %183, %190 : vector<128x256xf32>
    %cst_66 = arith.constant -0.284496725 : f32
    %192 = vector.broadcast %cst_66 : f32 to vector<128x256xf32>
    %193 = arith.addf %192, %191 : vector<128x256xf32>
    %194 = arith.mulf %183, %193 : vector<128x256xf32>
    %cst_67 = arith.constant 0.254829586 : f32
    %195 = vector.broadcast %cst_67 : f32 to vector<128x256xf32>
    %196 = arith.addf %195, %194 : vector<128x256xf32>
    %197 = arith.mulf %183, %196 : vector<128x256xf32>
    %cst_68 = arith.constant 0.000000e+00 : f32
    %198 = vector.broadcast %cst_68 : f32 to vector<128x256xf32>
    %199 = arith.subf %198, %177 : vector<128x256xf32>
    %200 = arith.mulf %199, %177 : vector<128x256xf32>
    %201 = math.exp %200 : vector<128x256xf32>
    %202 = arith.mulf %197, %201 : vector<128x256xf32>
    %cst_69 = arith.constant 1.000000e+00 : f32
    %203 = vector.broadcast %cst_69 : f32 to vector<128x256xf32>
    %204 = arith.subf %203, %202 : vector<128x256xf32>
    %cst_70 = arith.constant 0.000000e+00 : f32
    %205 = vector.broadcast %cst_70 : f32 to vector<128x256xf32>
    %206 = arith.cmpf olt, %176, %205 : vector<128x256xf32>
    %cst_71 = arith.constant 0.000000e+00 : f32
    %207 = vector.broadcast %cst_71 : f32 to vector<128x256xf32>
    %208 = arith.subf %207, %204 : vector<128x256xf32>
    %209 = arith.select %206, %208, %204 : vector<128x256xi1>, vector<128x256xf32>
    %cst_72 = arith.constant 1.000000e+00 : f32
    %210 = vector.broadcast %cst_72 : f32 to vector<128x256xf32>
    %211 = arith.addf %210, %209 : vector<128x256xf32>
    %212 = arith.mulf %174, %211 : vector<128x256xf32>
    %c0_73 = arith.constant 0 : index
    %c0_74 = arith.constant 0 : index
    %c0_75 = arith.constant 0 : index
    %213 = vector.load %arg8[%c0_73, %c0_74, %c0_75] : memref<2x128x256xf32, #tpu.memory_space<vmem>>, vector<1x128x256xf32>
    %214 = vector.shape_cast %213 : vector<1x128x256xf32> to vector<128x256xf32>
    %215 = vector.shape_cast %212 : vector<128x256xf32> to vector<1x128x256xf32>
    tpu.vector_store %arg8[%c0_73, %c0_74, %c0_75], %215 {strides = array<i32>} : memref<2x128x256xf32, #tpu.memory_space<vmem>>, vector<1x128x256xf32>,
    %c1 = arith.constant 1 : index
    %c0_76 = arith.constant 0 : index
    %c0_77 = arith.constant 0 : index
    %216 = vector.load %arg1[%c1, %c0_76, %c0_77] : memref<2x128x256xf32, #tpu.memory_space<vmem>>, vector<1x128x256xf32>
    %217 = vector.shape_cast %216 : vector<1x128x256xf32> to vector<128x256xf32>
    %cst_78 = arith.constant dense<0.000000e+00> : vector<32x256xf32>
    %218 = tpu.matmul %0, %217, %cst_78 {dimension_numbers = #tpu.dot_dimension_numbers<[1], [0], [0], [1], [0, 0, 1, 1], [], []>} : vector<32x128xf32>, vector<128x256xf32>, vector<32x256xf32> -> vector<32x256xf32>
    %219 = vector.broadcast %1 : vector<32x1xf32> to vector<32x256xf32>
    %220 = arith.addf %218, %219 : vector<32x256xf32>
    %cst_79 = arith.constant 5.000000e-01 : f32
    %221 = vector.broadcast %cst_79 : f32 to vector<32x256xf32>
    %222 = arith.mulf %221, %220 : vector<32x256xf32>
    %cst_80 = arith.constant 0.707106769 : f32
    %223 = vector.broadcast %cst_80 : f32 to vector<32x256xf32>
    %224 = arith.mulf %220, %223 : vector<32x256xf32>
    %225 = math.absf %224 : vector<32x256xf32>
    %cst_81 = arith.constant 0.327591091 : f32
    %226 = vector.broadcast %cst_81 : f32 to vector<32x256xf32>
    %227 = arith.mulf %226, %225 : vector<32x256xf32>
    %cst_82 = arith.constant 1.000000e+00 : f32
    %228 = vector.broadcast %cst_82 : f32 to vector<32x256xf32>
    %229 = arith.addf %228, %227 : vector<32x256xf32>
    %cst_83 = arith.constant 1.000000e+00 : f32
    %230 = vector.broadcast %cst_83 : f32 to vector<32x256xf32>
    %231 = arith.divf %230, %229 : vector<32x256xf32>
    %cst_84 = arith.constant 1.06140542 : f32
    %232 = vector.broadcast %cst_84 : f32 to vector<32x256xf32>
    %233 = arith.mulf %231, %232 : vector<32x256xf32>
    %cst_85 = arith.constant -1.45315206 : f32
    %234 = vector.broadcast %cst_85 : f32 to vector<32x256xf32>
    %235 = arith.addf %234, %233 : vector<32x256xf32>
    %236 = arith.mulf %231, %235 : vector<32x256xf32>
    %cst_86 = arith.constant 1.42141378 : f32
    %237 = vector.broadcast %cst_86 : f32 to vector<32x256xf32>
    %238 = arith.addf %237, %236 : vector<32x256xf32>
    %239 = arith.mulf %231, %238 : vector<32x256xf32>
    %cst_87 = arith.constant -0.284496725 : f32
    %240 = vector.broadcast %cst_87 : f32 to vector<32x256xf32>
    %241 = arith.addf %240, %239 : vector<32x256xf32>
    %242 = arith.mulf %231, %241 : vector<32x256xf32>
    %cst_88 = arith.constant 0.254829586 : f32
    %243 = vector.broadcast %cst_88 : f32 to vector<32x256xf32>
    %244 = arith.addf %243, %242 : vector<32x256xf32>
    %245 = arith.mulf %231, %244 : vector<32x256xf32>
    %cst_89 = arith.constant 0.000000e+00 : f32
    %246 = vector.broadcast %cst_89 : f32 to vector<32x256xf32>
    %247 = arith.subf %246, %225 : vector<32x256xf32>
    %248 = arith.mulf %247, %225 : vector<32x256xf32>
    %249 = math.exp %248 : vector<32x256xf32>
    %250 = arith.mulf %245, %249 : vector<32x256xf32>
    %cst_90 = arith.constant 1.000000e+00 : f32
    %251 = vector.broadcast %cst_90 : f32 to vector<32x256xf32>
    %252 = arith.subf %251, %250 : vector<32x256xf32>
    %cst_91 = arith.constant 0.000000e+00 : f32
    %253 = vector.broadcast %cst_91 : f32 to vector<32x256xf32>
    %254 = arith.cmpf olt, %224, %253 : vector<32x256xf32>
    %cst_92 = arith.constant 0.000000e+00 : f32
    %255 = vector.broadcast %cst_92 : f32 to vector<32x256xf32>
    %256 = arith.subf %255, %252 : vector<32x256xf32>
    %257 = arith.select %254, %256, %252 : vector<32x256xi1>, vector<32x256xf32>
    %cst_93 = arith.constant 1.000000e+00 : f32
    %258 = vector.broadcast %cst_93 : f32 to vector<32x256xf32>
    %259 = arith.addf %258, %257 : vector<32x256xf32>
    %260 = arith.mulf %222, %259 : vector<32x256xf32>
    %cst_94 = arith.constant 0.000000e+00 : f32
    %261 = vector.broadcast %cst_94 : f32 to vector<32x256xf32>
    %c17_i32_95 = arith.constant 17 : i32
    %262 = tpu.dynamic_rotate %260 by %c17_i32_95 dim 1 : vector<32x256xf32>, i32 -> vector<32x256xf32>
    %cst_96 = arith.constant 0.000000e+00 : f32
    %263 = vector.broadcast %cst_96 : f32 to vector<32x256xf32>
    %264 = arith.select %17, %262, %263 : vector<32x256xi1>, vector<32x256xf32>
    %265 = vector.broadcast %21 : vector<32x1xf32> to vector<32x256xf32>
    %266 = arith.mulf %264, %265 : vector<32x256xf32>
    %267 = arith.addf %261, %266 : vector<32x256xf32>
    %c16_i32_97 = arith.constant 16 : i32
    %268 = tpu.dynamic_rotate %260 by %c16_i32_97 dim 1 : vector<32x256xf32>, i32 -> vector<32x256xf32>
    %cst_98 = arith.constant 0.000000e+00 : f32
    %269 = vector.broadcast %cst_98 : f32 to vector<32x256xf32>
    %270 = arith.select %14, %268, %269 : vector<32x256xi1>, vector<32x256xf32>
    %271 = vector.broadcast %22 : vector<32x1xf32> to vector<32x256xf32>
    %272 = arith.mulf %270, %271 : vector<32x256xf32>
    %273 = arith.addf %267, %272 : vector<32x256xf32>
    %c15_i32_99 = arith.constant 15 : i32
    %274 = tpu.dynamic_rotate %260 by %c15_i32_99 dim 1 : vector<32x256xf32>, i32 -> vector<32x256xf32>
    %cst_100 = arith.constant 0.000000e+00 : f32
    %275 = vector.broadcast %cst_100 : f32 to vector<32x256xf32>
    %276 = arith.select %18, %274, %275 : vector<32x256xi1>, vector<32x256xf32>
    %277 = vector.broadcast %23 : vector<32x1xf32> to vector<32x256xf32>
    %278 = arith.mulf %276, %277 : vector<32x256xf32>
    %279 = arith.addf %273, %278 : vector<32x256xf32>
    %c1_i32_101 = arith.constant 1 : i32
    %280 = tpu.dynamic_rotate %260 by %c1_i32_101 dim 1 : vector<32x256xf32>, i32 -> vector<32x256xf32>
    %cst_102 = arith.constant 0.000000e+00 : f32
    %281 = vector.broadcast %cst_102 : f32 to vector<32x256xf32>
    %282 = arith.select %10, %280, %281 : vector<32x256xi1>, vector<32x256xf32>
    %283 = vector.broadcast %24 : vector<32x1xf32> to vector<32x256xf32>
    %284 = arith.mulf %282, %283 : vector<32x256xf32>
    %285 = arith.addf %279, %284 : vector<32x256xf32>
    %286 = vector.broadcast %25 : vector<32x1xf32> to vector<32x256xf32>
    %287 = arith.mulf %260, %286 : vector<32x256xf32>
    %288 = arith.addf %285, %287 : vector<32x256xf32>
    %c255_i32_103 = arith.constant 255 : i32
    %289 = tpu.dynamic_rotate %260 by %c255_i32_103 dim 1 : vector<32x256xf32>, i32 -> vector<32x256xf32>
    %cst_104 = arith.constant 0.000000e+00 : f32
    %290 = vector.broadcast %cst_104 : f32 to vector<32x256xf32>
    %291 = arith.select %12, %289, %290 : vector<32x256xi1>, vector<32x256xf32>
    %292 = vector.broadcast %26 : vector<32x1xf32> to vector<32x256xf32>
    %293 = arith.mulf %291, %292 : vector<32x256xf32>
    %294 = arith.addf %288, %293 : vector<32x256xf32>
    %c241_i32_105 = arith.constant 241 : i32
    %295 = tpu.dynamic_rotate %260 by %c241_i32_105 dim 1 : vector<32x256xf32>, i32 -> vector<32x256xf32>
    %cst_106 = arith.constant 0.000000e+00 : f32
    %296 = vector.broadcast %cst_106 : f32 to vector<32x256xf32>
    %297 = arith.select %19, %295, %296 : vector<32x256xi1>, vector<32x256xf32>
    %298 = vector.broadcast %27 : vector<32x1xf32> to vector<32x256xf32>
    %299 = arith.mulf %297, %298 : vector<32x256xf32>
    %300 = arith.addf %294, %299 : vector<32x256xf32>
    %c240_i32_107 = arith.constant 240 : i32
    %301 = tpu.dynamic_rotate %260 by %c240_i32_107 dim 1 : vector<32x256xf32>, i32 -> vector<32x256xf32>
    %cst_108 = arith.constant 0.000000e+00 : f32
    %302 = vector.broadcast %cst_108 : f32 to vector<32x256xf32>
    %303 = arith.select %16, %301, %302 : vector<32x256xi1>, vector<32x256xf32>
    %304 = vector.broadcast %28 : vector<32x1xf32> to vector<32x256xf32>
    %305 = arith.mulf %303, %304 : vector<32x256xf32>
    %306 = arith.addf %300, %305 : vector<32x256xf32>
    %c239_i32_109 = arith.constant 239 : i32
    %307 = tpu.dynamic_rotate %260 by %c239_i32_109 dim 1 : vector<32x256xf32>, i32 -> vector<32x256xf32>
    %cst_110 = arith.constant 0.000000e+00 : f32
    %308 = vector.broadcast %cst_110 : f32 to vector<32x256xf32>
    %309 = arith.select %20, %307, %308 : vector<32x256xi1>, vector<32x256xf32>
    %310 = vector.broadcast %29 : vector<32x1xf32> to vector<32x256xf32>
    %311 = arith.mulf %309, %310 : vector<32x256xf32>
    %312 = arith.addf %306, %311 : vector<32x256xf32>
    %313 = vector.broadcast %3 : vector<32x1xf32> to vector<32x256xf32>
    %314 = arith.addf %312, %313 : vector<32x256xf32>
    %cst_111 = arith.constant 5.000000e-01 : f32
    %315 = vector.broadcast %cst_111 : f32 to vector<32x256xf32>
    %316 = arith.mulf %315, %314 : vector<32x256xf32>
    %cst_112 = arith.constant 0.707106769 : f32
    %317 = vector.broadcast %cst_112 : f32 to vector<32x256xf32>
    %318 = arith.mulf %314, %317 : vector<32x256xf32>
    %319 = math.absf %318 : vector<32x256xf32>
    %cst_113 = arith.constant 0.327591091 : f32
    %320 = vector.broadcast %cst_113 : f32 to vector<32x256xf32>
    %321 = arith.mulf %320, %319 : vector<32x256xf32>
    %cst_114 = arith.constant 1.000000e+00 : f32
    %322 = vector.broadcast %cst_114 : f32 to vector<32x256xf32>
    %323 = arith.addf %322, %321 : vector<32x256xf32>
    %cst_115 = arith.constant 1.000000e+00 : f32
    %324 = vector.broadcast %cst_115 : f32 to vector<32x256xf32>
    %325 = arith.divf %324, %323 : vector<32x256xf32>
    %cst_116 = arith.constant 1.06140542 : f32
    %326 = vector.broadcast %cst_116 : f32 to vector<32x256xf32>
    %327 = arith.mulf %325, %326 : vector<32x256xf32>
    %cst_117 = arith.constant -1.45315206 : f32
    %328 = vector.broadcast %cst_117 : f32 to vector<32x256xf32>
    %329 = arith.addf %328, %327 : vector<32x256xf32>
    %330 = arith.mulf %325, %329 : vector<32x256xf32>
    %cst_118 = arith.constant 1.42141378 : f32
    %331 = vector.broadcast %cst_118 : f32 to vector<32x256xf32>
    %332 = arith.addf %331, %330 : vector<32x256xf32>
    %333 = arith.mulf %325, %332 : vector<32x256xf32>
    %cst_119 = arith.constant -0.284496725 : f32
    %334 = vector.broadcast %cst_119 : f32 to vector<32x256xf32>
    %335 = arith.addf %334, %333 : vector<32x256xf32>
    %336 = arith.mulf %325, %335 : vector<32x256xf32>
    %cst_120 = arith.constant 0.254829586 : f32
    %337 = vector.broadcast %cst_120 : f32 to vector<32x256xf32>
    %338 = arith.addf %337, %336 : vector<32x256xf32>
    %339 = arith.mulf %325, %338 : vector<32x256xf32>
    %cst_121 = arith.constant 0.000000e+00 : f32
    %340 = vector.broadcast %cst_121 : f32 to vector<32x256xf32>
    %341 = arith.subf %340, %319 : vector<32x256xf32>
    %342 = arith.mulf %341, %319 : vector<32x256xf32>
    %343 = math.exp %342 : vector<32x256xf32>
    %344 = arith.mulf %339, %343 : vector<32x256xf32>
    %cst_122 = arith.constant 1.000000e+00 : f32
    %345 = vector.broadcast %cst_122 : f32 to vector<32x256xf32>
    %346 = arith.subf %345, %344 : vector<32x256xf32>
    %cst_123 = arith.constant 0.000000e+00 : f32
    %347 = vector.broadcast %cst_123 : f32 to vector<32x256xf32>
    %348 = arith.cmpf olt, %318, %347 : vector<32x256xf32>
    %cst_124 = arith.constant 0.000000e+00 : f32
    %349 = vector.broadcast %cst_124 : f32 to vector<32x256xf32>
    %350 = arith.subf %349, %346 : vector<32x256xf32>
    %351 = arith.select %348, %350, %346 : vector<32x256xi1>, vector<32x256xf32>
    %cst_125 = arith.constant 1.000000e+00 : f32
    %352 = vector.broadcast %cst_125 : f32 to vector<32x256xf32>
    %353 = arith.addf %352, %351 : vector<32x256xf32>
    %354 = arith.mulf %316, %353 : vector<32x256xf32>
    %cst_126 = arith.constant dense<0.000000e+00> : vector<128x256xf32>
    %355 = tpu.matmul %4, %354, %cst_126 {dimension_numbers = #tpu.dot_dimension_numbers<[1], [0], [0], [1], [0, 0, 1, 1], [], []>} : vector<128x32xf32>, vector<32x256xf32>, vector<128x256xf32> -> vector<128x256xf32>
    %356 = vector.broadcast %5 : vector<128x1xf32> to vector<128x256xf32>
    %357 = arith.addf %355, %356 : vector<128x256xf32>
    %358 = arith.addf %357, %217 : vector<128x256xf32>
    %cst_127 = arith.constant 5.000000e-01 : f32
    %359 = vector.broadcast %cst_127 : f32 to vector<128x256xf32>
    %360 = arith.mulf %359, %358 : vector<128x256xf32>
    %cst_128 = arith.constant 0.707106769 : f32
    %361 = vector.broadcast %cst_128 : f32 to vector<128x256xf32>
    %362 = arith.mulf %358, %361 : vector<128x256xf32>
    %363 = math.absf %362 : vector<128x256xf32>
    %cst_129 = arith.constant 0.327591091 : f32
    %364 = vector.broadcast %cst_129 : f32 to vector<128x256xf32>
    %365 = arith.mulf %364, %363 : vector<128x256xf32>
    %cst_130 = arith.constant 1.000000e+00 : f32
    %366 = vector.broadcast %cst_130 : f32 to vector<128x256xf32>
    %367 = arith.addf %366, %365 : vector<128x256xf32>
    %cst_131 = arith.constant 1.000000e+00 : f32
    %368 = vector.broadcast %cst_131 : f32 to vector<128x256xf32>
    %369 = arith.divf %368, %367 : vector<128x256xf32>
    %cst_132 = arith.constant 1.06140542 : f32
    %370 = vector.broadcast %cst_132 : f32 to vector<128x256xf32>
    %371 = arith.mulf %369, %370 : vector<128x256xf32>
    %cst_133 = arith.constant -1.45315206 : f32
    %372 = vector.broadcast %cst_133 : f32 to vector<128x256xf32>
    %373 = arith.addf %372, %371 : vector<128x256xf32>
    %374 = arith.mulf %369, %373 : vector<128x256xf32>
    %cst_134 = arith.constant 1.42141378 : f32
    %375 = vector.broadcast %cst_134 : f32 to vector<128x256xf32>
    %376 = arith.addf %375, %374 : vector<128x256xf32>
    %377 = arith.mulf %369, %376 : vector<128x256xf32>
    %cst_135 = arith.constant -0.284496725 : f32
    %378 = vector.broadcast %cst_135 : f32 to vector<128x256xf32>
    %379 = arith.addf %378, %377 : vector<128x256xf32>
    %380 = arith.mulf %369, %379 : vector<128x256xf32>
    %cst_136 = arith.constant 0.254829586 : f32
    %381 = vector.broadcast %cst_136 : f32 to vector<128x256xf32>
    %382 = arith.addf %381, %380 : vector<128x256xf32>
    %383 = arith.mulf %369, %382 : vector<128x256xf32>
    %cst_137 = arith.constant 0.000000e+00 : f32
    %384 = vector.broadcast %cst_137 : f32 to vector<128x256xf32>
    %385 = arith.subf %384, %363 : vector<128x256xf32>
    %386 = arith.mulf %385, %363 : vector<128x256xf32>
    %387 = math.exp %386 : vector<128x256xf32>
    %388 = arith.mulf %383, %387 : vector<128x256xf32>
    %cst_138 = arith.constant 1.000000e+00 : f32
    %389 = vector.broadcast %cst_138 : f32 to vector<128x256xf32>
    %390 = arith.subf %389, %388 : vector<128x256xf32>
    %cst_139 = arith.constant 0.000000e+00 : f32
    %391 = vector.broadcast %cst_139 : f32 to vector<128x256xf32>
    %392 = arith.cmpf olt, %362, %391 : vector<128x256xf32>
    %cst_140 = arith.constant 0.000000e+00 : f32
    %393 = vector.broadcast %cst_140 : f32 to vector<128x256xf32>
    %394 = arith.subf %393, %390 : vector<128x256xf32>
    %395 = arith.select %392, %394, %390 : vector<128x256xi1>, vector<128x256xf32>
    %cst_141 = arith.constant 1.000000e+00 : f32
    %396 = vector.broadcast %cst_141 : f32 to vector<128x256xf32>
    %397 = arith.addf %396, %395 : vector<128x256xf32>
    %398 = arith.mulf %360, %397 : vector<128x256xf32>
    %c1_142 = arith.constant 1 : index
    %c0_143 = arith.constant 0 : index
    %c0_144 = arith.constant 0 : index
    %399 = vector.load %arg8[%c1_142, %c0_143, %c0_144] : memref<2x128x256xf32, #tpu.memory_space<vmem>>, vector<1x128x256xf32>
    %400 = vector.shape_cast %399 : vector<1x128x256xf32> to vector<128x256xf32>
    %401 = vector.shape_cast %398 : vector<128x256xf32> to vector<1x128x256xf32>
    tpu.vector_store %arg8[%c1_142, %c0_143, %c0_144], %401 {strides = array<i32>} : memref<2x128x256xf32, #tpu.memory_space<vmem>>, vector<1x128x256xf32>,
    return
  }
  func.func @transform_0(%arg0: i32) -> (i32, i32, i32) {
    %c0_i32 = arith.constant 0 : i32
    %c0_i32_0 = arith.constant 0 : i32
    %c0_i32_1 = arith.constant 0 : i32
    return %arg0, %c0_i32, %c0_i32_0 : i32, i32, i32
  }
  func.func @transform_1(%arg0: i32) -> (i32, i32) {
    %c0_i32 = arith.constant 0 : i32
    %c0_i32_0 = arith.constant 0 : i32
    %c0_i32_1 = arith.constant 0 : i32
    return %c0_i32, %c0_i32_0 : i32, i32
  }
  func.func @transform_2(%arg0: i32) -> (i32, i32) {
    %c0_i32 = arith.constant 0 : i32
    %c0_i32_0 = arith.constant 0 : i32
    %c0_i32_1 = arith.constant 0 : i32
    return %c0_i32, %c0_i32_0 : i32, i32
  }
  func.func @transform_3(%arg0: i32) -> (i32, i32) {
    %c0_i32 = arith.constant 0 : i32
    %c0_i32_0 = arith.constant 0 : i32
    %c0_i32_1 = arith.constant 0 : i32
    return %c0_i32, %c0_i32_0 : i32, i32
  }
  func.func @transform_4(%arg0: i32) -> (i32, i32) {
    %c0_i32 = arith.constant 0 : i32
    %c0_i32_0 = arith.constant 0 : i32
    %c0_i32_1 = arith.constant 0 : i32
    return %c0_i32, %c0_i32_0 : i32, i32
  }
  func.func @transform_5(%arg0: i32) -> (i32, i32) {
    %c0_i32 = arith.constant 0 : i32
    %c0_i32_0 = arith.constant 0 : i32
    %c0_i32_1 = arith.constant 0 : i32
    return %c0_i32, %c0_i32_0 : i32, i32
  }
  func.func @transform_6(%arg0: i32) -> (i32, i32) {
    %c0_i32 = arith.constant 0 : i32
    %c0_i32_0 = arith.constant 0 : i32
    %c0_i32_1 = arith.constant 0 : i32
    return %c0_i32, %c0_i32_0 : i32, i32
  }
  func.func @transform_7(%arg0: i32) -> (i32, i32, i32) {
    %c0_i32 = arith.constant 0 : i32
    %c0_i32_0 = arith.constant 0 : i32
    %c0_i32_1 = arith.constant 0 : i32
    return %arg0, %c0_i32, %c0_i32_0 : i32, i32, i32
  }
}

</mosaic_0001>

<bundles_post_ra>
// kernel: block_forward.1
= control target key start
LH: loop header
LB: loop body
LE: loop exit
PB: predicated region body
PF: predicated region fallthrough
CT: control target
= control target key end

     0   :  { %v12258_v3 = vmov 0   ;;  %v6302_v41 = vmov 1   ;;  %s6309_s10 = smov 15   ;;  %s6310_s11 = smov 17   ;;  %s12249_s0 = inlined_call_operand.vmem [shape: f32[2,128,256], index: 0, kind: input, shape index: {}]   ;;  %s12250_s2 = inlined_call_operand.vmem [shape: f32[32,1], index: 2, kind: input, shape index: {}]   ;;  %s12251_s3 = inlined_call_operand.vmem [shape: f32[32,9], index: 3, kind: input, shape index: {}]   ;;  %s12252_s1 = inlined_call_operand.vmem [shape: f32[32,128], index: 1, kind: input, shape index: {}]   ;;  %s12253_s4 = inlined_call_operand.vmem [shape: f32[32,1], index: 4, kind: input, shape index: {}]   ;;  %s12254_s6 = inlined_call_operand.vmem [shape: f32[128,1], index: 6, kind: input, shape index: {}]   ;;  %s12255_s5 = inlined_call_operand.vmem [shape: f32[128,32], index: 5, kind: input, shape index: {}]   ;;  %s12256_s7 = inlined_call_operand.vmem [shape: f32[2,128,256], index: 7, kind: output, shape index: {}]  }
   0x1   :  { %v125_v0 = vld [vmem:[%s12249_s0 + $0xf0] sm:$0xff]  ;;  %v126_v1 = vld [vmem:[%s12249_s0 + $0xf8] sm:$0xff]  ;;  %v123_v2 = vld [vmem:[%s12249_s0 + $0xe0] sm:$0xff]  ;;  %5804 = vset.pattern.permute.xlu1 %v12258_v3  ;;  %5803 = vset.pattern.permute.xlu0 %v12258_v3  ;;  %s6311_s12 = smov 16   ;;  %s6312_s13 = smov 1  }
   0x2   :  { %147 = vmatpush.msra.mxu0 %v125_v0  ;;  %176 = vmatpush.msra.mxu1 %v126_v1  ;;  %v124_v4 = vld [vmem:[%s12249_s0 + $0xe8] sm:$0xff]  ;;  %v121_v5 = vld [vmem:[%s12249_s0 + $0xd0] sm:$0xff]  ;;  %v122_v6 = vld [vmem:[%s12249_s0 + $0xd8] sm:$0xff]  ;;  %s6313_s14 = smov 127   ;;  %s6315_s15 = smov 112  }
   0x3   :  { %5805 = vset.pattern.permute.xlu2 %v12258_v3  ;;  %v119_v7 = vld [vmem:[%s12249_s0 + $0xc0] sm:$0xff]  ;;  %v120_v8 = vld [vmem:[%s12249_s0 + $0xc8] sm:$0xff]  ;;  %v117_v9 = vld [vmem:[%s12249_s0 + $0xb0] sm:$0xff]  ;;  %s6316_s16 = smov 111  }
   0x4   :  { %148 = vmatpush.msra.mxu0 %v123_v2  ;;  %177 = vmatpush.msra.mxu1 %v124_v4  ;;  %v118_v10 = vld [vmem:[%s12249_s0 + $0xb8] sm:$0xff]  ;;  %v115_v11 = vld [vmem:[%s12249_s0 + $0xa0] sm:$0xff]  ;;  %v116_v12 = vld [vmem:[%s12249_s0 + $0xa8] sm:$0xff]  ;;  %v6303_v4 = vmov 2  }
   0x5   :  { %v113_v13 = vld [vmem:[%s12249_s0 + $0x90] sm:$0xff]  ;;  %v114_v14 = vld [vmem:[%s12249_s0 + $0x98] sm:$0xff]  ;;  %v111_v16 = vld [vmem:[%s12249_s0 + $0x80] sm:$0xff] }
   0x6   :  { %149 = vmatpush.msra.mxu0 %v121_v5  ;;  %178 = vmatpush.msra.mxu1 %v122_v6  ;;  %v32_v15 = vld [vmem:[%s12250_s2 + $0x10] sm:$0xff]  ;;  %v112_v17 = vld [vmem:[%s12249_s0 + $0x88] sm:$0xff]  ;;  %v30_v18 = vld [vmem:[%s12250_s2] sm:$0xff] }
   0x7   :  { %139 = vperm.xlu1 %5804, %v32_v15   ;;  %v109_v19 = vld [vmem:[%s12249_s0 + $0x70] sm:$0xff]  ;;  %v110_v20 = vld [vmem:[%s12249_s0 + $0x78] sm:$0xff]  ;;  %129 = vperm.xlu0 %5803, %v30_v18   ;;  %v107_v21 = vld [vmem:[%s12249_s0 + $0x60] sm:$0xff] }
   0x8   :  { %150 = vmatpush.msra.mxu0 %v119_v7  ;;  %179 = vmatpush.msra.mxu1 %v120_v8  ;;  %v108_v22 = vld [vmem:[%s12249_s0 + $0x68] sm:$0xff]  ;;  %v33_v23 = vld [vmem:[%s12250_s2 + $0x18] sm:$0xff]  ;;  %v105_v24 = vld [vmem:[%s12249_s0 + $0x50] sm:$0xff] }
   0x9   :  { %v106_v25 = vld [vmem:[%s12249_s0 + $0x58] sm:$0xff]  ;;  %v31_v26 = vld [vmem:[%s12250_s2 + $0x8] sm:$0xff]  ;;  %v103_v27 = vld [vmem:[%s12249_s0 + $0x40] sm:$0xff]  ;;  %s6314_s2 = smov 113  }
   0xa   :  { %151 = vmatpush.msra.mxu0 %v117_v9  ;;  %180 = vmatpush.msra.mxu1 %v118_v10  ;;  %v104_v28 = vld [vmem:[%s12249_s0 + $0x48] sm:$0xff]  ;;  %v101_v29 = vld [vmem:[%s12249_s0 + $0x30] sm:$0xff]  ;;  %v102_v30 = vld [vmem:[%s12249_s0 + $0x38] sm:$0xff] }
   0xb   :  { %v99_v31 = vld [vmem:[%s12249_s0 + $0x20] sm:$0xff]  ;;  %v100_v32 = vld [vmem:[%s12249_s0 + $0x28] sm:$0xff]  ;;  %v97_v34 = vld [vmem:[%s12249_s0 + $0x10] sm:$0xff] }
   0xc   :  { %152 = vmatpush.msra.mxu0 %v115_v11  ;;  %181 = vmatpush.msra.mxu1 %v116_v12  ;;  %v6460_v33 = vld [vmem:[%s12251_s3 + $0x8] sm:$0xff]  ;;  %v98_v35 = vld [vmem:[%s12249_s0 + $0x18] sm:$0xff]  ;;  %v95_v36 = vld [vmem:[%s12249_s0] sm:$0xff] }
   0xd   :  { %v96_v37 = vld [vmem:[%s12249_s0 + $0x8] sm:$0xff]  ;;  %v6478_v38 = vld [vmem:[%s12252_s1] sm:$0xff]  ;;  %v5712_v39 = vld [vmem:[%s12249_s0 + $0x1f0] sm:$0xff] }
   0xe   :  { %153 = vmatpush.msra.mxu0 %v113_v13  ;;  %182 = vmatpush.msra.mxu1 %v114_v14  ;;  %v5713_v40 = vld [vmem:[%s12249_s0 + $0x1f8] sm:$0xff]  ;;  %v5710_v42 = vld [vmem:[%s12249_s0 + $0x1e0] sm:$0xff]  ;;  %v5711_v43 = vld [vmem:[%s12249_s0 + $0x1e8] sm:$0xff] }
   0xf   :  { %144 = vperm.xlu1 %5804, %v33_v23   ;;  %134 = vperm.xlu0 %5803, %v31_v26   ;;  %v5708_v44 = vld [vmem:[%s12249_s0 + $0x1d0] sm:$0xff]  ;;  %v5709_v45 = vld [vmem:[%s12249_s0 + $0x1d8] sm:$0xff]  ;;  %v5706_v46 = vld [vmem:[%s12249_s0 + $0x1c0] sm:$0xff]  ;;  %v6306_v23 = vmov 5  }
  0x10   :  { %154 = vmatpush.msra.mxu0 %v111_v16  ;;  %183 = vmatpush.msra.mxu1 %v112_v17  ;;  %v5707_v47 = vld [vmem:[%s12249_s0 + $0x1c8] sm:$0xff]  ;;  %v5704_v49 = vld [vmem:[%s12249_s0 + $0x1b0] sm:$0xff]  ;;  %v5705_v50 = vld [vmem:[%s12249_s0 + $0x1b8] sm:$0xff]  ;;  %v6304_v16 = vmov 3   ;;  %v6305_v17 = vmov 4  }
  0x11   :  { %v6511_v48 = vld [vmem:[%s12252_s1 + $0x8] sm:$0xff]  ;;  %v5702_v51 = vld [vmem:[%s12249_s0 + $0x1a0] sm:$0xff]  ;;  %v5700_v54 = vld [vmem:[%s12249_s0 + $0x190] sm:$0xff] }
  0x12   :  { %155 = vmatpush.msra.mxu0 %v109_v19  ;;  %184 = vmatpush.msra.mxu1 %v110_v20  ;;  %v5703_v52 = vld [vmem:[%s12249_s0 + $0x1a8] sm:$0xff]  ;;  %v6531_v53 = vld [vmem:[%s12251_s3] sm:$0xff]  ;;  %v5701_v55 = vld [vmem:[%s12249_s0 + $0x198] sm:$0xff] }
  0x13   :  { %v6543_v56 = vld [vmem:[%s12251_s3 + $0x18] sm:$0xff]  ;;  %v5698_v57 = vld [vmem:[%s12249_s0 + $0x180] sm:$0xff]  ;;  %v5699_v58 = vld [vmem:[%s12249_s0 + $0x188] sm:$0xff] }
  0x14   :  { %156 = vmatpush.msra.mxu0 %v107_v21  ;;  %185 = vmatpush.msra.mxu1 %v108_v22  ;;  %v6554_v59 = vld [vmem:[%s12252_s1 + $0x10] sm:$0xff]  ;;  %v5697_v61 = vld [vmem:[%s12249_s0 + $0x178] sm:$0xff]  ;;  %v5694_v62 = vld [vmem:[%s12249_s0 + $0x160] sm:$0xff] }
  0x15   :  { %v5696_v60 = vld [vmem:[%s12249_s0 + $0x170] sm:$0xff]  ;;  %v5695_v63 = vld [vmem:[%s12249_s0 + $0x168] sm:$0xff]  ;;  %v5693_v2 = vld [vmem:[%s12249_s0 + $0x158] sm:$0xff] }
  0x16   :  { %157 = vmatpush.msra.mxu0 %v105_v24  ;;  %186 = vmatpush.msra.mxu1 %v106_v25  ;;  %v6574_v0 = vld [vmem:[%s12251_s3 + $0x10] sm:$0xff]  ;;  %v5690_v5 = vld [vmem:[%s12249_s0 + $0x140] sm:$0xff]  ;;  %v5691_v6 = vld [vmem:[%s12249_s0 + $0x148] sm:$0xff] }
  0x17   :  { %565 = vperm.xlu1 %5804, %v6460_v33   ;;  %5806 = vset.pattern.permute.xlu0 %v6302_v41  ;;  %v5692_v1 = vld [vmem:[%s12249_s0 + $0x150] sm:$0xff]  ;;  %v29_v7 = vld [vmem:[%s12252_s1 + $0x18] sm:$0xff]  ;;  %v5686_v10 = vld [vmem:[%s12249_s0 + $0x120] sm:$0xff] }
  0x18   :  { %158 = vmatpush.msra.mxu0 %v103_v27  ;;  %187 = vmatpush.msra.mxu1 %v104_v28  ;;  %v5688_v8 = vld [vmem:[%s12249_s0 + $0x130] sm:$0xff]  ;;  %v5689_v9 = vld [vmem:[%s12249_s0 + $0x138] sm:$0xff]  ;;  %v5687_v11 = vld [vmem:[%s12249_s0 + $0x128] sm:$0xff] }
  0x19   :  { %628 = vperm.xlu0 %5806, %v6531_v53   ;;  %570 = vperm.xlu2 %5805, %v6574_v0   ;;  %v5684_v12 = vld [vmem:[%s12249_s0 + $0x110] sm:$0xff]  ;;  %v5685_v13 = vld [vmem:[%s12249_s0 + $0x118] sm:$0xff]  ;;  %v5682_v14 = vld [vmem:[%s12249_s0 + $0x100] sm:$0xff] }
  0x1a   :  { %159 = vmatpush.msra.mxu0 %v101_v29  ;;  %188 = vmatpush.msra.mxu1 %v102_v30  ;;  %v5683_v15 = vld [vmem:[%s12249_s0 + $0x108] sm:$0xff] }
  0x1c   :  { %160 = vmatpush.msra.mxu0 %v99_v31  ;;  %189 = vmatpush.msra.mxu1 %v100_v32 }
  0x1e   :  { %161 = vmatpush.msra.mxu0 %v97_v34  ;;  %190 = vmatpush.msra.mxu1 %v98_v35 }
  0x1f   :  { %5807 = vset.pattern.permute.xlu1 %v6302_v41 }
  0x20   :  { %162 = vmatpush.msra.mxu0 %v95_v36  ;;  %191 = vmatpush.msra.mxu1 %v96_v37 }
  0x21   :  { %163 = vmatmul.f32.vlgmr.msra.gmra.mxu0 %v6478_v38  ;;  %192 = vmatmul.f32.vlgmr.msra.gmra.mxu1 %v6478_v38 }
  0x22   :  { %3065 = vmatpush.msrb.mxu0 %v5712_v39  ;;  %3094 = vmatpush.msrb.mxu1 %v5713_v40 }
  0x23   :  { %632 = vperm.xlu1 %5807, %v6460_v33   ;;  %5811 = vset.pattern.permute.xlu0 %v6303_v4 }
  0x24   :  { %3066 = vmatpush.msrb.mxu0 %v5710_v42  ;;  %3095 = vmatpush.msrb.mxu1 %v5711_v43 }
  0x25   :  { %701 = vperm.xlu0 %5811, %v6574_v0   ;;  %5808 = vset.pattern.permute.xlu2 %v6302_v41 }
  0x26   :  { %3067 = vmatpush.msrb.mxu0 %v5708_v44  ;;  %3096 = vmatpush.msrb.mxu1 %v5709_v45 }
  0x27   :  { %636 = vperm.xlu2 %5808, %v6574_v0  }
  0x28   :  { %3068 = vmatpush.msrb.mxu0 %v5706_v46  ;;  %3097 = vmatpush.msrb.mxu1 %v5707_v47 }
  0x29   :  { %166 = vmatmul.f32.gmra.mxu0 %v6511_v48  ;;  %195 = vmatmul.f32.gmra.mxu1 %v6511_v48 }
  0x2a   :  { %3069 = vmatpush.msrb.mxu0 %v5704_v49  ;;  %3098 = vmatpush.msrb.mxu1 %v5705_v50 }
  0x2b   :  { %640 = vperm.xlu1 %5807, %v6543_v56  }
  0x2c   :  { %3070 = vmatpush.msrb.mxu0 %v5702_v51  ;;  %3099 = vmatpush.msrb.mxu1 %v5703_v52 }
  0x2d   :  { %5813 = vset.pattern.permute.xlu0 %v6304_v16 }
  0x2e   :  { %3071 = vmatpush.msrb.mxu0 %v5700_v54  ;;  %3100 = vmatpush.msrb.mxu1 %v5701_v55 }
  0x2f   :  { %762 = vperm.xlu0 %5813, %v6460_v33   ;;  %5810 = vset.pattern.permute.xlu2 %v6303_v4 }
  0x30   :  { %3072 = vmatpush.msrb.mxu0 %v5698_v57  ;;  %3101 = vmatpush.msrb.mxu1 %v5699_v58 }
  0x31   :  { %169 = vmatmul.f32.gmra.mxu0 %v6554_v59  ;;  %198 = vmatmul.f32.gmra.mxu1 %v6554_v59 }
  0x32   :  { %3073 = vmatpush.msrb.mxu0 %v5696_v60  ;;  %3102 = vmatpush.msrb.mxu1 %v5697_v61 }
  0x33   :  { %5809 = vset.pattern.permute.xlu1 %v6303_v4  ;;  %697 = vperm.xlu2 %5810, %v6460_v33  }
  0x34   :  { %3074 = vmatpush.msrb.mxu0 %v5694_v62  ;;  %3103 = vmatpush.msrb.mxu1 %v5695_v63 }
  0x35   :  { %693 = vperm.xlu1 %5809, %v6531_v53  }
  0x36   :  { %3075 = vmatpush.msrb.mxu0 %v5692_v1  ;;  %3104 = vmatpush.msrb.mxu1 %v5693_v2 }
  0x37   :  { %5817 = vset.pattern.permute.xlu0 %v6305_v17 }
  0x38   :  { %3076 = vmatpush.msrb.mxu0 %v5690_v5  ;;  %3105 = vmatpush.msrb.mxu1 %v5691_v6 }
  0x39   :  { %172 = vmatmul.f32.gmra.mxu0 %v29_v7  ;;  %201 = vmatmul.f32.gmra.mxu1 %v29_v7 }
  0x3a   :  { %3077 = vmatpush.msrb.mxu0 %v5688_v8  ;;  %3106 = vmatpush.msrb.mxu1 %v5689_v9 }
  0x3b   :  { %798 = vperm.xlu0 %5817, %v6574_v0   ;;  %5812 = vset.pattern.permute.xlu2 %v6304_v16 }
  0x3c   :  { %3078 = vmatpush.msrb.mxu0 %v5686_v10  ;;  %3107 = vmatpush.msrb.mxu1 %v5687_v11 }
  0x3d   :  { %705 = vperm.xlu1 %5809, %v6543_v56   ;;  %758 = vperm.xlu2 %5812, %v6531_v53  }
  0x3e   :  { %3079 = vmatpush.msrb.mxu0 %v5684_v12  ;;  %3108 = vmatpush.msrb.mxu1 %v5685_v13 }
  0x40   :  { %3080 = vmatpush.msrb.mxu0 %v5682_v14  ;;  %3109 = vmatpush.msrb.mxu1 %v5683_v15 }
  0x41   :  { %3081 = vmatmul.f32.vlgmr.msrb.gmra.mxu0 %v6478_v38  ;;  %3110 = vmatmul.f32.vlgmr.msrb.gmra.mxu1 %v6478_v38 }
  0x43   :  { %5819 = vset.pattern.permute.xlu0 %v6306_v23 }
  0x44   :  { %859 = vperm.xlu0 %5819, %v6460_v33  }
  0x45   :  { %5814 = vset.pattern.permute.xlu1 %v6304_v16  ;;  %770 = vperm.xlu2 %5812, %v6543_v56  }
  0x46   :  { %766 = vperm.xlu1 %5814, %v6574_v0  }
  0x49   :  { %3084 = vmatmul.f32.gmra.mxu0 %v6511_v48  ;;  %3113 = vmatmul.f32.gmra.mxu1 %v6511_v48 }
  0x4d   :  { %5816 = vset.pattern.permute.xlu2 %v6305_v17 }
  0x4e   :  { %5815 = vset.pattern.permute.xlu1 %v6305_v17  ;;  %794 = vperm.xlu2 %5816, %v6460_v33  }
  0x4f   :  { %790 = vperm.xlu1 %5815, %v6531_v53  }
  0x51   :  { %3087 = vmatmul.f32.gmra.mxu0 %v6554_v59  ;;  %3116 = vmatmul.f32.gmra.mxu1 %v6554_v59 }
  0x56   :  { %5818 = vset.pattern.permute.xlu2 %v6306_v23 }
  0x57   :  { %802 = vperm.xlu1 %5815, %v6543_v56   ;;  %855 = vperm.xlu2 %5818, %v6531_v53  }
  0x59   :  { %3090 = vmatmul.f32.gmra.mxu0 %v29_v7  ;;  %3119 = vmatmul.f32.gmra.mxu1 %v29_v7 }
  0x5f   :  { %5820 = vset.pattern.permute.xlu1 %v6306_v23  ;;  %867 = vperm.xlu2 %5818, %v6543_v56  }
  0x60   :  { %863 = vperm.xlu1 %5820, %v6574_v0  }
  0x79   :  { %v6636_v18 = vpop.permute.xlu0 %129  ;;  %v6682_v45 = vpop.permute.xlu1 %139 }
  0x81   :  { %v6661_v32 = vpop.permute.xlu0 %134 }
  0x9e   :  { %v164_v19 = vpop.f32.mrf.mxu0  ;;  %v193_v20 = vpop.f32.mrf.mxu1 }
  0x9f   :  { %v6639_v21 = vadd.f32 %v164_v19, %v6636_v18  ;;  %v6642_v22 = vadd.f32 %v193_v20, %v6636_v18 }
  0xa1   :  { %v6645_v24 = vmul.f32 0.70710677, %v6639_v21  ;;  %v6648_v25 = vmul.f32 0.70710677, %v6642_v22 }
  0xa3   :  { %v6653_v26 = vand.u32 2147483647, %v6645_v24  ;;  %v6656_v27 = vand.u32 2147483647, %v6648_v25 }
  0xa5   :  { %v229_v28 = vmul.f32 0.3275911, %v6653_v26  ;;  %v230_v29 = vmul.f32 0.3275911, %v6656_v27 }
  0xa6   :  { %v167_v30 = vpop.f32.mrf.mxu0  ;;  %v196_v31 = vpop.f32.mrf.mxu1 }
  0xa7   :  { %v237_v34 = vadd.f32 1.0, %v229_v28  ;;  %v238_v35 = vadd.f32 1.0, %v230_v29  ;;  %v6664_v36 = vadd.f32 %v167_v30, %v6661_v32  ;;  %v6667_v37 = vadd.f32 %v196_v31, %v6661_v32 }
  0xa9   :  { %5833 = vrcp.f32 %v237_v34  ;;  %v6671_v38 = vmul.f32 0.70710677, %v6664_v36  ;;  %v6674_v39 = vmul.f32 0.70710677, %v6667_v37  ;;  %v254_v52 = vand.u32 2147483647, %v237_v34 }
  0xaa   :  { %5835 = vrcp.f32 %v238_v35  ;;  %v256_v54 = vand.u32 2147483648, %v237_v34  ;;  %v269_v57 = vand.u32 2147483647, %v238_v35  ;;  %v271_v60 = vand.u32 2147483648, %v238_v35 }
  0xab   :  { %v6677_v40 = vand.u32 2147483647, %v6671_v38  ;;  %v6680_v43 = vand.u32 2147483647, %v6674_v39  ;;  %vm250_vm2 = vweird.f32 %v237_v34  ;;  %vm265_vm4 = vweird.f32 %v238_v35 }
  0xac   :  { %v257_v1 = vor.u32 1.1754944e-38, %v256_v54  ;;  %vm255_vm5 = vcmp.eq.f32.partialorder %v254_v52, 8.507059e+37  ;;  %v272_v5 = vor.u32 1.1754944e-38, %v271_v60  ;;  %vm270_vm7 = vcmp.eq.f32.partialorder %v269_v57, 8.507059e+37 }
  0xad   :  { %v231_v47 = vmul.f32 0.3275911, %v6677_v40  ;;  %v232_v49 = vmul.f32 0.3275911, %v6680_v43 }
  0xae   :  { %v170_v41 = vpop.f32.mrf.mxu0  ;;  %v199_v16 = vpop.f32.mrf.mxu1 }
  0xaf   :  { %v5834_v42 = vpop.eup %5833  ;;  %v6687_v50 = vadd.f32 %v170_v41, %v6682_v45  ;;  %v6689_v53 = vadd.f32 1.0, %v231_v47  ;;  %v240_v58 = vadd.f32 1.0, %v232_v49  ;;  %v6707_v31 = vadd.f32 %v199_v16, %v6682_v45 }
  0xb0   :  { %v5836_v44 = vpop.eup %5835  ;;  %v246_v46 = vmul.f32 %v5834_v42, %v237_v34  ;;  %vm251_vm0 = vweird.f32 %v5834_v42 }
  0xb1   :  { %v261_v48 = vmul.f32 %v5836_v44, %v238_v35  ;;  %5837 = vrcp.f32 %v6689_v53  ;;  %vm266_vm1 = vweird.f32 %v5836_v44  ;;  %v6693_v62 = vmul.f32 0.70710677, %v6687_v50  ;;  %vm252_vm3 = vmor %vm250_vm2, %vm251_vm0 }
  0xb2   :  { %v247_v51 = vsub.f32 1.0, %v246_v46  ;;  %5839 = vrcp.f32 %v240_v58  ;;  %vm267_vm6 = vmor %vm265_vm4, %vm266_vm1  ;;  %v301_v28 = vand.u32 2147483648, %v240_v58  ;;  %v299_v30 = vand.u32 2147483647, %v240_v58 }
  0xb3   :  { %v262_v55 = vsub.f32 1.0, %v261_v48  ;;  %v6698_v8 = vand.u32 2147483647, %v6693_v62  ;;  %vm295_vm9 = vweird.f32 %v240_v58  ;;  %v6714_v48 = vmul.f32 0.70710677, %v6707_v31 }
  0xb4   :  { %v248_v59 = vmul.f32 %v5834_v42, %v247_v51  ;;  %v302_v46 = vor.u32 1.1754944e-38, %v301_v28  ;;  %vm300_vm11 = vcmp.eq.f32.partialorder %v299_v30, 8.507059e+37  ;;  %vm280_vm13 = vweird.f32 %v6689_v53 }
  0xb5   :  { %v263_v61 = vmul.f32 %v5836_v44, %v262_v55  ;;  %v233_v15 = vmul.f32 0.3275911, %v6698_v8 }
  0xb6   :  { %v249_v63 = vadd.f32 %v5834_v42, %v248_v59 }
  0xb7   :  { %v264_v2 = vadd.f32 %v5836_v44, %v263_v61  ;;  %v5838_v9 = vpop.eup %5837  ;;  %v6709_v34 = vadd.f32 1.0, %v233_v15 }
  0xb8   :  { %v253_v4 = vsel %vm252_vm3, %v5834_v42, %v249_v63  ;;  %v5840_v11 = vpop.eup %5839  ;;  %v276_v19 = vmul.f32 %v5838_v9, %v6689_v53  ;;  %vm281_vm12 = vweird.f32 %v5838_v9 }
  0xb9   :  { %v6695_v6 = vsel %vm255_vm5, %v257_v1, %v253_v4  ;;  %v268_v7 = vsel %vm267_vm6, %v5836_v44, %v264_v2  ;;  %v291_v14 = vmul.f32 %v5840_v11, %v240_v58  ;;  %vm296_vm8 = vweird.f32 %v5840_v11  ;;  %vm282_vm14 = vmor %vm280_vm13, %vm281_vm12 }
  0xba   :  { %v6700_v10 = vsel %vm270_vm7, %v272_v5, %v268_v7  ;;  %v365_v12 = vmul.f32 1.0614054, %v6695_v6  ;;  %v277_v41 = vsub.f32 1.0, %v276_v19  ;;  %vm297_vm10 = vmor %vm295_vm9, %vm296_vm8  ;;  %5841 = vrcp.f32 %v6709_v34 }
  0xbb   :  { %v366_v13 = vmul.f32 1.0614054, %v6700_v10  ;;  %v292_v20 = vsub.f32 1.0, %v291_v14  ;;  %v6721_v58 = vand.u32 2147483647, %v6714_v48  ;;  %v438_v2 = vsub.f32 0.0, %v6656_v27 }
  0xbc   :  { %v373_v23 = vadd.f32 -1.4531521, %v365_v12  ;;  %v278_v52 = vmul.f32 %v5838_v9, %v277_v41  ;;  %v286_v4 = vand.u32 2147483648, %v6689_v53  ;;  %v437_v5 = vsub.f32 0.0, %v6653_v26 }
  0xbd   :  { %v374_v17 = vadd.f32 -1.4531521, %v366_v13  ;;  %v293_v29 = vmul.f32 %v5840_v11, %v292_v20  ;;  %v284_v7 = vand.u32 2147483647, %v6689_v53  ;;  %v440_v41 = vsub.f32 0.0, %v6680_v43 }
  0xbe   :  { %v381_v44 = vmul.f32 %v373_v23, %v6695_v6  ;;  %v279_v60 = vadd.f32 %v5838_v9, %v278_v52  ;;  %v287_v19 = vor.u32 1.1754944e-38, %v286_v4  ;;  %v445_v20 = vmul.f32 %v437_v5, %v6653_v26 }
  0xbf   :  { %v382_v35 = vmul.f32 %v374_v17, %v6700_v10  ;;  %v294_v42 = vadd.f32 %v5840_v11, %v293_v29  ;;  %v446_v17 = vmul.f32 %v438_v2, %v6656_v27  ;;  %vm285_vm15 = vcmp.eq.f32.partialorder %v284_v7, 8.507059e+37 }
  0xc0   :  { %v389_v55 = vadd.f32 1.4214138, %v381_v44  ;;  %v6725_v63 = vpop.eup %5841  ;;  %v283_v13 = vsel %vm282_vm14, %v5838_v9, %v279_v60  ;;  %vm310_vm0 = vweird.f32 %v6709_v34  ;;  %vm486_vm6 = vcmp.lt.f32.partialorder %v6648_v25, 0.0 }
  0xc1   :  { %v298_v47 = vsel %vm297_vm10, %v5840_v11, %v294_v42  ;;  %v390_v51 = vadd.f32 1.4214138, %v382_v35  ;;  %v234_v11 = vmul.f32 0.3275911, %v6721_v58  ;;  %v306_v15 = vmul.f32 %v6725_v63, %v6709_v34 }
  0xc2   :  { %v6716_v49 = vsel %vm300_vm11, %v302_v46, %v298_v47  ;;  %v397_v1 = vmul.f32 %v389_v55, %v6695_v6  ;;  %v6740_v28 = vsel %vm285_vm15, %v287_v19, %v283_v13  ;;  %v455_v35 = vmul.f32 1.442695, %v446_v17 }
  0xc3   :  { %v368_v54 = vmul.f32 1.0614054, %v6716_v49  ;;  %v398_v59 = vmul.f32 %v390_v51, %v6700_v10  ;;  %v6738_v23 = vadd.f32 1.0, %v234_v11  ;;  %v307_v9 = vsub.f32 1.0, %v306_v15  ;;  %v6770_v15 = vpop.permute.xlu1 %144 }
  0xc4   :  { %v405_v16 = vadd.f32 -0.28449672, %v397_v1  ;;  %v453_v42 = vmul.f32 1.442695, %v445_v20  ;;  %v367_v27 = vmul.f32 1.0614054, %v6740_v28  ;;  %v448_v51 = vmul.f32 %v440_v41, %v6680_v43 }
  0xc5   :  { %v376_v57 = vadd.f32 -1.4531521, %v368_v54  ;;  %v406_v12 = vadd.f32 -0.28449672, %v398_v59  ;;  %5843 = vrcp.f32 %v6738_v23  ;;  %v308_v46 = vmul.f32 %v6725_v63, %v307_v9 }
  0xc6   :  { %v413_v30 = vmul.f32 %v405_v16, %v6695_v6  ;;  %5845 = vpow2.f32 %v455_v35  ;;  %v375_v52 = vadd.f32 -1.4531521, %v367_v27  ;;  %vm311_vm1 = vweird.f32 %v6725_v63 }
  0xc7   :  { %v384_v61 = vmul.f32 %v376_v57, %v6716_v49  ;;  %v414_v53 = vmul.f32 %v406_v12, %v6700_v10  ;;  %5847 = vpow2.f32 %v453_v42  ;;  %v316_v54 = vand.u32 2147483648, %v6709_v34  ;;  %vm6760_vm2 = vmor %vm310_vm0, %vm311_vm1 }
  0xc8   :  { %v421_v47 = vadd.f32 0.2548296, %v413_v30  ;;  %v309_v60 = vadd.f32 %v6725_v63, %v308_v46  ;;  %v459_v1 = vmul.f32 1.442695, %v448_v51  ;;  %v383_v4 = vmul.f32 %v375_v52, %v6740_v28 }
  0xc9   :  { %v392_v14 = vadd.f32 1.4214138, %v384_v61  ;;  %v422_v26 = vadd.f32 0.2548296, %v414_v53  ;;  %v314_v61 = vand.u32 2147483647, %v6709_v34  ;;  %vm325_vm4 = vweird.f32 %v6738_v23 }
  0xca   :  { %v429_v43 = vmul.f32 %v421_v47, %v6695_v6  ;;  %v317_v7 = vor.u32 1.1754944e-38, %v316_v54  ;;  %v313_v34 = vsel %vm6760_vm2, %v6725_v63, %v309_v60  ;;  %v202_v6 = vpop.f32.mrf.mxu1  ;;  %5849 = vpow2.f32 %v459_v1  ;;  %v173_v47 = vpop.f32.mrf.mxu0 }
  0xcb   :  { %v400_v29 = vmul.f32 %v392_v14, %v6716_v49  ;;  %v6753_v55 = vpop.eup %5843  ;;  %v430_v57 = vmul.f32 %v422_v26, %v6700_v10  ;;  %vm315_vm3 = vcmp.eq.f32.partialorder %v314_v61, 8.507059e+37  ;;  %v391_v16 = vadd.f32 1.4214138, %v383_v4 }
  0xcc   :  { %v5846_v5 = vpop.eup %5845  ;;  %v321_v10 = vmul.f32 %v6753_v55, %v6738_v23  ;;  %v6772_v17 = vsel %vm315_vm3, %v317_v7, %v313_v34  ;;  %v6775_v20 = vadd.f32 %v202_v6, %v6770_v15  ;;  %vm326_vm5 = vweird.f32 %v6753_v55 }
  0xcd   :  { %v408_v44 = vadd.f32 -0.28449672, %v400_v29  ;;  %v5848_v11 = vpop.eup %5847  ;;  %v470_v12 = vmul.f32 %v5846_v5, %v430_v57  ;;  %v439_v29 = vsub.f32 0.0, %v6677_v40  ;;  %v399_v63 = vmul.f32 %v391_v16, %v6740_v28  ;;  %vm6799_vm8 = vmor %vm325_vm4, %vm326_vm5 }
  0xce   :  { %v469_v14 = vmul.f32 %v5848_v11, %v429_v43  ;;  %v322_v19 = vsub.f32 1.0, %v321_v10  ;;  %v369_v35 = vmul.f32 1.0614054, %v6772_v17  ;;  %v6783_v27 = vmul.f32 0.70710677, %v6775_v20 }
  0xcf   :  { %v416_v59 = vmul.f32 %v408_v44, %v6716_v49  ;;  %v478_v53 = vsub.f32 1.0, %v470_v12  ;;  %v447_v44 = vmul.f32 %v439_v29, %v6677_v40  ;;  %v407_v52 = vadd.f32 -0.28449672, %v399_v63 }
  0xd0   :  { %v477_v30 = vsub.f32 1.0, %v469_v14  ;;  %v5850_v41 = vpop.eup %5849  ;;  %v323_v42 = vmul.f32 %v6753_v55, %v322_v19  ;;  %v377_v54 = vadd.f32 -1.4531521, %v369_v35  ;;  %v331_v57 = vand.u32 2147483648, %v6738_v23 }
  0xd1   :  { %v424_v13 = vadd.f32 0.2548296, %v416_v59  ;;  %v494_v26 = vsub.f32 0.0, %v478_v53  ;;  %v6793_v60 = vadd.f32 %v173_v47, %v6770_v15  ;;  %v6796_v40 = vand.u32 2147483647, %v6783_v27 }
  0xd2   :  { %v493_v51 = vsub.f32 0.0, %v477_v30  ;;  %v324_v59 = vadd.f32 %v6753_v55, %v323_v42  ;;  %vm485_vm7 = vcmp.lt.f32.partialorder %v6645_v24, 0.0  ;;  %v6307_v4 = vmov 6  }
  0xd3   :  { %v432_v9 = vmul.f32 %v424_v13, %v6716_v49  ;;  %v329_v49 = vand.u32 2147483647, %v6738_v23  ;;  %v502_v61 = vsel %vm486_vm6, %v494_v26, %v478_v53  ;;  %v457_v23 = vmul.f32 1.442695, %v447_v44  ;;  %5822 = vset.pattern.permute.xlu1 %v6307_v4  ;;  %5821 = vset.pattern.permute.xlu2 %v6307_v4 }
  0xd4   :  { %v501_v2 = vsel %vm485_vm7, %v493_v51, %v477_v30  ;;  %v415_v25 = vmul.f32 %v407_v52, %v6740_v28  ;;  %v385_v5 = vmul.f32 %v377_v54, %v6772_v17  ;;  %v332_v24 = vor.u32 1.1754944e-38, %v331_v57  ;;  %928 = vperm.xlu1 %5822, %v6574_v0   ;;  %5824 = vset.pattern.permute.xlu0 %v6307_v4 }
  0xd5   :  { %v472_v46 = vmul.f32 %v5850_v41, %v432_v9  ;;  %vm6805_vm9 = vcmp.eq.f32.partialorder %v329_v49, 8.507059e+37  ;;  %v510_v10 = vadd.f32 1.0, %v502_v61  ;;  %v328_v11 = vsel %vm6799_vm8, %v6753_v55, %v324_v59  ;;  %932 = vperm.xlu2 %5821, %v6543_v56   ;;  %924 = vperm.xlu0 %5824, %v6460_v33  }
  0xd6   :  { %v6814_v12 = vmul.f32 0.70710677, %v6793_v60  ;;  %v236_v13 = vmul.f32 0.3275911, %v6796_v40  ;;  %v509_v34 = vadd.f32 1.0, %v501_v2  ;;  %v205_v14 = vmul.f32 0.5, %v6639_v21  ;;  %v6867_v2 = vpop.permute.xlu2 %570 }
  0xd7   :  { %v480_v43 = vsub.f32 1.0, %v472_v46  ;;  %v206_v0 = vmul.f32 0.5, %v6642_v22  ;;  %vm488_vm10 = vcmp.lt.f32.partialorder %v6674_v39, 0.0  ;;  %v423_v16 = vadd.f32 0.2548296, %v415_v25  ;;  %12432 = vst [vmem:[#allocation3_spill] sm:$0xff] %v6867_v2 }
  0xd8   :  { %5851 = vpow2.f32 %v457_v23  ;;  %v393_v55 = vadd.f32 1.4214138, %v385_v5  ;;  %v6824_v19 = vsel %vm6805_vm9, %v332_v24, %v328_v11  ;;  %v6829_v29 = vand.u32 2147483647, %v6814_v12 }
  0xd9   :  { %v496_v6 = vsub.f32 0.0, %v480_v43  ;;  %v6826_v53 = vmul.f32 %v510_v10, %v206_v0  ;;  %v6831_v33 = vadd.f32 1.0, %v236_v13  ;;  %v6833_v9 = vmul.f32 %v509_v34, %v205_v14  ;;  %v6885_v34 = vpop.permute.xlu1 %565 }
  0xda   :  { %v441_v22 = vsub.f32 0.0, %v6698_v8  ;;  %v431_v39 = vmul.f32 %v423_v16, %v6740_v28  ;;  %v401_v30 = vmul.f32 %v393_v55, %v6772_v17  ;;  %v370_v63 = vmul.f32 1.0614054, %v6824_v19  ;;  %12433 = vst [vmem:[#allocation4_spill] sm:$0xff] %v6885_v34 }
  0xdb   :  { %12431 = vst [vmem:[#allocation2_spill] sm:$0xff] %v6833_v9  ;;  %v504_v21 = vsel %vm488_vm10, %v496_v6, %v480_v43  ;;  %v12257_v35 = vmov 7   ;;  %v235_v42 = vmul.f32 0.3275911, %v6829_v29  ;;  %5853 = vrcp.f32 %v6831_v33 }
  0xdc   :  { %5823 = vset.pattern.permute.xlu1 %v12257_v35  ;;  %v512_v41 = vadd.f32 1.0, %v504_v21  ;;  %v208_v28 = vmul.f32 0.5, %v6667_v37  ;;  %v449_v44 = vmul.f32 %v441_v22, %v6698_v8  ;;  %v409_v47 = vadd.f32 -0.28449672, %v401_v30 }
  0xdd   :  { %997 = vperm.xlu1 %5823, %v6543_v56   ;;  %667 = vrot.lane.b32.xlu0 %v6826_v53, %s6309_s10  ;;  %v378_v51 = vadd.f32 -1.4531521, %v370_v63  ;;  %v6852_v56 = vadd.f32 1.0, %v235_v42  ;;  %vm487_vm11 = vcmp.lt.f32.partialorder %v6671_v38, 0.0  ;;  %v442_v25 = vsub.f32 0.0, %v6721_v58 }
  0xde   :  { %v5852_v26 = vpop.eup %5851  ;;  %525 = vrot.lane.b32.xlu2 %v6833_v9, %s6310_s11  ;;  %5828 = vset.pattern.permute.xlu0 %v12257_v35  ;;  %v6850_v49 = vmul.f32 %v512_v41, %v208_v28  ;;  %v461_v54 = vmul.f32 1.442695, %v449_v44  ;;  %v417_v59 = vmul.f32 %v409_v47, %v6772_v17  ;;  %vm355_vm12 = vweird.f32 %v6831_v33  ;;  %v6900_v42 = vpop.permute.xlu2 %636 }
  0xdf   :  { %v471_v46 = vmul.f32 %v5852_v26, %v431_v39  ;;  %v386_v61 = vmul.f32 %v378_v51, %v6824_v19  ;;  %5855 = vrcp.f32 %v6852_v56  ;;  %v207_v0 = vmul.f32 0.5, %v6664_v36  ;;  %12436 = vst [vmem:[#allocation5_spill] sm:$0xff] %v6900_v42 }
  0xe0   :  { %5857 = vpow2.f32 %v461_v54  ;;  %v425_v43 = vadd.f32 0.2548296, %v417_v59  ;;  %v361_v16 = vand.u32 2147483648, %v6831_v33  ;;  %v359_v22 = vand.u32 2147483647, %v6831_v33 }
  0xe1   :  { %v6854_v52 = vpop.eup %5853  ;;  %v479_v57 = vsub.f32 1.0, %v471_v46  ;;  %v394_v1 = vadd.f32 1.4214138, %v386_v61  ;;  %vm340_vm0 = vweird.f32 %v6852_v56  ;;  %vm489_vm2 = vcmp.lt.f32.partialorder %v6693_v62, 0.0  ;;  %v6918_v51 = vpop.permute.xlu1 %632 }
  0xe2   :  { %v351_v37 = vmul.f32 %v6854_v52, %v6831_v33  ;;  %v433_v7 = vmul.f32 %v425_v43, %v6772_v17  ;;  %v450_v17 = vmul.f32 %v442_v25, %v6721_v58  ;;  %vm356_vm13 = vweird.f32 %v6854_v52  ;;  %12437 = vst [vmem:[#allocation6_spill] sm:$0xff] %v6918_v51 }
  0xe3   :  { %v495_v8 = vsub.f32 0.0, %v479_v57  ;;  %v402_v24 = vmul.f32 %v394_v1, %v6824_v19  ;;  %vm6895_vm14 = vmor %vm355_vm12, %vm356_vm13  ;;  %v362_v36 = vor.u32 1.1754944e-38, %v361_v16  ;;  %vm360_vm15 = vcmp.eq.f32.partialorder %v359_v22, 8.507059e+37 }
  0xe4   :  { %v352_v23 = vsub.f32 1.0, %v351_v37  ;;  %v463_v58 = vmul.f32 1.442695, %v450_v17  ;;  %v346_v46 = vand.u32 2147483648, %v6852_v56  ;;  %v344_v54 = vand.u32 2147483647, %v6852_v56 }
  0xe5   :  { %594 = vrot.lane.b32.xlu1 %v6833_v9, %s6311_s12  ;;  %535 = vrot.lane.b32.xlu0 %v6850_v49, %s6310_s11  ;;  %v6869_v4 = vpop.eup %5855  ;;  %v503_v5 = vsel %vm487_vm11, %v495_v8, %v479_v57  ;;  %v410_v14 = vadd.f32 -0.28449672, %v402_v24  ;;  %v209_v25 = vmul.f32 0.5, %v6687_v50  ;;  %vm490_vm5 = vcmp.lt.f32.partialorder %v6714_v48, 0.0 }
  0xe6   :  { %533 = vrot.lane.b32.xlu2 %v6826_v53, %s6310_s11  ;;  %v5858_v10 = vpop.eup %5857  ;;  %v336_v11 = vmul.f32 %v6869_v4, %v6852_v56  ;;  %v353_v38 = vmul.f32 %v6854_v52, %v352_v23  ;;  %v511_v13 = vadd.f32 1.0, %v503_v5  ;;  %5859 = vpow2.f32 %v463_v58  ;;  %v6935_v43 = vpop.permute.xlu2 %697 }
  0xe7   :  { %v473_v6 = vmul.f32 %v5858_v10, %v433_v7  ;;  %v418_v41 = vmul.f32 %v410_v14, %v6824_v19  ;;  %vm341_vm1 = vweird.f32 %v6869_v4  ;;  %v347_v8 = vor.u32 1.1754944e-38, %v346_v46  ;;  %12440 = vst [vmem:[#allocation7_spill] sm:$0xff] %v6935_v43 }
  0xe8   :  { %v337_v55 = vsub.f32 1.0, %v336_v11  ;;  %v354_v21 = vadd.f32 %v6854_v52, %v353_v38  ;;  %v6893_v39 = vmul.f32 %v511_v13, %v207_v0  ;;  %vm6922_vm3 = vmor %vm340_vm0, %vm341_vm1  ;;  %vm345_vm4 = vcmp.eq.f32.partialorder %v344_v54, 8.507059e+37 }
  0xe9   :  { %v481_v63 = vsub.f32 1.0, %v473_v6  ;;  %v426_v44 = vadd.f32 0.2548296, %v418_v41  ;;  %v6942_v10 = vpop.permute.xlu1 %640  ;;  %v6954_v6 = vpop.f32.mrf.mxu1  ;;  %v444_v14 = vsub.f32 0.0, %v6796_v40  ;;  %vm492_vm6 = vcmp.lt.f32.partialorder %v6783_v27, 0.0 }
  0xea   :  { %v338_v33 = vmul.f32 %v6869_v4, %v337_v55  ;;  %v358_v26 = vsel %vm6895_vm14, %v6854_v52, %v354_v21  ;;  %12441 = vst [vmem:[#allocation8_spill] sm:$0xff] %v6942_v10  ;;  %vm491_vm7 = vcmp.lt.f32.partialorder %v6814_v12, 0.0 }
  0xeb   :  { %v497_v28 = vsub.f32 0.0, %v481_v63  ;;  %v6916_v47 = vsel %vm360_vm15, %v362_v36, %v358_v26  ;;  %v434_v61 = vmul.f32 %v426_v44, %v6824_v19  ;;  %v452_v22 = vmul.f32 %v444_v14, %v6796_v40  ;;  %v6983_v40 = vpop.f32.mrf.mxu0 }
  0xec   :  { %v339_v52 = vadd.f32 %v6869_v4, %v338_v33  ;;  %v372_v37 = vmul.f32 1.0614054, %v6916_v47  ;;  %v5860_v62 = vpop.eup %5859  ;;  %v443_v33 = vsub.f32 0.0, %v6829_v29 }
  0xed   :  { %732 = vrot.lane.b32.xlu1 %v6826_v53, %s6312_s13  ;;  %604 = vrot.lane.b32.xlu0 %v6850_v49, %s6311_s12  ;;  %v505_v59 = vsel %vm489_vm2, %v497_v28, %v481_v63  ;;  %v474_v1 = vmul.f32 %v5860_v62, %v434_v61  ;;  %v210_v63 = vmul.f32 0.5, %v6707_v31  ;;  %v467_v26 = vmul.f32 1.442695, %v452_v22 }
  0xee   :  { %602 = vrot.lane.b32.xlu2 %v6826_v53, %s6311_s12  ;;  %v343_v56 = vsel %vm6922_vm3, %v6869_v4, %v339_v52  ;;  %v513_v19 = vadd.f32 1.0, %v505_v59  ;;  %v380_v23 = vadd.f32 -1.4531521, %v372_v37  ;;  %v6951_v17 = vpop.permute.xlu2 %758  ;;  %v451_v31 = vmul.f32 %v443_v33, %v6829_v29  ;;  %v6985_v52 = vpop.permute.xlu0 %628 }
  0xef   :  { %v348_v5 = vsel %vm345_vm4, %v347_v8, %v343_v56  ;;  %v482_v24 = vsub.f32 1.0, %v474_v1  ;;  %12442 = vst [vmem:[#allocation9_spill] sm:$0xff] %v6951_v17  ;;  %5861 = vpow2.f32 %v467_v26 }
  0xf0   :  { %v6940_v7 = vmul.f32 %v513_v19, %v209_v25  ;;  %v371_v11 = vmul.f32 1.0614054, %v348_v5  ;;  %v388_v4 = vmul.f32 %v380_v23, %v6916_v47  ;;  %12446 = vst [vmem:[#allocation13_spill] sm:$0xff] %v6985_v52  ;;  %v465_v61 = vmul.f32 1.442695, %v451_v31 }
  0xf1   :  { %v498_v38 = vsub.f32 0.0, %v482_v24  ;;  %v6962_v21 = vpop.permute.xlu1 %693  ;;  %v6973_v28 = vpop.f32.mrf.mxu1 }
  0xf2   :  { %v379_v50 = vadd.f32 -1.4531521, %v371_v11  ;;  %v396_v13 = vadd.f32 1.4214138, %v388_v4  ;;  %12443 = vst [vmem:[#allocation10_spill] sm:$0xff] %v6962_v21  ;;  %5863 = vpow2.f32 %v465_v61 }
  0xf3   :  { %v506_v0 = vsel %vm490_vm5, %v498_v38, %v482_v24  ;;  %v3085_v23 = vpop.f32.mrf.mxu0 }
  0xf4   :  { %v387_v16 = vmul.f32 %v379_v50, %v348_v5  ;;  %v404_v55 = vmul.f32 %v396_v13, %v6916_v47  ;;  %v514_v48 = vadd.f32 1.0, %v506_v0  ;;  %v7033_v33 = vadd.f32 %v3085_v23, %v6661_v32 }
  0xf5   :  { %829 = vrot.lane.b32.xlu1 %v6826_v53, %s6313_s14  ;;  %661 = vrot.lane.b32.xlu0 %v6893_v39, %s6309_s10  ;;  %v5862_v56 = vpop.eup %5861 }
  0xf6   :  { %659 = vrot.lane.b32.xlu2 %v6833_v9, %s6309_s10  ;;  %v395_v58 = vadd.f32 1.4214138, %v387_v16  ;;  %v412_v30 = vadd.f32 -0.28449672, %v404_v55  ;;  %v6968_v41 = vpop.permute.xlu2 %770  ;;  %v6970_v36 = vmul.f32 %v514_v48, %v210_v63  ;;  %v6998_v25 = vpop.permute.xlu0 %701  ;;  %12456 = vst [vmem:[#allocation23_spill] sm:$0xff] %v7033_v33 }
  0xf7   :  { %12444 = vst [vmem:[#allocation11_spill] sm:$0xff] %v6968_v41 }
  0xf8   :  { %12445 = vst [vmem:[#allocation12_spill] sm:$0xff] %v6970_v36  ;;  %v403_v44 = vmul.f32 %v395_v58, %v348_v5  ;;  %v420_v46 = vmul.f32 %v412_v30, %v6916_v47  ;;  %v5864_v38 = vpop.eup %5863 }
  0xf9   :  { %v6987_v59 = vpop.permute.xlu1 %705  ;;  %v3117_v19 = vpop.f32.mrf.mxu1  ;;  %12449 = vst [vmem:[#allocation16_spill] sm:$0xff] %v6998_v25  ;;  %v54_v25 = vld [vmem:[%s12255_s5 + $0x60] sm:$0xff] }
  0xfa   :  { %v411_v54 = vadd.f32 -0.28449672, %v403_v44  ;;  %v428_v57 = vadd.f32 0.2548296, %v420_v46  ;;  %12447 = vst [vmem:[#allocation14_spill] sm:$0xff] %v6987_v59  ;;  %v212_v44 = vmul.f32 0.5, %v6775_v20  ;;  %v7068_v23 = vadd.f32 %v3117_v19, %v6682_v45 }
  0xfc   :  { %v419_v37 = vmul.f32 %v411_v54, %v348_v5  ;;  %v436_v62 = vmul.f32 %v428_v57, %v6916_v47  ;;  %v7046_v57 = vmul.f32 0.70710677, %v7033_v33  ;;  %12462 = vst [vmem:[#allocation29_spill] sm:$0xff] %v7068_v23  ;;  %v74_v33 = vlaneseq }
  0xfd   :  { %886 = vrot.lane.b32.xlu1 %v6833_v9, %s6314_s2  ;;  %896 = vrot.lane.b32.xlu0 %v6850_v49, %s6314_s2 }
  0xfe   :  { %724 = vrot.lane.b32.xlu2 %v6833_v9, %s6312_s13  ;;  %v6990_v8 = vpop.permute.xlu2 %794  ;;  %v427_v29 = vadd.f32 0.2548296, %v419_v37  ;;  %v476_v1 = vmul.f32 %v5862_v56, %v436_v62  ;;  %v7014_v16 = vpop.permute.xlu0 %762  ;;  %12458 = vst [vmem:[#allocation25_spill] sm:$0xff] %v7046_v57 }
  0xff   :  { %12448 = vst [vmem:[#allocation15_spill] sm:$0xff] %v6990_v8 }
 0x100   :  { %v435_v24 = vmul.f32 %v427_v29, %v348_v5  ;;  %v484_v11 = vsub.f32 1.0, %v476_v1  ;;  %v3088_v5 = vpop.f32.mrf.mxu0  ;;  %12452 = vst [vmem:[#allocation19_spill] sm:$0xff] %v7014_v16  ;;  %v7065_v1 = vand.u32 2147483647, %v7046_v57 }
 0x101   :  { %v7000_v47 = vpop.permute.xlu1 %766  ;;  %v3120_v50 = vpop.f32.mrf.mxu1  ;;  %v7025_v30 = vadd.f32 %v3088_v5, %v6682_v45 }
 0x102   :  { %12450 = vst [vmem:[#allocation17_spill] sm:$0xff] %v7000_v47  ;;  %v475_v13 = vmul.f32 %v5864_v38, %v435_v24  ;;  %v500_v14 = vsub.f32 0.0, %v484_v11  ;;  %v7011_v0 = vadd.f32 %v3120_v50, %v6770_v15  ;;  %v211_v24 = vmul.f32 0.5, %v6793_v60 }
 0x103   :  { %12455 = vst [vmem:[#allocation22_spill] sm:$0xff] %v7025_v30  ;;  %v7037_v46 = vmul.f32 0.70710677, %v7025_v30 }
 0x104   :  { %v483_v55 = vsub.f32 1.0, %v475_v13  ;;  %v508_v48 = vsel %vm492_vm6, %v500_v14, %v484_v11  ;;  %v7028_v27 = vmul.f32 0.70710677, %v7011_v0  ;;  %v3149_v13 = vmul.f32 0.3275911, %v7065_v1 }
 0x105   :  { %669 = vrot.lane.b32.xlu1 %v6850_v49, %s6309_s10  ;;  %529 = vrot.lane.b32.xlu0 %v6940_v7, %s6310_s11  ;;  %v516_v63 = vadd.f32 1.0, %v508_v48  ;;  %v7059_v20 = vand.u32 2147483647, %v7037_v46  ;;  %v7078_v14 = vmul.f32 0.70710677, %v7068_v23  ;;  %v7099_v48 = vadd.f32 %v6973_v28, %v6661_v32 }
 0x106   :  { %821 = vrot.lane.b32.xlu2 %v6833_v9, %s6313_s14  ;;  %v7002_v4 = vpop.permute.xlu2 %855  ;;  %v499_v26 = vsub.f32 0.0, %v483_v55  ;;  %v7040_v31 = vand.u32 2147483647, %v7028_v27  ;;  %v7052_v56 = vpop.permute.xlu0 %798  ;;  %v7095_v19 = vadd.f32 1.0, %v3149_v13 }
 0x107   :  { %12451 = vst [vmem:[#allocation18_spill] sm:$0xff] %v7002_v4  ;;  %v7043_v54 = vmul.f32 %v516_v63, %v212_v44  ;;  %v3151_v11 = vmul.f32 0.3275911, %v7059_v20  ;;  %v7102_v63 = vand.u32 2147483647, %v7078_v14 }
 0x108   :  { %v507_v61 = vsel %vm491_vm7, %v499_v26, %v483_v55  ;;  %12461 = vst [vmem:[#allocation28_spill] sm:$0xff] %v7052_v56  ;;  %v3154_v12 = vmul.f32 0.3275911, %v7040_v31  ;;  %v7106_v26 = vadd.f32 %v6954_v6, %v6636_v18  ;;  %v3091_v28 = vpop.f32.mrf.mxu0  ;;  %vm3198_vm0 = vweird.f32 %v7095_v19 }
 0x109   :  { %v7016_v22 = vpop.permute.xlu1 %790  ;;  %12457 = vst [vmem:[#allocation24_spill] sm:$0xff] %v7043_v54  ;;  %v515_v29 = vadd.f32 1.0, %v507_v61  ;;  %v7090_v60 = vadd.f32 1.0, %v3151_v11  ;;  %v7113_v61 = vmul.f32 0.70710677, %v7099_v48 }
 0x10a   :  { %12453 = vst [vmem:[#allocation20_spill] sm:$0xff] %v7016_v22  ;;  %v7072_v38 = vadd.f32 1.0, %v3154_v12  ;;  %v3152_v12 = vmul.f32 0.3275911, %v7102_v63  ;;  %v7123_v6 = vmul.f32 0.70710677, %v7106_v26 }
 0x10b   :  { %v7074_v50 = vmul.f32 %v515_v29, %v211_v24  ;;  %12464 = vst [vmem:[#allocation31_spill] sm:$0xff] %v7078_v14  ;;  %v7136_v35 = vand.u32 2147483647, %v7113_v61  ;;  %vm3228_vm10 = vweird.f32 %v7090_v60 }
 0x10c   :  { %5865 = vrcp.f32 %v7072_v38  ;;  %12468 = vst [vmem:[#allocation35_spill] sm:$0xff] %v7099_v48  ;;  %v7138_v3 = vadd.f32 1.0, %v3152_v12  ;;  %vm3273_vm8 = vweird.f32 %v7072_v38 }
 0x10d   :  { %726 = vrot.lane.b32.xlu1 %v6893_v39, %s6312_s13  ;;  %598 = vrot.lane.b32.xlu0 %v6940_v7, %s6311_s12  ;;  %12463 = vst [vmem:[#allocation30_spill] sm:$0xff] %v7074_v50  ;;  %5867 = vrcp.f32 %v7090_v60  ;;  %v3150_v4 = vmul.f32 0.3275911, %v7136_v35 }
 0x10e   :  { %894 = vrot.lane.b32.xlu2 %v6826_v53, %s6314_s2  ;;  %v7018_v58 = vpop.permute.xlu2 %867  ;;  %v7088_v45 = vpop.permute.xlu0 %859  ;;  %12469 = vst [vmem:[#allocation36_spill] sm:$0xff] %v7106_v26  ;;  %5869 = vrcp.f32 %v7095_v19  ;;  %v7180_v26 = vadd.f32 %v6983_v40, %v6636_v18  ;;  %vm3243_vm4 = vweird.f32 %v7138_v3 }
 0x10f   :  { %12454 = vst [vmem:[#allocation21_spill] sm:$0xff] %v7018_v58  ;;  %v7143_v58 = vadd.f32 %v3091_v28, %v6770_v15  ;;  %5871 = vrcp.f32 %v7138_v3 }
 0x110   :  { %12467 = vst [vmem:[#allocation34_spill] sm:$0xff] %v7088_v45 }
 0x111   :  { %v7048_v37 = vpop.permute.xlu1 %802  ;;  %12470 = vst [vmem:[#allocation37_spill] sm:$0xff] %v7113_v61  ;;  %v7157_v17 = vmul.f32 0.70710677, %v7143_v58 }
 0x112   :  { %12459 = vst [vmem:[#allocation26_spill] sm:$0xff] %v7048_v37  ;;  %v7110_v44 = vpop.eup %5865  ;;  %v7146_v37 = vand.u32 2147483647, %v7123_v6 }
 0x113   :  { %12472 = vst [vmem:[#allocation39_spill] sm:$0xff] %v7123_v6  ;;  %v3269_v24 = vmul.f32 %v7110_v44, %v7072_v38  ;;  %v7133_v13 = vpop.eup %5867  ;;  %vm3274_vm9 = vweird.f32 %v7110_v44 }
 0x114   :  { %12475 = vst [vmem:[#allocation42_spill] sm:$0xff] %v7143_v58  ;;  %v3224_v59 = vmul.f32 %v7133_v13, %v7090_v60  ;;  %v3148_v15 = vmul.f32 0.3275911, %v7146_v37  ;;  %vm3229_vm11 = vweird.f32 %v7133_v13  ;;  %vm7211_vm12 = vmor %vm3273_vm8, %vm3274_vm9 }
 0x115   :  { %823 = vrot.lane.b32.xlu1 %v6893_v39, %s6313_s14  ;;  %736 = vrot.lane.b32.xlu0 %v6970_v36, %s6312_s13  ;;  %12476 = vst [vmem:[#allocation43_spill] sm:$0xff] %v7146_v37  ;;  %v3270_v41 = vsub.f32 1.0, %v3269_v24  ;;  %vm7232_vm14 = vmor %vm3228_vm10, %vm3229_vm11 }
 0x116   :  { %527 = vrot.lane.b32.xlu2 %v6893_v39, %s6310_s11  ;;  %12478 = vst [vmem:[#allocation45_spill] sm:$0xff] %v7157_v17  ;;  %v3225_v28 = vsub.f32 1.0, %v3224_v59  ;;  %v7182_v6 = vadd.f32 1.0, %v3148_v15 }
 0x117   :  { %v3271_v24 = vmul.f32 %v7110_v44, %v3270_v41  ;;  %12481 = vst [vmem:[#allocation48_spill] sm:$0xff] %v7180_v26 }
 0x118   :  { %v3226_v41 = vmul.f32 %v7133_v13, %v3225_v28  ;;  %v3277_v28 = vand.u32 2147483647, %v7072_v38  ;;  %vm3183_vm9 = vweird.f32 %v7182_v6 }
 0x119   :  { %v7080_v5 = vpop.permute.xlu1 %863  ;;  %v3272_v59 = vadd.f32 %v7110_v44, %v3271_v24  ;;  %v3234_v24 = vand.u32 2147483648, %v7090_v60 }
 0x11a   :  { %12465 = vst [vmem:[#allocation32_spill] sm:$0xff] %v7080_v5  ;;  %vm3278_vm15 = vcmp.eq.f32.partialorder %v3277_v28, 8.507059e+37 }
 0x11b   :  { %v3235_v56 = vor.u32 1.1754944e-38, %v3234_v24 }
 0x11d   :  { %537 = vrot.lane.b32.xlu1 %v6970_v36, %s6310_s11  ;;  %833 = vrot.lane.b32.xlu0 %v6970_v36, %s6313_s14 }
 0x11e   :  { %596 = vrot.lane.b32.xlu2 %v6893_v39, %s6311_s12 }
 0x125   :  { %606 = vrot.lane.b32.xlu1 %v6970_v36, %s6311_s12  ;;  %890 = vrot.lane.b32.xlu0 %v6940_v7, %s6314_s2 }
 0x126   :  { %734 = vrot.lane.b32.xlu2 %v6850_v49, %s6312_s13 }
 0x12d   :  { %663 = vrot.lane.b32.xlu1 %v6940_v7, %s6309_s10  ;;  %963 = vrot.lane.b32.xlu0 %v6970_v36, %s6315_s15 }
 0x12e   :  { %831 = vrot.lane.b32.xlu2 %v6850_v49, %s6313_s14 }
 0x12f   :  { %v7050_v62 = vpop.permute.xlu2 %932 }
 0x130   :  { %12460 = vst [vmem:[#allocation27_spill] sm:$0xff] %v7050_v62  ;;  %v7140_v62 = vpop.eup %5869 }
 0x131   :  { %v3194_v10 = vmul.f32 %v7140_v62, %v7095_v19  ;;  %vm3199_vm13 = vweird.f32 %v7140_v62 }
 0x132   :  { %vm7254_vm2 = vmor %vm3198_vm0, %vm3199_vm13 }
 0x133   :  { %v3195_v22 = vsub.f32 1.0, %v3194_v10 }
 0x135   :  { %898 = vrot.lane.b32.xlu1 %v6970_v36, %s6314_s2  ;;  %673 = vrot.lane.b32.xlu0 %v7043_v54, %s6309_s10  ;;  %v3196_v10 = vmul.f32 %v7140_v62, %v3195_v22  ;;  %v7204_v22 = vmul.f32 0.70710677, %v7180_v26  ;;  %v3276_v26 = vsel %vm7211_vm12, %v7110_v44, %v3272_v59 }
 0x136   :  { %888 = vrot.lane.b32.xlu2 %v6893_v39, %s6314_s2 }
 0x137   :  { %12483 = vst [vmem:[#allocation50_spill] sm:$0xff] %v7204_v22  ;;  %v7242_v59 = vand.u32 2147483647, %v7204_v22 }
 0x138   :  { %v7082_v55 = vpop.permute.xlu2 %525 }
 0x139   :  { %12466 = vst [vmem:[#allocation33_spill] sm:$0xff] %v7082_v55  ;;  %v7171_v55 = vadd.f32 1.0, %v3150_v4  ;;  %v3279_v4 = vand.u32 2147483648, %v7072_v38 }
 0x13a   :  { %12489 = vst [vmem:[#allocation52_spill] sm:$0xff] %v7242_v59 }
 0x13b   :  { %5873 = vrcp.f32 %v7171_v55  ;;  %vm3213_vm11 = vweird.f32 %v7171_v55 }
 0x13c   :  { %5875 = vrcp.f32 %v7182_v6 }
 0x13d   :  { %531 = vrot.lane.b32.xlu1 %v7074_v50, %s6310_s11  ;;  %730 = vrot.lane.b32.xlu0 %v7074_v50, %s6312_s13 }
 0x13e   :  { %671 = vrot.lane.b32.xlu2 %v6970_v36, %s6309_s10 }
 0x140   :  { %v7116_v32 = vpop.permute.xlu2 %533 }
 0x141   :  { %12471 = vst [vmem:[#allocation38_spill] sm:$0xff] %v7116_v32  ;;  %v7174_v32 = vand.u32 2147483647, %v7157_v17 }
 0x143   :  { %v3153_v15 = vmul.f32 0.3275911, %v7174_v32 }
 0x145   :  { %600 = vrot.lane.b32.xlu1 %v7074_v50, %s6311_s12  ;;  %827 = vrot.lane.b32.xlu0 %v7074_v50, %s6313_s14 }
 0x146   :  { %v7125_v29 = vpop.permute.xlu1 %928  ;;  %728 = vrot.lane.b32.xlu2 %v6940_v7, %s6312_s13 }
 0x147   :  { %12473 = vst [vmem:[#allocation40_spill] sm:$0xff] %v7125_v29  ;;  %v7131_v11 = vpop.permute.xlu0 %924  ;;  %v3197_v29 = vadd.f32 %v7140_v62, %v3196_v10 }
 0x148   :  { %12474 = vst [vmem:[#allocation41_spill] sm:$0xff] %v7131_v11  ;;  %v7154_v12 = vpop.permute.xlu2 %602 }
 0x149   :  { %12477 = vst [vmem:[#allocation44_spill] sm:$0xff] %v7154_v12  ;;  %v7176_v12 = vpop.eup %5871 }
 0x14a   :  { %v3239_v40 = vmul.f32 %v7176_v12, %v7138_v3  ;;  %v7239_v44 = vpop.eup %5873  ;;  %vm3244_vm5 = vweird.f32 %v7176_v12 }
 0x14b   :  { %v7260_v28 = vpop.eup %5875  ;;  %vm7293_vm6 = vmor %vm3243_vm4, %vm3244_vm5  ;;  %vm3214_vm8 = vweird.f32 %v7239_v44 }
 0x14c   :  { %v3240_v5 = vsub.f32 1.0, %v3239_v40  ;;  %vm3184_vm10 = vweird.f32 %v7260_v28  ;;  %vm7349_vm13 = vmor %vm3213_vm11, %vm3214_vm8 }
 0x14d   :  { %738 = vrot.lane.b32.xlu1 %v7043_v54, %s6312_s13  ;;  %957 = vrot.lane.b32.xlu0 %v7074_v50, %s6315_s15 }
 0x14e   :  { %825 = vrot.lane.b32.xlu2 %v6940_v7, %s6313_s14 }
 0x14f   :  { %v7167_v52 = vpop.permute.xlu1 %997  ;;  %v7169_v21 = vpop.permute.xlu0 %667 }
 0x150   :  { %12479 = vst [vmem:[#allocation46_spill] sm:$0xff] %v7167_v52  ;;  %v7192_v18 = vpop.permute.xlu2 %659  ;;  %v7237_v52 = vadd.f32 1.0, %v3153_v15 }
 0x151   :  { %12480 = vst [vmem:[#allocation47_spill] sm:$0xff] %v7169_v21  ;;  %v3227_v21 = vadd.f32 %v7133_v13, %v3226_v41  ;;  %v3280_v41 = vor.u32 1.1754944e-38, %v3279_v4  ;;  %v3202_v4 = vand.u32 2147483647, %v7095_v19 }
 0x152   :  { %12482 = vst [vmem:[#allocation49_spill] sm:$0xff] %v7192_v18  ;;  %v3232_v18 = vand.u32 2147483647, %v7090_v60  ;;  %5877 = vrcp.f32 %v7237_v52  ;;  %vm3258_vm0 = vweird.f32 %v7237_v52 }
 0x153   :  { %v7245_v60 = vsel %vm3278_vm15, %v3280_v41, %v3276_v26  ;;  %v3231_v10 = vsel %vm7232_vm14, %v7133_v13, %v3227_v21  ;;  %v3201_v26 = vsel %vm7254_vm2, %v7140_v62, %v3197_v29  ;;  %v3209_v13 = vmul.f32 %v7239_v44, %v7171_v55  ;;  %vm7373_vm14 = vmor %vm3183_vm9, %vm3184_vm10 }
 0x154   :  { %vm3233_vm1 = vcmp.eq.f32.partialorder %v3232_v18, 8.507059e+37  ;;  %v3290_v21 = vmul.f32 1.0614054, %v7245_v60  ;;  %v3147_v62 = vmul.f32 0.3275911, %v7242_v59  ;;  %vm3203_vm3 = vcmp.eq.f32.partialorder %v3202_v4, 8.507059e+37 }
 0x155   :  { %835 = vrot.lane.b32.xlu1 %v7043_v54, %s6313_s14  ;;  %1030 = vrot.lane.b32.xlu0 %v7043_v54, %s6316_s16  ;;  %v7274_v18 = vsel %vm3233_vm1, %v3235_v56, %v3231_v10  ;;  %v3249_v56 = vand.u32 2147483648, %v7138_v3  ;;  %v3247_v4 = vand.u32 2147483647, %v7138_v3 }
 0x156   :  { %955 = vrot.lane.b32.xlu2 %v6940_v7, %s6315_s15  ;;  %v3287_v41 = vmul.f32 1.0614054, %v7274_v18  ;;  %v3298_v40 = vadd.f32 -1.4531521, %v3290_v21  ;;  %v7299_v59 = vadd.f32 1.0, %v3147_v62 }
 0x157   :  { %v7223_v48 = vpop.permute.xlu1 %594  ;;  %v7225_v38 = vpop.permute.xlu0 %535  ;;  %vm3248_vm7 = vcmp.eq.f32.partialorder %v3247_v4, 8.507059e+37 }
 0x158   :  { %12486 = vst [vmem:[#allocation51_spill] sm:$0xff] %v7223_v48  ;;  %v3204_v48 = vand.u32 2147483648, %v7095_v19  ;;  %v7258_v15 = vpop.permute.xlu2 %724  ;;  %v3241_v19 = vmul.f32 %v7176_v12, %v3240_v5  ;;  %v3295_v61 = vadd.f32 -1.4531521, %v3287_v41  ;;  %5879 = vrcp.f32 %v7299_v59 }
 0x159   :  { %12492 = vst [vmem:[#allocation53_spill] sm:$0xff] %v7258_v15  ;;  %v3210_v15 = vsub.f32 1.0, %v3209_v13 }
 0x15a   :  { %v3205_v58 = vor.u32 1.1754944e-38, %v3204_v48  ;;  %v3179_v48 = vmul.f32 %v7260_v28, %v7182_v6  ;;  %v3242_v10 = vadd.f32 %v7176_v12, %v3241_v19  ;;  %v3306_v19 = vmul.f32 %v3298_v40, %v7245_v60 }
 0x15b   :  { %v3211_v21 = vmul.f32 %v7239_v44, %v3210_v15  ;;  %v3189_v15 = vand.u32 2147483648, %v7182_v6  ;;  %v3303_v4 = vmul.f32 %v3295_v61, %v7274_v18  ;;  %v3217_v61 = vand.u32 2147483647, %v7171_v55 }
 0x15c   :  { %v7287_v24 = vsel %vm3203_vm3, %v3205_v58, %v3201_v26  ;;  %v3180_v26 = vsub.f32 1.0, %v3179_v48  ;;  %v3246_v3 = vsel %vm7293_vm6, %v7176_v12, %v3242_v10  ;;  %v3187_v48 = vand.u32 2147483647, %v7182_v6 }
 0x15d   :  { %892 = vrot.lane.b32.xlu1 %v7074_v50, %s6314_s2  ;;  %1028 = vrot.lane.b32.xlu0 %v6970_v36, %s6316_s16  ;;  %v3285_v58 = vmul.f32 1.0614054, %v7287_v24  ;;  %v3250_v36 = vor.u32 1.1754944e-38, %v3249_v56  ;;  %v3357_v10 = vsub.f32 0.0, %v7065_v1  ;;  %v3314_v40 = vadd.f32 1.4214138, %v3306_v19 }
 0x15e   :  { %539 = vrot.lane.b32.xlu2 %v7043_v54, %s6310_s11  ;;  %v3181_v62 = vmul.f32 %v7260_v28, %v3180_v26  ;;  %vm7343_vm12 = vcmp.eq.f32.partialorder %v3187_v48, 8.507059e+37  ;;  %v3190_v47 = vor.u32 1.1754944e-38, %v3189_v15  ;;  %vm3218_vm15 = vcmp.eq.f32.partialorder %v3217_v61, 8.507059e+37 }
 0x15f   :  { %v7281_v5 = vpop.permute.xlu1 %732  ;;  %v7283_v29 = vpop.permute.xlu0 %604  ;;  %v3293_v56 = vadd.f32 -1.4531521, %v3285_v58  ;;  %v7324_v41 = vsel %vm3248_vm7, %v3250_v36, %v3246_v3  ;;  %v3219_v36 = vand.u32 2147483648, %v7171_v55  ;;  %v7359_v55 = vmul.f32 %v3357_v10, %v7065_v1 }
 0x160   :  { %12493 = vst [vmem:[#allocation54_spill] sm:$0xff] %v7281_v5  ;;  %v7297_v5 = vpop.eup %5877  ;;  %v7302_v17 = vpop.permute.xlu2 %821  ;;  %v3288_v26 = vmul.f32 1.0614054, %v7324_v41  ;;  %v3182_v58 = vadd.f32 %v7260_v28, %v3181_v62  ;;  %v3311_v62 = vadd.f32 1.4214138, %v3303_v4  ;;  %v3359_v6 = vsub.f32 0.0, %v7059_v20 }
 0x161   :  { %12496 = vst [vmem:[#allocation55_spill] sm:$0xff] %v7302_v17  ;;  %v3254_v13 = vmul.f32 %v7297_v5, %v7237_v52  ;;  %v3212_v17 = vadd.f32 %v7239_v44, %v3211_v21  ;;  %v3301_v3 = vmul.f32 %v3293_v56, %v7287_v24  ;;  %v7341_v21 = vpop.eup %5879  ;;  %v3322_v56 = vmul.f32 %v3314_v40, %v7245_v60 }
 0x162   :  { %v3220_v1 = vor.u32 1.1754944e-38, %v3219_v36  ;;  %v3296_v23 = vadd.f32 -1.4531521, %v3288_v26  ;;  %v3319_v36 = vmul.f32 %v3311_v62, %v7274_v18  ;;  %vm3259_vm1 = vweird.f32 %v7297_v5 }
 0x163   :  { %v3216_v48 = vsel %vm7349_vm13, %v7239_v44, %v3212_v17  ;;  %v3362_v17 = vsub.f32 0.0, %v7040_v31  ;;  %v3309_v40 = vadd.f32 1.4214138, %v3301_v3  ;;  %v3330_v26 = vadd.f32 -0.28449672, %v3322_v56  ;;  %vm7411_vm3 = vmor %vm3258_vm0, %vm3259_vm1 }
 0x164   :  { %v7387_v57 = vsel %vm3218_vm15, %v3220_v1, %v3216_v48  ;;  %v3264_v3 = vand.u32 2147483648, %v7237_v52  ;;  %v3367_v56 = vmul.f32 %v3359_v6, %v7059_v20  ;;  %v3375_v11 = vmul.f32 1.442695, %v7359_v55 }
 0x165   :  { %965 = vrot.lane.b32.xlu1 %v7043_v54, %s6315_s15  ;;  %951 = vrot.lane.b32.xlu0 %v6833_v9, %s6315_s15  ;;  %v3370_v61 = vmul.f32 %v3362_v17, %v7040_v31  ;;  %v3317_v62 = vmul.f32 %v3309_v40, %v7287_v24  ;;  %v3286_v1 = vmul.f32 1.0614054, %v7387_v57  ;;  %v7419_v31 = vld [vmem:[%s12251_s3 + $0x10] sm:$0xff]  ;;  %v3327_v17 = vadd.f32 -0.28449672, %v3319_v36 }
 0x166   :  { %608 = vrot.lane.b32.xlu2 %v7043_v54, %s6311_s12  ;;  %12509 = vst [vmem:[#allocation60_spill] sm:$0xff] %v7419_v31  ;;  %vm3410_vm15 = vcmp.lt.f32.partialorder %v7028_v27, 0.0 }
 0x167   :  { %v7318_v12 = vpop.permute.xlu1 %829  ;;  %v7320_v22 = vpop.permute.xlu0 %661  ;;  %v3335_v14 = vmul.f32 %v3327_v17, %v7274_v18 }
 0x168   :  { %12497 = vst [vmem:[#allocation56_spill] sm:$0xff] %v7318_v12  ;;  %v3255_v12 = vsub.f32 1.0, %v3254_v13  ;;  %v7339_v19 = vpop.permute.xlu2 %894  ;;  %v3338_v13 = vmul.f32 %v3330_v26, %v7245_v60  ;;  %v3385_v26 = vmul.f32 1.442695, %v3370_v61 }
 0x169   :  { %12498 = vst [vmem:[#allocation57_spill] sm:$0xff] %v7339_v19  ;;  %v7365_v19 = vand.u32 127, %v74_v33  ;;  %v3343_v42 = vadd.f32 0.2548296, %v3335_v14 }
 0x16a   :  { %v3256_v15 = vmul.f32 %v7297_v5, %v3255_v12  ;;  %v3186_v12 = vsel %vm7373_vm14, %v7260_v28, %v3182_v58  ;;  %v3304_v58 = vmul.f32 %v3296_v23, %v7324_v41  ;;  %v7431_v23 = vld [vmem:[%s12251_s3] sm:$0xff]  ;;  %v3346_v61 = vadd.f32 0.2548296, %v3338_v13 }
 0x16b   :  { %v7395_v4 = vadd.s32 128, %v7365_v19  ;;  %v7399_v28 = vsel %vm7343_vm12, %v3190_v47, %v3186_v12  ;;  %v77_v48 = vand.u32 15, %v7365_v19  ;;  %vm541_vm2 = vcmp.lt.s32.totalorder %v7365_v19, 17 }
 0x16c   :  { %v3257_v10 = vadd.f32 %v7297_v5, %v3256_v15  ;;  %v3312_v6 = vadd.f32 1.4214138, %v3304_v58  ;;  %vm12328_vm5 = vcmp.lt.s32.totalorder %v7365_v19, 15  ;;  %vm12325_vm7 = vcmp.ge.s32.totalorder %v7365_v19, 16 }
 0x16d   :  { %953 = vrot.lane.b32.xlu1 %v6893_v39, %s6315_s15  ;;  %1018 = vrot.lane.b32.xlu0 %v6893_v39, %s6316_s16  ;;  %12506 = vst [vmem:[#allocation59_spill] sm:$0xff] %v7395_v4  ;;  %v78_v40 = vand.u32 15, %v7395_v4  ;;  %vm7443_vm6 = vcmp.ge.s32.totalorder %v77_v48, 1  ;;  %v3379_v58 = vmul.f32 1.442695, %v3367_v56  ;;  %vm7460_vm9 = vcmp.le.s32.totalorder %v77_v48, 14 }
 0x16e   :  { %665 = vrot.lane.b32.xlu2 %v7074_v50, %s6309_s10  ;;  %v3261_v12 = vsel %vm7411_vm3, %v7297_v5, %v3257_v10  ;;  %v3294_v47 = vadd.f32 -1.4531521, %v3286_v1  ;;  %v3320_v37 = vmul.f32 %v3312_v6, %v7324_v41  ;;  %5881 = vpow2.f32 %v3385_v26  ;;  %vm7470_vm10 = vmand %vm12325_vm7, %vm7443_vm6  ;;  %v7509_v26 = vld [vmem:[%s12251_s3 + $0x18] sm:$0xff] }
 0x16f   :  { %v7379_v44 = vpop.permute.xlu1 %886  ;;  %v7381_v33 = vpop.permute.xlu0 %896  ;;  %vm7456_vm8 = vcmp.ge.s32.totalorder %v78_v40, 1  ;;  %vm12326_vm11 = vcmp.lt.s32.totalorder %v7365_v19, 16  ;;  %vm7478_vm12 = vcmp.le.s32.totalorder %v78_v40, 14  ;;  %v3354_v17 = vmul.f32 %v3346_v61, %v7245_v60  ;;  %vm7489_vm13 = vmand %vm12325_vm7, %vm7460_vm9 }
 0x170   :  { %12505 = vst [vmem:[#allocation58_spill] sm:$0xff] %v7379_v44  ;;  %v3262_v44 = vand.u32 2147483647, %v7237_v52  ;;  %v528_v15 = vpop.permute.xlu2 %527  ;;  %v12308_v40 = vmov 8   ;;  %5883 = vpow2.f32 %v3379_v58  ;;  %vm12387_vm14 = vcmp.lt.s32.totalorder %v7365_v19, 1 }
 0x171   :  { %v543_v20 = vsel %vm541_vm2, %v528_v15, %v7225_v38  ;;  %v547_v52 = vsel %vm541_vm2, %v7225_v38, %v528_v15  ;;  %v3265_v38 = vor.u32 1.1754944e-38, %v3264_v3  ;;  %5885 = vpow2.f32 %v3375_v11 }
 0x172   :  { %vm3263_vm4 = vcmp.eq.f32.partialorder %v3262_v44, 8.507059e+37  ;;  %v3325_v44 = vadd.f32 -0.28449672, %v3317_v62  ;;  %v553_v62 = vsel %vm7456_vm8, %v543_v20, 0.0  ;;  %v552_v1 = vsel %vm7470_vm10, %v547_v52, 0.0 }
 0x173   :  { %v7454_v3 = vsel %vm3263_vm4, %v3265_v38, %v3261_v12  ;;  %v12521_v20 = vmov 0  ;;  %v581_v38 = vmul.f32 %v6885_v34, %v553_v62  ;;  %v580_v61 = vmul.f32 %v6885_v34, %v552_v1 }
 0x174   :  { %v3289_v56 = vmul.f32 1.0614054, %v7454_v3  ;;  %v12522_v20 = vsel %vm7489_vm13, 4294967295, %v12521_v20  ;;  %v3328_v34 = vadd.f32 -0.28449672, %v3320_v37  ;;  %v3351_v37 = vmul.f32 %v3343_v42, %v7274_v18 }
 0x175   :  { %993 = vperm.xlu1 %5823, %v7419_v31   ;;  %985 = vperm.xlu0 %5828, %v7431_v23   ;;  %12523 = vst [vmem:[#allocation62_spill] sm:$0xff] %v12522_v20  ;;  %v807_v11 = vmul.f32 %v6990_v8, %v6893_v39  ;;  %vm12385_vm0 = vcmp.lt.s32.totalorder %v7365_v19, 127  ;;  %vm12327_vm1 = vcmp.lt.s32.totalorder %v7395_v4, 240  ;;  %vm3407_vm3 = vcmp.lt.f32.partialorder %v7037_v46, 0.0 }
 0x176   :  { %900 = vrot.lane.b32.xlu2 %v7043_v54, %s6314_s2  ;;  %v3297_v20 = vadd.f32 -1.4531521, %v3289_v56  ;;  %vm12384_vm4 = vcmp.lt.s32.totalorder %v7365_v19, 113  ;;  %v73_v54 = vld [vmem:[%s12254_s6 + $0x78] sm:$0xff] }
 0x177   :  { %v670_v15 = vpop.permute.xlu1 %669  ;;  %v7441_v31 = vpop.permute.xlu0 %529 }
 0x178   :  { %v677_v5 = vsel %vm12328_vm5, %v7320_v22, %v670_v15  ;;  %v681_v10 = vsel %vm12328_vm5, %v670_v15, %v7320_v22  ;;  %v12516_v22 = vmov 0  ;;  %v597_v13 = vpop.permute.xlu2 %596  ;;  %v3305_v14 = vmul.f32 %v3297_v20, %v7454_v3 }
 0x179   :  { %v12517_v22 = vsel %vm7470_vm10, 4294967295, %v12516_v22  ;;  %v687_v12 = vsel %vm7478_vm12, %v677_v5, 0.0  ;;  %v612_v52 = vsel %vm12326_vm11, %v597_v13, %v7283_v29  ;;  %v616_v60 = vsel %vm12326_vm11, %v7283_v29, %v597_v13 }
 0x17a   :  { %12518 = vst [vmem:[#allocation61_spill] sm:$0xff] %v12517_v22  ;;  %v686_v6 = vsel %vm7489_vm13, %v681_v10, 0.0  ;;  %v621_v15 = vsel %vm12325_vm7, %v616_v60, 0.0  ;;  %v646_v5 = vmul.f32 %v6918_v51, %v612_v52  ;;  %v3302_v29 = vmul.f32 %v3294_v47, %v7387_v57 }
 0x17b   :  { %v3360_v10 = vsub.f32 0.0, %v7102_v63  ;;  %v645_v13 = vmul.f32 %v6918_v51, %v621_v15  ;;  %v3284_v60 = vmul.f32 1.0614054, %v7399_v28  ;;  %v711_v52 = vmul.f32 %v6935_v43, %v687_v12 }
 0x17c   :  { %v654_v30 = vadd.f32 %v646_v5, %v581_v38  ;;  %v3333_v47 = vmul.f32 %v3325_v44, %v7287_v24  ;;  %v710_v2 = vmul.f32 %v6935_v43, %v686_v6  ;;  %v12525_v12 = vsub.f32 0.0, %v7136_v35 }
 0x17d   :  { %5825 = vset.pattern.permute.xlu1 %v12308_v40  ;;  %5830 = vset.pattern.permute.xlu0 %v12308_v40  ;;  %v653_v1 = vadd.f32 %v645_v13, %v580_v61  ;;  %v3368_v22 = vmul.f32 %v3360_v10, %v7102_v63  ;;  %v3292_v9 = vadd.f32 -1.4531521, %v3284_v60  ;;  %v12526_v6 = vmov 0  }
 0x17e   :  { %1062 = vperm.xlu1 %5825, %v7509_v26   ;;  %1022 = vrot.lane.b32.xlu2 %v7074_v50, %s6316_s16  ;;  %v5882_v50 = vpop.eup %5881  ;;  %v719_v51 = vadd.f32 %v711_v52, %v654_v30  ;;  %v3366_v38 = vmul.f32 %v12525_v12, %v7136_v35  ;;  %v3341_v58 = vadd.f32 0.2548296, %v3333_v47  ;;  %v7557_v10 = vmul.f32 %v7341_v21, %v7299_v59 }
 0x17f   :  { %v727_v62 = vpop.permute.xlu1 %726  ;;  %1050 = vperm.xlu0 %5830, %v7431_v23   ;;  %v7522_v40 = vpop.permute.xlu0 %598  ;;  %v3394_v15 = vmul.f32 %v5882_v50, %v3354_v17  ;;  %v718_v56 = vadd.f32 %v710_v2, %v653_v1  ;;  %v3336_v2 = vmul.f32 %v3328_v34, %v7324_v41  ;;  %v3381_v18 = vmul.f32 1.442695, %v3368_v22 }
 0x180   :  { %12524 = vst [vmem:[#allocation63_spill] sm:$0xff] %v7522_v40  ;;  %v3310_v40 = vadd.f32 1.4214138, %v3302_v29  ;;  %v735_v44 = vpop.permute.xlu2 %734  ;;  %v5884_v29 = vpop.eup %5883  ;;  %v3313_v61 = vadd.f32 1.4214138, %v3305_v14  ;;  %v3300_v13 = vmul.f32 %v3292_v9, %v7399_v28  ;;  %v3349_v1 = vmul.f32 %v3341_v58, %v7287_v24 }
 0x181   :  { %v742_v30 = vsel %vm12387_vm14, %v727_v62, %v735_v44  ;;  %v746_v50 = vsel %vm12387_vm14, %v735_v44, %v727_v62  ;;  %v3402_v63 = vsub.f32 1.0, %v3394_v15  ;;  %v3377_v60 = vmul.f32 1.442695, %v3366_v38 }
 0x182   :  { %v751_v35 = vsel %vm7443_vm6, %v746_v50, 0.0  ;;  %v752_v55 = vsel %vm7456_vm8, %v742_v30, 0.0  ;;  %v3318_v42 = vmul.f32 %v3310_v40, %v7387_v57  ;;  %v7560_v40 = vmul.f32 %v5884_v29, %v3351_v37  ;;  %v5886_v37 = vpop.eup %5885 }
 0x183   :  { %v775_v20 = vmul.f32 %v7014_v16, %v751_v35  ;;  %v776_v34 = vmul.f32 %v7014_v16, %v752_v55  ;;  %v3344_v52 = vadd.f32 0.2548296, %v3336_v2  ;;  %v3418_v47 = vsub.f32 0.0, %v3402_v63 }
 0x184   :  { %v3326_v15 = vadd.f32 -0.28449672, %v3318_v42  ;;  %5887 = vpow2.f32 %v3381_v18  ;;  %v3361_v12 = vsub.f32 0.0, %v7174_v32  ;;  %v3321_v14 = vmul.f32 %v3313_v61, %v7454_v3 }
 0x185   :  { %v783_v22 = vadd.f32 %v775_v20, %v718_v56  ;;  %v784_v62 = vadd.f32 %v776_v34, %v719_v51  ;;  %v3399_v9 = vsub.f32 1.0, %v7560_v40  ;;  %v808_v56 = vmul.f32 %v6990_v8, %v6850_v49 }
 0x186   :  { %959 = vrot.lane.b32.xlu1 %v6826_v53, %s6315_s15  ;;  %961 = vrot.lane.b32.xlu2 %v6850_v49, %s6315_s15  ;;  %v3352_v44 = vmul.f32 %v3344_v52, %v7324_v41  ;;  %v3426_v27 = vsel %vm3410_vm15, %v3418_v47, %v3402_v63  ;;  %v3329_v55 = vadd.f32 -0.28449672, %v3321_v14  ;;  %v3165_v20 = vsub.f32 1.0, %v7557_v10  ;;  %vm7611_vm15 = vmand %vm12327_vm1, %vm7456_vm8  ;;  %v12530_v14 = vld [vmem:[#allocation2_spill] sm:$0xff] }
 0x187   :  { %v824_v17 = vpop.permute.xlu1 %823  ;;  %5831 = vset.pattern.permute.xlu0 %v12526_v6  ;;  %v7553_v5 = vpop.permute.xlu0 %736  ;;  %v815_v50 = vadd.f32 %v807_v11, %v783_v22  ;;  %v816_v2 = vadd.f32 %v808_v56, %v784_v62  ;;  %v3369_v34 = vmul.f32 %v3361_v12, %v7174_v32  ;;  %5889 = vpow2.f32 %v3377_v60 }
 0x188   :  { %560 = vperm.xlu0 %5831, %v7431_v23   ;;  %v832_v51 = vpop.permute.xlu2 %831  ;;  %v3415_v40 = vsub.f32 0.0, %v3399_v9  ;;  %v3434_v22 = vadd.f32 1.0, %v3426_v27  ;;  %v3308_v62 = vadd.f32 1.4214138, %v3300_v13  ;;  %v7601_v52 = vmul.f32 %v5886_v37, %v3349_v1 }
 0x189   :  { %v839_v24 = vsel %vm12385_vm0, %v824_v17, %v832_v51  ;;  %v843_v38 = vsel %vm12385_vm0, %v832_v51, %v824_v17  ;;  %v3130_v10 = vmul.f32 0.5, %v7011_v0  ;;  %v12527_v13 = vmov 0 }
 0x18a   :  { %v848_v39 = vsel %vm7460_vm9, %v839_v24, 0.0  ;;  %v849_v58 = vsel %vm7478_vm12, %v843_v38, 0.0  ;;  %v5888_v17 = vpop.eup %5887  ;;  %v12528_v13 = vsel %vm7611_vm15, 4294967295, %v12527_v13  ;;  %v3423_v1 = vsel %vm3407_vm3, %v3415_v40, %v3399_v9 }
 0x18b   :  { %v872_v35 = vmul.f32 %v7088_v45, %v848_v39  ;;  %v873_v41 = vmul.f32 %v7088_v45, %v849_v58  ;;  %12529 = vst [vmem:[#allocation64_spill] sm:$0xff] %v12528_v13  ;;  %v7623_v12 = vmul.f32 %v3434_v22, %v3130_v10  ;;  %v3166_v22 = vmul.f32 %v7341_v21, %v3165_v20 }
 0x18c   :  { %vm3168_vm3 = vweird.f32 %v7299_v59  ;;  %v3174_v20 = vand.u32 2147483648, %v7299_v59 }
 0x18d   :  { %v880_v29 = vadd.f32 %v872_v35, %v815_v50  ;;  %v881_v61 = vadd.f32 %v873_v41, %v816_v2  ;;  %v5890_v58 = vpop.eup %5889  ;;  %v12534_v2 = vld [vmem:[#allocation63_spill] sm:$0xff] }
 0x18e   :  { %1026 = vrot.lane.b32.xlu1 %v6850_v49, %s6316_s16  ;;  %1020 = vrot.lane.b32.xlu2 %v6940_v7, %s6316_s16  ;;  %v3334_v49 = vmul.f32 %v3326_v15, %v7387_v57  ;;  %v3383_v15 = vmul.f32 1.442695, %v3369_v34 }
 0x18f   :  { %v538_v30 = vpop.permute.xlu1 %537  ;;  %v7588_v63 = vpop.permute.xlu0 %833 }
 0x190   :  { %v544_v42 = vsel %vm541_vm2, %v7441_v31, %v538_v30  ;;  %v548_v18 = vsel %vm541_vm2, %v538_v30, %v7441_v31  ;;  %575 = vperm.xlu0 %5831, %v7509_v26   ;;  %v3392_v31 = vmul.f32 %v5888_v17, %v3352_v44  ;;  %v3342_v47 = vadd.f32 0.2548296, %v3334_v49  ;;  %v889_v32 = vpop.permute.xlu2 %888  ;;  %v12533_v30 = vld [vmem:[#allocation3_spill] sm:$0xff]  ;;  %v12535_v49 = vld [vmem:[#allocation5_spill] sm:$0xff] }
 0x191   :  { %v3337_v26 = vmul.f32 %v3329_v55, %v7454_v3  ;;  %v555_v46 = vsel %vm7456_vm8, %v544_v42, 0.0  ;;  %v904_v60 = vsel %vm12384_vm4, %v889_v32, %v7381_v33  ;;  %v908_v0 = vsel %vm12384_vm4, %v7381_v33, %v889_v32  ;;  %v12532_v33 = vld [vmem:[#allocation41_spill] sm:$0xff] }
 0x192   :  { %v913_v11 = vsel %vm7443_vm6, %v904_v60, 0.0  ;;  %v914_v51 = vsel %vm7611_vm15, %v908_v0, 0.0  ;;  %v3400_v56 = vsub.f32 1.0, %v3392_v31  ;;  %v554_v38 = vsel %vm7470_vm10, %v548_v18, 0.0 }
 0x193   :  { %v937_v9 = vmul.f32 %v12532_v33, %v913_v11  ;;  %v938_v27 = vmul.f32 %v12532_v33, %v914_v51  ;;  %v3345_v37 = vadd.f32 0.2548296, %v3337_v26  ;;  %v583_v50 = vmul.f32 %v12533_v30, %v555_v46  ;;  %v12537_v11 = vld [vmem:[#allocation43_spill] sm:$0xff] }
 0x194   :  { %v3431_v17 = vadd.f32 1.0, %v3423_v1  ;;  %5891 = vpow2.f32 %v3383_v15  ;;  %v582_v34 = vmul.f32 %v12533_v30, %v554_v38  ;;  %v3316_v31 = vmul.f32 %v3308_v62, %v7399_v28  ;;  %v12538_v38 = vld [vmem:[#allocation31_spill] sm:$0xff] }
 0x195   :  { %v7650_v42 = vadd.f32 %v937_v9, %v880_v29  ;;  %v7652_v18 = vadd.f32 %v938_v27, %v881_v61  ;;  %v3416_v26 = vsub.f32 0.0, %v3400_v56  ;;  %v3172_v32 = vand.u32 2147483647, %v7299_v59  ;;  %v12536_v29 = vld [vmem:[#allocation22_spill] sm:$0xff] }
 0x196   :  { %1016 = vrot.lane.b32.xlu1 %v12530_v14, %s6316_s16  ;;  %920 = vperm.xlu2 %5821, %v7431_v23   ;;  %v3350_v46 = vmul.f32 %v3342_v47, %v7387_v57  ;;  %v3127_v60 = vmul.f32 0.5, %v12536_v29  ;;  %v3397_v15 = vsub.f32 1.0, %v7601_v52  ;;  %v3353_v1 = vmul.f32 %v3345_v37, %v7454_v3  ;;  %v6220_v57 = vld [vmem:[%s12251_s3 + $0x8] sm:$0xff] }
 0x197   :  { %v607_v44 = vpop.permute.xlu1 %606  ;;  %v7636_v39 = vpop.permute.xlu0 %890  ;;  %v3356_v62 = vsub.f32 0.0, %v12537_v11  ;;  %v12539_v47 = vmov 7   ;;  %v3324_v3 = vadd.f32 -0.28449672, %v3316_v31  ;;  %vm7677_vm1 = vcmp.eq.f32.partialorder %v3172_v32, 8.507059e+37  ;;  %v12545_v31 = vld [vmem:[#allocation16_spill] sm:$0xff] }
 0x198   :  { %v613_v35 = vsel %vm12326_vm11, %v12534_v2, %v607_v44  ;;  %v617_v23 = vsel %vm12326_vm11, %v607_v44, %v12534_v2  ;;  %3457 = vrot.lane.b32.xlu0 %v7623_v12, %s6310_s11  ;;  %v672_v0 = vpop.permute.xlu2 %671  ;;  %v7666_v51 = vmul.f32 %v3431_v17, %v3127_v60  ;;  %v3167_v44 = vadd.f32 %v7341_v21, %v3166_v22 }
 0x199   :  { %v623_v41 = vsel %vm12325_vm7, %v617_v23, 0.0  ;;  %v648_v55 = vmul.f32 %v12535_v49, %v613_v35  ;;  %vm3408_vm7 = vcmp.lt.f32.partialorder %v12538_v38, 0.0  ;;  %vm3169_vm11 = vweird.f32 %v7341_v21 }
 0x19a   :  { %v647_v40 = vmul.f32 %v12535_v49, %v623_v41  ;;  %v3424_v52 = vsel %vm3408_vm7, %v3416_v26, %v3400_v56  ;;  %v5892_v37 = vpop.eup %5891  ;;  %v3390_v2 = vmul.f32 %v5890_v58, %v3350_v46  ;;  %v3413_v56 = vsub.f32 0.0, %v3397_v15  ;;  %vm7695_vm7 = vmor %vm3168_vm3, %vm3169_vm11  ;;  %v12591_v49 = vld [vmem:[#allocation33_spill] sm:$0xff] }
 0x19b   :  { %v656_v10 = vadd.f32 %v648_v55, %v583_v50  ;;  %v3393_v41 = vmul.f32 %v5892_v37, %v3353_v1  ;;  %v3432_v22 = vadd.f32 1.0, %v3424_v52  ;;  %v3171_v46 = vsel %vm7695_vm7, %v7341_v21, %v3167_v44  ;;  %v12547_v1 = vld [vmem:[#allocation29_spill] sm:$0xff] }
 0x19c   :  { %v655_v61 = vadd.f32 %v647_v40, %v582_v34  ;;  %v3364_v40 = vmul.f32 %v3356_v62, %v12537_v11  ;;  %v3175_v29 = vor.u32 1.1754944e-38, %v3174_v20  ;;  %v3332_v60 = vmul.f32 %v3324_v3, %v7399_v28  ;;  %v40_v11 = vld [vmem:[%s12253_s4 + $0x10] sm:$0xff] }
 0x19d   :  { %v3398_v59 = vsub.f32 1.0, %v3390_v2  ;;  %v3128_v38 = vmul.f32 0.5, %v12547_v1  ;;  %v12552_v1 = vld [vmem:[#allocation37_spill] sm:$0xff] }
 0x19e   :  { %1054 = vperm.xlu1 %5825, %v6220_v57   ;;  %5826 = vset.pattern.permute.xlu2 %v12539_v47  ;;  %v3373_v44 = vmul.f32 1.442695, %v3364_v40  ;;  %v3340_v37 = vadd.f32 0.2548296, %v3332_v60  ;;  %v12550_v40 = vld [vmem:[#allocation60_spill] sm:$0xff] }
 0x19f   :  { %v664_v9 = vpop.permute.xlu1 %663  ;;  %989 = vperm.xlu2 %5826, %v6220_v57   ;;  %v7675_v27 = vpop.permute.xlu0 %963  ;;  %v7717_v3 = vmul.f32 %v3432_v22, %v3128_v38 }
 0x1a0   :  { %v678_v35 = vsel %vm12328_vm5, %v664_v9, %v672_v0  ;;  %v682_v23 = vsel %vm12328_vm5, %v672_v0, %v664_v9  ;;  %3447 = vrot.lane.b32.xlu0 %v7666_v51, %s6310_s11  ;;  %v12546_v0 = vld [vmem:[#allocation25_spill] sm:$0xff]  ;;  %v729_v62 = vpop.permute.xlu2 %728  ;;  %v3401_v9 = vsub.f32 1.0, %v3393_v41  ;;  %5893 = vpow2.f32 %v3373_v44 }
 0x1a1   :  { %v688_v17 = vsel %vm7489_vm13, %v682_v23, 0.0  ;;  %v689_v34 = vsel %vm7478_vm12, %v678_v35, 0.0  ;;  %vm3405_vm5 = vcmp.lt.f32.partialorder %v12546_v0, 0.0  ;;  %v743_v21 = vsel %vm12387_vm14, %v729_v62, %v7553_v5  ;;  %v12548_v35 = vld [vmem:[#allocation17_spill] sm:$0xff] }
 0x1a2   :  { %v712_v26 = vmul.f32 %v12545_v31, %v688_v17  ;;  %v713_v32 = vmul.f32 %v12545_v31, %v689_v34  ;;  %v3421_v52 = vsel %vm3405_vm5, %v3413_v56, %v3397_v15  ;;  %v747_v20 = vsel %vm12387_vm14, %v7553_v5, %v729_v62  ;;  %v12554_v62 = vld [vmem:[#allocation28_spill] sm:$0xff]  ;;  %v12590_v31 = vld [vmem:[#allocation38_spill] sm:$0xff] }
 0x1a3   :  { %v7726_v15 = vsel %vm7677_vm1, %v3175_v29, %v3171_v46  ;;  %v12549_v56 = vmov 8   ;;  %v3429_v17 = vadd.f32 1.0, %v3421_v52  ;;  %v3414_v34 = vsub.f32 0.0, %v3398_v59  ;;  %v12551_v46 = vld [vmem:[#allocation23_spill] sm:$0xff] }
 0x1a4   :  { %v720_v57 = vadd.f32 %v712_v26, %v655_v61  ;;  %v721_v47 = vadd.f32 %v713_v32, %v656_v10  ;;  %v753_v10 = vsel %vm7443_vm6, %v747_v20, 0.0  ;;  %v754_v61 = vsel %vm7456_vm8, %v743_v21, 0.0  ;;  %v12555_v20 = vld [vmem:[#allocation12_spill] sm:$0xff] }
 0x1a5   :  { %v777_v5 = vmul.f32 %v12548_v35, %v753_v10  ;;  %v778_v23 = vmul.f32 %v12548_v35, %v754_v61  ;;  %v3417_v22 = vsub.f32 0.0, %v3401_v9  ;;  %v3125_v29 = vmul.f32 0.5, %v12551_v46 }
 0x1a6   :  { %5832 = vset.pattern.permute.xlu1 %v12526_v6  ;;  %v3283_v60 = vmul.f32 1.0614054, %v7726_v15  ;;  %v3348_v0 = vmul.f32 %v3340_v37, %v7399_v28  ;;  %vm3406_vm5 = vcmp.lt.f32.partialorder %v12552_v1, 0.0  ;;  %v809_v52 = vmul.f32 %v12554_v62, %v6940_v7 }
 0x1a7   :  { %1093 = vperm.xlu1 %5832, %v40_v11   ;;  %v899_v2 = vpop.permute.xlu1 %898  ;;  %5827 = vset.pattern.permute.xlu2 %v12549_v56  ;;  %v7731_v41 = vpop.permute.xlu0 %673  ;;  %v785_v26 = vadd.f32 %v777_v5, %v720_v57  ;;  %v786_v32 = vadd.f32 %v778_v23, %v721_v47  ;;  %v7746_v38 = vmul.f32 %v3429_v17, %v3125_v29  ;;  %v12553_v11 = vld [vmem:[#allocation45_spill] sm:$0xff]  ;;  %v38_v57 = vld [vmem:[%s12253_s4] sm:$0xff]  ;;  %v12556_v23 = vld [vmem:[#allocation32_spill] sm:$0xff]  ;;  %vm12367_vm1 = vcmp.lt.s32.totalorder %v7365_v19, 112 }
 0x1a8   :  { %v905_v58 = vsel %vm12384_vm4, %v7636_v39, %v899_v2  ;;  %v909_v50 = vsel %vm12384_vm4, %v899_v2, %v7636_v39  ;;  %3503 = vrot.lane.b32.xlu0 %v7717_v3, %s6311_s12  ;;  %1058 = vperm.xlu2 %5827, %v12550_v40   ;;  %v3422_v39 = vsel %vm3406_vm5, %v3414_v34, %v3398_v59  ;;  %vm3409_vm11 = vcmp.lt.f32.partialorder %v12553_v11, 0.0  ;;  %v826_v47 = vpop.permute.xlu2 %825  ;;  %v12558_v11 = vld [vmem:[#allocation42_spill] sm:$0xff] }
 0x1a9   :  { %v3425_v21 = vsel %vm3409_vm11, %v3417_v22, %v3401_v9  ;;  %v810_v28 = vmul.f32 %v12554_v62, %v12555_v20  ;;  %v840_v44 = vsel %vm12385_vm0, %v826_v47, %v7588_v63  ;;  %v844_v59 = vsel %vm12385_vm0, %v7588_v63, %v826_v47  ;;  %v12588_v62 = vld [vmem:[#allocation53_spill] sm:$0xff] }
 0x1aa   :  { %v915_v7 = vsel %vm7443_vm6, %v905_v58, 0.0  ;;  %v916_v10 = vsel %vm7611_vm15, %v909_v50, 0.0  ;;  %v850_v9 = vsel %vm7460_vm9, %v840_v44, 0.0  ;;  %v851_v61 = vsel %vm7478_vm12, %v844_v59, 0.0  ;;  %v5894_v58 = vpop.eup %5893  ;;  %v12557_v50 = vld [vmem:[#allocation40_spill] sm:$0xff] }
 0x1ab   :  { %v817_v2 = vadd.f32 %v809_v52, %v785_v26  ;;  %v818_v5 = vadd.f32 %v810_v28, %v786_v32  ;;  %v874_v56 = vmul.f32 %v12556_v23, %v850_v9  ;;  %v875_v63 = vmul.f32 %v12556_v23, %v851_v61  ;;  %v12587_v23 = vld [vmem:[#allocation54_spill] sm:$0xff] }
 0x1ac   :  { %v3433_v34 = vadd.f32 1.0, %v3425_v21  ;;  %v939_v40 = vmul.f32 %v12557_v50, %v915_v7  ;;  %v940_v22 = vmul.f32 %v12557_v50, %v916_v10  ;;  %v3291_v32 = vadd.f32 -1.4531521, %v3283_v60  ;;  %v12559_v21 = vld [vmem:[#allocation35_spill] sm:$0xff] }
 0x1ad   :  { %v882_v46 = vadd.f32 %v874_v56, %v817_v2  ;;  %v883_v26 = vadd.f32 %v875_v63, %v818_v5  ;;  %v3430_v29 = vadd.f32 1.0, %v3422_v39  ;;  %v3388_v1 = vmul.f32 %v5894_v58, %v3348_v0  ;;  %v41_v0 = vld [vmem:[%s12253_s4 + $0x18] sm:$0xff]  ;;  %v39_v63 = vld [vmem:[%s12253_s4 + $0x8] sm:$0xff] }
 0x1ae   :  { %v3129_v52 = vmul.f32 0.5, %v12558_v11  ;;  %v3126_v20 = vmul.f32 0.5, %v12559_v21  ;;  %v3299_v39 = vmul.f32 %v3291_v32, %v7726_v15  ;;  %v12562_v58 = vld [vmem:[#allocation39_spill] sm:$0xff]  ;;  %v12565_v21 = vld [vmem:[#allocation36_spill] sm:$0xff]  ;;  %vm12574_vm5 = vcmp.lt.s32.totalorder %v7395_v4, 240 }
 0x1af   :  { %1083 = vperm.xlu1 %5832, %v38_v57   ;;  %v532_v37 = vpop.permute.xlu1 %531  ;;  %v731_v17 = vpop.permute.xlu0 %730  ;;  %v7781_v57 = vadd.f32 %v939_v40, %v882_v46  ;;  %v7783_v47 = vadd.f32 %v940_v22, %v883_v26  ;;  %v3396_v7 = vsub.f32 1.0, %v3388_v1  ;;  %vm3404_vm3 = vcmp.lt.f32.partialorder %v12562_v58, 0.0  ;;  %v12563_v40 = vld [vmem:[#allocation52_spill] sm:$0xff] }
 0x1b0   :  { %3445 = vrot.lane.b32.xlu0 %v7746_v38, %s6310_s11  ;;  %1024 = vrot.lane.b32.xlu2 %v6826_v53, %s6316_s16  ;;  %v956_v28 = vpop.permute.xlu2 %955  ;;  %v7786_v44 = vmul.f32 %v3433_v34, %v3129_v52  ;;  %v7802_v59 = vmul.f32 %v3430_v29, %v3126_v20  ;;  %v3355_v22 = vsub.f32 0.0, %v12563_v40  ;;  %v3124_v20 = vmul.f32 0.5, %v12565_v21 }
 0x1b1   :  { %5829 = vset.pattern.permute.xlu2 %v12526_v6  ;;  %v7791_v6 = vsel %vm12367_vm1, %v956_v28, %v7675_v27  ;;  %v7796_v60 = vsel %vm12367_vm1, %v7675_v27, %v956_v28  ;;  %v3307_v27 = vadd.f32 1.4214138, %v3299_v39  ;;  %v3412_v61 = vsub.f32 0.0, %v3396_v7 }
 0x1b2   :  { %12560 = vst [vmem:[#allocation2_spill] sm:$0xff] %v7786_v44  ;;  %v3363_v52 = vmul.f32 %v3355_v22, %v12563_v40  ;;  %vm12582_vm11 = vcmp.lt.s32.totalorder %v7365_v19, 15  ;;  %v741_v16 = vsel %vm12387_vm14, %v12588_v62, %v12587_v23  ;;  %v745_v35 = vsel %vm12387_vm14, %v12587_v23, %v12588_v62  ;;  %v12594_v23 = vld [vmem:[#allocation20_spill] sm:$0xff] }
 0x1b3   :  { %12561 = vst [vmem:[#allocation61_spill] sm:$0xff] %v7802_v59  ;;  %v3315_v34 = vmul.f32 %v3307_v27, %v7726_v15  ;;  %v3420_v46 = vsel %vm3404_vm3, %v3412_v61, %v3396_v7  ;;  %vm12583_vm3 = vmmov %vm12582_vm11 }
 0x1b4   :  { %v3428_v11 = vadd.f32 1.0, %v3420_v46  ;;  %v3371_v7 = vmul.f32 1.442695, %v3363_v52 }
 0x1b5   :  { %v3323_v1 = vadd.f32 -0.28449672, %v3315_v34 }
 0x1b6   :  { %v7845_v39 = vmul.f32 %v3428_v11, %v3124_v20  ;;  %5895 = vpow2.f32 %v3371_v7  ;;  %v12572_v20 = vld [vmem:[#allocation50_spill] sm:$0xff] }
 0x1b7   :  { %3497 = vrot.lane.b32.xlu1 %v7786_v44, %s6311_s12  ;;  %v7806_v10 = vpop.permute.xlu1 %600  ;;  %v7808_v9 = vpop.permute.xlu0 %827  ;;  %vm3403_vm7 = vcmp.lt.f32.partialorder %v12572_v20, 0.0  ;;  %v981_v20 = vsel %vm12574_vm5, %v7796_v60, 0.0 }
 0x1b8   :  { %3501 = vrot.lane.b32.xlu0 %v7802_v59, %s6311_s12  ;;  %1098 = vperm.xlu2 %5829, %v41_v0   ;;  %v540_v2 = vpop.permute.xlu2 %539  ;;  %v3331_v0 = vmul.f32 %v3323_v1, %v7726_v15 }
 0x1b9   :  { %v7814_v5 = vsel %vm541_vm2, %v532_v37, %v540_v2  ;;  %v7818_v56 = vsel %vm541_vm2, %v540_v2, %v532_v37 }
 0x1ba   :  { %v3339_v2 = vadd.f32 0.2548296, %v3331_v0 }
 0x1bc   :  { %v3347_v34 = vmul.f32 %v3339_v2, %v7726_v15  ;;  %v5896_v22 = vpop.eup %5895 }
 0x1be   :  { %v3387_v46 = vmul.f32 %v5896_v22, %v3347_v34  ;;  %v12573_v22 = vld [vmem:[#allocation48_spill] sm:$0xff] }
 0x1bf   :  { %3455 = vrot.lane.b32.xlu1 %v7717_v3, %s6310_s11  ;;  %v739_v26 = vpop.permute.xlu1 %738  ;;  %v7828_v32 = vpop.permute.xlu0 %957 }
 0x1c0   :  { %12564 = vst [vmem:[#allocation63_spill] sm:$0xff] %v7828_v32  ;;  %v7832_v37 = vsel %vm12387_vm14, %v731_v17, %v739_v26  ;;  %v7836_v29 = vsel %vm12387_vm14, %v739_v26, %v731_v17  ;;  %3593 = vrot.lane.b32.xlu0 %v7786_v44, %s6312_s13  ;;  %1088 = vperm.xlu2 %5829, %v39_v63   ;;  %v7842_v28 = vpop.permute.xlu2 %608  ;;  %v3395_v1 = vsub.f32 1.0, %v3387_v46  ;;  %v3123_v46 = vmul.f32 0.5, %v12573_v22 }
 0x1c2   :  { %v3411_v52 = vsub.f32 0.0, %v3395_v1 }
 0x1c4   :  { %v3419_v0 = vsel %vm3403_vm7, %v3411_v52, %v3395_v1  ;;  %vm12586_vm7 = vcmp.lt.s32.totalorder %v7365_v19, 16 }
 0x1c5   :  { %v3427_v34 = vadd.f32 1.0, %v3419_v0  ;;  %vm12595_vm5 = vmmov %vm12586_vm7 }
 0x1c7   :  { %3545 = vrot.lane.b32.xlu1 %v7786_v44, %s6309_s10  ;;  %v7849_v17 = vpop.permute.xlu1 %835  ;;  %v7851_v27 = vpop.permute.xlu0 %1030  ;;  %v7900_v45 = vmul.f32 %v3427_v34, %v3123_v46 }
 0x1c8   :  { %12566 = vst [vmem:[#allocation22_spill] sm:$0xff] %v7851_v27  ;;  %v7857_v61 = vsel %vm12385_vm0, %v7849_v17, %v7808_v9  ;;  %3451 = vrot.lane.b32.xlu0 %v7845_v39, %s6310_s11  ;;  %3449 = vrot.lane.b32.xlu2 %v7786_v44, %s6310_s11  ;;  %v7863_v63 = vpop.permute.xlu2 %665  ;;  %v7978_v27 = vmul.f32 %v12594_v23, %v12530_v14 }
 0x1c9   :  { %12567 = vst [vmem:[#allocation43_spill] sm:$0xff] %v7857_v61  ;;  %v12599_v61 = vld [vmem:[#allocation9_spill] sm:$0xff] }
 0x1cf   :  { %3453 = vrot.lane.b32.xlu1 %v7802_v59, %s6310_s11  ;;  %v7868_v58 = vpop.permute.xlu1 %892  ;;  %v7870_v40 = vpop.permute.xlu0 %1028 }
 0x1d0   :  { %12568 = vst [vmem:[#allocation31_spill] sm:$0xff] %v7868_v58  ;;  %3541 = vrot.lane.b32.xlu0 %v7746_v38, %s6309_s10  ;;  %3505 = vrot.lane.b32.xlu2 %v7623_v12, %s6311_s12  ;;  %v7876_v26 = vpop.permute.xlu2 %900 }
 0x1d1   :  { %12569 = vst [vmem:[#allocation62_spill] sm:$0xff] %v7876_v26 }
 0x1d7   :  { %3543 = vrot.lane.b32.xlu1 %v7666_v51, %s6309_s10  ;;  %v7880_v15 = vpop.permute.xlu1 %965  ;;  %v7882_v11 = vpop.permute.xlu0 %951 }
 0x1d8   :  { %12570 = vst [vmem:[#allocation25_spill] sm:$0xff] %v7880_v15  ;;  %3599 = vrot.lane.b32.xlu0 %v7717_v3, %s6312_s13  ;;  %3495 = vrot.lane.b32.xlu2 %v7666_v51, %s6311_s12  ;;  %v7888_v21 = vpop.permute.xlu2 %1022  ;;  %v7982_v15 = vmul.f32 %v12594_v23, %v6826_v53  ;;  %v749_v53 = vsel %vm7443_vm6, %v745_v35, 0.0 }
 0x1d9   :  { %12571 = vst [vmem:[#allocation29_spill] sm:$0xff] %v7888_v21  ;;  %v12593_v21 = vld [vmem:[#allocation55_spill] sm:$0xff]  ;;  %v773_v58 = vmul.f32 %v12599_v61, %v749_v53 }
 0x1df   :  { %3601 = vrot.lane.b32.xlu1 %v7623_v12, %s6312_s13  ;;  %v954_v7 = vpop.permute.xlu1 %953  ;;  %v7893_v2 = vpop.permute.xlu0 %1018 }
 0x1e0   :  { %3589 = vrot.lane.b32.xlu0 %v7746_v38, %s6312_s13  ;;  %3553 = vrot.lane.b32.xlu2 %v7623_v12, %s6309_s10  ;;  %v962_v33 = vpop.permute.xlu2 %961 }
 0x1e1   :  { %v969_v1 = vsel %vm12367_vm1, %v954_v7, %v962_v33  ;;  %v973_v52 = vsel %vm12367_vm1, %v962_v33, %v954_v7 }
 0x1e7   :  { %3491 = vrot.lane.b32.xlu1 %v7900_v45, %s6311_s12  ;;  %v7911_v50 = vpop.permute.xlu1 %993  ;;  %v7913_v0 = vpop.permute.xlu0 %985 }
 0x1e8   :  { %12575 = vst [vmem:[#allocation60_spill] sm:$0xff] %v7911_v50  ;;  %v1004_v34 = vmul.f32 %v7911_v50, %v7791_v6  ;;  %v1005_v22 = vmul.f32 %v7911_v50, %v981_v20  ;;  %3665 = vrot.lane.b32.xlu0 %v7623_v12, %s6313_s14  ;;  %3493 = vrot.lane.b32.xlu2 %v7746_v38, %s6311_s12  ;;  %v7928_v7 = vpop.permute.xlu2 %1020  ;;  %v12581_v20 = vld [vmem:[#allocation47_spill] sm:$0xff]  ;;  %v12585_v50 = vld [vmem:[#allocation44_spill] sm:$0xff] }
 0x1e9   :  { %12576 = vst [vmem:[#allocation23_spill] sm:$0xff] %v7913_v0 }
 0x1ea   :  { %v7923_v33 = vadd.f32 %v1004_v34, %v7781_v57  ;;  %v7926_v60 = vadd.f32 %v1005_v22, %v7783_v47  ;;  %v12580_v57 = vld [vmem:[#allocation49_spill] sm:$0xff]  ;;  %v12584_v22 = vld [vmem:[#allocation51_spill] sm:$0xff] }
 0x1eb   :  { %v680_v47 = vsel %vm12582_vm11, %v12581_v20, %v12580_v57  ;;  %v676_v34 = vsel %vm12583_vm3, %v12580_v57, %v12581_v20  ;;  %v615_v8 = vsel %vm12586_vm7, %v12585_v50, %v12584_v22  ;;  %v542_v57 = vsel %vm541_vm2, %v12591_v49, %v12590_v31  ;;  %vm12602_vm3 = vmmov %vm12595_vm5 }
 0x1ec   :  { %12577 = vst [vmem:[#allocation37_spill] sm:$0xff] %v7923_v33  ;;  %v546_v20 = vsel %vm541_vm2, %v12590_v31, %v12591_v49  ;;  %v684_v30 = vsel %vm7489_vm13, %v680_v47, 0.0  ;;  %v685_v32 = vsel %vm7478_vm12, %v676_v34, 0.0  ;;  %v611_v31 = vsel %vm12595_vm5, %v12584_v22, %v12585_v50  ;;  %v12597_v34 = vld [vmem:[#allocation10_spill] sm:$0xff]  ;;  %vm12607_vm5 = vmmov %vm12602_vm3 }
 0x1ed   :  { %12578 = vst [vmem:[#allocation45_spill] sm:$0xff] %v7926_v60  ;;  %vm12596_vm11 = vcmp.ge.s32.totalorder %v7365_v19, 16  ;;  %v750_v47 = vsel %vm7456_vm8, %v741_v16, 0.0  ;;  %v708_v50 = vmul.f32 %v12597_v34, %v684_v30  ;;  %v709_v16 = vmul.f32 %v12597_v34, %v685_v32 }
 0x1ee   :  { %v619_v14 = vsel %vm12596_vm11, %v615_v8, 0.0  ;;  %v774_v32 = vmul.f32 %v12599_v61, %v750_v47  ;;  %v618_v60 = vsel %vm12602_vm3, %v7842_v28, %v7806_v10  ;;  %vm12605_vm7 = vcmp.lt.s32.totalorder %v7395_v4, 240 }
 0x1ef   :  { %3549 = vrot.lane.b32.xlu1 %v7802_v59, %s6309_s10  ;;  %vm12608_vm3 = vcmp.lt.s32.totalorder %v7365_v19, 15 }
 0x1f0   :  { %v7932_v6 = vpop.permute.xlu1 %1062  ;;  %3655 = vrot.lane.b32.xlu0 %v7666_v51, %s6313_s14  ;;  %3551 = vrot.lane.b32.xlu2 %v7717_v3, %s6309_s10  ;;  %v7960_v43 = vpop.permute.xlu2 %920 }
 0x1f1   :  { %12579 = vst [vmem:[#allocation12_spill] sm:$0xff] %v7932_v6  ;;  %v7938_v46 = vpop.permute.xlu0 %1050  ;;  %v12592_v6 = vld [vmem:[#allocation56_spill] sm:$0xff] }
 0x1f2   :  { %12589 = vst [vmem:[#allocation42_spill] sm:$0xff] %v7960_v43  ;;  %v838_v62 = vsel %vm12385_vm0, %v12593_v21, %v12592_v6  ;;  %v842_v49 = vsel %vm12385_vm0, %v12592_v6, %v12593_v21  ;;  %v550_v21 = vsel %vm7470_vm10, %v546_v20, 0.0  ;;  %v551_v6 = vsel %vm7456_vm8, %v542_v57, 0.0  ;;  %v12598_v20 = vld [vmem:[#allocation13_spill] sm:$0xff] }
 0x1f3   :  { %v846_v8 = vsel %vm7460_vm9, %v838_v62, 0.0  ;;  %v847_v35 = vsel %vm7478_vm12, %v842_v49, 0.0  ;;  %v643_v62 = vmul.f32 %v12598_v20, %v619_v14  ;;  %v644_v23 = vmul.f32 %v12598_v20, %v611_v31  ;;  %v12601_v49 = vld [vmem:[#allocation18_spill] sm:$0xff]  ;;  %v12603_v31 = vld [vmem:[#allocation57_spill] sm:$0xff] }
 0x1f4   :  { %v870_v26 = vmul.f32 %v12601_v49, %v846_v8  ;;  %v871_v14 = vmul.f32 %v12601_v49, %v847_v35  ;;  %v979_v8 = vsel %vm12605_vm7, %v973_v52, 0.0  ;;  %v614_v20 = vsel %vm12607_vm5, %v7806_v10, %v7842_v28  ;;  %vm12609_vm7 = vmmov %vm12608_vm3 }
 0x1f5   :  { %v679_v52 = vsel %vm12608_vm3, %v7863_v63, %v7731_v41  ;;  %vm12380_vm5 = vcmp.lt.s32.totalorder %v7365_v19, 111 }
 0x1f7   :  { %3539 = vrot.lane.b32.xlu1 %v7900_v45, %s6309_s10 }
 0x1f8   :  { %v960_v22 = vpop.permute.xlu1 %959  ;;  %3713 = vrot.lane.b32.xlu0 %v7623_v12, %s6314_s2  ;;  %3443 = vrot.lane.b32.xlu2 %v7900_v45, %s6310_s11 }
 0x1f9   :  { %v8019_v57 = vsel %vm12367_vm1, %v7882_v11, %v960_v22  ;;  %v972_v30 = vsel %vm12367_vm1, %v960_v22, %v7882_v11  ;;  %v12604_v22 = vld [vmem:[#allocation58_spill] sm:$0xff]  ;;  %v8048_v61 = vpop.permute.xlu2 %989 }
 0x1fa   :  { %v8028_v34 = vpop.permute.xlu0 %560  ;;  %v903_v53 = vsel %vm12384_vm4, %v12604_v22, %v12603_v31  ;;  %v907_v47 = vsel %vm12384_vm4, %v12603_v31, %v12604_v22  ;;  %12606 = vst [vmem:[#allocation39_spill] sm:$0xff] %v8048_v61  ;;  %v691_v31 = vsel %vm7478_vm12, %v679_v52, 0.0 }
 0x1fb   :  { %12600 = vst [vmem:[#allocation35_spill] sm:$0xff] %v8028_v34  ;;  %v578_v33 = vmul.f32 %v8028_v34, %v550_v21  ;;  %v579_v11 = vmul.f32 %v8028_v34, %v551_v6  ;;  %v1002_v21 = vmul.f32 %v8048_v61, %v969_v1  ;;  %v1003_v6 = vmul.f32 %v8048_v61, %v979_v8 }
 0x1fc   :  { %v625_v34 = vsel %vm12596_vm11, %v618_v60, 0.0  ;;  %v683_v1 = vsel %vm12609_vm7, %v7731_v41, %v7863_v63  ;;  %v556_v41 = vsel %vm7470_vm10, %v7818_v56, 0.0  ;;  %vm12614_vm11 = vcmp.lt.s32.totalorder %v7395_v4, 240 }
 0x1fd   :  { %v651_v35 = vadd.f32 %v643_v62, %v578_v33  ;;  %v652_v49 = vadd.f32 %v644_v23, %v579_v11  ;;  %v8069_v33 = vadd.f32 %v1002_v21, %v7650_v42  ;;  %v8072_v10 = vadd.f32 %v1003_v6, %v7652_v18  ;;  %v12612_v6 = vld [vmem:[#allocation14_spill] sm:$0xff]  ;;  %vm12615_vm3 = vmmov %vm12614_vm11 }
 0x1fe   :  { %v911_v23 = vsel %vm7443_vm6, %v903_v53, 0.0  ;;  %v755_v62 = vsel %vm7443_vm6, %v7836_v29, 0.0  ;;  %v690_v18 = vsel %vm7489_vm13, %v683_v1, 0.0  ;;  %v715_v1 = vmul.f32 %v12612_v6, %v691_v31  ;;  %vm8144_vm7 = vmand %vm12615_vm3, %vm7478_vm12 }
 0x1ff   :  { %3597 = vrot.lane.b32.xlu1 %v7802_v59, %s6312_s13  ;;  %v716_v28 = vadd.f32 %v708_v50, %v651_v35  ;;  %v717_v60 = vadd.f32 %v709_v16, %v652_v49  ;;  %v557_v50 = vsel %vm7456_vm8, %v7814_v5, 0.0  ;;  %v12610_v16 = vld [vmem:[#allocation8_spill] sm:$0xff]  ;;  %v912_v5 = vsel %vm7611_vm15, %v907_v47, 0.0 }
 0x200   :  { %v8083_v42 = vpop.permute.xlu1 %1026  ;;  %3703 = vrot.lane.b32.xlu0 %v7666_v51, %s6314_s2  ;;  %3499 = vrot.lane.b32.xlu2 %v7845_v39, %s6311_s12  ;;  %v649_v49 = vmul.f32 %v12610_v16, %v625_v34  ;;  %v650_v11 = vmul.f32 %v12610_v16, %v614_v20  ;;  %v756_v34 = vsel %vm7456_vm8, %v7832_v37, 0.0  ;;  %v12611_v20 = vld [vmem:[#allocation11_spill] sm:$0xff]  ;;  %v714_v35 = vmul.f32 %v12612_v6, %v690_v18 }
 0x201   :  { %v8095_v29 = vsel %vm12380_vm5, %v8083_v42, %v7893_v2  ;;  %v781_v56 = vadd.f32 %v773_v58, %v716_v28  ;;  %v782_v63 = vadd.f32 %v774_v32, %v717_v60  ;;  %v779_v21 = vmul.f32 %v12611_v20, %v755_v62 }
 0x202   :  { %v8104_v22 = vpop.permute.xlu0 %575  ;;  %v8117_v52 = vpop.permute.xlu2 %1058  ;;  %v935_v60 = vmul.f32 %v7960_v43, %v911_v23  ;;  %v936_v47 = vmul.f32 %v7960_v43, %v912_v5  ;;  %v780_v37 = vmul.f32 %v12611_v20, %v756_v34  ;;  %v1000_v62 = vmul.f32 %v7913_v0, %v8019_v57 }
 0x203   :  { %v584_v53 = vmul.f32 %v8104_v22, %v556_v41  ;;  %v585_v8 = vmul.f32 %v8104_v22, %v557_v50  ;;  %v814_v58 = vadd.f32 %v7982_v15, %v782_v63  ;;  %v813_v32 = vadd.f32 %v7978_v27, %v781_v56  ;;  %12613 = vst [vmem:[#allocation52_spill] sm:$0xff] %v8117_v52 }
 0x204   :  { %v977_v15 = vsel %vm12614_vm11, %v972_v30, 0.0  ;;  %v1035_v34 = vsel %vm12380_vm5, %v7928_v7, %v7870_v40  ;;  %vm12634_vm11 = vmmov %vm12615_vm3  ;;  %vm12640_vm3 = vcmp.lt.s32.totalorder %v7365_v19, 16 }
 0x205   :  { %v657_v28 = vadd.f32 %v649_v49, %v584_v53  ;;  %v658_v27 = vadd.f32 %v650_v11, %v585_v8  ;;  %v879_v41 = vadd.f32 %v871_v14, %v814_v58  ;;  %v878_v56 = vadd.f32 %v870_v26, %v813_v32 }
 0x206   :  { %v1001_v30 = vmul.f32 %v7913_v0, %v977_v15  ;;  %v12616_v53 = vmov 0 }
 0x207   :  { %3587 = vrot.lane.b32.xlu1 %v7900_v45, %s6312_s13  ;;  %v722_v18 = vadd.f32 %v714_v35, %v657_v28  ;;  %v723_v63 = vadd.f32 %v715_v1, %v658_v27  ;;  %v944_v26 = vadd.f32 %v936_v47, %v879_v41  ;;  %v943_v14 = vadd.f32 %v935_v60, %v878_v56  ;;  %v12623_v41 = vld [vmem:[#allocation37_spill] sm:$0xff] }
 0x208   :  { %v8130_v50 = vpop.permute.xlu1 %1016  ;;  %3761 = vrot.lane.b32.xlu0 %v7623_v12, %s6315_s15  ;;  %3591 = vrot.lane.b32.xlu2 %v7666_v51, %s6312_s13  ;;  %v12617_v53 = vsel %vm8144_vm7, 4294967295, %v12616_v53  ;;  %v1045_v1 = vsel %vm7460_vm9, %v1035_v34, 0.0 }
 0x209   :  { %v787_v23 = vadd.f32 %v779_v21, %v722_v18  ;;  %v788_v49 = vadd.f32 %v780_v37, %v723_v63  ;;  %v1009_v57 = vadd.f32 %v1001_v30, %v944_v26  ;;  %v8136_v11 = vadd.f32 %v1000_v62, %v943_v14  ;;  %12618 = vst [vmem:[#allocation36_spill] sm:$0xff] %v12617_v53  ;;  %v12624_v37 = vld [vmem:[#allocation45_spill] sm:$0xff]  ;;  %v12625_v18 = vld [vmem:[#allocation30_spill] sm:$0xff]  ;;  %v12627_v63 = vld [vmem:[#allocation24_spill] sm:$0xff] }
 0x20a   :  { %v8138_v31 = vpop.permute.xlu2 %1024  ;;  %v1039_v21 = vsel %vm12380_vm5, %v7870_v40, %v7928_v7  ;;  %v1069_v27 = vmul.f32 %v8117_v52, %v1045_v1  ;;  %v841_v40 = vsel %vm12385_vm0, %v7808_v9, %v7849_v17  ;;  %v1034_v7 = vsel %vm12380_vm5, %v7893_v2, %v8083_v42  ;;  %v12626_v9 = vld [vmem:[#allocation26_spill] sm:$0xff]  ;;  %v3458_v2 = vpop.permute.xlu0 %3457  ;;  %v12629_v14 = vld [vmem:[#allocation31_spill] sm:$0xff]  ;;  %v12632_v1 = vld [vmem:[#allocation25_spill] sm:$0xff] }
 0x20b   :  { %v1037_v8 = vsel %vm12380_vm5, %v8138_v31, %v8130_v50  ;;  %v1046_v15 = vsel %vm8144_vm7, %v1039_v21, 0.0  ;;  %v811_v17 = vmul.f32 %v12626_v9, %v12625_v18  ;;  %v812_v30 = vmul.f32 %v12626_v9, %v12627_v63  ;;  %v12628_v26 = vld [vmem:[#allocation62_spill] sm:$0xff]  ;;  %v12631_v21 = vld [vmem:[#allocation63_spill] sm:$0xff] }
 0x20c   :  { %v1042_v58 = vsel %vm8144_vm7, %v1037_v8, 0.0  ;;  %v1070_v60 = vmul.f32 %v8117_v52, %v1046_v15  ;;  %v1077_v56 = vadd.f32 %v1069_v27, %v12623_v41  ;;  %v852_v42 = vsel %vm7460_vm9, %v841_v40, 0.0 }
 0x20d   :  { %v1066_v32 = vmul.f32 %v7938_v46, %v1042_v58  ;;  %v910_v8 = vsel %vm12384_vm4, %v12628_v26, %v12629_v14  ;;  %v1043_v58 = vsel %vm7460_vm9, %v1034_v7, 0.0  ;;  %v975_v15 = vsel %vm12367_vm1, %v12632_v1, %v12631_v21 }
 0x20e   :  { %v8199_v62 = vadd.f32 %v1070_v60, %v12624_v37  ;;  %v819_v40 = vadd.f32 %v811_v17, %v787_v23  ;;  %v820_v41 = vadd.f32 %v812_v30, %v788_v49  ;;  %v12633_v37 = vld [vmem:[#allocation21_spill] sm:$0xff]  ;;  %v918_v63 = vsel %vm7611_vm15, %v910_v8, 0.0  ;;  %v12635_v23 = vld [vmem:[#allocation22_spill] sm:$0xff] }
 0x20f   :  { %3663 = vrot.lane.b32.xlu1 %v7717_v3, %s6313_s14  ;;  %v8171_v35 = vadd.f32 %v1066_v32, %v1009_v57  ;;  %v906_v57 = vsel %vm12384_vm4, %v12629_v14, %v12628_v26  ;;  %v12630_v32 = vld [vmem:[#allocation43_spill] sm:$0xff]  ;;  %v876_v18 = vmul.f32 %v12633_v37, %v852_v42  ;;  %v971_v14 = vsel %vm12367_vm1, %v12631_v21, %v12632_v1  ;;  %v12636_v49 = vld [vmem:[#allocation29_spill] sm:$0xff] }
 0x210   :  { %v8157_v5 = vpop.permute.xlu1 %1054  ;;  %3701 = vrot.lane.b32.xlu0 %v7746_v38, %s6314_s2  ;;  %3547 = vrot.lane.b32.xlu2 %v7845_v39, %s6309_s10  ;;  %v853_v34 = vsel %vm7478_vm12, %v12630_v32, 0.0  ;;  %v917_v7 = vsel %vm7443_vm6, %v906_v57, 0.0  ;;  %v1036_v17 = vsel %vm12380_vm5, %v12636_v49, %v12635_v23  ;;  %v1040_v30 = vsel %vm12380_vm5, %v12635_v23, %v12636_v49  ;;  %v12637_v57 = vld [vmem:[#allocation27_spill] sm:$0xff] }
 0x211   :  { %12619 = vst [vmem:[#allocation50_spill] sm:$0xff] %v8157_v5  ;;  %v1067_v27 = vmul.f32 %v8157_v5, %v1043_v58  ;;  %v877_v26 = vmul.f32 %v12633_v37, %v853_v34  ;;  %v983_v58 = vsel %vm12634_vm11, %v975_v15, 0.0  ;;  %v941_v8 = vmul.f32 %v12637_v57, %v917_v7  ;;  %v12638_v15 = vld [vmem:[#allocation46_spill] sm:$0xff]  ;;  %vm12641_vm11 = vmmov %vm12640_vm3 }
 0x212   :  { %12620 = vst [vmem:[#allocation48_spill] sm:$0xff] %v8171_v35  ;;  %v8177_v28 = vpop.permute.xlu2 %1098  ;;  %v942_v32 = vmul.f32 %v12637_v57, %v918_v63  ;;  %v884_v21 = vadd.f32 %v876_v18, %v819_v40  ;;  %v1006_v52 = vmul.f32 %v12638_v15, %v971_v14  ;;  %v1007_v23 = vmul.f32 %v12638_v15, %v983_v58  ;;  %v12639_v63 = vld [vmem:[#allocation12_spill] sm:$0xff]  ;;  %v3448_v18 = vpop.permute.xlu0 %3447 }
 0x213   :  { %12621 = vst [vmem:[#allocation49_spill] sm:$0xff] %v8177_v28  ;;  %v8254_v42 = vadd.f32 %v1067_v27, %v8069_v33  ;;  %v885_v1 = vadd.f32 %v877_v26, %v820_v41  ;;  %v1047_v49 = vsel %vm7460_vm9, %v1036_v17, 0.0  ;;  %v1048_v0 = vsel %vm8144_vm7, %v1040_v30, 0.0 }
 0x214   :  { %v1044_v33 = vsel %vm8144_vm7, %v8095_v29, 0.0  ;;  %v949_v27 = vadd.f32 %v941_v8, %v884_v21  ;;  %v1071_v61 = vmul.f32 %v12639_v63, %v1047_v49  ;;  %v1072_v40 = vmul.f32 %v12639_v63, %v1048_v0  ;;  %v12645_v63 = vld [vmem:[#allocation3_spill] sm:$0xff] }
 0x215   :  { %v950_v7 = vadd.f32 %v942_v32, %v885_v1  ;;  %v1068_v41 = vmul.f32 %v8157_v5, %v1044_v33  ;;  %vm12642_vm1 = vcmp.ge.s32.totalorder %v7365_v19, 16  ;;  %vm12654_vm0 = vcmp.lt.s32.totalorder %v7365_v19, 15 }
 0x216   :  { %v1014_v17 = vadd.f32 %v1006_v52, %v949_v27  ;;  %vm12655_vm14 = vmmov %vm12654_vm0 }
 0x217   :  { %3653 = vrot.lane.b32.xlu1 %v7746_v38, %s6313_s14  ;;  %v1015_v30 = vadd.f32 %v1007_v23, %v950_v7 }
 0x218   :  { %3759 = vrot.lane.b32.xlu0 %v7717_v3, %s6315_s15  ;;  %3657 = vrot.lane.b32.xlu2 %v7786_v44, %s6313_s14  ;;  %v1079_v21 = vadd.f32 %v1071_v61, %v1014_v17 }
 0x219   :  { %v8195_v47 = vpop.permute.xlu1 %1093  ;;  %v1080_v1 = vadd.f32 %v1072_v40, %v1015_v30 }
 0x21a   :  { %12622 = vst [vmem:[#allocation47_spill] sm:$0xff] %v8195_v47  ;;  %v8225_v60 = vpop.permute.xlu2 %1088  ;;  %v8289_v52 = vadd.f32 %v8195_v47, %v1077_v56  ;;  %v8295_v49 = vadd.f32 %v8177_v28, %v1079_v21 }
 0x21c   :  { %v8301_v61 = vmul.f32 0.70710677, %v8289_v52  ;;  %v8304_v33 = vmul.f32 0.70710677, %v8295_v49 }
 0x21f   :  { %3711 = vrot.lane.b32.xlu1 %v7717_v3, %s6314_s2 }
 0x220   :  { %3699 = vrot.lane.b32.xlu0 %v7900_v45, %s6314_s2  ;;  %3595 = vrot.lane.b32.xlu2 %v7845_v39, %s6312_s13 }
 0x221   :  { %v8258_v34 = vpop.permute.xlu1 %1083 }
 0x222   :  { %v3450_v26 = vpop.permute.xlu2 %3449 }
 0x223   :  { %v3462_v14 = vsel %vm541_vm2, %v3450_v26, %v3458_v2  ;;  %v3466_v58 = vsel %vm541_vm2, %v3458_v2, %v3450_v26  ;;  %v8292_v2 = vadd.f32 %v1068_v41, %v8072_v10  ;;  %v8310_v10 = vand.u32 2147483647, %v8301_v61  ;;  %v3504_v26 = vpop.permute.xlu0 %3503 }
 0x224   :  { %v3473_v29 = vsel %vm7470_vm10, %v3466_v58, 0.0  ;;  %v3474_v8 = vsel %vm7456_vm8, %v3462_v14, 0.0  ;;  %v1131_v41 = vand.u32 2147483647, %v8304_v33 }
 0x225   :  { %v3481_v0 = vmul.f32 %v3473_v29, %v8104_v22  ;;  %v3482_v32 = vmul.f32 %v3474_v8, %v8104_v22  ;;  %v8298_v22 = vadd.f32 %v8177_v28, %v1080_v1  ;;  %v8326_v8 = vadd.f32 %v8195_v47, %v8199_v62 }
 0x226   :  { %v1139_v29 = vmul.f32 0.3275911, %v1131_v41  ;;  %v1347_v1 = vsub.f32 0.0, %v1131_v41 }
 0x227   :  { %3651 = vrot.lane.b32.xlu1 %v7900_v45, %s6313_s14  ;;  %v8307_v27 = vmul.f32 0.70710677, %v8298_v22  ;;  %12643 = vst [vmem:[#allocation51_spill] sm:$0xff] %v8326_v8  ;;  %v8353_v28 = vmul.f32 0.70710677, %v8326_v8 }
 0x228   :  { %3757 = vrot.lane.b32.xlu0 %v7802_v59, %s6315_s15  ;;  %3705 = vrot.lane.b32.xlu2 %v7786_v44, %s6314_s2 }
 0x229   :  { %v3498_v23 = vpop.permute.xlu1 %3497  ;;  %v1132_v17 = vand.u32 2147483647, %v8307_v27  ;;  %12644 = vst [vmem:[#allocation44_spill] sm:$0xff] %v8353_v28 }
 0x22a   :  { %v3506_v56 = vpop.permute.xlu2 %3505 }
 0x22b   :  { %v3510_v7 = vsel %vm12640_vm3, %v3498_v23, %v3506_v56  ;;  %v3514_v40 = vsel %vm12641_vm11, %v3506_v56, %v3498_v23  ;;  %v1140_v23 = vmul.f32 0.3275911, %v1132_v17  ;;  %v1137_v56 = vmul.f32 0.3275911, %v8310_v10 }
 0x22c   :  { %v3521_v14 = vsel %vm12642_vm1, %v3514_v40, 0.0  ;;  %v3530_v58 = vmul.f32 %v3510_v7, %v12610_v16  ;;  %v1348_v47 = vsub.f32 0.0, %v1132_v17  ;;  %vm12646_vm1 = vmmov %vm12640_vm3  ;;  %vm12648_vm11 = vcmp.ge.s32.totalorder %v7365_v19, 16 }
 0x22d   :  { %v3529_v30 = vmul.f32 %v3521_v14, %v12610_v16  ;;  %v8337_v16 = vadd.f32 1.0, %v1139_v29  ;;  %v8343_v14 = vadd.f32 1.0, %v1140_v23  ;;  %v1355_v29 = vmul.f32 %v1347_v1, %v1131_v41  ;;  %vm12647_vm3 = vmmov %vm12646_vm1 }
 0x22e   :  { %v8328_v21 = vadd.f32 %v3530_v58, %v3482_v32  ;;  %v8350_v5 = vadd.f32 1.0, %v1137_v56 }
 0x22f   :  { %3709 = vrot.lane.b32.xlu1 %v7802_v59, %s6314_s2  ;;  %v8335_v40 = vadd.f32 %v3529_v30, %v3481_v0  ;;  %5897 = vrcp.f32 %v8337_v16  ;;  %v1248_v1 = vand.u32 2147483647, %v8337_v16  ;;  %v1250_v56 = vand.u32 2147483648, %v8337_v16 }
 0x230   :  { %3747 = vrot.lane.b32.xlu0 %v7900_v45, %s6315_s15  ;;  %3661 = vrot.lane.b32.xlu2 %v7802_v59, %s6313_s14  ;;  %5899 = vrcp.f32 %v8343_v14 }
 0x231   :  { %v3456_v7 = vpop.permute.xlu1 %3455  ;;  %5901 = vrcp.f32 %v8350_v5 }
 0x232   :  { %v3461_v62 = vsel %vm541_vm2, %v3448_v18, %v3456_v7  ;;  %v3465_v32 = vsel %vm541_vm2, %v3456_v7, %v3448_v18  ;;  %v3496_v30 = vpop.permute.xlu2 %3495 }
 0x233   :  { %v3472_v58 = vsel %vm7456_vm8, %v3461_v62, 0.0  ;;  %v3471_v0 = vsel %vm7470_vm10, %v3465_v32, 0.0  ;;  %v3509_v23 = vsel %vm12646_vm1, %v3496_v30, %v3504_v26  ;;  %v3513_v7 = vsel %vm12647_vm3, %v3504_v26, %v3496_v30  ;;  %v12649_v32 = vld [vmem:[#allocation5_spill] sm:$0xff] }
 0x234   :  { %v3480_v18 = vmul.f32 %v3472_v58, %v12645_v63  ;;  %v3519_v62 = vsel %vm12648_vm11, %v3513_v7, 0.0  ;;  %v3528_v41 = vmul.f32 %v3509_v23, %v12649_v32  ;;  %v8370_v58 = vsel %vm12380_vm5, %v8130_v50, %v8138_v31  ;;  %v3446_v7 = vpop.permute.xlu0 %3445 }
 0x235   :  { %v3479_v53 = vmul.f32 %v3471_v0, %v12645_v63  ;;  %v3527_v26 = vmul.f32 %v3519_v62, %v12649_v32  ;;  %v1356_v30 = vmul.f32 %v1348_v47, %v1132_v17  ;;  %v1263_v50 = vand.u32 2147483647, %v8343_v14  ;;  %v5898_v63 = vpop.eup %5897 }
 0x236   :  { %v8376_v23 = vadd.f32 %v3528_v41, %v3480_v18  ;;  %v1345_v31 = vsub.f32 0.0, %v8310_v10  ;;  %vm1244_vm1 = vweird.f32 %v8337_v16  ;;  %v1265_v47 = vand.u32 2147483648, %v8343_v14  ;;  %v5900_v43 = vpop.eup %5899 }
 0x237   :  { %3801 = vrot.lane.b32.xlu1 %v7786_v44, %s6316_s16  ;;  %v8385_v15 = vadd.f32 %v3527_v26, %v3479_v53  ;;  %v8390_v17 = vand.u32 2147483647, %v8353_v28  ;;  %v1240_v18 = vmul.f32 %v5898_v63, %v8337_v16  ;;  %vm8393_vm3 = vcmp.eq.f32.partialorder %v1248_v1, 8.507059e+37  ;;  %v5902_v13 = vpop.eup %5901 }
 0x238   :  { %3805 = vrot.lane.b32.xlu0 %v7802_v59, %s6316_s16  ;;  %3753 = vrot.lane.b32.xlu2 %v7786_v44, %s6315_s15  ;;  %v1251_v32 = vor.u32 1.1754944e-38, %v1250_v56  ;;  %v8397_v41 = vmul.f32 1.442695, %v1355_v29  ;;  %vm1245_vm11 = vweird.f32 %v5898_v63  ;;  %v8400_v53 = vmul.f32 1.442695, %v1356_v30 }
 0x239   :  { %v3546_v0 = vpop.permute.xlu1 %3545  ;;  %v1218_v26 = vand.u32 2147483647, %v8350_v5  ;;  %v1241_v37 = vsub.f32 1.0, %v1240_v18  ;;  %v1255_v44 = vmul.f32 %v5900_v43, %v8343_v14  ;;  %vm8404_vm4 = vcmp.eq.f32.partialorder %v1263_v50, 8.507059e+37  ;;  %v58_v18 = vld [vmem:[%s12254_s6] sm:$0xff]  ;;  %vm1246_vm5 = vmor %vm1244_vm1, %vm1245_vm11 }
 0x23a   :  { %v3554_v57 = vpop.permute.xlu2 %3553  ;;  %v1220_v56 = vand.u32 2147483648, %v8350_v5  ;;  %v1353_v29 = vmul.f32 %v1345_v31, %v8310_v10  ;;  %v1266_v4 = vor.u32 1.1754944e-38, %v1265_v47  ;;  %v1138_v50 = vmul.f32 0.3275911, %v8390_v17 }
 0x23b   :  { %v3558_v9 = vsel %vm12654_vm0, %v3546_v0, %v3554_v57  ;;  %v3562_v30 = vsel %vm12655_vm14, %v3554_v57, %v3546_v0  ;;  %v1242_v31 = vmul.f32 %v5898_v63, %v1241_v37  ;;  %v1256_v28 = vsub.f32 1.0, %v1255_v44 }
 0x23c   :  { %v3569_v59 = vsel %vm7489_vm13, %v3562_v30, 0.0  ;;  %v3570_v10 = vsel %vm7478_vm12, %v3558_v9, 0.0  ;;  %v1210_v47 = vmul.f32 %v5902_v13, %v8350_v5  ;;  %vm8428_vm0 = vcmp.eq.f32.partialorder %v1218_v26, 8.507059e+37 }
 0x23d   :  { %v3577_v57 = vmul.f32 %v3569_v59, %v12612_v6  ;;  %v3578_v0 = vmul.f32 %v3570_v10, %v12612_v6  ;;  %v1243_v9 = vadd.f32 %v5898_v63, %v1242_v31  ;;  %v1257_v44 = vmul.f32 %v5900_v43, %v1256_v28 }
 0x23e   :  { %v1221_v37 = vor.u32 1.1754944e-38, %v1220_v56  ;;  %v1365_v30 = vmul.f32 1.442695, %v1353_v29  ;;  %v1211_v26 = vsub.f32 1.0, %v1210_v47  ;;  %vm1215_vm14 = vweird.f32 %v5902_v13 }
 0x23f   :  { %3707 = vrot.lane.b32.xlu1 %v7845_v39, %s6314_s2  ;;  %v8435_v59 = vadd.f32 %v3577_v57, %v8335_v40  ;;  %v8438_v6 = vadd.f32 %v3578_v0, %v8328_v21  ;;  %v1247_v56 = vsel %vm1246_vm5, %v5898_v63, %v1243_v9  ;;  %v1258_v29 = vadd.f32 %v5900_v43, %v1257_v44 }
 0x240   :  { %1431 = vperm.xlu0 %5831, %v58_v18   ;;  %3659 = vrot.lane.b32.xlu2 %v7845_v39, %s6313_s14  ;;  %v3502_v18 = vpop.permute.xlu0 %3501  ;;  %v8451_v21 = vsel %vm8393_vm3, %v1251_v32, %v1247_v56  ;;  %vm12658_vm7 = vweird.f32 %v5900_v43  ;;  %vm12659_vm1 = vweird.f32 %v8343_v14  ;;  %v1212_v16 = vmul.f32 %v5902_v13, %v1211_v26  ;;  %v63_v14 = vld [vmem:[%s12254_s6 + $0x28] sm:$0xff]  ;;  %v12664_v26 = vld [vmem:[#allocation6_spill] sm:$0xff] }
 0x241   :  { %v3454_v35 = vpop.permute.xlu1 %3453  ;;  %vm1261_vm11 = vmor %vm12659_vm1, %vm12658_vm7  ;;  %v8456_v31 = vadd.f32 1.0, %v1138_v50  ;;  %v1275_v0 = vmul.f32 1.0614054, %v8451_v21  ;;  %vm12661_vm5 = vcmp.lt.s32.totalorder %v7365_v19, 16  ;;  %vm12663_vm7 = vcmp.ge.s32.totalorder %v7365_v19, 16 }
 0x242   :  { %v3460_v10 = vsel %vm541_vm2, %v3446_v7, %v3454_v35  ;;  %v3464_v28 = vsel %vm541_vm2, %v3454_v35, %v3446_v7  ;;  %v12660_v35 = vld [vmem:[#allocation4_spill] sm:$0xff]  ;;  %v3494_v63 = vpop.permute.xlu2 %3493  ;;  %v1262_v47 = vsel %vm1261_vm11, %v5900_v43, %v1258_v29  ;;  %vm12662_vm3 = vmmov %vm12661_vm5  ;;  %v1213_v9 = vadd.f32 %v5902_v13, %v1212_v16 }
 0x243   :  { %v3470_v40 = vsel %vm7456_vm8, %v3460_v10, 0.0  ;;  %v3469_v57 = vsel %vm7470_vm10, %v3464_v28, 0.0  ;;  %v3508_v62 = vsel %vm12661_vm5, %v3494_v63, %v3502_v18  ;;  %v3512_v32 = vsel %vm12662_vm3, %v3502_v18, %v3494_v63 }
 0x244   :  { %v3478_v7 = vmul.f32 %v3470_v40, %v12660_v35  ;;  %v8471_v50 = vsel %vm8404_vm4, %v1266_v4, %v1262_v47  ;;  %v3517_v44 = vsel %vm12663_vm7, %v3512_v32, 0.0  ;;  %v3526_v43 = vmul.f32 %v3508_v62, %v12664_v26 }
 0x245   :  { %v1283_v10 = vadd.f32 -1.4531521, %v1275_v0  ;;  %v1276_v28 = vmul.f32 1.0614054, %v8471_v50  ;;  %vm12665_vm1 = vweird.f32 %v8350_v5  ;;  %v3477_v18 = vmul.f32 %v3469_v57, %v12660_v35 }
 0x246   :  { %vm1216_vm11 = vmor %vm12665_vm1, %vm1215_vm14  ;;  %v3525_v4 = vmul.f32 %v3517_v44, %v12664_v26  ;;  %5903 = vrcp.f32 %v8456_v31  ;;  %v8485_v56 = vadd.f32 %v3526_v43, %v3478_v7  ;;  %v8504_v0 = vadd.f32 %v8225_v60, %v8254_v42 }
 0x247   :  { %3799 = vrot.lane.b32.xlu1 %v7666_v51, %s6316_s16  ;;  %v1217_v1 = vsel %vm1216_vm11, %v5902_v13, %v1213_v9  ;;  %v1291_v29 = vmul.f32 %v1283_v10, %v8451_v21  ;;  %v1284_v5 = vadd.f32 -1.4531521, %v1276_v28  ;;  %5905 = vpow2.f32 %v8397_v41 }
 0x248   :  { %1456 = vperm.xlu0 %5831, %v63_v14   ;;  %3751 = vrot.lane.b32.xlu2 %v7666_v51, %s6315_s15  ;;  %v8492_v40 = vsel %vm8428_vm0, %v1221_v37, %v1217_v1  ;;  %v8497_v57 = vadd.f32 %v3525_v4, %v3477_v18  ;;  %5907 = vpow2.f32 %v8400_v53  ;;  %v1233_v37 = vand.u32 2147483647, %v8456_v31  ;;  %v3594_v62 = vpop.permute.xlu0 %3593  ;;  %v12668_v4 = vld [vmem:[#allocation16_spill] sm:$0xff] }
 0x249   :  { %v3544_v13 = vpop.permute.xlu1 %3543  ;;  %v1273_v35 = vmul.f32 1.0614054, %v8492_v40  ;;  %v1299_v7 = vadd.f32 1.4214138, %v1291_v29  ;;  %v1292_v63 = vmul.f32 %v1284_v5, %v8471_v50  ;;  %5909 = vpow2.f32 %v1365_v30 }
 0x24a   :  { %v3552_v32 = vpop.permute.xlu2 %3551  ;;  %v1235_v41 = vand.u32 2147483648, %v8456_v31  ;;  %vm12666_vm4 = vcmp.lt.s32.totalorder %v7365_v19, 15  ;;  %vm1229_vm0 = vweird.f32 %v8456_v31  ;;  %v8520_v43 = vmul.f32 0.70710677, %v8504_v0 }
 0x24b   :  { %v1281_v8 = vadd.f32 -1.4531521, %v1273_v35  ;;  %v1307_v14 = vmul.f32 %v1299_v7, %v8451_v21  ;;  %v1300_v9 = vadd.f32 1.4214138, %v1292_v63  ;;  %v3557_v42 = vsel %vm12666_vm4, %v3544_v13, %v3552_v32  ;;  %vm12667_vm14 = vmmov %vm12666_vm4 }
 0x24c   :  { %v8511_v44 = vpop.eup %5903  ;;  %v3561_v53 = vsel %vm12667_vm14, %v3552_v32, %v3544_v13  ;;  %v3568_v10 = vsel %vm7478_vm12, %v3557_v42, 0.0  ;;  %vm8533_vm5 = vcmp.eq.f32.partialorder %v1233_v37, 8.507059e+37  ;;  %v8542_v32 = vand.u32 2147483647, %v8520_v43 }
 0x24d   :  { %v1289_v26 = vmul.f32 %v1281_v8, %v8492_v40  ;;  %v3567_v30 = vsel %vm7489_vm13, %v3561_v53, 0.0  ;;  %v1315_v28 = vadd.f32 -0.28449672, %v1307_v14  ;;  %v1308_v18 = vmul.f32 %v1300_v9, %v8471_v50  ;;  %v5906_v7 = vpop.eup %5905 }
 0x24e   :  { %v3575_v1 = vmul.f32 %v3567_v30, %v12668_v4  ;;  %v3576_v29 = vmul.f32 %v3568_v10, %v12668_v4  ;;  %v1225_v13 = vmul.f32 %v8511_v44, %v8456_v31  ;;  %vm1230_vm3 = vweird.f32 %v8511_v44  ;;  %v5908_v14 = vpop.eup %5907 }
 0x24f   :  { %3755 = vrot.lane.b32.xlu1 %v7845_v39, %s6315_s15  ;;  %v1297_v5 = vadd.f32 1.4214138, %v1289_v26  ;;  %v1323_v63 = vmul.f32 %v1315_v28, %v8451_v21  ;;  %v1316_v8 = vadd.f32 -0.28449672, %v1308_v18  ;;  %v5910_v30 = vpop.eup %5909  ;;  %vm12671_vm7 = vcmp.lt.s32.totalorder %v7365_v19, 1  ;;  %vm1231_vm11 = vmor %vm1229_vm0, %vm1230_vm3 }
 0x250   :  { %3809 = vrot.lane.b32.xlu2 %v7623_v12, %s6316_s16  ;;  %v8545_v42 = vadd.f32 %v3575_v1, %v8385_v15  ;;  %v8548_v37 = vadd.f32 %v3576_v29, %v8376_v23  ;;  %v1226_v26 = vsub.f32 1.0, %v1225_v13  ;;  %vm12672_vm1 = vmmov %vm12671_vm7  ;;  %vm1396_vm4 = vcmp.lt.f32.partialorder %v8307_v27, 0.0 }
 0x251   :  { %v3602_v9 = vpop.permute.xlu1 %3601  ;;  %v1305_v53 = vmul.f32 %v1297_v5, %v8492_v40  ;;  %v1331_v18 = vadd.f32 0.2548296, %v1323_v63  ;;  %v1324_v4 = vmul.f32 %v1316_v8, %v8471_v50  ;;  %v1236_v8 = vor.u32 1.1754944e-38, %v1235_v41 }
 0x252   :  { %v3606_v10 = vsel %vm12671_vm7, %v3594_v62, %v3602_v9  ;;  %v3610_v28 = vsel %vm12672_vm1, %v3602_v9, %v3594_v62  ;;  %v1227_v29 = vmul.f32 %v8511_v44, %v1226_v26  ;;  %v1135_v9 = vmul.f32 0.3275911, %v8542_v32  ;;  %v3444_v41 = vpop.permute.xlu2 %3443 }
 0x253   :  { %v3617_v15 = vsel %vm7443_vm6, %v3610_v28, 0.0  ;;  %v3618_v23 = vsel %vm7456_vm8, %v3606_v10, 0.0  ;;  %v1313_v1 = vadd.f32 -0.28449672, %v1305_v53  ;;  %v1339_v47 = vmul.f32 %v1331_v18, %v8451_v21  ;;  %v3452_v28 = vpop.permute.xlu0 %3451  ;;  %v66_v21 = vld [vmem:[%s12254_s6 + $0x40] sm:$0xff] }
 0x254   :  { %v3625_v5 = vmul.f32 %v3617_v15, %v12611_v20  ;;  %v3626_v13 = vmul.f32 %v3618_v23, %v12611_v20  ;;  %v1332_v16 = vadd.f32 0.2548296, %v1324_v4  ;;  %v1228_v63 = vadd.f32 %v8511_v44, %v1227_v29  ;;  %1471 = vperm.xlu0 %5831, %v66_v21  }
 0x255   :  { %v1321_v62 = vmul.f32 %v1313_v1, %v8492_v40  ;;  %v1379_v26 = vmul.f32 %v5906_v7, %v1339_v47  ;;  %v8590_v31 = vsel %vm541_vm2, %v3452_v28, %v3444_v41  ;;  %v1115_v23 = vmul.f32 0.5, %v8295_v49 }
 0x256   :  { %v8568_v10 = vadd.f32 %v3625_v5, %v8435_v59  ;;  %v8571_v53 = vadd.f32 %v3626_v13, %v8438_v6  ;;  %v1340_v20 = vmul.f32 %v1332_v16, %v8471_v50  ;;  %v1232_v59 = vsel %vm1231_vm11, %v8511_v44, %v1228_v63 }
 0x257   :  { %v1329_v18 = vadd.f32 0.2548296, %v1321_v62  ;;  %3795 = vrot.lane.b32.xlu1 %v7900_v45, %s6316_s16  ;;  %v8586_v6 = vsel %vm541_vm2, %v3444_v41, %v3452_v28  ;;  %v1387_v50 = vsub.f32 1.0, %v1379_v26  ;;  %v8594_v47 = vsel %vm8533_vm5, %v1236_v8, %v1232_v59 }
 0x258   :  { %v1380_v16 = vmul.f32 %v5908_v14, %v1340_v20  ;;  %3749 = vrot.lane.b32.xlu2 %v7746_v38, %s6315_s15  ;;  %v12673_v44 = vsel %vm7460_vm9, %v8370_v58, 0.0  ;;  %v1274_v15 = vmul.f32 1.0614054, %v8594_v47  ;;  %v8606_v35 = vadd.f32 1.0, %v1135_v9 }
 0x259   :  { %v1065_v7 = vmul.f32 %v7938_v46, %v12673_v44  ;;  %v1337_v4 = vmul.f32 %v1329_v18, %v8492_v40  ;;  %v1403_v14 = vsub.f32 0.0, %v1387_v50  ;;  %vm1395_vm2 = vcmp.lt.f32.partialorder %v8304_v33, 0.0  ;;  %v12675_v44 = vld [vmem:[#allocation48_spill] sm:$0xff] }
 0x25a   :  { %v1388_v1 = vsub.f32 1.0, %v1380_v16  ;;  %v1282_v5 = vadd.f32 -1.4531521, %v1274_v15  ;;  %v12674_v13 = vsub.f32 0.0, %v8390_v17  ;;  %5911 = vrcp.f32 %v8606_v35 }
 0x25b   :  { %v1377_v29 = vmul.f32 %v5910_v30, %v1337_v4  ;;  %v1411_v62 = vsel %vm1395_vm2, %v1403_v14, %v1387_v50  ;;  %v8615_v40 = vadd.f32 %v8225_v60, %v8292_v2  ;;  %v1073_v30 = vadd.f32 %v1065_v7, %v8136_v11 }
 0x25c   :  { %v1354_v58 = vmul.f32 %v12674_v13, %v8390_v17  ;;  %v1404_v63 = vsub.f32 0.0, %v1388_v1  ;;  %v1419_v49 = vadd.f32 1.0, %v1411_v62  ;;  %v1290_v33 = vmul.f32 %v1282_v5, %v8594_v47 }
 0x25d   :  { %v1385_v8 = vsub.f32 1.0, %v1377_v29  ;;  %v1116_v9 = vmul.f32 0.5, %v8298_v22  ;;  %vm1393_vm14 = vcmp.lt.f32.partialorder %v8301_v61, 0.0  ;;  %v8623_v2 = vmul.f32 0.70710677, %v8615_v40 }
 0x25e   :  { %v1412_v28 = vsel %vm1396_vm4, %v1404_v63, %v1388_v1  ;;  %v1427_v17 = vmul.f32 %v1419_v49, %v1115_v23  ;;  %v1298_v21 = vadd.f32 1.4214138, %v1290_v33  ;;  %v1367_v41 = vmul.f32 1.442695, %v1354_v58  ;;  %v8638_v23 = vpop.permute.xlu0 %3541 }
 0x25f   :  { %v1420_v26 = vadd.f32 1.0, %v1412_v28  ;;  %v1401_v20 = vsub.f32 0.0, %v1385_v8  ;;  %v8629_v22 = vadd.f32 %v8258_v34, %v1073_v30  ;;  %v1113_v50 = vmul.f32 0.5, %v8289_v52 }
 0x260   :  { %3807 = vrot.lane.b32.xlu2 %v7717_v3, %s6316_s16  ;;  %1570 = vmatpush.msra.mxu2 %v1427_v17  ;;  %v1306_v11 = vmul.f32 %v1298_v21, %v8594_v47  ;;  %v5912_v59 = vpop.eup %5911  ;;  %v1128_v61 = vand.u32 2147483647, %v8623_v2  ;;  %v8635_v7 = vadd.f32 %v8258_v34, %v12675_v44  ;;  %5913 = vpow2.f32 %v1367_v41  ;;  %v12676_v44 = vld [vmem:[#allocation51_spill] sm:$0xff] }
 0x261   :  { %v1428_v27 = vmul.f32 %v1420_v26, %v1116_v9  ;;  %v1409_v18 = vsel %vm1393_vm14, %v1401_v20, %v1385_v8  ;;  %v1180_v15 = vmul.f32 %v5912_v59, %v8606_v35  ;;  %v8641_v29 = vmul.f32 0.70710677, %v8629_v22 }
 0x262   :  { %v1417_v16 = vadd.f32 1.0, %v1409_v18  ;;  %v1314_v4 = vadd.f32 -0.28449672, %v1306_v11  ;;  %v1136_v1 = vmul.f32 0.3275911, %v1128_v61  ;;  %v1343_v13 = vsub.f32 0.0, %v8542_v32 }
 0x263   :  { %1635 = vmatpush.msra.mxu3 %v1428_v27  ;;  %v1181_v5 = vsub.f32 1.0, %v1180_v15  ;;  %v8646_v58 = vmul.f32 0.70710677, %v8635_v7  ;;  %v1188_v62 = vand.u32 2147483647, %v8606_v35  ;;  %v1190_v63 = vand.u32 2147483648, %v8606_v35 }
 0x264   :  { %v1425_v14 = vmul.f32 %v1417_v16, %v1113_v50  ;;  %v1322_v52 = vmul.f32 %v1314_v4, %v8594_v47  ;;  %v8650_v49 = vadd.f32 1.0, %v1136_v1  ;;  %v1125_v8 = vand.u32 2147483647, %v8641_v29 }
 0x265   :  { %v1182_v30 = vmul.f32 %v5912_v59, %v1181_v5  ;;  %vm1185_vm0 = vweird.f32 %v5912_v59  ;;  %v8654_v9 = vand.u32 2147483647, %v8646_v58  ;;  %vm1184_vm5 = vweird.f32 %v8606_v35 }
 0x266   :  { %1571 = vmatpush.msra.mxu2 %v1425_v14  ;;  %v1330_v33 = vadd.f32 0.2548296, %v1322_v52  ;;  %5915 = vrcp.f32 %v8650_v49  ;;  %v1133_v26 = vmul.f32 0.3275911, %v1125_v8  ;;  %v5914_v20 = vpop.eup %5913  ;;  %vm1186_vm3 = vmor %vm1184_vm5, %vm1185_vm0  ;;  %v1191_v21 = vor.u32 1.1754944e-38, %v1190_v63  ;;  %v8676_v52 = vpop.permute.xlu0 %3599 }
 0x267   :  { %v1183_v17 = vadd.f32 %v5912_v59, %v1182_v30  ;;  %v1351_v41 = vmul.f32 %v1343_v13, %v8542_v32  ;;  %v1344_v27 = vsub.f32 0.0, %v1128_v61  ;;  %v1134_v18 = vmul.f32 0.3275911, %v8654_v9  ;;  %v12678_v30 = vld [vmem:[#allocation35_spill] sm:$0xff] }
 0x268   :  { %3797 = vrot.lane.b32.xlu2 %v7746_v38, %s6316_s16  ;;  %v1338_v28 = vmul.f32 %v1330_v33, %v8594_v47  ;;  %vm1189_vm7 = vcmp.eq.f32.partialorder %v1188_v62, 8.507059e+37  ;;  %v8663_v16 = vadd.f32 1.0, %v1133_v26  ;;  %v1114_v4 = vmul.f32 0.5, %v12676_v44  ;;  %v12677_v47 = vld [vmem:[#allocation44_spill] sm:$0xff] }
 0x269   :  { %v1187_v50 = vsel %vm1186_vm3, %v5912_v59, %v1183_v17  ;;  %vm1394_vm1 = vcmp.lt.f32.partialorder %v12677_v47, 0.0  ;;  %v8669_v35 = vadd.f32 1.0, %v1134_v18  ;;  %v3467_v32 = vsel %vm7470_vm10, %v8590_v31, 0.0 }
 0x26a   :  { %v1378_v11 = vmul.f32 %v5914_v20, %v1338_v28  ;;  %v8667_v15 = vsel %vm1189_vm7, %v1191_v21, %v1187_v50  ;;  %5917 = vrcp.f32 %v8663_v16  ;;  %v3468_v5 = vsel %vm7456_vm8, %v8586_v6, 0.0 }
 0x26b   :  { %v1271_v1 = vmul.f32 1.0614054, %v8667_v15  ;;  %v1361_v13 = vmul.f32 1.442695, %v1351_v41  ;;  %v1352_v62 = vmul.f32 %v1344_v27, %v1128_v61  ;;  %5919 = vrcp.f32 %v8669_v35 }
 0x26c   :  { %v1386_v14 = vsub.f32 1.0, %v1378_v11  ;;  %v5916_v59 = vpop.eup %5915  ;;  %v1203_v31 = vand.u32 2147483647, %v8650_v49  ;;  %v8685_v28 = vmul.f32 %v3467_v32, %v12678_v30  ;;  %v8688_v17 = vmul.f32 0.5, %v8504_v0  ;;  %v8702_v11 = vpop.permute.xlu1 %3491 }
 0x26d   :  { %v1279_v33 = vadd.f32 -1.4531521, %v1271_v1  ;;  %v1195_v24 = vmul.f32 %v5916_v59, %v8650_v49  ;;  %v1205_v26 = vand.u32 2147483648, %v8650_v49  ;;  %v1341_v20 = vsub.f32 0.0, %v1125_v8 }
 0x26e   :  { %v1402_v63 = vsub.f32 0.0, %v1386_v14  ;;  %v8696_v61 = vmul.f32 %v3468_v5, %v12678_v30  ;;  %5921 = vpow2.f32 %v1361_v13  ;;  %vm1199_vm10 = vweird.f32 %v8650_v49 }
 0x26f   :  { %v1287_v21 = vmul.f32 %v1279_v33, %v8667_v15  ;;  %v1196_v41 = vsub.f32 1.0, %v1195_v24  ;;  %v8700_v0 = vmul.f32 1.442695, %v1352_v62  ;;  %vm1200_vm11 = vweird.f32 %v5916_v59 }
 0x270   :  { %3803 = vrot.lane.b32.xlu2 %v7845_v39, %s6316_s16  ;;  %v1410_v6 = vsel %vm1394_vm1, %v1402_v63, %v1386_v14  ;;  %v5918_v18 = vpop.eup %5917  ;;  %vm8704_vm2 = vcmp.eq.f32.partialorder %v1203_v31, 8.507059e+37  ;;  %v1206_v1 = vor.u32 1.1754944e-38, %v1205_v26  ;;  %v1349_v13 = vmul.f32 %v1341_v20, %v1125_v8  ;;  %vm1201_vm4 = vmor %vm1199_vm10, %vm1200_vm11 }
 0x271   :  { %v1418_v27 = vadd.f32 1.0, %v1410_v6  ;;  %v1295_v50 = vadd.f32 1.4214138, %v1287_v21  ;;  %v1197_v44 = vmul.f32 %v5916_v59, %v1196_v41  ;;  %v5920_v14 = vpop.eup %5919  ;;  %v1150_v5 = vmul.f32 %v5918_v18, %v8663_v16  ;;  %v8718_v41 = vpop.permute.xlu0 %3589 }
 0x272   :  { %v1165_v33 = vmul.f32 %v5920_v14, %v8669_v35  ;;  %v1342_v24 = vsub.f32 0.0, %v8654_v9  ;;  %vm1154_vm14 = vweird.f32 %v8663_v16  ;;  %v1160_v30 = vand.u32 2147483648, %v8663_v16 }
 0x273   :  { %v1426_v32 = vmul.f32 %v1418_v27, %v1114_v4  ;;  %v1303_v63 = vmul.f32 %v1295_v50, %v8667_v15  ;;  %v1198_v62 = vadd.f32 %v5916_v59, %v1197_v44  ;;  %v1151_v31 = vsub.f32 1.0, %v1150_v5 }
 0x274   :  { %v1158_v4 = vand.u32 2147483647, %v8663_v16  ;;  %v1166_v20 = vsub.f32 1.0, %v1165_v33  ;;  %v1173_v6 = vand.u32 2147483647, %v8669_v35  ;;  %v5922_v21 = vpop.eup %5921  ;;  %vm1155_vm0 = vweird.f32 %v5918_v18 }
 0x275   :  { %1636 = vmatpush.msra.mxu3 %v1426_v32  ;;  %v1311_v26 = vadd.f32 -0.28449672, %v1303_v63  ;;  %v1202_v8 = vsel %vm1201_vm4, %v5916_v59, %v1198_v62  ;;  %v1152_v49 = vmul.f32 %v5918_v18, %v1151_v31  ;;  %v1175_v50 = vand.u32 2147483648, %v8669_v35  ;;  %vm1156_vm7 = vmor %vm1154_vm14, %vm1155_vm0 }
 0x276   :  { %v8722_v27 = vsel %vm8704_vm2, %v1206_v1, %v1202_v8  ;;  %v1167_v5 = vmul.f32 %v5920_v14, %v1166_v20  ;;  %vm1170_vm5 = vweird.f32 %v5920_v14  ;;  %vm8727_vm3 = vcmp.eq.f32.partialorder %v1158_v4, 8.507059e+37 }
 0x277   :  { %v1319_v44 = vmul.f32 %v1311_v26, %v8667_v15  ;;  %v1272_v32 = vmul.f32 1.0614054, %v8722_v27  ;;  %v1153_v59 = vadd.f32 %v5918_v18, %v1152_v49  ;;  %v1161_v62 = vor.u32 1.1754944e-38, %v1160_v30  ;;  %v3500_v49 = vpop.permute.xlu2 %3499 }
 0x278   :  { %v1357_v33 = vmul.f32 1.442695, %v1349_v13  ;;  %v1168_v31 = vadd.f32 %v5920_v14, %v1167_v5  ;;  %vm1169_vm1 = vweird.f32 %v8669_v35  ;;  %vm1391_vm10 = vcmp.lt.f32.partialorder %v8520_v43, 0.0  ;;  %v69_v35 = vld [vmem:[%s12254_s6 + $0x58] sm:$0xff] }
 0x279   :  { %v1327_v47 = vadd.f32 0.2548296, %v1319_v44  ;;  %v1280_v1 = vadd.f32 -1.4531521, %v1272_v32  ;;  %v1157_v26 = vsel %vm1156_vm7, %v5918_v18, %v1153_v59  ;;  %vm1171_vm11 = vmor %vm1169_vm1, %vm1170_vm5  ;;  %vm1174_vm2 = vcmp.eq.f32.partialorder %v1173_v6, 8.507059e+37  ;;  %v59_v18 = vld [vmem:[%s12254_s6 + $0x8] sm:$0xff]  ;;  %v3550_v6 = vpop.permute.xlu1 %3549  ;;  %1486 = vperm.xlu0 %5831, %v69_v35  }
 0x27a   :  { %v1176_v8 = vor.u32 1.1754944e-38, %v1175_v50  ;;  %v1350_v4 = vmul.f32 %v1342_v24, %v8654_v9  ;;  %v8740_v30 = vsel %vm8727_vm3, %v1161_v62, %v1157_v26  ;;  %v1172_v16 = vsel %vm1171_vm11, %v5920_v14, %v1168_v31  ;;  %1436 = vperm.xlu1 %5832, %v59_v18   ;;  %v12685_v62 = vld [vmem:[#allocation7_spill] sm:$0xff]  ;;  %v12688_v35 = vld [vmem:[#allocation13_spill] sm:$0xff] }
 0x27b   :  { %v1335_v20 = vmul.f32 %v1327_v47, %v8667_v15  ;;  %v1288_v13 = vmul.f32 %v1280_v1, %v8722_v27  ;;  %v1269_v9 = vmul.f32 1.0614054, %v8740_v30  ;;  %vm12683_vm4 = vcmp.lt.s32.totalorder %v7365_v19, 15 }
 0x27c   :  { %v8749_v24 = vsel %vm1174_vm2, %v1176_v8, %v1172_v16  ;;  %v3556_v15 = vsel %vm12683_vm4, %v8638_v23, %v3550_v6  ;;  %vm12684_vm14 = vmmov %vm12683_vm4  ;;  %vm12686_vm0 = vcmp.lt.s32.totalorder %v7365_v19, 16  ;;  %5923 = vpow2.f32 %v8700_v0  ;;  %v61_v0 = vld [vmem:[%s12254_s6 + $0x18] sm:$0xff] }
 0x27d   :  { %v3560_v14 = vsel %vm12684_vm14, %v3550_v6, %v8638_v23  ;;  %v1375_v50 = vmul.f32 %v5922_v21, %v1335_v20  ;;  %v1296_v44 = vadd.f32 1.4214138, %v1288_v13  ;;  %v1270_v32 = vmul.f32 1.0614054, %v8749_v24  ;;  %v8769_v20 = vpop.permute.xlu0 %3665  ;;  %vm12687_vm5 = vmmov %vm12686_vm0 }
 0x27e   :  { %v3565_v5 = vsel %vm7489_vm13, %v3560_v14, 0.0  ;;  %v1277_v59 = vadd.f32 -1.4531521, %v1269_v9  ;;  %v3566_v63 = vsel %vm7478_vm12, %v3556_v15, 0.0  ;;  %v3507_v1 = vsel %vm12686_vm0, %v8702_v11, %v3500_v49  ;;  %vm12696_vm14 = vmmov %vm12683_vm4 }
 0x27f   :  { %v3573_v47 = vmul.f32 %v3565_v5, %v12685_v62  ;;  %v1383_v31 = vsub.f32 1.0, %v1375_v50  ;;  %v1304_v23 = vmul.f32 %v1296_v44, %v8722_v27  ;;  %v1278_v21 = vadd.f32 -1.4531521, %v1270_v32 }
 0x280   :  { %v3574_v26 = vmul.f32 %v3566_v63, %v12685_v62  ;;  %v1285_v8 = vmul.f32 %v1277_v59, %v8740_v30  ;;  %v3511_v16 = vsel %vm12687_vm5, %v3500_v49, %v8702_v11  ;;  %v3524_v18 = vmul.f32 %v3507_v1, %v12688_v35  ;;  %v3592_v62 = vpop.permute.xlu2 %3591 }
 0x281   :  { %v8772_v13 = vadd.f32 %v3573_v47, %v8497_v57  ;;  %v1399_v6 = vsub.f32 0.0, %v1383_v31  ;;  %v1312_v9 = vadd.f32 -0.28449672, %v1304_v23  ;;  %v1286_v15 = vmul.f32 %v1278_v21, %v8749_v24  ;;  %v3540_v59 = vpop.permute.xlu1 %3539 }
 0x282   :  { %v8780_v14 = vadd.f32 %v3574_v26, %v8485_v56  ;;  %v1293_v50 = vadd.f32 1.4214138, %v1285_v8  ;;  %vm12689_vm3 = vcmp.ge.s32.totalorder %v7365_v19, 16  ;;  %v8786_v44 = vadd.f32 %v3524_v18, %v8696_v61  ;;  %v72_v56 = vld [vmem:[%s12254_s6 + $0x70] sm:$0xff]  ;;  %1446 = vperm.xlu1 %5832, %v61_v0  }
 0x283   :  { %v3515_v57 = vsel %vm12689_vm3, %v3511_v16, 0.0  ;;  %v1407_v11 = vsel %vm1391_vm10, %v1399_v6, %v1383_v31  ;;  %v1320_v49 = vmul.f32 %v1312_v9, %v8722_v27  ;;  %v1294_v32 = vadd.f32 1.4214138, %v1286_v15  ;;  %1501 = vperm.xlu0 %5831, %v72_v56   ;;  %v5924_v6 = vpop.eup %5923  ;;  %v64_v0 = vld [vmem:[%s12254_s6 + $0x30] sm:$0xff] }
 0x284   :  { %v3523_v5 = vmul.f32 %v3515_v57, %v12688_v35  ;;  %v1415_v63 = vadd.f32 1.0, %v1407_v11  ;;  %v1301_v61 = vmul.f32 %v1293_v50, %v8740_v30  ;;  %5925 = vpow2.f32 %v1357_v33  ;;  %v12692_v35 = vld [vmem:[#allocation17_spill] sm:$0xff] }
 0x285   :  { %v1359_v43 = vmul.f32 1.442695, %v1350_v4  ;;  %v1328_v47 = vadd.f32 0.2548296, %v1320_v49  ;;  %v1302_v1 = vmul.f32 %v1294_v32, %v8749_v24  ;;  %vm12690_vm7 = vcmp.lt.s32.totalorder %v7365_v19, 1  ;;  %v8822_v11 = vpop.permute.xlu0 %3655 }
 0x286   :  { %v8801_v31 = vadd.f32 %v3523_v5, %v8685_v28  ;;  %v3605_v23 = vsel %vm12690_vm7, %v3592_v62, %v8676_v52  ;;  %v1423_v21 = vmul.f32 %v1415_v63, %v8688_v17  ;;  %v1309_v26 = vadd.f32 -0.28449672, %v1301_v61  ;;  %vm12691_vm1 = vmmov %vm12690_vm7 }
 0x287   :  { %v3609_v33 = vsel %vm12691_vm1, %v8676_v52, %v3592_v62  ;;  %v3616_v4 = vsel %vm7456_vm8, %v3605_v23, 0.0  ;;  %v1336_v8 = vmul.f32 %v1328_v47, %v8722_v27  ;;  %v1310_v16 = vadd.f32 -0.28449672, %v1302_v1  ;;  %vm12693_vm11 = vmmov %vm12691_vm1  ;;  %v12695_v23 = vld [vmem:[#allocation19_spill] sm:$0xff] }
 0x288   :  { %v3615_v28 = vsel %vm7443_vm6, %v3609_v33, 0.0  ;;  %v3624_v18 = vmul.f32 %v3616_v4, %v12692_v35  ;;  %1572 = vmatpush.msra.mxu2 %v1423_v21  ;;  %v1317_v17 = vmul.f32 %v1309_v26, %v8740_v30  ;;  %5927 = vpow2.f32 %v1359_v43  ;;  %vm12694_vm2 = vmmov %vm12691_vm1 }
 0x289   :  { %v3623_v9 = vmul.f32 %v3615_v28, %v12692_v35  ;;  %v1376_v15 = vmul.f32 %v5924_v6, %v1336_v8  ;;  %v1318_v52 = vmul.f32 %v1310_v16, %v8749_v24  ;;  %v1112_v32 = vmul.f32 0.5, %v8615_v40  ;;  %v3598_v63 = vpop.permute.xlu1 %3597  ;;  %v3548_v40 = vpop.permute.xlu2 %3547 }
 0x28a   :  { %v8820_v50 = vadd.f32 %v3624_v18, %v8548_v37  ;;  %v5926_v27 = vpop.eup %5925  ;;  %v1325_v57 = vadd.f32 0.2548296, %v1317_v17  ;;  %vm1392_vm10 = vcmp.lt.f32.partialorder %v8623_v2, 0.0  ;;  %1461 = vperm.xlu1 %5832, %v64_v0   ;;  %v3604_v61 = vsel %vm12693_vm11, %v8718_v41, %v3598_v63 }
 0x28b   :  { %v8825_v49 = vadd.f32 %v3623_v9, %v8545_v42  ;;  %v1384_v5 = vsub.f32 1.0, %v1376_v15  ;;  %v1326_v56 = vadd.f32 0.2548296, %v1318_v52  ;;  %v3608_v42 = vsel %vm12694_vm2, %v3598_v63, %v8718_v41  ;;  %v12697_v9 = vld [vmem:[#allocation10_spill] sm:$0xff] }
 0x28c   :  { %v1333_v37 = vmul.f32 %v1325_v57, %v8740_v30  ;;  %v3613_v47 = vsel %vm7443_vm6, %v3608_v42, 0.0  ;;  %v3614_v2 = vsel %vm7456_vm8, %v3604_v61, 0.0  ;;  %v3555_v33 = vsel %vm12683_vm4, %v3540_v59, %v3548_v40 }
 0x28d   :  { %v1400_v43 = vsub.f32 0.0, %v1384_v5  ;;  %v1334_v62 = vmul.f32 %v1326_v56, %v8749_v24  ;;  %v3621_v21 = vmul.f32 %v3613_v47, %v12695_v23  ;;  %v3622_v26 = vmul.f32 %v3614_v2, %v12695_v23  ;;  %v8868_v55 = vpop.permute.xlu0 %3713 }
 0x28e   :  { %v5928_v30 = vpop.eup %5927  ;;  %v1373_v1 = vmul.f32 %v5926_v27, %v1333_v37  ;;  %v3559_v24 = vsel %vm12696_vm14, %v3548_v40, %v3540_v59  ;;  %v3564_v8 = vsel %vm7478_vm12, %v3555_v33, 0.0  ;;  %vm1389_vm0 = vcmp.lt.f32.partialorder %v8641_v29, 0.0  ;;  %v42_v40 = vld [vmem:[%s12255_s5] sm:$0xff]  ;;  %v12702_v33 = vld [vmem:[#allocation32_spill] sm:$0xff] }
 0x28f   :  { %v1408_v41 = vsel %vm1392_vm10, %v1400_v43, %v1384_v5  ;;  %v1374_v4 = vmul.f32 %v5928_v30, %v1334_v62  ;;  %v8853_v35 = vadd.f32 %v3621_v21, %v8772_v13  ;;  %v8856_v18 = vadd.f32 %v3622_v26, %v8780_v14  ;;  %v67_v13 = vld [vmem:[%s12254_s6 + $0x48] sm:$0xff]  ;;  %v12698_v43 = vld [vmem:[#allocation28_spill] sm:$0xff]  ;;  %vm12701_vm10 = vmmov %vm12691_vm1 }
 0x290   :  { %v1416_v16 = vadd.f32 1.0, %v1408_v41  ;;  %v1381_v28 = vsub.f32 1.0, %v1373_v1  ;;  %v3563_v17 = vsel %vm7489_vm13, %v3559_v24, 0.0  ;;  %v3572_v15 = vmul.f32 %v3564_v8, %v12697_v9  ;;  %v43_v8 = vld [vmem:[%s12255_s5 + $0x8] sm:$0xff] }
 0x291   :  { %v1382_v6 = vsub.f32 1.0, %v1374_v4  ;;  %v3571_v59 = vmul.f32 %v3563_v17, %v12697_v9  ;;  %v3588_v14 = vpop.permute.xlu1 %3587  ;;  %vm1390_vm13 = vcmp.lt.f32.partialorder %v8646_v58, 0.0  ;;  %v8871_v0 = vpop.permute.xlu2 %3657  ;;  %v1109_v29 = vmul.f32 0.5, %v8629_v22  ;;  %v70_v22 = vld [vmem:[%s12254_s6 + $0x60] sm:$0xff] }
 0x292   :  { %v1424_v52 = vmul.f32 %v1416_v16, %v1112_v32  ;;  %v1397_v27 = vsub.f32 0.0, %v1381_v28  ;;  %v3580_v5 = vadd.f32 %v3572_v15, %v8786_v44  ;;  %1476 = vperm.xlu1 %5832, %v67_v13   ;;  %v1110_v37 = vmul.f32 0.5, %v8635_v7  ;;  %v60_v7 = vld [vmem:[%s12254_s6 + $0x10] sm:$0xff]  ;;  %v12703_v16 = vld [vmem:[#allocation9_spill] sm:$0xff] }
 0x293   :  { %v1398_v57 = vsub.f32 0.0, %v1382_v6  ;;  %v3579_v32 = vadd.f32 %v3571_v59, %v8801_v31  ;;  %vm1509_vm5 = vcmask 261120   ;;  %v3639_v31 = vmul.f32 %v7666_v51, %v12698_v43  ;;  %1441 = vperm.xlu2 %5829, %v60_v7  }
 0x294   :  { %1637 = vmatpush.msra.mxu3 %v1424_v52  ;;  %v1405_v56 = vsel %vm1389_vm0, %v1397_v27, %v1381_v28  ;;  %v3640_v62 = vmul.f32 %v7717_v3, %v12698_v43  ;;  %vm12699_vm3 = vcmp.lt.s32.totalorder %v7365_v19, 127  ;;  %v62_v27 = vld [vmem:[%s12254_s6 + $0x20] sm:$0xff] }
 0x295   :  { %v1413_v63 = vadd.f32 1.0, %v1405_v56  ;;  %v1406_v44 = vsel %vm1390_vm13, %v1398_v57, %v1382_v6  ;;  %v3647_v51 = vadd.f32 %v3639_v31, %v8825_v49  ;;  %vm12700_vm7 = vmmov %vm12699_vm3  ;;  %v3704_v26 = vpop.permute.xlu0 %3703 }
 0x296   :  { %v1414_v61 = vadd.f32 1.0, %v1406_v44  ;;  %v3648_v3 = vadd.f32 %v3640_v62, %v8820_v50  ;;  %vm12709_vm2 = vmmov %vm12699_vm3  ;;  %v12711_v62 = vld [vmem:[#allocation40_spill] sm:$0xff] }
 0x297   :  { %v1421_v42 = vmul.f32 %v1413_v63, %v1109_v29  ;;  %v12705_v63 = vld [vmem:[#allocation61_spill] sm:$0xff]  ;;  %vm12710_vm4 = vmmov %vm12709_vm2 }
 0x298   :  { %v1422_v58 = vmul.f32 %v1414_v61, %v1110_v37  ;;  %vm12716_vm13 = vmmov %vm12709_vm2 }
 0x299   :  { %1573 = vmatpush.msra.mxu2 %v1421_v42  ;;  %v3664_v47 = vpop.permute.xlu1 %3663  ;;  %v3596_v1 = vpop.permute.xlu2 %3595 }
 0x29a   :  { %1638 = vmatpush.msra.mxu3 %v1422_v58  ;;  %5650 = vmatmul.msk.f32.vlgmr.msra.gmra.mxu2 %vm1509_vm5, %v42_v40  ;;  %v3669_v2 = vsel %vm12699_vm3, %v8822_v11, %v3664_v47  ;;  %v3673_v30 = vsel %vm12700_vm7, %v3664_v47, %v8822_v11  ;;  %v3603_v49 = vsel %vm12691_vm1, %v3588_v14, %v3596_v1  ;;  %vm12717_vm3 = vmmov %vm12709_vm2  ;;  %v49_v58 = vld [vmem:[%s12255_s5 + $0x38] sm:$0xff] }
 0x29b   :  { %5666 = vmatmul.msk.f32.vlgmr.msra.gmra.mxu3 %vm1509_vm5, %v42_v40  ;;  %1491 = vperm.xlu1 %5832, %v70_v22   ;;  %v3679_v23 = vsel %vm7460_vm9, %v3669_v2, 0.0  ;;  %v3680_v21 = vsel %vm7478_vm12, %v3673_v30, 0.0  ;;  %v3607_v50 = vsel %vm12701_vm10, %v3596_v1, %v3588_v14  ;;  %v3612_v24 = vsel %vm7456_vm8, %v3603_v49, 0.0  ;;  %v65_v14 = vld [vmem:[%s12254_s6 + $0x38] sm:$0xff]  ;;  %v12712_v1 = vld [vmem:[#allocation34_spill] sm:$0xff]  ;;  %vm12720_vm7 = vmmov %vm12709_vm2 }
 0x29c   :  { %v3687_v41 = vmul.f32 %v3679_v23, %v12702_v33  ;;  %v3688_v4 = vmul.f32 %v3680_v21, %v12702_v33  ;;  %v3611_v11 = vsel %vm7443_vm6, %v3607_v50, 0.0  ;;  %v3620_v6 = vmul.f32 %v3612_v24, %v12703_v16  ;;  %1451 = vperm.xlu2 %5829, %v62_v27   ;;  %v71_v24 = vld [vmem:[%s12254_s6 + $0x68] sm:$0xff]  ;;  %vm12721_vm1 = vmmov %vm12709_vm2 }
 0x29d   :  { %v3619_v28 = vmul.f32 %v3611_v11, %v12703_v16  ;;  %v8934_v13 = vpop.permute.xlu0 %3761  ;;  %vm12706_vm8 = vcmp.lt.s32.totalorder %v7365_v19, 113  ;;  %v46_v11 = vld [vmem:[%s12255_s5 + $0x20] sm:$0xff]  ;;  %v12713_v16 = vld [vmem:[#allocation20_spill] sm:$0xff] }
 0x29e   :  { %v3695_v17 = vadd.f32 %v3687_v41, %v3647_v51  ;;  %v3696_v9 = vadd.f32 %v3688_v4, %v3648_v3  ;;  %v8919_v52 = vadd.f32 %v3620_v6, %v3580_v5  ;;  %v44_v5 = vld [vmem:[%s12255_s5 + $0x10] sm:$0xff]  ;;  %vm12707_vm11 = vmmov %vm12706_vm8  ;;  %v45_v3 = vld [vmem:[%s12255_s5 + $0x18] sm:$0xff]  ;;  %v3636_v6 = vmul.f32 %v7845_v39, %v12713_v16 }
 0x29f   :  { %v8917_v15 = vadd.f32 %v3619_v28, %v3579_v32  ;;  %v12704_v32 = vld [vmem:[#allocation15_spill] sm:$0xff]  ;;  %v68_v4 = vld [vmem:[%s12254_s6 + $0x50] sm:$0xff]  ;;  %v3635_v28 = vmul.f32 %v7900_v45, %v12713_v16  ;;  %vm12714_vm14 = vmmov %vm12706_vm8 }
 0x2a0   :  { %v3637_v29 = vmul.f32 %v7746_v38, %v12704_v32  ;;  %v3638_v44 = vmul.f32 %v12705_v63, %v12704_v32  ;;  %vm12715_vm0 = vmmov %vm12706_vm8 }
 0x2a1   :  { %v3654_v59 = vpop.permute.xlu1 %3653  ;;  %v8929_v57 = vpop.permute.xlu2 %3705  ;;  %vm12722_vm10 = vmmov %vm12715_vm0 }
 0x2a2   :  { %5651 = vmatmul.msk.f32.gmra.mxu2 %vm1509_vm5, %v43_v8  ;;  %v3645_v2 = vadd.f32 %v3637_v29, %v8853_v35  ;;  %v3646_v30 = vadd.f32 %v3638_v44, %v8856_v18  ;;  %v47_v44 = vld [vmem:[%s12255_s5 + $0x28] sm:$0xff] }
 0x2a3   :  { %5667 = vmatmul.msk.f32.gmra.mxu3 %vm1509_vm5, %v43_v8  ;;  %1506 = vperm.xlu1 %5832, %v73_v54  }
 0x2a4   :  { %1466 = vperm.xlu2 %5829, %v65_v14   ;;  %v12718_v14 = vld [vmem:[#allocation41_spill] sm:$0xff] }
 0x2a5   :  { %v3702_v41 = vpop.permute.xlu0 %3701 }
 0x2a9   :  { %v3712_v56 = vpop.permute.xlu1 %3711  ;;  %v3662_v42 = vpop.permute.xlu2 %3661 }
 0x2aa   :  { %5652 = vmatmul.msk.f32.gmra.mxu2 %vm1509_vm5, %v44_v5  ;;  %v3717_v37 = vsel %vm12706_vm8, %v3704_v26, %v3712_v56  ;;  %v3721_v61 = vsel %vm12707_vm11, %v3712_v56, %v3704_v26  ;;  %v3668_v38 = vsel %vm12709_vm2, %v3654_v59, %v3662_v42  ;;  %v3672_v31 = vsel %vm12710_vm4, %v3662_v42, %v3654_v59  ;;  %v12719_v42 = vld [vmem:[#allocation18_spill] sm:$0xff]  ;;  %vm12730_vm4 = vmmov %vm12715_vm0 }
 0x2ab   :  { %5668 = vmatmul.msk.f32.gmra.mxu3 %vm1509_vm5, %v44_v5  ;;  %v3727_v40 = vsel %vm7443_vm6, %v3717_v37, 0.0  ;;  %v3728_v43 = vsel %vm7611_vm15, %v3721_v61, 0.0  ;;  %v3677_v47 = vsel %vm7460_vm9, %v3668_v38, 0.0  ;;  %v3678_v51 = vsel %vm7478_vm12, %v3672_v31, 0.0 }
 0x2ac   :  { %v3735_v22 = vmul.f32 %v3727_v40, %v12711_v62  ;;  %v3736_v7 = vmul.f32 %v3728_v43, %v12711_v62  ;;  %v3685_v23 = vmul.f32 %v3677_v47, %v12712_v1  ;;  %v3686_v21 = vmul.f32 %v3678_v51, %v12712_v1  ;;  %1481 = vperm.xlu2 %5829, %v68_v4   ;;  %v12725_v1 = vld [vmem:[#allocation59_spill] sm:$0xff] }
 0x2ad   :  { %v3643_v37 = vadd.f32 %v3635_v28, %v8917_v15  ;;  %v3644_v61 = vadd.f32 %v3636_v6, %v8919_v52  ;;  %v3670_v15 = vsel %vm12720_vm7, %v8871_v0, %v8769_v20  ;;  %v3674_v47 = vsel %vm12721_vm1, %v8769_v20, %v8871_v0 }
 0x2ae   :  { %v3743_v49 = vadd.f32 %v3735_v22, %v3695_v17  ;;  %v3744_v50 = vadd.f32 %v3736_v7, %v3696_v9  ;;  %v3693_v26 = vadd.f32 %v3685_v23, %v3645_v2  ;;  %v3694_v33 = vadd.f32 %v3686_v21, %v3646_v30  ;;  %v3760_v17 = vpop.permute.xlu0 %3759  ;;  %v12727_v21 = vld [vmem:[#allocation60_spill] sm:$0xff] }
 0x2af   :  { %v3718_v51 = vsel %vm12722_vm10, %v8929_v57, %v8868_v55  ;;  %vm12723_vm8 = vcmp.lt.s32.totalorder %v7365_v19, 112  ;;  %vm12726_vm2 = vcmp.lt.s32.totalorder %v12725_v1, 240  ;;  %v3681_v4 = vsel %vm7460_vm9, %v3670_v15, 0.0 }
 0x2b0   :  { %vm12724_vm11 = vmmov %vm12723_vm8  ;;  %vm12738_vm7 = vcmp.lt.s32.totalorder %v7365_v19, 111 }
 0x2b1   :  { %v3652_v35 = vpop.permute.xlu1 %3651  ;;  %v8975_v18 = vpop.permute.xlu2 %3753  ;;  %vm12739_vm1 = vmmov %vm12738_vm7 }
 0x2b2   :  { %5653 = vmatmul.msk.f32.gmra.mxu2 %vm1509_vm5, %v45_v3  ;;  %vm12746_vm10 = vmmov %vm12723_vm8 }
 0x2b3   :  { %5669 = vmatmul.msk.f32.gmra.mxu3 %vm1509_vm5, %v45_v3 }
 0x2b4   :  { %1496 = vperm.xlu2 %5829, %v71_v24   ;;  %v3682_v24 = vsel %vm7478_vm12, %v3674_v47, 0.0 }
 0x2b6   :  { %v3700_v30 = vpop.permute.xlu0 %3699 }
 0x2b9   :  { %v3710_v8 = vpop.permute.xlu1 %3709  ;;  %v3660_v27 = vpop.permute.xlu2 %3659 }
 0x2ba   :  { %5654 = vmatmul.msk.f32.gmra.mxu2 %vm1509_vm5, %v46_v11  ;;  %v3716_v9 = vsel %vm12714_vm14, %v3702_v41, %v3710_v8  ;;  %v3720_v54 = vsel %vm12715_vm0, %v3710_v8, %v3702_v41  ;;  %v3667_v45 = vsel %vm12716_vm13, %v3652_v35, %v3660_v27  ;;  %v3671_v39 = vsel %vm12717_vm3, %v3660_v27, %v3652_v35  ;;  %v12729_v41 = vld [vmem:[#allocation2_spill] sm:$0xff]  ;;  %v48_v35 = vld [vmem:[%s12255_s5 + $0x30] sm:$0xff]  ;;  %vm12731_vm14 = vmmov %vm12723_vm8 }
 0x2bb   :  { %5670 = vmatmul.msk.f32.gmra.mxu3 %vm1509_vm5, %v46_v11  ;;  %v3725_v59 = vsel %vm7443_vm6, %v3716_v9, 0.0  ;;  %v3726_v5 = vsel %vm7611_vm15, %v3720_v54, 0.0  ;;  %v3675_v29 = vsel %vm7460_vm9, %v3667_v45, 0.0  ;;  %v3676_v63 = vsel %vm7478_vm12, %v3671_v39, 0.0  ;;  %v12732_v9 = vld [vmem:[#allocation21_spill] sm:$0xff]  ;;  %v12733_v54 = vld [vmem:[#allocation27_spill] sm:$0xff]  ;;  %vm12734_vm12 = vmmov %vm12723_vm8 }
 0x2bc   :  { %v3733_v56 = vmul.f32 %v3725_v59, %v12718_v14  ;;  %v3734_v32 = vmul.f32 %v3726_v5, %v12718_v14  ;;  %v3683_v40 = vmul.f32 %v3675_v29, %v12719_v42  ;;  %v3684_v43 = vmul.f32 %v3676_v63, %v12719_v42  ;;  %vm12735_vm0 = vmmov %vm12726_vm2  ;;  %v12742_v42 = vld [vmem:[#allocation36_spill] sm:$0xff] }
 0x2bd   :  { %v3722_v8 = vsel %vm12730_vm4, %v8868_v55, %v8929_v57  ;;  %v3770_v28 = vsel %vm12731_vm14, %v8934_v13, %v8975_v18  ;;  %v3689_v55 = vmul.f32 %v3681_v4, %v12732_v9  ;;  %v3690_v57 = vmul.f32 %v3682_v24, %v12732_v9  ;;  %vm12736_vm13 = vmmov %vm12730_vm4  ;;  %v50_v24 = vld [vmem:[%s12255_s5 + $0x40] sm:$0xff] }
 0x2be   :  { %v9014_v38 = vadd.f32 %v3733_v56, %v3693_v26  ;;  %v9016_v31 = vadd.f32 %v3734_v32, %v3694_v33  ;;  %v3691_v62 = vadd.f32 %v3683_v40, %v3643_v37  ;;  %v3692_v22 = vadd.f32 %v3684_v43, %v3644_v61  ;;  %v12728_v33 = vld [vmem:[#allocation26_spill] sm:$0xff]  ;;  %vm12737_vm3 = vmmov %vm12730_vm4  ;;  %v3758_v15 = vpop.permute.xlu0 %3757 }
 0x2bf   :  { %v3641_v20 = vmul.f32 %v12729_v41, %v12728_v33  ;;  %v3642_v0 = vmul.f32 %v7623_v12, %v12728_v33  ;;  %v3729_v12 = vsel %vm7443_vm6, %v3718_v51, 0.0  ;;  %v12740_v32 = vld [vmem:[#allocation42_spill] sm:$0xff]  ;;  %vm12752_vm4 = vmmov %vm12735_vm0 }
 0x2c0   :  { %v3737_v27 = vmul.f32 %v3729_v12, %v12733_v54  ;;  %v12741_v37 = vld [vmem:[#allocation46_spill] sm:$0xff]  ;;  %vm12754_vm14 = vmmov %vm12739_vm1 }
 0x2c1   :  { %v3802_v7 = vpop.permute.xlu1 %3801  ;;  %v3752_v52 = vpop.permute.xlu2 %3751  ;;  %v3649_v48 = vadd.f32 %v3641_v20, %v8568_v10  ;;  %v3766_v10 = vsel %vm12734_vm12, %v8975_v18, %v8934_v13  ;;  %vm12755_vm12 = vmmov %vm12739_vm1 }
 0x2c2   :  { %5655 = vmatmul.msk.f32.gmra.mxu2 %vm1509_vm5, %v47_v44  ;;  %v3765_v3 = vsel %vm12723_vm8, %v3752_v52, %v3760_v17  ;;  %v3769_v2 = vsel %vm12724_vm11, %v3760_v17, %v3752_v52  ;;  %v3650_v17 = vadd.f32 %v3642_v0, %v8571_v53  ;;  %v3778_v53 = vsel %vm12735_vm0, %v3770_v28, 0.0  ;;  %v12749_v28 = vld [vmem:[#allocation49_spill] sm:$0xff]  ;;  %vm12750_vm11 = vmmov %vm12746_vm10 }
 0x2c3   :  { %5671 = vmatmul.msk.f32.gmra.mxu3 %vm1509_vm5, %v47_v44  ;;  %v3776_v23 = vsel %vm12726_vm2, %v3769_v2, 0.0  ;;  %v3783_v26 = vmul.f32 %v3765_v3, %v12727_v21  ;;  %v3697_v36 = vadd.f32 %v3689_v55, %v3649_v48  ;;  %v3785_v61 = vmul.f32 %v3766_v10, %v12741_v37  ;;  %v12744_v3 = vld [vmem:[#allocation12_spill] sm:$0xff]  ;;  %vm12751_vm2 = vmmov %vm12746_vm10 }
 0x2c4   :  { %v3784_v11 = vmul.f32 %v3776_v23, %v12727_v21  ;;  %v3698_v43 = vadd.f32 %v3690_v57, %v3650_v17 }
 0x2c5   :  { %v9057_v16 = vadd.f32 %v3783_v26, %v3743_v49  ;;  %v3730_v49 = vsel %vm7611_vm15, %v3722_v8, 0.0  ;;  %v3745_v51 = vadd.f32 %v3737_v27, %v3697_v36 }
 0x2c6   :  { %v9063_v6 = vadd.f32 %v3784_v11, %v3744_v50  ;;  %v3738_v18 = vmul.f32 %v3730_v49, %v12733_v54  ;;  %v3748_v17 = vpop.permute.xlu0 %3747 }
 0x2c7   :  { %v3793_v21 = vadd.f32 %v3785_v61, %v3745_v51 }
 0x2c9   :  { %v3708_v59 = vpop.permute.xlu1 %3707  ;;  %v3810_v45 = vpop.permute.xlu2 %3809 }
 0x2ca   :  { %5656 = vmatmul.msk.f32.gmra.mxu2 %vm1509_vm5, %v48_v35  ;;  %v3715_v50 = vsel %vm12736_vm13, %v3700_v30, %v3708_v59  ;;  %v3719_v5 = vsel %vm12737_vm3, %v3708_v59, %v3700_v30  ;;  %v3814_v56 = vsel %vm12738_vm7, %v3802_v7, %v3810_v45  ;;  %v3818_v13 = vsel %vm12739_vm1, %v3810_v45, %v3802_v7  ;;  %v51_v45 = vld [vmem:[%s12255_s5 + $0x48] sm:$0xff] }
 0x2cb   :  { %5672 = vmatmul.msk.f32.gmra.mxu3 %vm1509_vm5, %v48_v35  ;;  %v3723_v39 = vsel %vm7443_vm6, %v3715_v50, 0.0  ;;  %v3724_v14 = vsel %vm7611_vm15, %v3719_v5, 0.0  ;;  %v3825_v44 = vsel %vm7460_vm9, %v3814_v56, 0.0  ;;  %vm12743_vm6 = vnez %v12742_v42  ;;  %vm12745_vm15 = vmmov %vm12723_vm8  ;;  %v12748_v35 = vld [vmem:[#allocation39_spill] sm:$0xff] }
 0x2cc   :  { %v3731_v29 = vmul.f32 %v3723_v39, %v12740_v32  ;;  %v3732_v63 = vmul.f32 %v3724_v14, %v12740_v32  ;;  %v3826_v40 = vsel %vm12743_vm6, %v3818_v13, 0.0  ;;  %v3786_v7 = vmul.f32 %v3778_v53, %v12741_v37  ;;  %vm12747_vm8 = vmmov %vm12735_vm0  ;;  %v12756_v32 = vld [vmem:[#allocation52_spill] sm:$0xff] }
 0x2cd   :  { %v3833_v2 = vmul.f32 %v3825_v44, %v12744_v3  ;;  %v3746_v30 = vadd.f32 %v3738_v18, %v3698_v43  ;;  %v3834_v23 = vmul.f32 %v3826_v40, %v12744_v3  ;;  %vm12757_vm0 = vmmov %vm12739_vm1 }
 0x2ce   :  { %v3739_v52 = vadd.f32 %v3731_v29, %v3691_v62  ;;  %v3740_v47 = vadd.f32 %v3732_v63, %v3692_v22  ;;  %v3806_v37 = vpop.permute.xlu0 %3805  ;;  %vm12758_vm13 = vmmov %vm12757_vm0 }
 0x2cf   :  { %v3794_v33 = vadd.f32 %v3786_v7, %v3746_v30  ;;  %v3841_v20 = vadd.f32 %v3833_v2, %v3793_v21  ;;  %vm12760_vm3 = vmmov %vm12757_vm0 }
 0x2d0   :  { %vm12761_vm7 = vmmov %vm12757_vm0 }
 0x2d1   :  { %v3800_v26 = vpop.permute.xlu1 %3799  ;;  %v3750_v41 = vpop.permute.xlu2 %3749  ;;  %v3842_v22 = vadd.f32 %v3834_v23, %v3794_v33  ;;  %v9121_v48 = vadd.f32 %v3841_v20, %v12749_v28 }
 0x2d2   :  { %5657 = vmatmul.msk.f32.gmra.mxu2 %vm1509_vm5, %v49_v58  ;;  %v3764_v0 = vsel %vm12745_vm15, %v3750_v41, %v3758_v15  ;;  %v3768_v62 = vsel %vm12746_vm10, %v3758_v15, %v3750_v41 }
 0x2d3   :  { %5673 = vmatmul.msk.f32.gmra.mxu3 %vm1509_vm5, %v49_v58  ;;  %v3774_v4 = vsel %vm12747_vm8, %v3768_v62, 0.0  ;;  %v3781_v11 = vmul.f32 %v3764_v0, %v12748_v35  ;;  %v9125_v9 = vadd.f32 %v3842_v22, %v12749_v28  ;;  %v9134_v27 = vmul.f32 0.70710677, %v9121_v48  ;;  %v53_v0 = vld [vmem:[%s12255_s5 + $0x58] sm:$0xff] }
 0x2d4   :  { %v3782_v8 = vmul.f32 %v3774_v4, %v12748_v35 }
 0x2d5   :  { %v3789_v12 = vadd.f32 %v3781_v11, %v9014_v38  ;;  %v9139_v10 = vmul.f32 0.70710677, %v9125_v9  ;;  %v9155_v18 = vand.u32 2147483647, %v9134_v27 }
 0x2d6   :  { %v3790_v55 = vadd.f32 %v3782_v8, %v9016_v31  ;;  %v12753_v31 = vld [vmem:[#allocation23_spill] sm:$0xff] }
 0x2d7   :  { %v9161_v44 = vand.u32 2147483647, %v9139_v10  ;;  %v3881_v40 = vmul.f32 0.3275911, %v9155_v18 }
 0x2d9   :  { %v3756_v57 = vpop.permute.xlu1 %3755  ;;  %v3808_v54 = vpop.permute.xlu2 %3807  ;;  %v3882_v7 = vmul.f32 0.3275911, %v9161_v44  ;;  %v3889_v2 = vadd.f32 1.0, %v3881_v40 }
 0x2da   :  { %5658 = vmatmul.msk.f32.gmra.mxu2 %vm1509_vm5, %v50_v24  ;;  %v3763_v49 = vsel %vm12750_vm11, %v3748_v17, %v3756_v57  ;;  %v3767_v38 = vsel %vm12751_vm2, %v3756_v57, %v3748_v17  ;;  %v3813_v5 = vsel %vm12754_vm14, %v3800_v26, %v3808_v54  ;;  %v3817_v39 = vsel %vm12755_vm12, %v3808_v54, %v3800_v26 }
 0x2db   :  { %5674 = vmatmul.msk.f32.gmra.mxu3 %vm1509_vm5, %v50_v24  ;;  %v3772_v59 = vsel %vm12752_vm4, %v3767_v38, 0.0  ;;  %v3779_v53 = vmul.f32 %v3763_v49, %v12753_v31  ;;  %v3823_v1 = vsel %vm7460_vm9, %v3813_v5, 0.0  ;;  %v3824_v13 = vsel %vm12743_vm6, %v3817_v39, 0.0  ;;  %v55_v38 = vld [vmem:[%s12255_s5 + $0x68] sm:$0xff] }
 0x2dc   :  { %v3780_v50 = vmul.f32 %v3772_v59, %v12753_v31  ;;  %v3831_v29 = vmul.f32 %v3823_v1, %v12756_v32  ;;  %v3832_v63 = vmul.f32 %v3824_v13, %v12756_v32  ;;  %v3890_v30 = vadd.f32 1.0, %v3882_v7  ;;  %v12762_v7 = vld [vmem:[#allocation47_spill] sm:$0xff] }
 0x2dd   :  { %v3787_v14 = vadd.f32 %v3779_v53, %v3739_v52  ;;  %5929 = vrcp.f32 %v3889_v2  ;;  %v3990_v57 = vand.u32 2147483647, %v3889_v2  ;;  %v4089_v39 = vsub.f32 0.0, %v9155_v18 }
 0x2de   :  { %v3788_v56 = vadd.f32 %v3780_v50, %v3740_v47  ;;  %v9165_v36 = vadd.f32 %v3831_v29, %v9057_v16  ;;  %v9168_v58 = vadd.f32 %v3832_v63, %v9063_v6  ;;  %v52_v16 = vld [vmem:[%s12255_s5 + $0x50] sm:$0xff]  ;;  %v12759_v47 = vld [vmem:[#allocation50_spill] sm:$0xff]  ;;  %5931 = vrcp.f32 %v3890_v30 }
 0x2df   :  { %v4007_v49 = vand.u32 2147483648, %v3890_v30  ;;  %v4005_v59 = vand.u32 2147483647, %v3890_v30  ;;  %vm4001_vm10 = vweird.f32 %v3890_v30  ;;  %vm3991_vm8 = vcmp.eq.f32.partialorder %v3990_v57, 8.507059e+37 }
 0x2e0   :  { %vm4137_vm4 = vcmp.lt.f32.partialorder %v9134_v27, 0.0  ;;  %vm4138_vm14 = vcmp.lt.f32.partialorder %v9139_v10, 0.0  ;;  %v6221_v10 = vld [vmem:[%s12249_s0] sm:$0xff] }
 0x2e1   :  { %v3798_v61 = vpop.permute.xlu2 %3797  ;;  %v3796_v33 = vpop.permute.xlu1 %3795  ;;  %vm4006_vm2 = vcmp.eq.f32.partialorder %v4005_v59, 8.507059e+37 }
 0x2e2   :  { %5659 = vmatmul.msk.f32.gmra.mxu2 %vm1509_vm5, %v51_v45  ;;  %v3812_v43 = vsel %vm12757_vm0, %v3798_v61, %v3806_v37  ;;  %v3816_v15 = vsel %vm12758_vm13, %v3806_v37, %v3798_v61  ;;  %v4097_v37 = vmul.f32 %v4089_v39, %v9155_v18  ;;  %v56_v61 = vld [vmem:[%s12255_s5 + $0x70] sm:$0xff] }
 0x2e3   :  { %5675 = vmatmul.msk.f32.gmra.mxu3 %vm1509_vm5, %v51_v45  ;;  %v3821_v52 = vsel %vm7460_vm9, %v3812_v43, 0.0  ;;  %v3822_v6 = vsel %vm12743_vm6, %v3816_v15, 0.0  ;;  %v5930_v11 = vpop.eup %5929  ;;  %v4008_v45 = vor.u32 1.1754944e-38, %v4007_v49  ;;  %v9227_v15 = vadd.f32 %v9165_v36, %v12762_v7 }
 0x2e4   :  { %v3829_v51 = vmul.f32 %v3821_v52, %v12759_v47  ;;  %v3830_v3 = vmul.f32 %v3822_v6, %v12759_v47  ;;  %v5932_v8 = vpop.eup %5931 }
 0x2e5   :  { %v3997_v28 = vmul.f32 %v5932_v8, %v3890_v30  ;;  %vm4002_vm1 = vweird.f32 %v5932_v8 }
 0x2e6   :  { %v9186_v23 = vadd.f32 %v3829_v51, %v3789_v12  ;;  %v9188_v21 = vadd.f32 %v3830_v3, %v3790_v55  ;;  %v3982_v12 = vmul.f32 %v5930_v11, %v3889_v2  ;;  %vm4003_vm11 = vmor %vm4001_vm10, %vm4002_vm1  ;;  %v4111_v51 = vmul.f32 1.442695, %v4097_v37 }
 0x2e7   :  { %v3998_v17 = vsub.f32 1.0, %v3997_v28 }
 0x2e8   :  { %v3983_v42 = vsub.f32 1.0, %v3982_v12  ;;  %v9235_v18 = vadd.f32 %v9186_v23, %v8225_v60  ;;  %5933 = vpow2.f32 %v4111_v51  ;;  %v3858_v51 = vmul.f32 0.5, %v9125_v9  ;;  %v6222_v9 = vld [vmem:[%s12249_s0 + $0x8] sm:$0xff] }
 0x2e9   :  { %v3804_v26 = vpop.permute.xlu2 %3803  ;;  %v3999_v54 = vmul.f32 %v5932_v8, %v3998_v17 }
 0x2ea   :  { %5660 = vmatmul.msk.f32.gmra.mxu2 %vm1509_vm5, %v52_v16  ;;  %v3811_v41 = vsel %vm12760_vm3, %v3796_v33, %v3804_v26  ;;  %v3815_v20 = vsel %vm12761_vm7, %v3804_v26, %v3796_v33  ;;  %v3984_v55 = vmul.f32 %v5930_v11, %v3983_v42  ;;  %12763 = vst [vmem:[#allocation54_spill] sm:$0xff] %v9235_v18  ;;  %v9253_v33 = vmul.f32 0.70710677, %v9235_v18 }
 0x2eb   :  { %5676 = vmatmul.msk.f32.gmra.mxu3 %vm1509_vm5, %v52_v16  ;;  %v3819_v62 = vsel %vm7460_vm9, %v3811_v41, 0.0  ;;  %v3820_v22 = vsel %vm12743_vm6, %v3815_v20, 0.0  ;;  %vm3987_vm9 = vweird.f32 %v5930_v11  ;;  %vm3986_vm6 = vweird.f32 %v3889_v2  ;;  %v57_v41 = vld [vmem:[%s12255_s5 + $0x78] sm:$0xff] }
 0x2ec   :  { %v3827_v4 = vmul.f32 %v3819_v62, %v7938_v46  ;;  %v3828_v35 = vmul.f32 %v3820_v22, %v7938_v46  ;;  %v3992_v46 = vand.u32 2147483648, %v3889_v2  ;;  %v3985_v31 = vadd.f32 %v5930_v11, %v3984_v55  ;;  %vm3988_vm15 = vmor %vm3986_vm6, %vm3987_vm9  ;;  %12766 = vst [vmem:[#allocation33_spill] sm:$0xff] %v9253_v33 }
 0x2ed   :  { %v4000_v50 = vadd.f32 %v5932_v8, %v3999_v54  ;;  %v9231_v16 = vadd.f32 %v9168_v58, %v12762_v7  ;;  %v9244_v58 = vmul.f32 0.70710677, %v9227_v15 }
 0x2ee   :  { %v3835_v19 = vadd.f32 %v3827_v4, %v3787_v14  ;;  %v9206_v24 = vadd.f32 %v3828_v35, %v3788_v56  ;;  %v3993_v53 = vor.u32 1.1754944e-38, %v3992_v46  ;;  %v3989_v5 = vsel %vm3988_vm15, %v5930_v11, %v3985_v31  ;;  %v5934_v17 = vpop.eup %5933 }
 0x2ef   :  { %v4004_v14 = vsel %vm4003_vm11, %v5932_v8, %v4000_v50  ;;  %v4090_v56 = vsub.f32 0.0, %v9161_v44  ;;  %v9250_v23 = vmul.f32 0.70710677, %v9231_v16  ;;  %v3869_v11 = vand.u32 2147483647, %v9253_v33 }
 0x2f0   :  { %v3994_v1 = vsel %vm3991_vm8, %v3993_v53, %v3989_v5  ;;  %v4009_v32 = vsel %vm4006_vm2, %v4008_v45, %v4004_v14  ;;  %v9247_v2 = vadd.f32 %v3835_v19, %v8258_v34 }
 0x2f1   :  { %v4017_v13 = vmul.f32 1.0614054, %v3994_v1  ;;  %v4018_v29 = vmul.f32 1.0614054, %v4009_v32  ;;  %v4098_v43 = vmul.f32 %v4090_v56, %v9161_v44  ;;  %v9240_v44 = vadd.f32 %v9188_v21, %v8225_v60 }
 0x2f2   :  { %5661 = vmatmul.msk.f32.gmra.mxu2 %vm1509_vm5, %v53_v0  ;;  %12765 = vst [vmem:[#allocation38_spill] sm:$0xff] %v9247_v2  ;;  %v9263_v62 = vmul.f32 0.70710677, %v9247_v2  ;;  %v3872_v4 = vand.u32 2147483647, %v9250_v23  ;;  %v4085_v37 = vsub.f32 0.0, %v3869_v11 }
 0x2f3   :  { %5677 = vmatmul.msk.f32.gmra.mxu3 %vm1509_vm5, %v53_v0  ;;  %v4025_v63 = vadd.f32 -1.4531521, %v4017_v13  ;;  %v4026_v40 = vadd.f32 -1.4531521, %v4018_v29  ;;  %12764 = vst [vmem:[#allocation53_spill] sm:$0xff] %v9240_v44  ;;  %v3857_v13 = vmul.f32 0.5, %v9121_v48 }
 0x2f4   :  { %v4113_v3 = vmul.f32 1.442695, %v4098_v43  ;;  %v9256_v21 = vmul.f32 0.70710677, %v9240_v44  ;;  %v3871_v0 = vand.u32 2147483647, %v9244_v58 }
 0x2f5   :  { %v4033_v52 = vmul.f32 %v4025_v63, %v3994_v1  ;;  %v4034_v6 = vmul.f32 %v4026_v40, %v4009_v32  ;;  %12768 = vst [vmem:[#allocation55_spill] sm:$0xff] %v9263_v62  ;;  %v3880_v46 = vmul.f32 0.3275911, %v3872_v4  ;;  %v3877_v49 = vmul.f32 0.3275911, %v3869_v11 }
 0x2f6   :  { %12767 = vst [vmem:[#allocation56_spill] sm:$0xff] %v9256_v21  ;;  %5935 = vpow2.f32 %v4113_v3  ;;  %v9269_v8 = vand.u32 2147483647, %v9256_v21  ;;  %v3879_v28 = vmul.f32 0.3275911, %v3871_v0  ;;  %v4087_v54 = vsub.f32 0.0, %v3871_v0 }
 0x2f7   :  { %v4041_v47 = vadd.f32 1.4214138, %v4033_v52  ;;  %v4042_v36 = vadd.f32 1.4214138, %v4034_v6  ;;  %v4088_v50 = vsub.f32 0.0, %v3872_v4  ;;  %v9280_v39 = vadd.f32 1.0, %v3880_v46 }
 0x2f8   :  { %v3878_v59 = vmul.f32 0.3275911, %v9269_v8  ;;  %v9276_v53 = vadd.f32 1.0, %v3879_v28  ;;  %v9287_v56 = vadd.f32 1.0, %v3877_v49  ;;  %v4095_v29 = vmul.f32 %v4087_v54, %v3871_v0 }
 0x2f9   :  { %v4049_v30 = vmul.f32 %v4041_v47, %v3994_v1  ;;  %v4050_v26 = vmul.f32 %v4042_v36, %v4009_v32  ;;  %v4096_v27 = vmul.f32 %v4088_v50, %v3872_v4  ;;  %v4093_v3 = vmul.f32 %v4085_v37, %v3869_v11 }
 0x2fa   :  { %5662 = vmatmul.msk.f32.gmra.mxu2 %vm1509_vm5, %v54_v25  ;;  %v9290_v63 = vadd.f32 1.0, %v3878_v59  ;;  %5937 = vrcp.f32 %v9276_v53 }
 0x2fb   :  { %5678 = vmatmul.msk.f32.gmra.mxu3 %vm1509_vm5, %v54_v25  ;;  %v4057_v60 = vadd.f32 -0.28449672, %v4049_v30  ;;  %v4058_v20 = vadd.f32 -0.28449672, %v4050_v26  ;;  %v9273_v25 = vand.u32 2147483647, %v9263_v62  ;;  %5939 = vrcp.f32 %v9280_v39 }
 0x2fc   :  { %v5936_v57 = vpop.eup %5935  ;;  %5941 = vrcp.f32 %v9287_v56  ;;  %v4109_v0 = vmul.f32 1.442695, %v4096_v27 }
 0x2fd   :  { %v4065_v22 = vmul.f32 %v4057_v60, %v3994_v1  ;;  %v4066_v35 = vmul.f32 %v4058_v20, %v4009_v32  ;;  %12769 = vst [vmem:[#allocation57_spill] sm:$0xff] %v9273_v25  ;;  %v3875_v5 = vmul.f32 0.3275911, %v9273_v25  ;;  %5943 = vrcp.f32 %v9290_v63 }
 0x2fe   :  { %v4107_v60 = vmul.f32 1.442695, %v4095_v29 }
 0x2ff   :  { %v4073_v19 = vadd.f32 0.2548296, %v4065_v22  ;;  %v4074_v12 = vadd.f32 0.2548296, %v4066_v35  ;;  %v9293_v40 = vadd.f32 1.0, %v3875_v5 }
 0x300   :  { %v9318_v35 = vpop.eup %5937 }
 0x301   :  { %v4081_v42 = vmul.f32 %v4073_v19, %v3994_v1  ;;  %v4082_v55 = vmul.f32 %v4074_v12, %v4009_v32  ;;  %v9284_v1 = vadd.f32 %v9206_v24, %v8258_v34  ;;  %12771 = vst [vmem:[#allocation8_spill] sm:$0xff] %v9293_v40  ;;  %v9295_v24 = vpop.permute.xlu0 %1431  ;;  %5945 = vrcp.f32 %v9293_v40  ;;  %v9322_v19 = vpop.eup %5939 }
 0x302   :  { %5663 = vmatmul.msk.f32.gmra.mxu2 %vm1509_vm5, %v55_v38  ;;  %12772 = vst [vmem:[#allocation11_spill] sm:$0xff] %v9295_v24  ;;  %v4103_v12 = vmul.f32 1.442695, %v4093_v3  ;;  %5947 = vpow2.f32 %v4107_v60  ;;  %v3952_v59 = vmul.f32 %v9318_v35, %v9276_v53 }
 0x303   :  { %5679 = vmatmul.msk.f32.gmra.mxu3 %vm1509_vm5, %v55_v38  ;;  %v4121_v38 = vmul.f32 %v5934_v17, %v4081_v42  ;;  %v4122_v31 = vmul.f32 %v5936_v57, %v4082_v55  ;;  %12770 = vst [vmem:[#allocation58_spill] sm:$0xff] %v9284_v1  ;;  %v9299_v43 = vmul.f32 0.70710677, %v9284_v1  ;;  %v9326_v42 = vpop.eup %5941  ;;  %5949 = vpow2.f32 %v4109_v0  ;;  %v9331_v55 = vpop.permute.xlu1 %1436 }
 0x304   :  { %v9329_v46 = vpop.eup %5943  ;;  %12775 = vst [vmem:[#allocation45_spill] sm:$0xff] %v9331_v55  ;;  %5951 = vpow2.f32 %v4103_v12  ;;  %v9348_v29 = vmul.f32 %v9326_v42, %v9287_v56 }
 0x305   :  { %v4129_v45 = vsub.f32 1.0, %v4121_v38  ;;  %v4130_v14 = vsub.f32 1.0, %v4122_v31  ;;  %12773 = vst [vmem:[#allocation14_spill] sm:$0xff] %v9299_v43  ;;  %v9313_v22 = vand.u32 2147483647, %v9299_v43  ;;  %v4086_v31 = vsub.f32 0.0, %v9269_v8 }
 0x306   :  { %v9352_v37 = vmul.f32 %v9329_v46, %v9290_v63 }
 0x307   :  { %v4145_v32 = vsub.f32 0.0, %v4129_v45  ;;  %12774 = vst [vmem:[#allocation37_spill] sm:$0xff] %v9313_v22  ;;  %v3876_v57 = vmul.f32 0.3275911, %v9313_v22  ;;  %v9335_v54 = vpop.eup %5945 }
 0x308   :  { %12776 = vst [vmem:[#allocation30_spill] sm:$0xff] %v9335_v54 }
 0x309   :  { %v4153_v34 = vsel %vm4137_vm4, %v4145_v32, %v4129_v45 }
 0x30a   :  { %5664 = vmatmul.msk.f32.gmra.mxu2 %vm1509_vm5, %v56_v61  ;;  %v4161_v7 = vadd.f32 1.0, %v4153_v34  ;;  %v9356_v34 = vadd.f32 1.0, %v3876_v57 }
 0x30b   :  { %5680 = vmatmul.msk.f32.gmra.mxu3 %vm1509_vm5, %v56_v61  ;;  %v4146_v61 = vsub.f32 0.0, %v4130_v14 }
 0x30c   :  { %v4169_v26 = vmul.f32 %v4161_v7, %v3857_v13  ;;  %12777 = vst [vmem:[#allocation24_spill] sm:$0xff] %v9356_v34 }
 0x30d   :  { %v4154_v52 = vsel %vm4138_vm14, %v4146_v61, %v4130_v14  ;;  %v9343_v14 = vmul.f32 %v9322_v19, %v9280_v39 }
 0x30e   :  { %v4162_v36 = vadd.f32 1.0, %v4154_v52  ;;  %4183 = vmatpush.msra.mxu0 %v4169_v26  ;;  %5778 = vmatpush.msrb.mxu2 %v4169_v26  ;;  %v6223_v52 = vld [vmem:[%s12249_s0 + $0x10] sm:$0xff]  ;;  %v3953_v26 = vsub.f32 1.0, %v3952_v59 }
 0x310   :  { %v4170_v20 = vmul.f32 %v4162_v36, %v3858_v51  ;;  %v9372_v51 = vmul.f32 %v4086_v31, %v9269_v8  ;;  %v6224_v36 = vld [vmem:[%s12249_s0 + $0x18] sm:$0xff] }
 0x312   :  { %5665 = vmatmul.msk.f32.gmra.mxu2 %vm1509_vm5, %v57_v41  ;;  %4248 = vmatpush.msra.mxu1 %v4170_v20 }
 0x313   :  { %5681 = vmatmul.msk.f32.gmra.mxu3 %vm1509_vm5, %v57_v41 }
 0x314   :  { %5782 = vmatpush.msrb.mxu3 %v4170_v20 }
 0x31d   :  { %v1575_v48 = vpop.f32.mrf.mxu2 }
 0x31e   :  { %v1576_v6 = vadd.f32 %v1575_v48, %v9295_v24  ;;  %v1640_v47 = vpop.f32.mrf.mxu3  ;;  %v9360_v48 = vmul.f32 %v9335_v54, %v9293_v40 }
 0x31f   :  { %v1641_v30 = vadd.f32 %v1640_v47, %v9295_v24  ;;  %v9369_v47 = vpop.eup %5947 }
 0x320   :  { %v1688_v41 = vadd.f32 %v6221_v10, %v1576_v6  ;;  %12778 = vst [vmem:[#allocation62_spill] sm:$0xff] %v9360_v48 }
 0x321   :  { %v1689_v4 = vadd.f32 %v6222_v9, %v1641_v30  ;;  %v9380_v30 = vpop.eup %5949 }
 0x322   :  { %v9320_v11 = vmul.f32 0.70710677, %v1688_v41  ;;  %v9387_v12 = vpop.eup %5951  ;;  %v9395_v31 = vmul.f32 0.5, %v1688_v41 }
 0x323   :  { %v9324_v28 = vmul.f32 0.70710677, %v1689_v4  ;;  %12779 = vst [vmem:[#allocation31_spill] sm:$0xff] %v9387_v12 }
 0x324   :  { %v1784_v17 = vand.u32 2147483647, %v9320_v11 }
 0x325   :  { %v1785_v49 = vand.u32 2147483647, %v9324_v28  ;;  %v1578_v38 = vpop.f32.mrf.mxu2 }
 0x326   :  { %v1816_v50 = vmul.f32 0.3275911, %v1784_v17  ;;  %v1579_v5 = vadd.f32 %v1578_v38, %v9331_v55  ;;  %v1643_v45 = vpop.f32.mrf.mxu3  ;;  %v2648_v27 = vsub.f32 0.0, %v1784_v17 }
 0x327   :  { %v1817_v13 = vmul.f32 0.3275911, %v1785_v49  ;;  %v1644_v32 = vadd.f32 %v1643_v45, %v9331_v55  ;;  %v2649_v10 = vsub.f32 0.0, %v1785_v49  ;;  %v9404_v45 = vmul.f32 0.5, %v1689_v4 }
 0x328   :  { %v9354_v61 = vadd.f32 1.0, %v1816_v50  ;;  %v9367_v6 = vadd.f32 %v6223_v52, %v1579_v5  ;;  %v2680_v9 = vmul.f32 %v2648_v27, %v1784_v17  ;;  %v9402_v17 = vmul.f32 0.5, %v9227_v15  ;;  %v9413_v15 = vpop.permute.xlu2 %1441 }
 0x329   :  { %v9362_v7 = vadd.f32 1.0, %v1817_v13  ;;  %v9378_v3 = vadd.f32 %v6224_v36, %v1644_v32  ;;  %v2681_v13 = vmul.f32 %v2649_v10, %v1785_v49  ;;  %v9408_v52 = vmul.f32 %v9318_v35, %v3953_v26  ;;  %12780 = vst [vmem:[#allocation43_spill] sm:$0xff] %v9413_v15 }
 0x32a   :  { %5953 = vrcp.f32 %v9354_v61  ;;  %v1889_v38 = vand.u32 2147483647, %v9354_v61  ;;  %v9393_v59 = vmul.f32 0.70710677, %v9367_v6  ;;  %v1891_v50 = vand.u32 2147483648, %v9354_v61 }
 0x32b   :  { %5955 = vrcp.f32 %v9362_v7  ;;  %v9399_v5 = vmul.f32 0.70710677, %v9378_v3  ;;  %vm1885_vm12 = vweird.f32 %v9354_v61  ;;  %v2712_v41 = vmul.f32 1.442695, %v2680_v9 }
 0x32c   :  { %5957 = vrcp.f32 %v9356_v34  ;;  %v1786_v32 = vand.u32 2147483647, %v9393_v59  ;;  %vm1900_vm0 = vweird.f32 %v9362_v7  ;;  %vm9416_vm13 = vcmp.eq.f32.partialorder %v1889_v38, 8.507059e+37 }
 0x32d   :  { %v1581_v27 = vpop.f32.mrf.mxu2  ;;  %v1787_v0 = vand.u32 2147483647, %v9399_v5  ;;  %v1904_v26 = vand.u32 2147483647, %v9362_v7  ;;  %v1892_v20 = vor.u32 1.1754944e-38, %v1891_v50  ;;  %v1906_v1 = vand.u32 2147483648, %v9362_v7 }
 0x32e   :  { %v1818_v10 = vmul.f32 0.3275911, %v1786_v32  ;;  %v1646_v8 = vpop.f32.mrf.mxu3  ;;  %v1582_v55 = vadd.f32 %v1581_v27, %v9413_v15  ;;  %v2714_v2 = vmul.f32 1.442695, %v2681_v13  ;;  %v2650_v44 = vsub.f32 0.0, %v1786_v32  ;;  %v6225_v13 = vld [vmem:[%s12249_s0 + $0x20] sm:$0xff] }
 0x32f   :  { %v1819_v60 = vmul.f32 0.3275911, %v1787_v0  ;;  %v1647_v18 = vadd.f32 %v1646_v8, %v9413_v15  ;;  %v2651_v33 = vsub.f32 0.0, %v1787_v0  ;;  %vm9438_vm9 = vcmp.eq.f32.partialorder %v1904_v26, 8.507059e+37 }
 0x330   :  { %v5954_v36 = vpop.eup %5953  ;;  %v9426_v38 = vadd.f32 1.0, %v1818_v10  ;;  %v1907_v8 = vor.u32 1.1754944e-38, %v1906_v1 }
 0x331   :  { %v5956_v57 = vpop.eup %5955  ;;  %v1881_v4 = vmul.f32 %v5954_v36, %v9354_v61  ;;  %v9428_v21 = vadd.f32 1.0, %v1819_v60  ;;  %vm1886_vm3 = vweird.f32 %v5954_v36  ;;  %v2683_v26 = vmul.f32 %v2651_v33, %v1787_v0 }
 0x332   :  { %v1896_v9 = vmul.f32 %v5956_v57, %v9362_v7  ;;  %v9423_v24 = vpop.eup %5957  ;;  %5959 = vrcp.f32 %v9426_v38  ;;  %vm1901_vm7 = vweird.f32 %v5956_v57  ;;  %vm1887_vm1 = vmor %vm1885_vm12, %vm1886_vm3  ;;  %vm1915_vm15 = vweird.f32 %v9426_v38 }
 0x333   :  { %12783 = vst [vmem:[#allocation63_spill] sm:$0xff] %v9423_v24  ;;  %v1882_v43 = vsub.f32 1.0, %v1881_v4  ;;  %5961 = vrcp.f32 %v9428_v21  ;;  %v9436_v4 = vadd.f32 %v6225_v13, %v1582_v55  ;;  %vm1902_vm6 = vmor %vm1900_vm0, %vm1901_vm7  ;;  %v1919_v55 = vand.u32 2147483647, %v9426_v38 }
 0x334   :  { %v1897_v62 = vsub.f32 1.0, %v1896_v9  ;;  %5963 = vpow2.f32 %v2712_v41  ;;  %v2682_v9 = vmul.f32 %v2650_v44, %v1786_v32  ;;  %v9451_v41 = vmul.f32 0.5, %v9378_v3  ;;  %v6226_v44 = vld [vmem:[%s12249_s0 + $0x28] sm:$0xff] }
 0x335   :  { %v1883_v50 = vmul.f32 %v5954_v36, %v1882_v43  ;;  %v9443_v43 = vmul.f32 0.5, %v9367_v6  ;;  %5965 = vpow2.f32 %v2714_v2  ;;  %v9463_v2 = vadd.f32 %v6226_v44, %v1647_v18  ;;  %v1584_v25 = vpop.f32.mrf.mxu2 }
 0x336   :  { %v1898_v27 = vmul.f32 %v5956_v57, %v1897_v62  ;;  %v1921_v3 = vand.u32 2147483648, %v9426_v38  ;;  %v2716_v32 = vmul.f32 1.442695, %v2682_v9  ;;  %vm9477_vm10 = vcmp.eq.f32.partialorder %v1919_v55, 8.507059e+37 }
 0x337   :  { %v1884_v10 = vadd.f32 %v5954_v36, %v1883_v50  ;;  %v9458_v50 = vmul.f32 0.70710677, %v9436_v4  ;;  %v1934_v13 = vand.u32 2147483647, %v9428_v21  ;;  %vm1930_vm8 = vweird.f32 %v9428_v21 }
 0x338   :  { %v1899_v62 = vadd.f32 %v5956_v57, %v1898_v27  ;;  %v5960_v1 = vpop.eup %5959  ;;  %v1936_v44 = vand.u32 2147483648, %v9428_v21  ;;  %v9489_v55 = vmul.f32 0.70710677, %v9463_v2  ;;  %vm2840_vm0 = vcmp.lt.f32.partialorder %v9320_v11, 0.0 }
 0x339   :  { %v1888_v15 = vsel %vm1887_vm1, %v5954_v36, %v1884_v10  ;;  %v1788_v18 = vand.u32 2147483647, %v9458_v50  ;;  %vm1916_vm11 = vweird.f32 %v5960_v1  ;;  %vm1935_vm14 = vcmp.eq.f32.partialorder %v1934_v13, 8.507059e+37 }
 0x33a   :  { %v9455_v6 = vsel %vm9416_vm13, %v1892_v20, %v1888_v15  ;;  %v1903_v61 = vsel %vm1902_vm6, %v5956_v57, %v1899_v62  ;;  %v5962_v20 = vpop.eup %5961  ;;  %v1911_v57 = vmul.f32 %v5960_v1, %v9426_v38  ;;  %vm1917_vm4 = vmor %vm1915_vm15, %vm1916_vm11  ;;  %vm2841_vm13 = vcmp.lt.f32.partialorder %v9324_v28, 0.0 }
 0x33b   :  { %v2360_v7 = vmul.f32 1.0614054, %v9455_v6  ;;  %v9468_v33 = vsel %vm9438_vm9, %v1907_v8, %v1903_v61  ;;  %v9475_v36 = vpop.eup %5963  ;;  %v1926_v27 = vmul.f32 %v5962_v20, %v9428_v21  ;;  %v1820_v8 = vmul.f32 0.3275911, %v1788_v18 }
 0x33c   :  { %v2361_v0 = vmul.f32 1.0614054, %v9468_v33  ;;  %v9483_v10 = vpop.eup %5965  ;;  %v1912_v62 = vsub.f32 1.0, %v1911_v57  ;;  %vm1931_vm2 = vweird.f32 %v5962_v20  ;;  %v9495_v57 = vand.u32 2147483647, %v9489_v55 }
 0x33d   :  { %v2392_v15 = vadd.f32 -1.4531521, %v2360_v7  ;;  %v1927_v61 = vsub.f32 1.0, %v1926_v27  ;;  %v9492_v12 = vadd.f32 1.0, %v1820_v8  ;;  %v1922_v27 = vor.u32 1.1754944e-38, %v1921_v3  ;;  %vm1932_vm12 = vmor %vm1930_vm8, %vm1931_vm2 }
 0x33e   :  { %v2393_v60 = vadd.f32 -1.4531521, %v2361_v0  ;;  %v1913_v22 = vmul.f32 %v5960_v1, %v1912_v62  ;;  %v2718_v62 = vmul.f32 1.442695, %v2683_v26  ;;  %v2652_v38 = vsub.f32 0.0, %v1788_v18 }
 0x33f   :  { %v2424_v9 = vmul.f32 %v2392_v15, %v9455_v6  ;;  %v1928_v0 = vmul.f32 %v5962_v20, %v1927_v61  ;;  %5967 = vrcp.f32 %v9492_v12  ;;  %v1937_v61 = vor.u32 1.1754944e-38, %v1936_v44 }
 0x340   :  { %v2425_v7 = vmul.f32 %v2393_v60, %v9468_v33  ;;  %v1914_v15 = vadd.f32 %v5960_v1, %v1913_v22  ;;  %v1821_v22 = vmul.f32 0.3275911, %v9495_v57  ;;  %5969 = vpow2.f32 %v2716_v32 }
 0x341   :  { %v2456_v40 = vadd.f32 1.4214138, %v2424_v9  ;;  %v1929_v60 = vadd.f32 %v5962_v20, %v1928_v0  ;;  %5971 = vpow2.f32 %v2718_v62  ;;  %vm1945_vm3 = vweird.f32 %v9492_v12 }
 0x342   :  { %v2457_v24 = vadd.f32 1.4214138, %v2425_v7  ;;  %v1918_v9 = vsel %vm1917_vm4, %v5960_v1, %v1914_v15  ;;  %v9512_v1 = vpop.permute.xlu1 %1446  ;;  %v1949_v15 = vand.u32 2147483647, %v9492_v12  ;;  %vm2843_vm2 = vcmp.lt.f32.partialorder %v9399_v5, 0.0 }
 0x343   :  { %v2488_v34 = vmul.f32 %v2456_v40, %v9455_v6  ;;  %v9507_v7 = vsel %vm9477_vm10, %v1922_v27, %v1918_v9  ;;  %v1933_v40 = vsel %vm1932_vm12, %v5962_v20, %v1929_v60  ;;  %v1585_v27 = vadd.f32 %v1584_v25, %v9512_v1 }
 0x344   :  { %v2489_v8 = vmul.f32 %v2457_v24, %v9468_v33  ;;  %v2362_v26 = vmul.f32 1.0614054, %v9507_v7  ;;  %v9510_v24 = vsel %vm1935_vm14, %v1937_v61, %v1933_v40  ;;  %v9522_v9 = vmul.f32 %v2652_v38, %v1788_v18 }
 0x345   :  { %v2520_v3 = vadd.f32 -0.28449672, %v2488_v34  ;;  %v2363_v13 = vmul.f32 1.0614054, %v9510_v24  ;;  %v9516_v34 = vadd.f32 1.0, %v1821_v22  ;;  %v5968_v49 = vpop.eup %5967  ;;  %v1951_v22 = vand.u32 2147483648, %v9492_v12 }
 0x346   :  { %v2521_v0 = vadd.f32 -0.28449672, %v2489_v8  ;;  %v2394_v44 = vadd.f32 -1.4531521, %v2362_v26  ;;  %v1941_v8 = vmul.f32 %v5968_v49, %v9492_v12  ;;  %v5970_v18 = vpop.eup %5969  ;;  %vm9533_vm7 = vcmp.eq.f32.partialorder %v1949_v15, 8.507059e+37 }
 0x347   :  { %v2552_v21 = vmul.f32 %v2520_v3, %v9455_v6  ;;  %v2395_v60 = vadd.f32 -1.4531521, %v2363_v13  ;;  %5973 = vrcp.f32 %v9516_v34  ;;  %v5972_v13 = vpop.eup %5971  ;;  %vm1946_vm9 = vweird.f32 %v5968_v49 }
 0x348   :  { %v2553_v20 = vmul.f32 %v2521_v0, %v9468_v33  ;;  %v2426_v62 = vmul.f32 %v2394_v44, %v9507_v7  ;;  %v1942_v40 = vsub.f32 1.0, %v1941_v8  ;;  %v1952_v15 = vor.u32 1.1754944e-38, %v1951_v22  ;;  %vm1947_vm6 = vmor %vm1945_vm3, %vm1946_vm9 }
 0x349   :  { %v2584_v32 = vadd.f32 0.2548296, %v2552_v21  ;;  %v2427_v25 = vmul.f32 %v2395_v60, %v9510_v24  ;;  %v6227_v21 = vld [vmem:[%s12249_s0 + $0x30] sm:$0xff]  ;;  %v2653_v8 = vsub.f32 0.0, %v9495_v57  ;;  %vm1960_vm1 = vweird.f32 %v9516_v34 }
 0x34a   :  { %v2585_v61 = vadd.f32 0.2548296, %v2553_v20  ;;  %v2458_v0 = vadd.f32 1.4214138, %v2426_v62  ;;  %vm2842_vm10 = vcmp.lt.f32.partialorder %v9393_v59, 0.0  ;;  %vm3957_vm4 = vweird.f32 %v9318_v35 }
 0x34b   :  { %v2616_v3 = vmul.f32 %v2584_v32, %v9455_v6  ;;  %v9540_v6 = vadd.f32 %v6227_v21, %v1585_v27  ;;  %v2459_v44 = vadd.f32 1.4214138, %v2427_v25  ;;  %v1943_v32 = vmul.f32 %v5968_v49, %v1942_v40 }
 0x34c   :  { %v2617_v38 = vmul.f32 %v2585_v61, %v9468_v33  ;;  %v2490_v33 = vmul.f32 %v2458_v0, %v9507_v7  ;;  %v1964_v27 = vand.u32 2147483647, %v9516_v34  ;;  %vm3956_vm12 = vweird.f32 %v9276_v53 }
 0x34d   :  { %v2776_v20 = vmul.f32 %v9475_v36, %v2616_v3  ;;  %v2491_v62 = vmul.f32 %v2459_v44, %v9510_v24  ;;  %v1944_v54 = vadd.f32 %v5968_v49, %v1943_v32  ;;  %v5974_v21 = vpop.eup %5973  ;;  %v9553_v22 = vmul.f32 0.70710677, %v9540_v6 }
 0x34e   :  { %v2777_v60 = vmul.f32 %v9483_v10, %v2617_v38  ;;  %v2522_v3 = vadd.f32 -0.28449672, %v2490_v33  ;;  %v1966_v10 = vand.u32 2147483648, %v9516_v34  ;;  %v1956_v0 = vmul.f32 %v5974_v21, %v9516_v34 }
 0x34f   :  { %v2808_v61 = vsub.f32 1.0, %v2776_v20  ;;  %v2523_v40 = vadd.f32 -0.28449672, %v2491_v62  ;;  %v1948_v38 = vsel %vm1947_vm6, %v5968_v49, %v1944_v54  ;;  %vm1961_vm15 = vweird.f32 %v5974_v21 }
 0x350   :  { %v2809_v36 = vsub.f32 1.0, %v2777_v60  ;;  %v2554_v44 = vmul.f32 %v2522_v3, %v9507_v7  ;;  %v9559_v32 = vsel %vm9533_vm7, %v1952_v15, %v1948_v38  ;;  %v1957_v48 = vsub.f32 1.0, %v1956_v0  ;;  %vm1962_vm8 = vmor %vm1960_vm1, %vm1961_vm15 }
 0x351   :  { %v2872_v25 = vsub.f32 0.0, %v2808_v61  ;;  %v2555_v60 = vmul.f32 %v2523_v40, %v9510_v24  ;;  %v2364_v33 = vmul.f32 1.0614054, %v9559_v32  ;;  %v9568_v3 = vand.u32 2147483647, %v9553_v22  ;;  %vm9682_vm1 = vmor %vm3956_vm12, %vm3957_vm4 }
 0x352   :  { %v2873_v20 = vsub.f32 0.0, %v2809_v36  ;;  %v2586_v49 = vadd.f32 0.2548296, %v2554_v44  ;;  %v1958_v11 = vmul.f32 %v5974_v21, %v1957_v48  ;;  %v2685_v0 = vmul.f32 %v2653_v8, %v9495_v57 }
 0x353   :  { %v2904_v12 = vsel %vm2840_vm0, %v2872_v25, %v2808_v61  ;;  %v2587_v15 = vadd.f32 0.2548296, %v2555_v60  ;;  %v2396_v38 = vadd.f32 -1.4531521, %v2364_v33  ;;  %v1649_v61 = vpop.f32.mrf.mxu3  ;;  %v1822_v28 = vmul.f32 0.3275911, %v9568_v3 }
 0x354   :  { %v2936_v62 = vadd.f32 1.0, %v2904_v12  ;;  %v2905_v54 = vsel %vm2841_vm13, %v2873_v20, %v2809_v36  ;;  %v2618_v40 = vmul.f32 %v2586_v49, %v9507_v7  ;;  %v1959_v12 = vadd.f32 %v5974_v21, %v1958_v11  ;;  %v1587_v11 = vpop.f32.mrf.mxu2 }
 0x355   :  { %v2937_v26 = vadd.f32 1.0, %v2905_v54  ;;  %v2619_v20 = vmul.f32 %v2587_v15, %v9510_v24  ;;  %v2428_v44 = vmul.f32 %v2396_v38, %v9559_v32  ;;  %vm1965_vm11 = vcmp.eq.f32.partialorder %v1964_v27, 8.507059e+37 }
 0x356   :  { %v2968_v25 = vmul.f32 %v2936_v62, %v9395_v31  ;;  %v2778_v48 = vmul.f32 %v5970_v18, %v2618_v40  ;;  %v1967_v31 = vor.u32 1.1754944e-38, %v1966_v10  ;;  %v9584_v57 = vadd.f32 1.0, %v1822_v28 }
 0x357   :  { %v2969_v36 = vmul.f32 %v2937_v26, %v9404_v45  ;;  %v2779_v45 = vmul.f32 %v5972_v13, %v2619_v20  ;;  %v2460_v7 = vadd.f32 1.4214138, %v2428_v44  ;;  %v1963_v24 = vsel %vm1962_vm8, %v5974_v21, %v1959_v12  ;;  %v6228_v21 = vld [vmem:[%s12249_s0 + $0x38] sm:$0xff] }
 0x358   :  { %3000 = vst [vmem:[%s12256_s7] sm:$0xff] %v2968_v25  ;;  %v1650_v8 = vadd.f32 %v1649_v61, %v9512_v1  ;;  %v2810_v60 = vsub.f32 1.0, %v2778_v48  ;;  %v2720_v18 = vmul.f32 1.442695, %v9522_v9  ;;  %v9591_v33 = vsel %vm1965_vm11, %v1967_v31, %v1963_v24 }
 0x359   :  { %3001 = vst [vmem:[%s12256_s7 + $0x8] sm:$0xff] %v2969_v36  ;;  %5975 = vrcp.f32 %v9584_v57  ;;  %v2811_v34 = vsub.f32 1.0, %v2779_v45  ;;  %v2492_v27 = vmul.f32 %v2460_v7, %v9559_v32  ;;  %v2365_v10 = vmul.f32 1.0614054, %v9591_v33 }
 0x35a   :  { %v2874_v62 = vsub.f32 0.0, %v2810_v60  ;;  %v2722_v13 = vmul.f32 1.442695, %v2685_v0  ;;  %v9600_v54 = vadd.f32 %v6228_v21, %v1650_v8  ;;  %v9604_v9 = vadd.f32 %v9318_v35, %v9408_v52  ;;  %v9615_v0 = vpop.permute.xlu2 %1451 }
 0x35b   :  { %v2875_v49 = vsub.f32 0.0, %v2811_v34  ;;  %v9607_v26 = vmul.f32 0.5, %v9436_v4  ;;  %v2524_v15 = vadd.f32 -0.28449672, %v2492_v27  ;;  %v2397_v38 = vadd.f32 -1.4531521, %v2365_v10  ;;  %v1652_v20 = vpop.f32.mrf.mxu3 }
 0x35c   :  { %v2906_v61 = vsel %vm2842_vm10, %v2874_v62, %v2810_v60  ;;  %5977 = vpow2.f32 %v2720_v18  ;;  %v9612_v25 = vmul.f32 0.5, %v9463_v2  ;;  %v2654_v40 = vsub.f32 0.0, %v9568_v3  ;;  %v6229_v27 = vld [vmem:[%s12249_s0 + $0x40] sm:$0xff] }
 0x35d   :  { %v2938_v52 = vadd.f32 1.0, %v2906_v61  ;;  %v2907_v28 = vsel %vm2843_vm2, %v2875_v49, %v2811_v34  ;;  %v2556_v4 = vmul.f32 %v2524_v15, %v9559_v32  ;;  %v2429_v36 = vmul.f32 %v2397_v38, %v9591_v33 }
 0x35e   :  { %v2939_v59 = vadd.f32 1.0, %v2907_v28  ;;  %5979 = vpow2.f32 %v2722_v13  ;;  %v9622_v12 = vmul.f32 0.70710677, %v9600_v54  ;;  %v1588_v2 = vadd.f32 %v1587_v11, %v9615_v0 }
 0x35f   :  { %v5976_v44 = vpop.eup %5975  ;;  %v2970_v48 = vmul.f32 %v2938_v52, %v9443_v43  ;;  %v2588_v31 = vadd.f32 0.2548296, %v2556_v4  ;;  %v2461_v45 = vadd.f32 1.4214138, %v2429_v36  ;;  %v2686_v24 = vmul.f32 %v2654_v40, %v9568_v3  ;;  %v6230_v40 = vld [vmem:[%s12249_s0 + $0x48] sm:$0xff] }
 0x360   :  { %v1971_v5 = vmul.f32 %v5976_v44, %v9584_v57  ;;  %v2971_v7 = vmul.f32 %v2939_v59, %v9451_v41  ;;  %v1791_v8 = vand.u32 2147483647, %v9622_v12  ;;  %v1653_v60 = vadd.f32 %v1652_v20, %v9615_v0 }
 0x361   :  { %3002 = vst [vmem:[%s12256_s7 + $0x10] sm:$0xff] %v2970_v48  ;;  %v2620_v18 = vmul.f32 %v2588_v31, %v9559_v32  ;;  %v2493_v43 = vmul.f32 %v2461_v45, %v9591_v33  ;;  %v1696_v41 = vadd.f32 %v6229_v27, %v1588_v2  ;;  %vm1976_vm14 = vweird.f32 %v5976_v44 }
 0x362   :  { %v1972_v34 = vsub.f32 1.0, %v1971_v5  ;;  %v5978_v3 = vpop.eup %5977  ;;  %3003 = vst [vmem:[%s12256_s7 + $0x18] sm:$0xff] %v2971_v7  ;;  %v1979_v10 = vand.u32 2147483647, %v9584_v57  ;;  %v1981_v32 = vand.u32 2147483648, %v9584_v57  ;;  %v2655_v15 = vsub.f32 0.0, %v1791_v8 }
 0x363   :  { %v1823_v62 = vmul.f32 0.3275911, %v1791_v8  ;;  %v2780_v13 = vmul.f32 %v5978_v3, %v2620_v18  ;;  %v2525_v21 = vadd.f32 -0.28449672, %v2493_v43  ;;  %vm1975_vm0 = vweird.f32 %v9584_v57 }
 0x364   :  { %v1973_v49 = vmul.f32 %v5976_v44, %v1972_v34  ;;  %v5980_v38 = vpop.eup %5979  ;;  %v9649_v61 = vmul.f32 0.70710677, %v1696_v41  ;;  %v1697_v52 = vadd.f32 %v6230_v40, %v1653_v60  ;;  %v2724_v20 = vmul.f32 1.442695, %v2686_v24  ;;  %vm1977_vm3 = vmor %vm1975_vm0, %vm1976_vm14 }
 0x365   :  { %v9647_v11 = vadd.f32 1.0, %v1823_v62  ;;  %v2812_v28 = vsub.f32 1.0, %v2780_v13  ;;  %v2557_v4 = vmul.f32 %v2525_v21, %v9591_v33  ;;  %vm2844_vm13 = vcmp.lt.f32.partialorder %v9458_v50, 0.0 }
 0x366   :  { %v1974_v36 = vadd.f32 %v5976_v44, %v1973_v49  ;;  %vm1980_vm7 = vcmp.eq.f32.partialorder %v1979_v10, 8.507059e+37  ;;  %v1982_v57 = vor.u32 1.1754944e-38, %v1981_v32  ;;  %v2687_v31 = vmul.f32 %v2655_v15, %v1791_v8 }
 0x367   :  { %5981 = vrcp.f32 %v9647_v11  ;;  %v2876_v59 = vsub.f32 0.0, %v2812_v28  ;;  %v2589_v2 = vadd.f32 0.2548296, %v2557_v4  ;;  %vm2845_vm9 = vcmp.lt.f32.partialorder %v9489_v55, 0.0 }
 0x368   :  { %v1978_v48 = vsel %vm1977_vm3, %v5976_v44, %v1974_v36  ;;  %v9660_v45 = vmul.f32 0.5, %v9540_v6  ;;  %v1792_v7 = vand.u32 2147483647, %v9649_v61  ;;  %v9665_v50 = vmul.f32 0.70710677, %v1697_v52 }
 0x369   :  { %v9662_v5 = vsel %vm1980_vm7, %v1982_v57, %v1978_v48  ;;  %v2908_v24 = vsel %vm2844_vm13, %v2876_v59, %v2812_v28  ;;  %v2621_v60 = vmul.f32 %v2589_v2, %v9591_v33  ;;  %5983 = vpow2.f32 %v2724_v20 }
 0x36a   :  { %v2366_v18 = vmul.f32 1.0614054, %v9662_v5  ;;  %v2940_v43 = vadd.f32 1.0, %v2908_v24  ;;  %v9670_v44 = vmul.f32 0.5, %v9600_v54  ;;  %v1994_v8 = vand.u32 2147483647, %v9647_v11 }
 0x36b   :  { %v1824_v6 = vmul.f32 0.3275911, %v1792_v7  ;;  %v2781_v34 = vmul.f32 %v5980_v38, %v2621_v60  ;;  %v1996_v3 = vand.u32 2147483648, %v9647_v11  ;;  %v2726_v10 = vmul.f32 1.442695, %v2687_v31 }
 0x36c   :  { %v2398_v27 = vadd.f32 -1.4531521, %v2366_v18  ;;  %v2972_v62 = vmul.f32 %v2940_v43, %v9607_v26  ;;  %v2656_v33 = vsub.f32 0.0, %v1792_v7  ;;  %v1793_v21 = vand.u32 2147483647, %v9665_v50 }
 0x36d   :  { %v5982_v32 = vpop.eup %5981  ;;  %v9675_v13 = vadd.f32 1.0, %v1824_v6  ;;  %v2813_v49 = vsub.f32 1.0, %v2781_v34  ;;  %v3959_v26 = vsel %vm9682_vm1, %v9318_v35, %v9604_v9  ;;  %vm1990_vm6 = vweird.f32 %v9647_v11 }
 0x36e   :  { %v2430_v15 = vmul.f32 %v2398_v27, %v9662_v5  ;;  %v1986_v38 = vmul.f32 %v5982_v32, %v9647_v11  ;;  %3004 = vst [vmem:[%s12256_s7 + $0x20] sm:$0xff] %v2972_v62  ;;  %v9696_v40 = vmul.f32 0.5, %v1696_v41  ;;  %v9699_v28 = vmul.f32 0.5, %v1697_v52 }
 0x36f   :  { %5985 = vrcp.f32 %v9675_v13  ;;  %v5984_v4 = vpop.eup %5983  ;;  %v2877_v36 = vsub.f32 0.0, %v2813_v49  ;;  %vm9701_vm15 = vcmp.eq.f32.partialorder %v1994_v8, 8.507059e+37  ;;  %v1997_v35 = vor.u32 1.1754944e-38, %v1996_v3 }
 0x370   :  { %v2462_v20 = vadd.f32 1.4214138, %v2430_v15  ;;  %v1987_v57 = vsub.f32 1.0, %v1986_v38  ;;  %5987 = vpow2.f32 %v2726_v10  ;;  %v2688_v9 = vmul.f32 %v2656_v33, %v1792_v7 }
 0x371   :  { %v1825_v2 = vmul.f32 0.3275911, %v1793_v21  ;;  %v2909_v41 = vsel %vm2845_vm9, %v2877_v36, %v2813_v49  ;;  %vm1991_vm10 = vweird.f32 %v5982_v32  ;;  %v2009_v24 = vand.u32 2147483647, %v9675_v13 }
 0x372   :  { %v2494_v48 = vmul.f32 %v2462_v20, %v9662_v5  ;;  %v1988_v31 = vmul.f32 %v5982_v32, %v1987_v57  ;;  %v2941_v52 = vadd.f32 1.0, %v2909_v41  ;;  %v2011_v60 = vand.u32 2147483648, %v9675_v13  ;;  %vm1992_vm8 = vmor %vm1990_vm6, %vm1991_vm10 }
 0x373   :  { %v9710_v18 = vadd.f32 1.0, %v1825_v2  ;;  %v3960_v6 = vand.u32 2147483647, %v9276_v53  ;;  %v3962_v7 = vand.u32 2147483648, %v9276_v53  ;;  %vm2005_vm11 = vweird.f32 %v9675_v13 }
 0x374   :  { %v2526_v43 = vadd.f32 -0.28449672, %v2494_v48  ;;  %v1989_v8 = vadd.f32 %v5982_v32, %v1988_v31  ;;  %v2973_v55 = vmul.f32 %v2941_v52, %v9612_v25  ;;  %v2657_v27 = vsub.f32 0.0, %v1793_v21 }
 0x375   :  { %v5986_v34 = vpop.eup %5985  ;;  %5989 = vrcp.f32 %v9710_v18  ;;  %v9721_v33 = vmul.f32 1.442695, %v2688_v9  ;;  %vm9732_vm2 = vcmp.eq.f32.partialorder %v2009_v24, 8.507059e+37  ;;  %v2012_v11 = vor.u32 1.1754944e-38, %v2011_v60 }
 0x376   :  { %v2558_v3 = vmul.f32 %v2526_v43, %v9662_v5  ;;  %v1993_v10 = vsel %vm1992_vm8, %v5982_v32, %v1989_v8  ;;  %v2001_v62 = vmul.f32 %v5986_v34, %v9675_v13  ;;  %v9723_v54 = vpop.eup %5987  ;;  %3005 = vst [vmem:[%s12256_s7 + $0x28] sm:$0xff] %v2973_v55  ;;  %v2024_v32 = vand.u32 2147483647, %v9710_v18 }
 0x377   :  { %v9730_v53 = vsel %vm9701_vm15, %v1997_v35, %v1993_v10  ;;  %v3963_v36 = vor.u32 1.1754944e-38, %v3962_v7  ;;  %vm2846_vm4 = vcmp.lt.f32.partialorder %v9553_v22, 0.0  ;;  %vm2006_vm14 = vweird.f32 %v5986_v34 }
 0x378   :  { %v2590_v49 = vadd.f32 0.2548296, %v2558_v3  ;;  %v2367_v15 = vmul.f32 1.0614054, %v9730_v53  ;;  %v2002_v38 = vsub.f32 1.0, %v2001_v62  ;;  %v9739_v20 = vmul.f32 %v2657_v27, %v1793_v21  ;;  %vm2007_vm7 = vmor %vm2005_vm11, %vm2006_vm14 }
 0x379   :  { %vm3961_vm12 = vcmp.eq.f32.partialorder %v3960_v6, 8.507059e+37  ;;  %v12796_v57 = vsub.f32 1.0, %v9343_v14  ;;  %vm2020_vm0 = vweird.f32 %v9710_v18  ;;  %v2026_v31 = vand.u32 2147483648, %v9710_v18 }
 0x37a   :  { %v2622_v35 = vmul.f32 %v2590_v49, %v9662_v5  ;;  %v2399_v9 = vadd.f32 -1.4531521, %v2367_v15  ;;  %v2003_v2 = vmul.f32 %v5986_v34, %v2002_v38  ;;  %v9746_v41 = vsel %vm3961_vm12, %v3963_v36, %v3959_v26 }
 0x37b   :  { %v3969_v59 = vmul.f32 %v9322_v19, %v12796_v57  ;;  %v5990_v48 = vpop.eup %5989  ;;  %v4015_v52 = vmul.f32 1.0614054, %v9746_v41  ;;  %vm3972_vm13 = vweird.f32 %v9322_v19  ;;  %vm9754_vm3 = vcmp.eq.f32.partialorder %v2024_v32, 8.507059e+37 }
 0x37c   :  { %v2782_v14 = vmul.f32 %v5984_v4, %v2622_v35  ;;  %v2431_v24 = vmul.f32 %v2399_v9, %v9730_v53  ;;  %v2004_v60 = vadd.f32 %v5986_v34, %v2003_v2  ;;  %v2016_v5 = vmul.f32 %v5990_v48, %v9710_v18  ;;  %v1590_v2 = vpop.f32.mrf.mxu2 }
 0x37d   :  { %v3970_v21 = vadd.f32 %v9322_v19, %v3969_v59  ;;  %vm2021_vm9 = vweird.f32 %v5990_v48  ;;  %v4023_v26 = vadd.f32 -1.4531521, %v4015_v52  ;;  %vm3971_vm1 = vweird.f32 %v9280_v39 }
 0x37e   :  { %v3975_v8 = vand.u32 2147483647, %v9280_v39  ;;  %v2814_v4 = vsub.f32 1.0, %v2782_v14  ;;  %v2463_v6 = vadd.f32 1.4214138, %v2431_v24  ;;  %v2008_v7 = vsel %vm2007_vm7, %v5986_v34, %v2004_v60  ;;  %vm9765_vm6 = vmor %vm3971_vm1, %vm3972_vm13 }
 0x37f   :  { %v2017_v55 = vsub.f32 1.0, %v2016_v5  ;;  %v9771_v13 = vsel %vm9732_vm2, %v2012_v11, %v2008_v7  ;;  %v4031_v3 = vmul.f32 %v4023_v26, %v9746_v41  ;;  %v3974_v10 = vsel %vm9765_vm6, %v9322_v19, %v3970_v21  ;;  %vm2022_vm10 = vmor %vm2020_vm0, %vm2021_vm9  ;;  %v9791_v21 = vpop.permute.xlu0 %1456  ;;  %v6231_v7 = vld [vmem:[%s12249_s0 + $0x50] sm:$0xff] }
 0x380   :  { %v3977_v62 = vand.u32 2147483648, %v9280_v39  ;;  %v2878_v34 = vsub.f32 0.0, %v2814_v4  ;;  %v2495_v32 = vmul.f32 %v2463_v6, %v9730_v53  ;;  %v2368_v49 = vmul.f32 1.0614054, %v9771_v13 }
 0x381   :  { %v2018_v15 = vmul.f32 %v5990_v48, %v2017_v55  ;;  %v2027_v38 = vor.u32 1.1754944e-38, %v2026_v31  ;;  %v4039_v36 = vadd.f32 1.4214138, %v4031_v3  ;;  %vm3976_vm15 = vcmp.eq.f32.partialorder %v3975_v8, 8.507059e+37 }
 0x382   :  { %v3978_v25 = vor.u32 1.1754944e-38, %v3977_v62  ;;  %v2910_v11 = vsel %vm2846_vm4, %v2878_v34, %v2814_v4  ;;  %v2527_v57 = vadd.f32 -0.28449672, %v2495_v32  ;;  %v2400_v59 = vadd.f32 -1.4531521, %v2368_v49 }
 0x383   :  { %v2019_v35 = vadd.f32 %v5990_v48, %v2018_v15  ;;  %v2942_v9 = vadd.f32 1.0, %v2910_v11  ;;  %v4047_v39 = vmul.f32 %v4039_v36, %v9746_v41  ;;  %v12801_v31 = vsub.f32 1.0, %v9348_v29 }
 0x384   :  { %v9786_v19 = vsel %vm3976_vm15, %v3978_v25, %v3974_v10  ;;  %v2559_v22 = vmul.f32 %v2527_v57, %v9730_v53  ;;  %v2432_v14 = vmul.f32 %v2400_v59, %v9771_v13  ;;  %v1591_v29 = vadd.f32 %v1590_v2, %v9791_v21 }
 0x385   :  { %v3924_v52 = vmul.f32 %v9326_v42, %v12801_v31  ;;  %v2023_v24 = vsel %vm2022_vm10, %v5990_v48, %v2019_v35  ;;  %v4016_v60 = vmul.f32 1.0614054, %v9786_v19  ;;  %v2974_v18 = vmul.f32 %v2942_v9, %v9660_v45 }
 0x386   :  { %v9799_v5 = vsel %vm9754_vm3, %v2027_v38, %v2023_v24  ;;  %v4055_v26 = vadd.f32 -0.28449672, %v4047_v39  ;;  %v2591_v8 = vadd.f32 0.2548296, %v2559_v22  ;;  %v2464_v4 = vadd.f32 1.4214138, %v2432_v14 }
 0x387   :  { %5991 = vpow2.f32 %v9721_v33  ;;  %v2369_v6 = vmul.f32 1.0614054, %v9799_v5  ;;  %3006 = vst [vmem:[%s12256_s7 + $0x30] sm:$0xff] %v2974_v18  ;;  %vm2847_vm8 = vcmp.lt.f32.partialorder %v9622_v12, 0.0  ;;  %v2730_v45 = vmul.f32 1.442695, %v9739_v20 }
 0x388   :  { %v4063_v48 = vmul.f32 %v4055_v26, %v9746_v41  ;;  %v4024_v43 = vadd.f32 -1.4531521, %v4016_v60  ;;  %v9813_v55 = vadd.f32 %v6231_v7, %v1591_v29  ;;  %v2623_v33 = vmul.f32 %v2591_v8, %v9730_v53 }
 0x389   :  { %v2496_v27 = vmul.f32 %v2464_v4, %v9771_v13  ;;  %v2401_v3 = vadd.f32 -1.4531521, %v2369_v6  ;;  %v3925_v10 = vadd.f32 %v9326_v42, %v3924_v52  ;;  %vm3926_vm11 = vweird.f32 %v9287_v56 }
 0x38a   :  { %v4071_v62 = vadd.f32 0.2548296, %v4063_v48  ;;  %v4032_v34 = vmul.f32 %v4024_v43, %v9786_v19  ;;  %v9820_v20 = vmul.f32 0.70710677, %v9813_v55  ;;  %v2783_v32 = vmul.f32 %v9723_v54, %v2623_v33 }
 0x38b   :  { %v2528_v49 = vadd.f32 -0.28449672, %v2496_v27  ;;  %v2433_v15 = vmul.f32 %v2401_v3, %v9799_v5  ;;  %vm3927_vm2 = vweird.f32 %v9326_v42  ;;  %v3930_v25 = vand.u32 2147483647, %v9287_v56 }
 0x38c   :  { %v4079_v53 = vmul.f32 %v4071_v62, %v9746_v41  ;;  %v4040_v38 = vadd.f32 1.4214138, %v4032_v34  ;;  %v9828_v36 = vand.u32 2147483647, %v9820_v20  ;;  %v2815_v57 = vsub.f32 1.0, %v2783_v32  ;;  %vm9838_vm4 = vmor %vm3926_vm11, %vm3927_vm2 }
 0x38d   :  { %v5992_v11 = vpop.eup %5991  ;;  %v2560_v59 = vmul.f32 %v2528_v49, %v9771_v13  ;;  %v2465_v35 = vadd.f32 1.4214138, %v2433_v15  ;;  %v3932_v54 = vand.u32 2147483648, %v9287_v56  ;;  %5993 = vpow2.f32 %v2730_v45 }
 0x38e   :  { %v4119_v9 = vmul.f32 %v9369_v47, %v4079_v53  ;;  %v4048_v39 = vmul.f32 %v4040_v38, %v9786_v19  ;;  %v1826_v41 = vmul.f32 0.3275911, %v9828_v36  ;;  %v2879_v31 = vsub.f32 0.0, %v2815_v57 }
 0x38f   :  { %v2592_v52 = vadd.f32 0.2548296, %v2560_v59  ;;  %v2497_v22 = vmul.f32 %v2465_v35, %v9799_v5  ;;  %v3929_v14 = vsel %vm9838_vm4, %v9326_v42, %v3925_v10  ;;  %vm3931_vm14 = vcmp.eq.f32.partialorder %v3930_v25, 8.507059e+37 }
 0x390   :  { %v4127_v24 = vsub.f32 1.0, %v4119_v9  ;;  %v4056_v47 = vadd.f32 -0.28449672, %v4048_v39  ;;  %v9846_v60 = vadd.f32 1.0, %v1826_v41  ;;  %v2911_v56 = vsel %vm2847_vm8, %v2879_v31, %v2815_v57 }
 0x391   :  { %v2624_v18 = vmul.f32 %v2592_v52, %v9771_v13  ;;  %v2529_v26 = vadd.f32 -0.28449672, %v2497_v22  ;;  %v3933_v29 = vor.u32 1.1754944e-38, %v3932_v54  ;;  %v2943_v8 = vadd.f32 1.0, %v2911_v56 }
 0x392   :  { %v4143_v4 = vsub.f32 0.0, %v4127_v24  ;;  %v4064_v6 = vmul.f32 %v4056_v47, %v9786_v19  ;;  %5995 = vrcp.f32 %v9846_v60  ;;  %vm4135_vm12 = vcmp.lt.f32.partialorder %v9244_v58, 0.0 }
 0x393   :  { %v2784_v45 = vmul.f32 %v5992_v11, %v2624_v18  ;;  %v2561_v42 = vmul.f32 %v2529_v26, %v9799_v5  ;;  %v9855_v48 = vsel %vm3931_vm14, %v3933_v29, %v3929_v14  ;;  %v5994_v43 = vpop.eup %5993  ;;  %v2975_v12 = vmul.f32 %v2943_v8, %v9670_v44  ;;  %v1655_v14 = vpop.f32.mrf.mxu3  ;;  %v12821_v8 = vld [vmem:[#allocation33_spill] sm:$0xff] }
 0x394   :  { %vm2848_vm0 = vcmp.lt.f32.partialorder %v9649_v61, 0.0  ;;  %v4151_v13 = vsel %vm4135_vm12, %v4143_v4, %v4127_v24  ;;  %v4072_v7 = vadd.f32 0.2548296, %v4064_v6  ;;  %v2039_v10 = vand.u32 2147483647, %v9846_v60 }
 0x395   :  { %v2816_v33 = vsub.f32 1.0, %v2784_v45  ;;  %v2593_v27 = vadd.f32 0.2548296, %v2561_v42  ;;  %v4159_v3 = vadd.f32 1.0, %v4151_v13  ;;  %3007 = vst [vmem:[%s12256_s7 + $0x38] sm:$0xff] %v2975_v12  ;;  %vm2849_vm13 = vcmp.lt.f32.partialorder %v9665_v50, 0.0 }
 0x396   :  { %v4080_v58 = vmul.f32 %v4072_v7, %v9786_v19  ;;  %v2041_v62 = vand.u32 2147483648, %v9846_v60  ;;  %v4013_v44 = vmul.f32 1.0614054, %v9855_v48  ;;  %v3856_v15 = vmul.f32 0.5, %v9231_v16 }
 0x397   :  { %v2880_v34 = vsub.f32 0.0, %v2816_v33  ;;  %v2625_v32 = vmul.f32 %v2593_v27, %v9799_v5  ;;  %v4167_v49 = vmul.f32 %v4159_v3, %v9402_v17  ;;  %vm4136_vm3 = vcmp.lt.f32.partialorder %v9250_v23, 0.0  ;;  %v12815_v17 = vld [vmem:[#allocation63_spill] sm:$0xff] }
 0x398   :  { %v5996_v53 = vpop.eup %5995  ;;  %v4120_v38 = vmul.f32 %v9380_v30, %v4080_v58  ;;  %vm2035_vm7 = vweird.f32 %v9846_v60  ;;  %v4021_v25 = vadd.f32 -1.4531521, %v4013_v44  ;;  %vm9876_vm9 = vcmp.eq.f32.partialorder %v2039_v10, 8.507059e+37  ;;  %v12809_v58 = vld [vmem:[#allocation62_spill] sm:$0xff] }
 0x399   :  { %v2912_v19 = vsel %vm2848_vm0, %v2880_v34, %v2816_v33  ;;  %v2785_v11 = vmul.f32 %v5994_v43, %v2625_v32  ;;  %4184 = vmatpush.msra.mxu0 %v4167_v49  ;;  %5779 = vmatpush.msrb.mxu2 %v4167_v49  ;;  %v2031_v5 = vmul.f32 %v5996_v53, %v9846_v60  ;;  %v2042_v30 = vor.u32 1.1754944e-38, %v2041_v62  ;;  %v12811_v44 = vld [vmem:[#allocation30_spill] sm:$0xff]  ;;  %v12812_v34 = vld [vmem:[#allocation57_spill] sm:$0xff] }
 0x39a   :  { %v2944_v16 = vadd.f32 1.0, %v2912_v19  ;;  %v4128_v57 = vsub.f32 1.0, %v4120_v38  ;;  %v4029_v59 = vmul.f32 %v4021_v25, %v9855_v48  ;;  %vm2036_vm1 = vweird.f32 %v5996_v53 }
 0x39b   :  { %v2817_v35 = vsub.f32 1.0, %v2785_v11  ;;  %v2032_v54 = vsub.f32 1.0, %v2031_v5  ;;  %v12806_v61 = vsub.f32 1.0, %v9352_v37  ;;  %vm3941_vm6 = vweird.f32 %v9290_v63  ;;  %vm2037_vm8 = vmor %vm2035_vm7, %vm2036_vm1  ;;  %v12814_v5 = vld [vmem:[#allocation24_spill] sm:$0xff] }
 0x39c   :  { %v2976_v39 = vmul.f32 %v2944_v16, %v9696_v40  ;;  %v4144_v41 = vsub.f32 0.0, %v4128_v57  ;;  %v4037_v2 = vadd.f32 1.4214138, %v4029_v59  ;;  %vm3942_vm15 = vweird.f32 %v9329_v46  ;;  %v12816_v59 = vld [vmem:[#allocation8_spill] sm:$0xff] }
 0x39d   :  { %v3939_v9 = vmul.f32 %v9329_v46, %v12806_v61  ;;  %v2881_v31 = vsub.f32 0.0, %v2817_v35  ;;  %v2033_v52 = vmul.f32 %v5996_v53, %v2032_v54  ;;  %v3945_v24 = vand.u32 2147483647, %v9290_v63  ;;  %vm9901_vm10 = vmor %vm3941_vm6, %vm3942_vm15 }
 0x39e   :  { %3008 = vst [vmem:[%s12256_s7 + $0x40] sm:$0xff] %v2976_v39  ;;  %v4152_v37 = vsel %vm4136_vm3, %v4144_v41, %v4128_v57  ;;  %v4045_v40 = vmul.f32 %v4037_v2, %v9855_v48  ;;  %v3947_v47 = vand.u32 2147483648, %v9290_v63  ;;  %v1656_v29 = vadd.f32 %v1655_v14, %v9791_v21  ;;  %v6232_v63 = vld [vmem:[%s12249_s0 + $0x58] sm:$0xff] }
 0x39f   :  { %v3940_v22 = vadd.f32 %v9329_v46, %v3939_v9  ;;  %v2913_v56 = vsel %vm2849_vm13, %v2881_v31, %v2817_v35  ;;  %v4160_v18 = vadd.f32 1.0, %v4152_v37  ;;  %v2034_v26 = vadd.f32 %v5996_v53, %v2033_v52 }
 0x3a0   :  { %v2945_v23 = vadd.f32 1.0, %v2913_v56  ;;  %v2658_v4 = vsub.f32 0.0, %v9828_v36  ;;  %v4053_v6 = vadd.f32 -0.28449672, %v4045_v40  ;;  %v9915_v43 = vadd.f32 %v6232_v63, %v1656_v29 }
 0x3a1   :  { %v3944_v50 = vsel %vm9901_vm10, %v9329_v46, %v3940_v22  ;;  %v4168_v45 = vmul.f32 %v4160_v18, %v3856_v15  ;;  %v2038_v42 = vsel %vm2037_vm8, %v5996_v53, %v2034_v26  ;;  %v3948_v12 = vor.u32 1.1754944e-38, %v3947_v47  ;;  %v12820_v18 = vld [vmem:[#allocation37_spill] sm:$0xff] }
 0x3a2   :  { %v2977_v13 = vmul.f32 %v2945_v23, %v9699_v28  ;;  %v9920_v60 = vsel %vm9876_vm9, %v2042_v30, %v2038_v42  ;;  %v4061_v7 = vmul.f32 %v4053_v6, %v9855_v48  ;;  %vm3946_vm11 = vcmp.eq.f32.partialorder %v3945_v24, 8.507059e+37 }
 0x3a3   :  { %v4105_v46 = vmul.f32 1.442695, %v9372_v51  ;;  %4249 = vmatpush.msra.mxu1 %v4168_v45  ;;  %5783 = vmatpush.msrb.mxu3 %v4168_v45  ;;  %v2370_v33 = vmul.f32 1.0614054, %v9920_v60  ;;  %v9926_v27 = vmul.f32 0.70710677, %v9915_v43  ;;  %v9928_v3 = vsel %vm3946_vm11, %v3948_v12, %v3944_v50 }
 0x3a4   :  { %3009 = vst [vmem:[%s12256_s7 + $0x48] sm:$0xff] %v2977_v13  ;;  %v4069_v28 = vadd.f32 0.2548296, %v4061_v7  ;;  %v4014_v10 = vmul.f32 1.0614054, %v9928_v3  ;;  %v12810_v62 = vsub.f32 1.0, %v12809_v58  ;;  %v2690_v53 = vmul.f32 %v2658_v4, %v9828_v36 }
 0x3a5   :  { %v12813_v32 = vsub.f32 0.0, %v12812_v34  ;;  %v2402_v15 = vadd.f32 -1.4531521, %v2370_v33  ;;  %v9942_v38 = vand.u32 2147483647, %v9926_v27  ;;  %vm3897_vm2 = vweird.f32 %v12811_v44  ;;  %v12817_v36 = vld [vmem:[#allocation31_spill] sm:$0xff] }
 0x3a6   :  { %v3894_v51 = vmul.f32 %v12811_v44, %v12810_v62  ;;  %v4077_v25 = vmul.f32 %v4069_v28, %v9855_v48  ;;  %v4022_v19 = vadd.f32 -1.4531521, %v4014_v10  ;;  %v3907_v16 = vmul.f32 %v12815_v17, %v12814_v5  ;;  %v12822_v4 = vld [vmem:[#allocation54_spill] sm:$0xff] }
 0x3a7   :  { %v4091_v49 = vmul.f32 %v12813_v32, %v12812_v34  ;;  %v2434_v57 = vmul.f32 %v2402_v15, %v9920_v60  ;;  %v1827_v30 = vmul.f32 0.3275911, %v9942_v38  ;;  %vm3896_vm4 = vweird.f32 %v12816_v59  ;;  %v6234_v15 = vld [vmem:[%s12249_s0 + $0x68] sm:$0xff] }
 0x3a8   :  { %v3895_v11 = vadd.f32 %v12811_v44, %v3894_v51  ;;  %v4117_v35 = vmul.f32 %v12817_v36, %v4077_v25  ;;  %v4030_v54 = vmul.f32 %v4022_v19, %v9928_v3  ;;  %v3900_v48 = vand.u32 2147483647, %v12816_v59  ;;  %vm9958_vm14 = vmor %vm3896_vm4, %vm3897_vm2 }
 0x3a9   :  { %v3902_v61 = vand.u32 2147483648, %v12816_v59  ;;  %5997 = vpow2.f32 %v4105_v46  ;;  %v2466_v9 = vadd.f32 1.4214138, %v2434_v57  ;;  %v9956_v39 = vadd.f32 1.0, %v1827_v30 }
 0x3aa   :  { %v2732_v2 = vmul.f32 1.442695, %v2690_v53  ;;  %v4125_v31 = vsub.f32 1.0, %v4117_v35  ;;  %v4038_v52 = vadd.f32 1.4214138, %v4030_v54  ;;  %v3899_v22 = vsel %vm9958_vm14, %v12811_v44, %v3895_v11 }
 0x3ab   :  { %v3908_v37 = vsub.f32 1.0, %v3907_v16  ;;  %v2498_v14 = vmul.f32 %v2466_v9, %v9920_v60  ;;  %5999 = vrcp.f32 %v9956_v39  ;;  %v3903_v40 = vor.u32 1.1754944e-38, %v3902_v61 }
 0x3ac   :  { %v4099_v24 = vmul.f32 1.442695, %v4091_v49  ;;  %v4141_v47 = vsub.f32 0.0, %v4125_v31  ;;  %v4046_v56 = vmul.f32 %v4038_v52, %v9928_v3  ;;  %vm3901_vm12 = vcmp.eq.f32.partialorder %v3900_v48, 8.507059e+37 }
 0x3ad   :  { %v4084_v26 = vsub.f32 0.0, %v12820_v18  ;;  %v2530_v29 = vadd.f32 -0.28449672, %v2498_v14  ;;  %vm4133_vm0 = vcmp.lt.f32.partialorder %v12821_v8, 0.0  ;;  %v9970_v23 = vsel %vm3901_vm12, %v3903_v40, %v3899_v22  ;;  %v12825_v8 = vld [vmem:[#allocation56_spill] sm:$0xff] }
 0x3ae   :  { %6001 = vpow2.f32 %v2732_v2  ;;  %v3853_v6 = vmul.f32 0.5, %v12822_v4  ;;  %v4149_v50 = vsel %vm4133_vm0, %v4141_v47, %v4125_v31  ;;  %v4054_v45 = vadd.f32 -0.28449672, %v4046_v56  ;;  %v10007_v31 = vpop.permute.xlu1 %1461 }
 0x3af   :  { %v5998_v42 = vpop.eup %5997  ;;  %v2562_v63 = vmul.f32 %v2530_v29, %v9920_v60  ;;  %v4157_v12 = vadd.f32 1.0, %v4149_v50  ;;  %v4011_v13 = vmul.f32 1.0614054, %v9970_v23  ;;  %v3909_v7 = vmul.f32 %v12815_v17, %v3908_v37  ;;  %v1593_v37 = vpop.f32.mrf.mxu2 }
 0x3b0   :  { %6003 = vpow2.f32 %v4099_v24  ;;  %v9977_v46 = vmul.f32 0.5, %v9813_v55  ;;  %v4062_v33 = vmul.f32 %v4054_v45, %v9928_v3  ;;  %vm3912_vm13 = vweird.f32 %v12815_v17 }
 0x3b1   :  { %v6000_v28 = vpop.eup %5999  ;;  %v2594_v10 = vadd.f32 0.2548296, %v2562_v63  ;;  %v4165_v58 = vmul.f32 %v4157_v12, %v3853_v6  ;;  %v4019_v62 = vadd.f32 -1.4531521, %v4011_v13  ;;  %v3910_v44 = vadd.f32 %v12815_v17, %v3909_v7  ;;  %v12826_v12 = vld [vmem:[#allocation53_spill] sm:$0xff] }
 0x3b2   :  { %v2046_v51 = vmul.f32 %v6000_v28, %v9956_v39  ;;  %v4070_v34 = vadd.f32 0.2548296, %v4062_v33  ;;  %vm3911_vm3 = vweird.f32 %v12814_v5  ;;  %v3915_v32 = vand.u32 2147483647, %v12814_v5 }
 0x3b3   :  { %v2626_v55 = vmul.f32 %v2594_v10, %v9920_v60  ;;  %vm2850_vm7 = vcmp.lt.f32.partialorder %v9820_v20, 0.0  ;;  %4185 = vmatpush.msra.mxu0 %v4165_v58  ;;  %5780 = vmatpush.msrb.mxu2 %v4165_v58  ;;  %v4027_v49 = vmul.f32 %v4019_v62, %v9970_v23  ;;  %vm9990_vm9 = vmor %vm3911_vm3, %vm3912_vm13  ;;  %v3917_v53 = vand.u32 2147483648, %v12814_v5 }
 0x3b4   :  { %v6002_v25 = vpop.eup %6001  ;;  %v2047_v19 = vsub.f32 1.0, %v2046_v51  ;;  %v2054_v11 = vand.u32 2147483647, %v9956_v39  ;;  %v4078_v60 = vmul.f32 %v4070_v34, %v9928_v3  ;;  %v3914_v16 = vsel %vm9990_vm9, %v12815_v17, %v3910_v44  ;;  %v1658_v44 = vpop.f32.mrf.mxu3 }
 0x3b5   :  { %v2786_v57 = vmul.f32 %v6002_v25, %v2626_v55  ;;  %v2056_v30 = vand.u32 2147483648, %v9956_v39  ;;  %v4035_v59 = vadd.f32 1.4214138, %v4027_v49  ;;  %v3918_v36 = vor.u32 1.1754944e-38, %v3917_v53 }
 0x3b6   :  { %v6004_v35 = vpop.eup %6003  ;;  %v2048_v54 = vmul.f32 %v6000_v28, %v2047_v19  ;;  %vm2051_vm1 = vweird.f32 %v6000_v28  ;;  %v4118_v48 = vmul.f32 %v5998_v42, %v4078_v60  ;;  %vm3916_vm6 = vcmp.eq.f32.partialorder %v3915_v32, 8.507059e+37  ;;  %v6233_v42 = vld [vmem:[%s12249_s0 + $0x60] sm:$0xff] }
 0x3b7   :  { %v2818_v5 = vsub.f32 1.0, %v2786_v57  ;;  %v2659_v61 = vsub.f32 0.0, %v9942_v38  ;;  %v4043_v9 = vmul.f32 %v4035_v59, %v9970_v23  ;;  %v10003_v3 = vsel %vm3916_vm6, %v3918_v36, %v3914_v16 }
 0x3b8   :  { %v2049_v41 = vadd.f32 %v6000_v28, %v2048_v54  ;;  %vm2050_vm15 = vweird.f32 %v9956_v39  ;;  %v4126_v17 = vsub.f32 1.0, %v4118_v48  ;;  %v4012_v2 = vmul.f32 1.0614054, %v10003_v3 }
 0x3b9   :  { %v2882_v52 = vsub.f32 0.0, %v2818_v5  ;;  %vm2052_vm10 = vmor %vm2050_vm15, %vm2051_vm1  ;;  %vm2055_vm8 = vcmp.eq.f32.partialorder %v2054_v11, 8.507059e+37  ;;  %v2057_v22 = vor.u32 1.1754944e-38, %v2056_v30  ;;  %v4051_v14 = vadd.f32 -0.28449672, %v4043_v9 }
 0x3ba   :  { %v2053_v40 = vsel %vm2052_vm10, %v6000_v28, %v2049_v41  ;;  %v4142_v24 = vsub.f32 0.0, %v4126_v17  ;;  %v1594_v47 = vadd.f32 %v1593_v37, %v10007_v31  ;;  %v4020_v56 = vadd.f32 -1.4531521, %v4012_v2 }
 0x3bb   :  { %v2914_v29 = vsel %vm2850_vm7, %v2882_v52, %v2818_v5  ;;  %v2058_v39 = vsel %vm2055_vm8, %v2057_v22, %v2053_v40  ;;  %vm4134_vm11 = vcmp.lt.f32.partialorder %v12825_v8, 0.0  ;;  %v4059_v4 = vmul.f32 %v4051_v14, %v9970_v23  ;;  %v12827_v5 = vld [vmem:[#allocation55_spill] sm:$0xff]  ;;  %v12828_v52 = vld [vmem:[#allocation38_spill] sm:$0xff] }
 0x3bc   :  { %v2946_v6 = vadd.f32 1.0, %v2914_v29  ;;  %v2371_v50 = vmul.f32 1.0614054, %v2058_v39  ;;  %v4150_v45 = vsel %vm4134_vm11, %v4142_v24, %v4126_v17  ;;  %v10017_v63 = vadd.f32 %v6233_v42, %v1594_v47 }
 0x3bd   :  { %v3854_v13 = vmul.f32 0.5, %v12826_v12  ;;  %v4158_v7 = vadd.f32 1.0, %v4150_v45  ;;  %v4067_v33 = vadd.f32 0.2548296, %v4059_v4  ;;  %v4028_v20 = vmul.f32 %v4020_v56, %v10003_v3 }
 0x3be   :  { %v2978_v28 = vmul.f32 %v2946_v6, %v9977_v46  ;;  %v2403_v10 = vadd.f32 -1.4531521, %v2371_v50  ;;  %v2691_v58 = vmul.f32 %v2659_v61, %v9942_v38  ;;  %v10024_v62 = vmul.f32 0.70710677, %v10017_v63  ;;  %v12829_v50 = vld [vmem:[#allocation58_spill] sm:$0xff] }
 0x3bf   :  { %v4166_v51 = vmul.f32 %v4158_v7, %v3854_v13  ;;  %v1659_v34 = vadd.f32 %v1658_v44, %v10007_v31  ;;  %v4075_v32 = vmul.f32 %v4067_v33, %v9970_v23  ;;  %v4036_v55 = vadd.f32 1.4214138, %v4028_v20  ;;  %v12830_v7 = vld [vmem:[#allocation14_spill] sm:$0xff]  ;;  %v1596_v44 = vpop.f32.mrf.mxu2 }
 0x3c0   :  { %v4092_v49 = vmul.f32 %v4084_v26, %v12820_v18  ;;  %3010 = vst [vmem:[%s12256_s7 + $0x50] sm:$0xff] %v2978_v28  ;;  %v2435_v46 = vmul.f32 %v2403_v10, %v2058_v39  ;;  %v10035_v38 = vand.u32 2147483647, %v10024_v62  ;;  %v2734_v19 = vmul.f32 1.442695, %v2691_v58  ;;  %v10076_v33 = vld [vmem:[%s12255_s5] sm:$0xff] }
 0x3c1   :  { %4250 = vmatpush.msra.mxu1 %v4166_v51  ;;  %5784 = vmatpush.msrb.mxu3 %v4166_v51  ;;  %v10040_v23 = vadd.f32 %v6234_v15, %v1659_v34  ;;  %v4115_v53 = vmul.f32 %v6004_v35, %v4075_v32  ;;  %v4044_v25 = vmul.f32 %v4036_v55, %v10003_v3  ;;  %vm4131_vm2 = vcmp.lt.f32.partialorder %v12827_v5, 0.0  ;;  %v1661_v51 = vpop.f32.mrf.mxu3 }
 0x3c2   :  { %v2467_v18 = vadd.f32 1.4214138, %v2435_v46  ;;  %v1828_v26 = vmul.f32 0.3275911, %v10035_v38  ;;  %v4101_v59 = vmul.f32 1.442695, %v4092_v49 }
 0x3c3   :  { %v10045_v11 = vmul.f32 0.70710677, %v10040_v23  ;;  %v4123_v60 = vsub.f32 1.0, %v4115_v53  ;;  %v4052_v30 = vadd.f32 -0.28449672, %v4044_v25  ;;  %v3851_v22 = vmul.f32 0.5, %v12828_v52 }
 0x3c4   :  { %v2499_v16 = vmul.f32 %v2467_v18, %v2058_v39  ;;  %v10047_v57 = vadd.f32 1.0, %v1828_v26  ;;  %v1731_v29 = vmul.f32 0.5, %v9915_v43  ;;  %vm2851_vm4 = vcmp.lt.f32.partialorder %v9926_v27, 0.0 }
 0x3c5   :  { %v10050_v36 = vand.u32 2147483647, %v10045_v11  ;;  %v4139_v54 = vsub.f32 0.0, %v4123_v60  ;;  %v4060_v41 = vmul.f32 %v4052_v30, %v10003_v3  ;;  %v10065_v45 = vmul.f32 0.5, %v12829_v50 }
 0x3c6   :  { %v2531_v35 = vadd.f32 -0.28449672, %v2499_v16  ;;  %6005 = vrcp.f32 %v10047_v57  ;;  %v2069_v6 = vand.u32 2147483647, %v10047_v57  ;;  %vm2065_vm14 = vweird.f32 %v10047_v57 }
 0x3c7   :  { %6007 = vpow2.f32 %v2734_v19  ;;  %v1829_v48 = vmul.f32 0.3275911, %v10050_v36  ;;  %v4147_v9 = vsel %vm4131_vm2, %v4139_v54, %v4123_v60  ;;  %v4068_v14 = vadd.f32 0.2548296, %v4060_v41  ;;  %v6237_v60 = vld [vmem:[%s12249_s0 + $0x70] sm:$0xff] }
 0x3c8   :  { %v2563_v61 = vmul.f32 %v2531_v35, %v2058_v39  ;;  %6009 = vpow2.f32 %v4101_v59  ;;  %v4155_v37 = vadd.f32 1.0, %v4147_v9  ;;  %v2071_v43 = vand.u32 2147483648, %v10047_v57  ;;  %v6238_v35 = vld [vmem:[%s12249_s0 + $0x78] sm:$0xff] }
 0x3c9   :  { %v10056_v17 = vadd.f32 1.0, %v1829_v48  ;;  %v4076_v42 = vmul.f32 %v4068_v14, %v10003_v3  ;;  %vm4132_vm12 = vcmp.lt.f32.partialorder %v12830_v7, 0.0  ;;  %v10083_v3 = vld [vmem:[%s12255_s5 + $0x58] sm:$0xff]  ;;  %v2660_v28 = vsub.f32 0.0, %v10035_v38 }
 0x3ca   :  { %v2595_v2 = vadd.f32 0.2548296, %v2563_v61  ;;  %v4163_v47 = vmul.f32 %v4155_v37, %v3851_v22  ;;  %v2661_v10 = vsub.f32 0.0, %v10050_v36  ;;  %vm10091_vm13 = vcmp.eq.f32.partialorder %v2069_v6, 8.507059e+37 }
 0x3cb   :  { %6011 = vrcp.f32 %v10056_v17  ;;  %v2072_v26 = vor.u32 1.1754944e-38, %v2071_v43  ;;  %v2084_v19 = vand.u32 2147483647, %v10056_v17  ;;  %v2086_v9 = vand.u32 2147483648, %v10056_v17 }
 0x3cc   :  { %v6006_v40 = vpop.eup %6005  ;;  %v2627_v24 = vmul.f32 %v2595_v2, %v2058_v39  ;;  %4186 = vmatpush.msra.mxu0 %v4163_v47  ;;  %5781 = vmatpush.msrb.mxu2 %v4163_v47  ;;  %v10068_v39 = vpop.permute.xlu2 %1466  ;;  %v2692_v47 = vmul.f32 %v2660_v28, %v10035_v38  ;;  %vm2080_vm9 = vweird.f32 %v10056_v17  ;;  %vm2852_vm10 = vcmp.lt.f32.partialorder %v10024_v62, 0.0  ;;  %v10295_v62 = vld [vmem:[%s12255_s5 + $0x20] sm:$0xff] }
 0x3cd   :  { %v6008_v56 = vpop.eup %6007  ;;  %v2061_v8 = vmul.f32 %v6006_v40, %v10047_v57  ;;  %5714 = vmatmul.msk.f32.vlgmr.msra.gmra.mxu0 %vm1509_vm5, %v10076_v33  ;;  %5725 = vmatmul.msk.f32.vlgmr.msrb.gmra.mxu2 %vm1509_vm5, %v10083_v3  ;;  %vm2066_vm0 = vweird.f32 %v6006_v40  ;;  %v1597_v55 = vadd.f32 %v1596_v44, %v10068_v39  ;;  %v1662_v49 = vadd.f32 %v1661_v51, %v10068_v39 }
 0x3ce   :  { %v2787_v4 = vmul.f32 %v6008_v56, %v2627_v24  ;;  %v6010_v12 = vpop.eup %6009  ;;  %vm2067_vm3 = vmor %vm2065_vm14, %vm2066_vm0  ;;  %v6240_v24 = vld [vmem:[%s12255_s5 + $0x60] sm:$0xff]  ;;  %v2087_v50 = vor.u32 1.1754944e-38, %v2086_v9  ;;  %vm2085_vm6 = vcmp.eq.f32.partialorder %v2084_v19, 8.507059e+37  ;;  %v2736_v28 = vmul.f32 1.442695, %v2692_v47 }
 0x3cf   :  { %v2062_v13 = vsub.f32 1.0, %v2061_v8  ;;  %v4116_v58 = vmul.f32 %v6010_v12, %v4076_v42  ;;  %v10100_v16 = vadd.f32 %v6237_v60, %v1597_v55  ;;  %v10109_v48 = vadd.f32 %v6238_v35, %v1662_v49  ;;  %v1599_v8 = vpop.f32.mrf.mxu2  ;;  %v6241_v49 = vld [vmem:[%s12249_s0 + $0x80] sm:$0xff] }
 0x3d0   :  { %v2819_v20 = vsub.f32 1.0, %v2787_v4  ;;  %v10139_v4 = vpop.permute.xlu0 %1471  ;;  %v10195_v35 = vmul.f32 0.5, %v10040_v23  ;;  %vm2853_vm2 = vcmp.lt.f32.partialorder %v10045_v11, 0.0 }
 0x3d1   :  { %v6012_v34 = vpop.eup %6011  ;;  %v2063_v32 = vmul.f32 %v6006_v40, %v2062_v13  ;;  %v4124_v25 = vsub.f32 1.0, %v4116_v58  ;;  %v10113_v41 = vmul.f32 0.70710677, %v10100_v16  ;;  %v1600_v13 = vadd.f32 %v1599_v8, %v10139_v4 }
 0x3d2   :  { %v2883_v46 = vsub.f32 0.0, %v2819_v20  ;;  %v2076_v53 = vmul.f32 %v6012_v34, %v10056_v17  ;;  %vm2081_vm7 = vweird.f32 %v6012_v34  ;;  %v10200_v9 = vmul.f32 0.5, %v10100_v16 }
 0x3d3   :  { %v2064_v18 = vadd.f32 %v6006_v40, %v2063_v32  ;;  %v4140_v54 = vsub.f32 0.0, %v4124_v25  ;;  %v1798_v14 = vand.u32 2147483647, %v10113_v41  ;;  %vm2082_vm1 = vmor %vm2080_vm9, %vm2081_vm7 }
 0x3d4   :  { %v2915_v30 = vsel %vm2851_vm4, %v2883_v46, %v2819_v20  ;;  %v2077_v59 = vsub.f32 1.0, %v2076_v53  ;;  %v10167_v46 = vadd.f32 %v6241_v49, %v1600_v13  ;;  %v1664_v53 = vpop.f32.mrf.mxu3 }
 0x3d5   :  { %v2947_v5 = vadd.f32 1.0, %v2915_v30  ;;  %v2068_v61 = vsel %vm2067_vm3, %v6006_v40, %v2064_v18  ;;  %v4148_v2 = vsel %vm4132_vm12, %v4140_v54, %v4124_v25  ;;  %v10126_v40 = vld [vmem:[%s12255_s5 + $0x8] sm:$0xff]  ;;  %5726 = vmatmul.msk.f32.gmra.mxu2 %vm1509_vm5, %v6240_v24  ;;  %v1830_v38 = vmul.f32 0.3275911, %v1798_v14 }
 0x3d6   :  { %v10117_v27 = vsel %vm10091_vm13, %v2072_v26, %v2068_v61  ;;  %v2078_v57 = vmul.f32 %v6012_v34, %v2077_v59  ;;  %v4156_v37 = vadd.f32 1.0, %v4148_v2  ;;  %5715 = vmatmul.msk.f32.gmra.mxu0 %vm1509_vm5, %v10126_v40  ;;  %v2662_v32 = vsub.f32 0.0, %v1798_v14 }
 0x3d7   :  { %v2979_v52 = vmul.f32 %v2947_v5, %v1731_v29  ;;  %v2372_v22 = vmul.f32 1.0614054, %v10117_v27  ;;  %v10137_v29 = vmul.f32 0.70710677, %v10109_v48  ;;  %v10151_v20 = vadd.f32 1.0, %v1830_v38  ;;  %v1602_v13 = vpop.f32.mrf.mxu2 }
 0x3d8   :  { %v2079_v56 = vadd.f32 %v6012_v34, %v2078_v57  ;;  %v4164_v42 = vmul.f32 %v4156_v37, %v10065_v45  ;;  %v2693_v45 = vmul.f32 %v2661_v10, %v10050_v36  ;;  %v10186_v25 = vmul.f32 0.5, %v10017_v63 }
 0x3d9   :  { %3011 = vst [vmem:[%s12256_s7 + $0x58] sm:$0xff] %v2979_v52  ;;  %v2404_v6 = vadd.f32 -1.4531521, %v2372_v22  ;;  %v1799_v17 = vand.u32 2147483647, %v10137_v29  ;;  %6013 = vrcp.f32 %v10151_v20  ;;  %v2694_v60 = vmul.f32 %v2662_v32, %v1798_v14 }
 0x3da   :  { %v2083_v12 = vsel %vm2082_vm1, %v6012_v34, %v2079_v56  ;;  %4251 = vmatpush.msra.mxu1 %v4164_v42  ;;  %5785 = vmatpush.msrb.mxu3 %v4164_v42  ;;  %6015 = vpow2.f32 %v2736_v28  ;;  %v2738_v15 = vmul.f32 1.442695, %v2693_v45  ;;  %v2099_v19 = vand.u32 2147483647, %v10151_v20  ;;  %v10230_v42 = vld [vmem:[%s12255_s5 + $0x18] sm:$0xff] }
 0x3db   :  { %v2436_v43 = vmul.f32 %v2404_v6, %v10117_v27  ;;  %v10149_v7 = vsel %vm2085_vm6, %v2087_v50, %v2083_v12  ;;  %5730 = vmatmul.msk.f32.vlgmr.msra.gmra.mxu1 %vm1509_vm5, %v10076_v33  ;;  %5741 = vmatmul.msk.f32.vlgmr.msrb.gmra.mxu3 %vm1509_vm5, %v10083_v3  ;;  %v1831_v44 = vmul.f32 0.3275911, %v1799_v17  ;;  %v10173_v33 = vld [vmem:[%s12255_s5 + $0x10] sm:$0xff]  ;;  %v10180_v3 = vld [vmem:[%s12255_s5 + $0x68] sm:$0xff]  ;;  %v10191_v30 = vmul.f32 0.70710677, %v10167_v46 }
 0x3dc   :  { %v2373_v58 = vmul.f32 1.0614054, %v10149_v7  ;;  %v2663_v5 = vsub.f32 0.0, %v1799_v17  ;;  %v1665_v63 = vadd.f32 %v1664_v53, %v10139_v4  ;;  %vm2095_vm15 = vweird.f32 %v10151_v20  ;;  %v6244_v6 = vld [vmem:[%s12249_s0 + $0x88] sm:$0xff] }
 0x3dd   :  { %v2468_v51 = vadd.f32 1.4214138, %v2436_v43  ;;  %v10162_v55 = vadd.f32 1.0, %v1831_v44  ;;  %5727 = vmatmul.msk.f32.gmra.mxu2 %vm1509_vm5, %v10180_v3  ;;  %v2101_v23 = vand.u32 2147483648, %v10151_v20  ;;  %v10209_v52 = vand.u32 2147483647, %v10191_v30 }
 0x3de   :  { %v2405_v34 = vadd.f32 -1.4531521, %v2373_v58  ;;  %5716 = vmatmul.msk.f32.gmra.mxu0 %vm1509_vm5, %v10173_v33  ;;  %vm10212_vm8 = vcmp.eq.f32.partialorder %v2099_v19, 8.507059e+37  ;;  %v10219_v56 = vmul.f32 %v2663_v5, %v1799_v17  ;;  %v10225_v50 = vadd.f32 %v6244_v6, %v1665_v63 }
 0x3df   :  { %v2500_v36 = vmul.f32 %v2468_v51, %v10117_v27  ;;  %6017 = vrcp.f32 %v10162_v55  ;;  %v6014_v59 = vpop.eup %6013  ;;  %v1832_v8 = vmul.f32 0.3275911, %v10209_v52  ;;  %v2102_v28 = vor.u32 1.1754944e-38, %v2101_v23  ;;  %v10247_v51 = vpop.permute.xlu1 %1476  ;;  %v10302_v23 = vld [vmem:[%s12255_s5 + $0x78] sm:$0xff] }
 0x3e0   :  { %v2437_v10 = vmul.f32 %v2405_v34, %v10149_v7  ;;  %6019 = vpow2.f32 %v2738_v15  ;;  %v2091_v57 = vmul.f32 %v6014_v59, %v10151_v20  ;;  %v6016_v22 = vpop.eup %6015  ;;  %vm2096_vm11 = vweird.f32 %v6014_v59 }
 0x3e1   :  { %v2532_v18 = vadd.f32 -0.28449672, %v2500_v36  ;;  %v2114_v58 = vand.u32 2147483647, %v10162_v55  ;;  %v10245_v45 = vadd.f32 1.0, %v1832_v8  ;;  %v2116_v36 = vand.u32 2147483648, %v10162_v55  ;;  %vm2097_vm4 = vmor %vm2095_vm15, %vm2096_vm11 }
 0x3e2   :  { %v2469_v26 = vadd.f32 1.4214138, %v2437_v10  ;;  %v2092_v37 = vsub.f32 1.0, %v2091_v57  ;;  %v10256_v15 = vmul.f32 0.70710677, %v10225_v50  ;;  %v1603_v53 = vadd.f32 %v1602_v13, %v10247_v51  ;;  %v6247_v57 = vld [vmem:[%s12249_s0 + $0x90] sm:$0xff] }
 0x3e3   :  { %v2564_v54 = vmul.f32 %v2532_v18, %v10117_v27  ;;  %5731 = vmatmul.msk.f32.gmra.mxu1 %vm1509_vm5, %v10126_v40  ;;  %5742 = vmatmul.msk.f32.gmra.mxu3 %vm1509_vm5, %v6240_v24  ;;  %v2740_v40 = vmul.f32 1.442695, %v2694_v60  ;;  %6021 = vrcp.f32 %v10245_v45  ;;  %vm2110_vm12 = vweird.f32 %v10162_v55 }
 0x3e4   :  { %v2501_v61 = vmul.f32 %v2469_v26, %v10149_v7  ;;  %v2093_v12 = vmul.f32 %v6014_v59, %v2092_v37  ;;  %vm10271_vm0 = vcmp.eq.f32.partialorder %v2114_v58, 8.507059e+37  ;;  %v10310_v8 = vmul.f32 0.5, %v10109_v48 }
 0x3e5   :  { %v2596_v2 = vadd.f32 0.2548296, %v2564_v54  ;;  %v10216_v47 = vpop.eup %6017  ;;  %6023 = vpow2.f32 %v2740_v40  ;;  %vm2125_vm7 = vweird.f32 %v10245_v45  ;;  %vm2854_vm6 = vcmp.lt.f32.partialorder %v10113_v41, 0.0 }
 0x3e6   :  { %v2533_v16 = vadd.f32 -0.28449672, %v2501_v61  ;;  %5717 = vmatmul.msk.f32.gmra.mxu0 %vm1509_vm5, %v10230_v42  ;;  %v2106_v17 = vmul.f32 %v10216_v47, %v10162_v55  ;;  %v6020_v44 = vpop.eup %6019  ;;  %v2094_v32 = vadd.f32 %v6014_v59, %v2093_v12  ;;  %vm2111_vm14 = vweird.f32 %v10216_v47 }
 0x3e7   :  { %v2628_v24 = vmul.f32 %v2596_v2, %v10117_v27  ;;  %v10237_v27 = vld [vmem:[%s12255_s5 + $0x70] sm:$0xff]  ;;  %vm10279_vm13 = vmor %vm2110_vm12, %vm2111_vm14  ;;  %v2664_v61 = vsub.f32 0.0, %v10209_v52  ;;  %v10285_v55 = vand.u32 2147483647, %v10256_v15  ;;  %v10290_v2 = vadd.f32 %v6247_v57, %v1603_v53 }
 0x3e8   :  { %5728 = vmatmul.msk.f32.gmra.mxu2 %vm1509_vm5, %v10237_v27  ;;  %v2565_v38 = vmul.f32 %v2533_v16, %v10149_v7  ;;  %v2107_v49 = vsub.f32 1.0, %v2106_v17  ;;  %v2098_v26 = vsel %vm2097_vm4, %v6014_v59, %v2094_v32  ;;  %v2131_v53 = vand.u32 2147483648, %v10245_v45 }
 0x3e9   :  { %v2788_v43 = vmul.f32 %v6016_v22, %v2628_v24  ;;  %v10268_v60 = vsel %vm10212_vm8, %v2102_v28, %v2098_v26  ;;  %v6022_v24 = vpop.eup %6021  ;;  %v10325_v48 = vmul.f32 0.70710677, %v10290_v2  ;;  %vm2855_vm11 = vcmp.lt.f32.partialorder %v10137_v29, 0.0 }
 0x3ea   :  { %v2597_v34 = vadd.f32 0.2548296, %v2565_v38  ;;  %v2108_v19 = vmul.f32 %v10216_v47, %v2107_v49  ;;  %v2374_v54 = vmul.f32 1.0614054, %v10268_v60  ;;  %v1833_v38 = vmul.f32 0.3275911, %v10285_v55 }
 0x3eb   :  { %v2820_v10 = vsub.f32 1.0, %v2788_v43  ;;  %5732 = vmatmul.msk.f32.gmra.mxu1 %vm1509_vm5, %v10173_v33  ;;  %5743 = vmatmul.msk.f32.gmra.mxu3 %vm1509_vm5, %v10180_v3  ;;  %v2117_v33 = vor.u32 1.1754944e-38, %v2116_v36  ;;  %v2121_v40 = vmul.f32 %v6022_v24, %v10245_v45  ;;  %v2129_v49 = vand.u32 2147483647, %v10245_v45  ;;  %v1667_v36 = vpop.f32.mrf.mxu3 }
 0x3ec   :  { %v2629_v18 = vmul.f32 %v2597_v34, %v10149_v7  ;;  %v2109_v5 = vadd.f32 %v10216_v47, %v2108_v19  ;;  %v2406_v37 = vadd.f32 -1.4531521, %v2374_v54  ;;  %v10322_v28 = vadd.f32 1.0, %v1833_v38  ;;  %v10350_v19 = vld [vmem:[%s12255_s5 + $0x28] sm:$0xff] }
 0x3ed   :  { %v2884_v20 = vsub.f32 0.0, %v2820_v10  ;;  %v2696_v34 = vmul.f32 %v2664_v61, %v10209_v52  ;;  %v2122_v32 = vsub.f32 1.0, %v2121_v40  ;;  %v2665_v52 = vsub.f32 0.0, %v10285_v55 }
 0x3ee   :  { %v2789_v59 = vmul.f32 %v6020_v44, %v2629_v18  ;;  %5718 = vmatmul.msk.f32.gmra.mxu0 %vm1509_vm5, %v10295_v62  ;;  %v2113_v14 = vsel %vm10279_vm13, %v10216_v47, %v2109_v5  ;;  %v2438_v13 = vmul.f32 %v2406_v37, %v10268_v60  ;;  %v2742_v47 = vmul.f32 1.442695, %v10219_v56  ;;  %v6024_v18 = vpop.eup %6023 }
 0x3ef   :  { %v2916_v3 = vsel %vm2852_vm10, %v2884_v20, %v2820_v10  ;;  %v10314_v6 = vsel %vm10271_vm0, %v2117_v33, %v2113_v14  ;;  %6025 = vrcp.f32 %v10322_v28  ;;  %v2123_v26 = vmul.f32 %v6022_v24, %v2122_v32 }
 0x3f0   :  { %5729 = vmatmul.msk.f32.gmra.mxu2 %vm1509_vm5, %v10302_v23  ;;  %v2948_v22 = vadd.f32 1.0, %v2916_v3  ;;  %v2821_v16 = vsub.f32 1.0, %v2789_v59  ;;  %v2375_v43 = vmul.f32 1.0614054, %v10314_v6  ;;  %v2470_v58 = vadd.f32 1.4214138, %v2438_v13 }
 0x3f1   :  { %vm2126_vm3 = vweird.f32 %v6022_v24  ;;  %6027 = vpow2.f32 %v2742_v47  ;;  %v1668_v59 = vadd.f32 %v1667_v36, %v10247_v51  ;;  %vm2130_vm9 = vcmp.eq.f32.partialorder %v2129_v49, 8.507059e+37  ;;  %v10399_v36 = vpop.permute.xlu2 %1481 }
 0x3f2   :  { %v2980_v12 = vmul.f32 %v2948_v22, %v10186_v25  ;;  %v2885_v17 = vsub.f32 0.0, %v2821_v16  ;;  %v2407_v44 = vadd.f32 -1.4531521, %v2375_v43  ;;  %v2502_v11 = vmul.f32 %v2470_v58, %v10268_v60  ;;  %vm2127_vm1 = vmor %vm2125_vm7, %vm2126_vm3 }
 0x3f3   :  { %5733 = vmatmul.msk.f32.gmra.mxu1 %vm1509_vm5, %v10230_v42  ;;  %5744 = vmatmul.msk.f32.gmra.mxu3 %vm1509_vm5, %v10237_v27  ;;  %v10345_v27 = vand.u32 2147483647, %v10325_v48  ;;  %v2132_v3 = vor.u32 1.1754944e-38, %v2131_v53  ;;  %v2744_v63 = vmul.f32 1.442695, %v2696_v34  ;;  %vm2140_vm15 = vweird.f32 %v10322_v28  ;;  %v10395_v34 = vld [vmem:[%s12255_s5 + $0x30] sm:$0xff]  ;;  %v1670_v49 = vpop.f32.mrf.mxu3 }
 0x3f4   :  { %3012 = vst [vmem:[%s12256_s7 + $0x60] sm:$0xff] %v2980_v12  ;;  %v2917_v25 = vsel %vm2853_vm2, %v2885_v17, %v2821_v16  ;;  %v2439_v10 = vmul.f32 %v2407_v44, %v10314_v6  ;;  %v2534_v20 = vadd.f32 -0.28449672, %v2502_v11  ;;  %v2144_v22 = vand.u32 2147483647, %v10322_v28  ;;  %v6251_v17 = vld [vmem:[%s12249_s0 + $0x98] sm:$0xff]  ;;  %v1605_v44 = vpop.f32.mrf.mxu2 }
 0x3f5   :  { %v2949_v56 = vadd.f32 1.0, %v2917_v25  ;;  %v1834_v54 = vmul.f32 0.3275911, %v10345_v27  ;;  %v6026_v61 = vpop.eup %6025  ;;  %v2697_v16 = vmul.f32 %v2665_v52, %v10285_v55  ;;  %v2146_v55 = vand.u32 2147483648, %v10322_v28 }
 0x3f6   :  { %5719 = vmatmul.msk.f32.gmra.mxu0 %vm1509_vm5, %v10350_v19  ;;  %v2471_v7 = vadd.f32 1.4214138, %v2439_v10  ;;  %v2566_v5 = vmul.f32 %v2534_v20, %v10268_v60  ;;  %v2136_v12 = vmul.f32 %v6026_v61, %v10322_v28  ;;  %v10381_v13 = vadd.f32 %v6251_v17, %v1668_v59 }
 0x3f7   :  { %v2981_v42 = vmul.f32 %v2949_v56, %v10195_v35  ;;  %v2124_v35 = vadd.f32 %v6022_v24, %v2123_v26  ;;  %v10365_v37 = vadd.f32 1.0, %v1834_v54  ;;  %v6028_v43 = vpop.eup %6027  ;;  %vm10386_vm10 = vcmp.eq.f32.partialorder %v2144_v22, 8.507059e+37 }
 0x3f8   :  { %v2503_v33 = vmul.f32 %v2471_v7, %v10314_v6  ;;  %v2598_v45 = vadd.f32 0.2548296, %v2566_v5  ;;  %v10390_v58 = vmul.f32 1.442695, %v2697_v16  ;;  %vm2141_vm8 = vweird.f32 %v6026_v61 }
 0x3f9   :  { %3013 = vst [vmem:[%s12256_s7 + $0x68] sm:$0xff] %v2981_v42  ;;  %v2128_v57 = vsel %vm2127_vm1, %v6022_v24, %v2124_v35  ;;  %6029 = vrcp.f32 %v10365_v37  ;;  %v2147_v10 = vor.u32 1.1754944e-38, %v2146_v55  ;;  %v2666_v53 = vsub.f32 0.0, %v10345_v27  ;;  %vm2142_vm2 = vmor %vm2140_vm15, %vm2141_vm8 }
 0x3fa   :  { %v2535_v14 = vadd.f32 -0.28449672, %v2503_v33  ;;  %v10367_v38 = vsel %vm2130_vm9, %v2132_v3, %v2128_v57  ;;  %6031 = vpow2.f32 %v2744_v63  ;;  %v10405_v52 = vmul.f32 0.70710677, %v10381_v13 }
 0x3fb   :  { %5734 = vmatmul.msk.f32.gmra.mxu1 %vm1509_vm5, %v10295_v62  ;;  %5745 = vmatmul.msk.f32.gmra.mxu3 %vm1509_vm5, %v10302_v23  ;;  %v2376_v24 = vmul.f32 1.0614054, %v10367_v38  ;;  %v2630_v62 = vmul.f32 %v2598_v45, %v10268_v60  ;;  %v2137_v23 = vsub.f32 1.0, %v2136_v12  ;;  %v1606_v20 = vadd.f32 %v1605_v44, %v10399_v36 }
 0x3fc   :  { %v2567_v47 = vmul.f32 %v2535_v14, %v10314_v6  ;;  %v2159_v35 = vand.u32 2147483647, %v10365_v37  ;;  %v10413_v54 = vand.u32 2147483647, %v10405_v52  ;;  %v1671_v5 = vadd.f32 %v1670_v49, %v10399_v36 }
 0x3fd   :  { %v2408_v40 = vadd.f32 -1.4531521, %v2376_v24  ;;  %v2790_v60 = vmul.f32 %v6024_v18, %v2630_v62  ;;  %v2138_v32 = vmul.f32 %v6026_v61, %v2137_v23  ;;  %v2161_v16 = vand.u32 2147483648, %v10365_v37 }
 0x3fe   :  { %5720 = vmatmul.msk.f32.gmra.mxu0 %vm1509_vm5, %v10395_v34  ;;  %v2599_v56 = vadd.f32 0.2548296, %v2567_v47  ;;  %v1835_v45 = vmul.f32 0.3275911, %v10413_v54  ;;  %v6254_v47 = vld [vmem:[%s12255_s5 + $0x38] sm:$0xff]  ;;  %vm2155_vm14 = vweird.f32 %v10365_v37  ;;  %vm2160_vm0 = vcmp.eq.f32.partialorder %v2159_v35, 8.507059e+37 }
 0x3ff   :  { %v2440_v11 = vmul.f32 %v2408_v40, %v10367_v38  ;;  %v2822_v42 = vsub.f32 1.0, %v2790_v60  ;;  %v2139_v18 = vadd.f32 %v6026_v61, %v2138_v32  ;;  %v6030_v7 = vpop.eup %6029  ;;  %v2698_v60 = vmul.f32 %v2666_v53, %v10345_v27  ;;  %v6255_v27 = vld [vmem:[%s12249_s0 + $0xa8] sm:$0xff] }
 0x400   :  { %v2631_v26 = vmul.f32 %v2599_v56, %v10314_v6  ;;  %v6032_v33 = vpop.eup %6031  ;;  %v2151_v6 = vmul.f32 %v6030_v7, %v10365_v37  ;;  %vm2156_vm4 = vweird.f32 %v6030_v7  ;;  %v10454_v53 = vadd.f32 %v6255_v27, %v1671_v5 }
 0x401   :  { %v2472_v59 = vadd.f32 1.4214138, %v2440_v11  ;;  %v2886_v3 = vsub.f32 0.0, %v2822_v42  ;;  %v2143_v57 = vsel %vm2142_vm2, %v6026_v61, %v2139_v18  ;;  %vm2157_vm12 = vmor %vm2155_vm14, %vm2156_vm4  ;;  %vm2856_vm13 = vcmp.lt.f32.partialorder %v10191_v30, 0.0 }
 0x402   :  { %v2791_v63 = vmul.f32 %v6028_v43, %v2631_v26  ;;  %v10422_v28 = vsel %vm10386_vm10, %v2147_v10, %v2143_v57  ;;  %v2152_v24 = vsub.f32 1.0, %v2151_v6  ;;  %v6253_v43 = vld [vmem:[%s12249_s0 + $0xa0] sm:$0xff]  ;;  %v2162_v10 = vor.u32 1.1754944e-38, %v2161_v16 }
 0x403   :  { %5735 = vmatmul.msk.f32.gmra.mxu1 %vm1509_vm5, %v10350_v19  ;;  %v2504_v22 = vmul.f32 %v2472_v59, %v10367_v38  ;;  %v2918_v14 = vsel %vm2854_vm6, %v2886_v3, %v2822_v42  ;;  %v2377_v61 = vmul.f32 1.0614054, %v10422_v28  ;;  %v10429_v19 = vadd.f32 1.0, %v1835_v45 }
 0x404   :  { %v2823_v12 = vsub.f32 1.0, %v2791_v63  ;;  %v2950_v55 = vadd.f32 1.0, %v2918_v14  ;;  %v10434_v62 = vadd.f32 %v6253_v43, %v1606_v20  ;;  %v2153_v40 = vmul.f32 %v6030_v7, %v2152_v24 }
 0x405   :  { %v2536_v17 = vadd.f32 -0.28449672, %v2504_v22  ;;  %v2409_v23 = vadd.f32 -1.4531521, %v2377_v61  ;;  %6033 = vrcp.f32 %v10429_v19  ;;  %v1736_v59 = vmul.f32 0.5, %v10167_v46  ;;  %v10482_v46 = vld [vmem:[%s12255_s5 + $0x40] sm:$0xff] }
 0x406   :  { %5721 = vmatmul.msk.f32.gmra.mxu0 %vm1509_vm5, %v6254_v47  ;;  %v2887_v41 = vsub.f32 0.0, %v2823_v12  ;;  %v2982_v25 = vmul.f32 %v2950_v55, %v10200_v9  ;;  %v2154_v49 = vadd.f32 %v6030_v7, %v2153_v40  ;;  %v10457_v26 = vmul.f32 0.70710677, %v10434_v62 }
 0x407   :  { %v2568_v44 = vmul.f32 %v2536_v17, %v10367_v38  ;;  %v2441_v32 = vmul.f32 %v2409_v23, %v10422_v28  ;;  %6035 = vpow2.f32 %v10390_v58  ;;  %v2748_v57 = vmul.f32 1.442695, %v2698_v60 }
 0x408   :  { %v2919_v56 = vsel %vm2855_vm11, %v2887_v41, %v2823_v12  ;;  %3014 = vst [vmem:[%s12256_s7 + $0x70] sm:$0xff] %v2982_v25  ;;  %v2158_v42 = vsel %vm2157_vm12, %v6030_v7, %v2154_v49  ;;  %v10469_v7 = vand.u32 2147483647, %v10457_v26  ;;  %v2174_v22 = vand.u32 2147483647, %v10429_v19 }
 0x409   :  { %v2951_v11 = vadd.f32 1.0, %v2919_v56  ;;  %v2600_v9 = vadd.f32 0.2548296, %v2568_v44  ;;  %v2473_v29 = vadd.f32 1.4214138, %v2441_v32  ;;  %v10463_v20 = vsel %vm2160_vm0, %v2162_v10, %v2158_v42 }
 0x40a   :  { %v2378_v3 = vmul.f32 1.0614054, %v10463_v20  ;;  %v2667_v58 = vsub.f32 0.0, %v10413_v54  ;;  %v1836_v16 = vmul.f32 0.3275911, %v10469_v7  ;;  %v2176_v55 = vand.u32 2147483648, %v10429_v19 }
 0x40b   :  { %5736 = vmatmul.msk.f32.gmra.mxu1 %vm1509_vm5, %v10395_v34  ;;  %v2983_v37 = vmul.f32 %v2951_v11, %v10310_v8  ;;  %v2632_v18 = vmul.f32 %v2600_v9, %v10367_v38  ;;  %v2505_v5 = vmul.f32 %v2473_v29, %v10422_v28  ;;  %v6034_v35 = vpop.eup %6033  ;;  %v10477_v8 = vmul.f32 0.70710677, %v10454_v53  ;;  %v1608_v29 = vpop.f32.mrf.mxu2 }
 0x40c   :  { %v2410_v63 = vadd.f32 -1.4531521, %v2378_v3  ;;  %vm2171_vm3 = vweird.f32 %v6034_v35  ;;  %v10496_v17 = vadd.f32 1.0, %v1836_v16  ;;  %vm2170_vm7 = vweird.f32 %v10429_v19 }
 0x40d   :  { %3015 = vst [vmem:[%s12256_s7 + $0x78] sm:$0xff] %v2983_v37  ;;  %v2792_v34 = vmul.f32 %v6032_v33, %v2632_v18  ;;  %v2537_v38 = vadd.f32 -0.28449672, %v2505_v5  ;;  %v2166_v33 = vmul.f32 %v6034_v35, %v10429_v19  ;;  %v10493_v61 = vand.u32 2147483647, %v10477_v8  ;;  %v6036_v25 = vpop.eup %6035  ;;  %vm2172_vm9 = vmor %vm2170_vm7, %vm2171_vm3  ;;  %v10521_v18 = vpop.permute.xlu0 %1486 }
 0x40e   :  { %5722 = vmatmul.msk.f32.gmra.mxu0 %vm1509_vm5, %v10482_v46  ;;  %v2442_v14 = vmul.f32 %v2410_v63, %v10463_v20  ;;  %v2699_v60 = vmul.f32 %v2667_v58, %v10413_v54  ;;  %6037 = vrcp.f32 %v10496_v17  ;;  %v1737_v9 = vmul.f32 0.5, %v10225_v50  ;;  %v10514_v54 = vld [vmem:[%s12255_s5 + $0x48] sm:$0xff]  ;;  %v1673_v58 = vpop.f32.mrf.mxu3 }
 0x40f   :  { %v2824_v6 = vsub.f32 1.0, %v2792_v34  ;;  %v2569_v45 = vmul.f32 %v2537_v38, %v10422_v28  ;;  %v2167_v12 = vsub.f32 1.0, %v2166_v33  ;;  %v1837_v40 = vmul.f32 0.3275911, %v10493_v61 }
 0x410   :  { %v2474_v41 = vadd.f32 1.4214138, %v2442_v14  ;;  %vm2175_vm1 = vcmp.eq.f32.partialorder %v2174_v22, 8.507059e+37  ;;  %6039 = vpow2.f32 %v2748_v57  ;;  %v2750_v42 = vmul.f32 1.442695, %v2699_v60 }
 0x411   :  { %v2888_v24 = vsub.f32 0.0, %v2824_v6  ;;  %v2601_v43 = vadd.f32 0.2548296, %v2569_v45  ;;  %v2168_v23 = vmul.f32 %v6034_v35, %v2167_v12  ;;  %v10509_v30 = vadd.f32 1.0, %v1837_v40 }
 0x412   :  { %v2506_v49 = vmul.f32 %v2474_v41, %v10463_v20  ;;  %v2668_v37 = vsub.f32 0.0, %v10469_v7  ;;  %vm2857_vm6 = vcmp.lt.f32.partialorder %v10256_v15, 0.0  ;;  %v10531_v34 = vmul.f32 0.5, %v10290_v2 }
 0x413   :  { %5737 = vmatmul.msk.f32.gmra.mxu1 %vm1509_vm5, %v6254_v47  ;;  %v2920_v44 = vsel %vm2856_vm13, %v2888_v24, %v2824_v6  ;;  %v2633_v32 = vmul.f32 %v2601_v43, %v10422_v28  ;;  %v2169_v11 = vadd.f32 %v6034_v35, %v2168_v23  ;;  %v2177_v47 = vor.u32 1.1754944e-38, %v2176_v55  ;;  %v6258_v43 = vld [vmem:[%s12249_s0 + $0xb0] sm:$0xff] }
 0x414   :  { %v2952_v56 = vadd.f32 1.0, %v2920_v44  ;;  %v2538_v10 = vadd.f32 -0.28449672, %v2506_v49  ;;  %6041 = vrcp.f32 %v10509_v30  ;;  %v2189_v38 = vand.u32 2147483647, %v10496_v17 }
 0x415   :  { %v2793_v19 = vmul.f32 %v6036_v25, %v2633_v32  ;;  %v2173_v27 = vsel %vm2172_vm9, %v6034_v35, %v2169_v11  ;;  %v6038_v35 = vpop.eup %6037  ;;  %v1609_v63 = vadd.f32 %v1608_v29, %v10521_v18  ;;  %vm2858_vm15 = vcmp.lt.f32.partialorder %v10325_v48, 0.0 }
 0x416   :  { %5723 = vmatmul.msk.f32.gmra.mxu0 %vm1509_vm5, %v10514_v54  ;;  %v2984_v28 = vmul.f32 %v2952_v56, %v1736_v59  ;;  %v10518_v50 = vsel %vm2175_vm1, %v2177_v47, %v2173_v27  ;;  %v2570_v3 = vmul.f32 %v2538_v10, %v10463_v20  ;;  %v2181_v22 = vmul.f32 %v6038_v35, %v10496_v17  ;;  %v6040_v24 = vpop.eup %6039 }
 0x417   :  { %v2825_v5 = vsub.f32 1.0, %v2793_v19  ;;  %v2379_v59 = vmul.f32 1.0614054, %v10518_v50  ;;  %6043 = vpow2.f32 %v2750_v42  ;;  %vm2185_vm10 = vweird.f32 %v10496_v17 }
 0x418   :  { %3016 = vst [vmem:[%s12256_s7 + $0x80] sm:$0xff] %v2984_v28  ;;  %v2602_v33 = vadd.f32 0.2548296, %v2570_v3  ;;  %v2191_v15 = vand.u32 2147483648, %v10496_v17  ;;  %v10542_v2 = vmul.f32 %v2668_v37, %v10469_v7  ;;  %v2182_v12 = vsub.f32 1.0, %v2181_v22  ;;  %v6260_v3 = vld [vmem:[%s12249_s0 + $0xb8] sm:$0xff] }
 0x419   :  { %v2889_v57 = vsub.f32 0.0, %v2825_v5  ;;  %v2411_v6 = vadd.f32 -1.4531521, %v2379_v59  ;;  %vm2186_vm8 = vweird.f32 %v6038_v35  ;;  %vm10546_vm11 = vcmp.eq.f32.partialorder %v2189_v38, 8.507059e+37 }
 0x41a   :  { %v2634_v45 = vmul.f32 %v2602_v33, %v10463_v20  ;;  %v10553_v7 = vadd.f32 %v6258_v43, %v1609_v63  ;;  %v6259_v20 = vld [vmem:[%s12255_s5 + $0x50] sm:$0xff]  ;;  %v6042_v41 = vpop.eup %6041  ;;  %v2183_v25 = vmul.f32 %v6038_v35, %v2182_v12  ;;  %v1674_v44 = vadd.f32 %v1673_v58, %v10521_v18  ;;  %vm2187_vm4 = vmor %vm2185_vm10, %vm2186_vm8 }
 0x41b   :  { %5738 = vmatmul.msk.f32.gmra.mxu1 %vm1509_vm5, %v10482_v46  ;;  %v2921_v16 = vsel %vm2857_vm6, %v2889_v57, %v2825_v5  ;;  %v2443_v14 = vmul.f32 %v2411_v6, %v10518_v50  ;;  %v2192_v56 = vor.u32 1.1754944e-38, %v2191_v15  ;;  %v2196_v32 = vmul.f32 %v6042_v41, %v10509_v30 }
 0x41c   :  { %v2953_v55 = vadd.f32 1.0, %v2921_v16  ;;  %v2794_v23 = vmul.f32 %v6040_v24, %v2634_v45  ;;  %vm2200_vm2 = vweird.f32 %v10509_v30  ;;  %v2184_v47 = vadd.f32 %v6038_v35, %v2183_v25  ;;  %v10598_v45 = vpop.permute.xlu1 %1491 }
 0x41d   :  { %v2475_v40 = vadd.f32 1.4214138, %v2443_v14  ;;  %v2204_v28 = vand.u32 2147483647, %v10509_v30  ;;  %v6044_v19 = vpop.eup %6043  ;;  %v2206_v10 = vand.u32 2147483648, %v10509_v30  ;;  %v2669_v27 = vsub.f32 0.0, %v10493_v61 }
 0x41e   :  { %5724 = vmatmul.msk.f32.gmra.mxu0 %vm1509_vm5, %v6259_v20  ;;  %v2985_v60 = vmul.f32 %v2953_v55, %v1737_v9  ;;  %v2826_v49 = vsub.f32 1.0, %v2794_v23  ;;  %v2197_v9 = vsub.f32 1.0, %v2196_v32  ;;  %v10573_v29 = vmul.f32 0.70710677, %v10553_v7 }
 0x41f   :  { %v2507_v11 = vmul.f32 %v2475_v40, %v10518_v50  ;;  %v2188_v5 = vsel %vm2187_vm4, %v6038_v35, %v2184_v47  ;;  %v10578_v59 = vadd.f32 %v6260_v3, %v1674_v44  ;;  %vm2201_vm14 = vweird.f32 %v6042_v41 }
 0x420   :  { %3017 = vst [vmem:[%s12256_s7 + $0x88] sm:$0xff] %v2985_v60  ;;  %v2890_v42 = vsub.f32 0.0, %v2826_v49  ;;  %v10584_v17 = vsel %vm10546_vm11, %v2192_v56, %v2188_v5  ;;  %v2198_v38 = vmul.f32 %v6042_v41, %v2197_v9  ;;  %v10587_v63 = vand.u32 2147483647, %v10573_v29  ;;  %vm2202_vm0 = vmor %vm2200_vm2, %vm2201_vm14  ;;  %v1676_v56 = vpop.f32.mrf.mxu3 }
 0x421   :  { %v2539_v37 = vadd.f32 -0.28449672, %v2507_v11  ;;  %v2380_v33 = vmul.f32 1.0614054, %v10584_v17  ;;  %vm10593_vm12 = vcmp.eq.f32.partialorder %v2204_v28, 8.507059e+37  ;;  %v2207_v58 = vor.u32 1.1754944e-38, %v2206_v10 }
 0x422   :  { %v2922_v35 = vsel %vm2858_vm15, %v2890_v42, %v2826_v49  ;;  %v2199_v15 = vadd.f32 %v6042_v41, %v2198_v38  ;;  %v1838_v16 = vmul.f32 0.3275911, %v10587_v63  ;;  %v10603_v48 = vmul.f32 0.70710677, %v10578_v59  ;;  %v6261_v11 = vld [vmem:[%s12249_s0 + $0xc0] sm:$0xff] }
 0x423   :  { %5739 = vmatmul.msk.f32.gmra.mxu1 %vm1509_vm5, %v10514_v54  ;;  %v2571_v57 = vmul.f32 %v2539_v37, %v10518_v50  ;;  %v1611_v54 = vpop.f32.mrf.mxu2  ;;  %v2954_v22 = vadd.f32 1.0, %v2922_v35  ;;  %v2412_v12 = vadd.f32 -1.4531521, %v2380_v33  ;;  %v2701_v60 = vmul.f32 %v2669_v27, %v10493_v61 }
 0x424   :  { %v2203_v55 = vsel %vm2202_vm0, %v6042_v41, %v2199_v15  ;;  %v10606_v46 = vadd.f32 1.0, %v1838_v16  ;;  %v1612_v43 = vadd.f32 %v1611_v54, %v10598_v45  ;;  %v10616_v30 = vand.u32 2147483647, %v10603_v48 }
 0x425   :  { %v2603_v14 = vadd.f32 0.2548296, %v2571_v57  ;;  %v2986_v24 = vmul.f32 %v2954_v22, %v10531_v34  ;;  %v2444_v40 = vmul.f32 %v2412_v12, %v10584_v17  ;;  %v10613_v25 = vsel %vm10593_vm12, %v2207_v58, %v2203_v55  ;;  %v6262_v22 = vld [vmem:[%s12249_s0 + $0xc8] sm:$0xff] }
 0x426   :  { %v2752_v34 = vmul.f32 1.442695, %v10542_v2  ;;  %v2381_v41 = vmul.f32 1.0614054, %v10613_v25  ;;  %6045 = vrcp.f32 %v10606_v46  ;;  %v1839_v49 = vmul.f32 0.3275911, %v10616_v30 }
 0x427   :  { %v2635_v23 = vmul.f32 %v2603_v14, %v10518_v50  ;;  %3018 = vst [vmem:[%s12256_s7 + $0x90] sm:$0xff] %v2986_v24  ;;  %v2476_v44 = vadd.f32 1.4214138, %v2444_v40  ;;  %v10630_v47 = vadd.f32 %v6261_v11, %v1612_v43  ;;  %v1739_v2 = vmul.f32 0.5, %v10381_v13 }
 0x428   :  { %v2413_v32 = vadd.f32 -1.4531521, %v2381_v41  ;;  %vm2859_vm13 = vcmp.lt.f32.partialorder %v10405_v52, 0.0  ;;  %6047 = vpow2.f32 %v2752_v34  ;;  %v1677_v9 = vadd.f32 %v1676_v56, %v10598_v45 }
 0x429   :  { %v2795_v50 = vmul.f32 %v6044_v19, %v2635_v23  ;;  %v2508_v19 = vmul.f32 %v2476_v44, %v10584_v17  ;;  %v2754_v42 = vmul.f32 1.442695, %v2701_v60  ;;  %v2670_v37 = vsub.f32 0.0, %v10587_v63 }
 0x42a   :  { %v2445_v61 = vmul.f32 %v2413_v32, %v10613_v25  ;;  %v10641_v13 = vmul.f32 0.5, %v10434_v62  ;;  %v10645_v52 = vmul.f32 0.70710677, %v10630_v47  ;;  %v10649_v57 = vmul.f32 0.5, %v10454_v53 }
 0x42b   :  { %5740 = vmatmul.msk.f32.gmra.mxu1 %vm1509_vm5, %v6259_v20  ;;  %v2827_v28 = vsub.f32 1.0, %v2795_v50  ;;  %v10636_v20 = vadd.f32 1.0, %v1839_v49  ;;  %v2540_v27 = vadd.f32 -0.28449672, %v2508_v19  ;;  %v2219_v62 = vand.u32 2147483647, %v10606_v46 }
 0x42c   :  { %v6046_v5 = vpop.eup %6045  ;;  %v2477_v3 = vadd.f32 1.4214138, %v2445_v61  ;;  %v10657_v15 = vadd.f32 %v6262_v22, %v1677_v9  ;;  %v2702_v14 = vmul.f32 %v2670_v37, %v10587_v63  ;;  %vm2860_vm5 = vcmp.lt.f32.partialorder %v10457_v26, 0.0  ;;  %v1614_v22 = vpop.f32.mrf.mxu2 }
 0x42d   :  { %v2891_v10 = vsub.f32 0.0, %v2827_v28  ;;  %6049 = vrcp.f32 %v10636_v20  ;;  %v2572_v35 = vmul.f32 %v2540_v27, %v10584_v17  ;;  %v2211_v33 = vmul.f32 %v6046_v5, %v10606_v46 }
 0x42e   :  { %v2509_v54 = vmul.f32 %v2477_v3, %v10613_v25  ;;  %6051 = vpow2.f32 %v2754_v42  ;;  %v6048_v53 = vpop.eup %6047  ;;  %v2221_v55 = vand.u32 2147483648, %v10606_v46  ;;  %v10663_v43 = vand.u32 2147483647, %v10645_v52 }
 0x42f   :  { %v2923_v38 = vsel %vm2859_vm13, %v2891_v10, %v2827_v28  ;;  %v2604_v58 = vadd.f32 0.2548296, %v2572_v35  ;;  %v2212_v16 = vsub.f32 1.0, %v2211_v33  ;;  %vm2215_vm3 = vweird.f32 %v10606_v46 }
 0x430   :  { %v2955_v6 = vadd.f32 1.0, %v2923_v38  ;;  %v2541_v24 = vadd.f32 -0.28449672, %v2509_v54  ;;  %vm2216_vm7 = vweird.f32 %v6046_v5  ;;  %vm10671_vm9 = vcmp.eq.f32.partialorder %v2219_v62, 8.507059e+37 }
 0x431   :  { %v2636_v23 = vmul.f32 %v2604_v58, %v10584_v17  ;;  %v2213_v40 = vmul.f32 %v6046_v5, %v2212_v16  ;;  %v1840_v50 = vmul.f32 0.3275911, %v10663_v43  ;;  %v10677_v44 = vmul.f32 0.70710677, %v10657_v15  ;;  %vm2217_vm1 = vmor %vm2215_vm3, %vm2216_vm7 }
 0x432   :  { %v2987_v12 = vmul.f32 %v2955_v6, %v1739_v2  ;;  %v2573_v63 = vmul.f32 %v2541_v24, %v10613_v25  ;;  %v2671_v56 = vsub.f32 0.0, %v10616_v30  ;;  %v2222_v49 = vor.u32 1.1754944e-38, %v2221_v55  ;;  %v10701_v24 = vpop.permute.xlu2 %1496 }
 0x433   :  { %v6050_v34 = vpop.eup %6049  ;;  %v2796_v17 = vmul.f32 %v6048_v53, %v2636_v23  ;;  %v2214_v60 = vadd.f32 %v6046_v5, %v2213_v40  ;;  %v10681_v11 = vadd.f32 1.0, %v1840_v50  ;;  %v10684_v2 = vand.u32 2147483647, %v10677_v44 }
 0x434   :  { %3019 = vst [vmem:[%s12256_s7 + $0x98] sm:$0xff] %v2987_v12  ;;  %v2226_v46 = vmul.f32 %v6050_v34, %v10636_v20  ;;  %v2605_v32 = vadd.f32 0.2548296, %v2573_v63  ;;  %v6052_v28 = vpop.eup %6051  ;;  %v2234_v10 = vand.u32 2147483647, %v10636_v20  ;;  %v2236_v37 = vand.u32 2147483648, %v10636_v20 }
 0x435   :  { %v2828_v19 = vsub.f32 1.0, %v2796_v17  ;;  %v2218_v61 = vsel %vm2217_vm1, %v6046_v5, %v2214_v60  ;;  %6053 = vrcp.f32 %v10681_v11  ;;  %vm2231_vm6 = vweird.f32 %v6050_v34 }
 0x436   :  { %v2227_v9 = vsub.f32 1.0, %v2226_v46  ;;  %v2637_v27 = vmul.f32 %v2605_v32, %v10613_v25  ;;  %v10690_v42 = vsel %vm10671_vm9, %v2222_v49, %v2218_v61  ;;  %vm2861_vm15 = vcmp.lt.f32.partialorder %v10477_v8, 0.0  ;;  %v6263_v8 = vld [vmem:[%s12249_s0 + $0xd0] sm:$0xff] }
 0x437   :  { %v2892_v3 = vsub.f32 0.0, %v2828_v19  ;;  %v2382_v38 = vmul.f32 1.0614054, %v10690_v42  ;;  %v2756_v5 = vmul.f32 1.442695, %v2702_v14  ;;  %vm2230_vm10 = vweird.f32 %v10636_v20 }
 0x438   :  { %v2228_v35 = vmul.f32 %v6050_v34, %v2227_v9  ;;  %v2797_v33 = vmul.f32 %v6052_v28, %v2637_v27  ;;  %v1841_v6 = vmul.f32 0.3275911, %v10684_v2  ;;  %vm2232_vm8 = vmor %vm2230_vm10, %vm2231_vm6  ;;  %v2237_v53 = vor.u32 1.1754944e-38, %v2236_v37 }
 0x439   :  { %v2924_v25 = vsel %vm2860_vm5, %v2892_v3, %v2828_v19  ;;  %v2414_v54 = vadd.f32 -1.4531521, %v2382_v38  ;;  %v2703_v12 = vmul.f32 %v2671_v56, %v10616_v30  ;;  %vm2235_vm11 = vcmp.eq.f32.partialorder %v2234_v10, 8.507059e+37 }
 0x43a   :  { %v2229_v62 = vadd.f32 %v6050_v34, %v2228_v35  ;;  %v2956_v58 = vadd.f32 1.0, %v2924_v25  ;;  %v2829_v16 = vsub.f32 1.0, %v2797_v33  ;;  %v10704_v23 = vadd.f32 1.0, %v1841_v6  ;;  %v1679_v25 = vpop.f32.mrf.mxu3 }
 0x43b   :  { %v2446_v14 = vmul.f32 %v2414_v54, %v10690_v42  ;;  %v6054_v26 = vpop.eup %6053  ;;  %v1615_v41 = vadd.f32 %v1614_v22, %v10701_v24  ;;  %6055 = vpow2.f32 %v2756_v5  ;;  %v2758_v60 = vmul.f32 1.442695, %v2703_v12  ;;  %v1617_v12 = vpop.f32.mrf.mxu2 }
 0x43c   :  { %v2233_v55 = vsel %vm2232_vm8, %v6050_v34, %v2229_v62  ;;  %v2988_v40 = vmul.f32 %v2956_v58, %v10641_v13  ;;  %v2893_v63 = vsub.f32 0.0, %v2829_v16  ;;  %v2241_v17 = vmul.f32 %v6054_v26, %v10681_v11 }
 0x43d   :  { %v10707_v20 = vsel %vm2235_vm11, %v2237_v53, %v2233_v55  ;;  %v2478_v50 = vadd.f32 1.4214138, %v2446_v14  ;;  %v2672_v13 = vsub.f32 0.0, %v10663_v43  ;;  %6057 = vrcp.f32 %v10704_v23 }
 0x43e   :  { %v2383_v30 = vmul.f32 1.0614054, %v10707_v20  ;;  %3020 = vst [vmem:[%s12256_s7 + $0xa0] sm:$0xff] %v2988_v40  ;;  %v2925_v34 = vsel %vm2861_vm15, %v2893_v63, %v2829_v16  ;;  %v2242_v49 = vsub.f32 1.0, %v2241_v17  ;;  %vm2246_vm2 = vweird.f32 %v6054_v26  ;;  %v10754_v63 = vpop.permute.xlu0 %1501 }
 0x43f   :  { %v2957_v46 = vadd.f32 1.0, %v2925_v34  ;;  %v2510_v56 = vmul.f32 %v2478_v50, %v10690_v42  ;;  %v2249_v28 = vand.u32 2147483647, %v10681_v11  ;;  %v2251_v19 = vand.u32 2147483648, %v10681_v11 }
 0x440   :  { %v2415_v32 = vadd.f32 -1.4531521, %v2383_v30  ;;  %v10725_v61 = vadd.f32 %v6263_v8, %v1615_v41  ;;  %v2243_v37 = vmul.f32 %v6054_v26, %v2242_v49  ;;  %v10730_v3 = vmul.f32 0.5, %v10553_v7 }
 0x441   :  { %v2989_v9 = vmul.f32 %v2957_v46, %v10649_v57  ;;  %v2542_v10 = vadd.f32 -0.28449672, %v2510_v56  ;;  %6059 = vpow2.f32 %v2758_v60  ;;  %v2704_v38 = vmul.f32 %v2672_v13, %v10663_v43  ;;  %v6056_v33 = vpop.eup %6055 }
 0x442   :  { %v2447_v27 = vmul.f32 %v2415_v32, %v10707_v20  ;;  %v10734_v35 = vmul.f32 0.70710677, %v10725_v61  ;;  %v2244_v6 = vadd.f32 %v6054_v26, %v2243_v37  ;;  %vm2245_vm4 = vweird.f32 %v10681_v11 }
 0x443   :  { %3021 = vst [vmem:[%s12256_s7 + $0xa8] sm:$0xff] %v2989_v9  ;;  %v2574_v57 = vmul.f32 %v2542_v10, %v10690_v42  ;;  %v6058_v7 = vpop.eup %6057  ;;  %vm2247_vm14 = vmor %vm2245_vm4, %vm2246_vm2  ;;  %vm2250_vm12 = vcmp.eq.f32.partialorder %v2249_v28, 8.507059e+37  ;;  %v2252_v43 = vor.u32 1.1754944e-38, %v2251_v19  ;;  %v2673_v54 = vsub.f32 0.0, %v10684_v2  ;;  %v6264_v28 = vld [vmem:[%s12249_s0 + $0xd8] sm:$0xff] }
 0x444   :  { %v2479_v5 = vadd.f32 1.4214138, %v2447_v27  ;;  %v10744_v62 = vand.u32 2147483647, %v10734_v35  ;;  %v2248_v16 = vsel %vm2247_vm14, %v6054_v26, %v2244_v6  ;;  %v2256_v53 = vmul.f32 %v6058_v7, %v10704_v23 }
 0x445   :  { %v2606_v22 = vadd.f32 0.2548296, %v2574_v57  ;;  %vm2862_vm0 = vcmp.lt.f32.partialorder %v10573_v29, 0.0  ;;  %v10749_v11 = vsel %vm2250_vm12, %v2252_v43, %v2248_v16  ;;  %v2264_v14 = vand.u32 2147483647, %v10704_v23 }
 0x446   :  { %v2511_v58 = vmul.f32 %v2479_v5, %v10707_v20  ;;  %v1842_v55 = vmul.f32 0.3275911, %v10744_v62  ;;  %v1680_v40 = vadd.f32 %v1679_v25, %v10701_v24  ;;  %v2384_v26 = vmul.f32 1.0614054, %v10749_v11 }
 0x447   :  { %v2638_v41 = vmul.f32 %v2606_v22, %v10690_v42  ;;  %v2257_v30 = vsub.f32 1.0, %v2256_v53  ;;  %v6060_v17 = vpop.eup %6059  ;;  %vm2261_vm13 = vweird.f32 %v6058_v7  ;;  %v2266_v34 = vand.u32 2147483648, %v10704_v23 }
 0x448   :  { %v2543_v50 = vadd.f32 -0.28449672, %v2511_v58  ;;  %v10759_v60 = vadd.f32 1.0, %v1842_v55  ;;  %v1618_v13 = vadd.f32 %v1617_v12, %v10754_v63  ;;  %v2416_v32 = vadd.f32 -1.4531521, %v2384_v26 }
 0x449   :  { %v2798_v46 = vmul.f32 %v6056_v33, %v2638_v41  ;;  %v2258_v49 = vmul.f32 %v6058_v7, %v2257_v30  ;;  %vm2260_vm5 = vweird.f32 %v10704_v23  ;;  %v2705_v42 = vmul.f32 %v2673_v54, %v10684_v2  ;;  %v6265_v2 = vld [vmem:[%s12249_s0 + $0xe0] sm:$0xff] }
 0x44a   :  { %v2575_v56 = vmul.f32 %v2543_v50, %v10707_v20  ;;  %6061 = vrcp.f32 %v10759_v60  ;;  %v10769_v19 = vadd.f32 %v6264_v28, %v1680_v40  ;;  %v2448_v10 = vmul.f32 %v2416_v32, %v10749_v11  ;;  %vm2262_vm3 = vmor %vm2260_vm5, %vm2261_vm13 }
 0x44b   :  { %v2830_v8 = vsub.f32 1.0, %v2798_v46  ;;  %v2259_v27 = vadd.f32 %v6058_v7, %v2258_v49  ;;  %v2760_v37 = vmul.f32 1.442695, %v2704_v38  ;;  %vm2265_vm7 = vcmp.eq.f32.partialorder %v2264_v14, 8.507059e+37 }
 0x44c   :  { %v2607_v9 = vadd.f32 0.2548296, %v2575_v56  ;;  %v2267_v23 = vor.u32 1.1754944e-38, %v2266_v34  ;;  %v10776_v33 = vadd.f32 %v6265_v2, %v1618_v13  ;;  %v2480_v6 = vadd.f32 1.4214138, %v2448_v10 }
 0x44d   :  { %v2894_v57 = vsub.f32 0.0, %v2830_v8  ;;  %v2263_v25 = vsel %vm2262_vm3, %v6058_v7, %v2259_v27  ;;  %vm2863_vm9 = vcmp.lt.f32.partialorder %v10603_v48, 0.0  ;;  %v2762_v38 = vmul.f32 1.442695, %v2705_v42 }
 0x44e   :  { %v2639_v5 = vmul.f32 %v2607_v9, %v10707_v20  ;;  %v10780_v43 = vsel %vm2265_vm7, %v2267_v23, %v2263_v25  ;;  %v10783_v54 = vmul.f32 0.70710677, %v10769_v19  ;;  %v2512_v16 = vmul.f32 %v2480_v6, %v10749_v11 }
 0x44f   :  { %v2926_v22 = vsel %vm2862_vm0, %v2894_v57, %v2830_v8  ;;  %v2385_v53 = vmul.f32 1.0614054, %v10780_v43  ;;  %6063 = vpow2.f32 %v2760_v37  ;;  %v10793_v14 = vmul.f32 0.70710677, %v10776_v33 }
 0x450   :  { %v2799_v58 = vmul.f32 %v6060_v17, %v2639_v5  ;;  %v6062_v12 = vpop.eup %6061  ;;  %v2958_v20 = vadd.f32 1.0, %v2926_v22  ;;  %v10790_v7 = vand.u32 2147483647, %v10783_v54  ;;  %v2544_v40 = vadd.f32 -0.28449672, %v2512_v16 }
 0x451   :  { %v2417_v41 = vadd.f32 -1.4531521, %v2385_v53  ;;  %v2271_v29 = vmul.f32 %v6062_v12, %v10759_v60  ;;  %v2279_v26 = vand.u32 2147483647, %v10759_v60  ;;  %v2674_v30 = vsub.f32 0.0, %v10744_v62 }
 0x452   :  { %v2831_v55 = vsub.f32 1.0, %v2799_v58  ;;  %v2990_v50 = vmul.f32 %v2958_v20, %v10730_v3  ;;  %v1843_v17 = vmul.f32 0.3275911, %v10790_v7  ;;  %v2576_v13 = vmul.f32 %v2544_v40, %v10749_v11 }
 0x453   :  { %v2449_v46 = vmul.f32 %v2417_v41, %v10780_v43  ;;  %v2272_v56 = vsub.f32 1.0, %v2271_v29  ;;  %vm2276_vm1 = vweird.f32 %v6062_v12  ;;  %v2281_v32 = vand.u32 2147483648, %v10759_v60 }
 0x454   :  { %v2895_v34 = vsub.f32 0.0, %v2831_v55  ;;  %3022 = vst [vmem:[%s12256_s7 + $0xb0] sm:$0xff] %v2990_v50  ;;  %v10806_v3 = vadd.f32 1.0, %v1843_v17  ;;  %v10809_v49 = vand.u32 2147483647, %v10793_v14  ;;  %v1743_v27 = vmul.f32 0.5, %v10578_v59  ;;  %v1620_v17 = vpop.f32.mrf.mxu2 }
 0x455   :  { %v2608_v28 = vadd.f32 0.2548296, %v2576_v13  ;;  %v2481_v8 = vadd.f32 1.4214138, %v2449_v46  ;;  %v2273_v9 = vmul.f32 %v6062_v12, %v2272_v56  ;;  %v6064_v10 = vpop.eup %6063  ;;  %v2706_v23 = vmul.f32 %v2674_v30, %v10744_v62  ;;  %v1682_v62 = vpop.f32.mrf.mxu3 }
 0x456   :  { %v2927_v42 = vsel %vm2863_vm9, %v2895_v34, %v2831_v55  ;;  %6065 = vrcp.f32 %v10806_v3  ;;  %vm2275_vm6 = vweird.f32 %v10759_v60  ;;  %v2282_v6 = vor.u32 1.1754944e-38, %v2281_v32 }
 0x457   :  { %v2959_v37 = vadd.f32 1.0, %v2927_v42  ;;  %v2640_v2 = vmul.f32 %v2608_v28, %v10749_v11  ;;  %v2513_v57 = vmul.f32 %v2481_v8, %v10780_v43  ;;  %v2274_v5 = vadd.f32 %v6062_v12, %v2273_v9  ;;  %vm2277_vm15 = vmor %vm2275_vm6, %vm2276_vm1  ;;  %v6266_v9 = vld [vmem:[%s12249_s0 + $0xe8] sm:$0xff] }
 0x458   :  { %6067 = vpow2.f32 %v2762_v38  ;;  %v1844_v25 = vmul.f32 0.3275911, %v10809_v49  ;;  %vm2280_vm10 = vcmp.eq.f32.partialorder %v2279_v26, 8.507059e+37  ;;  %v2764_v16 = vmul.f32 1.442695, %v2706_v23 }
 0x459   :  { %v2991_v48 = vmul.f32 %v2959_v37, %v1743_v27  ;;  %v2800_v59 = vmul.f32 %v6064_v10, %v2640_v2  ;;  %v2545_v22 = vadd.f32 -0.28449672, %v2513_v57  ;;  %v2278_v58 = vsel %vm2277_vm15, %v6062_v12, %v2274_v5  ;;  %v6268_v57 = vld [vmem:[%s12249_s0 + $0xf8] sm:$0xff] }
 0x45a   :  { %v10824_v11 = vsel %vm2280_vm10, %v2282_v6, %v2278_v58  ;;  %v2675_v60 = vsub.f32 0.0, %v10790_v7  ;;  %v10827_v38 = vadd.f32 1.0, %v1844_v25  ;;  %v1744_v53 = vmul.f32 0.5, %v10630_v47 }
 0x45b   :  { %3023 = vst [vmem:[%s12256_s7 + $0xb8] sm:$0xff] %v2991_v48  ;;  %v2832_v20 = vsub.f32 1.0, %v2800_v59  ;;  %v2577_v55 = vmul.f32 %v2545_v22, %v10780_v43  ;;  %v2386_v12 = vmul.f32 1.0614054, %v10824_v11  ;;  %vm2864_vm8 = vcmp.lt.f32.partialorder %v10645_v52, 0.0 }
 0x45c   :  { %v6066_v40 = vpop.eup %6065  ;;  %v10834_v41 = vmul.f32 0.5, %v10657_v15  ;;  %6069 = vrcp.f32 %v10827_v38  ;;  %v1683_v29 = vadd.f32 %v1682_v62, %v10754_v63  ;;  %vm2865_vm11 = vcmp.lt.f32.partialorder %v10677_v44, 0.0  ;;  %v10842_v15 = vpop.permute.xlu1 %1506 }
 0x45d   :  { %v2896_v50 = vsub.f32 0.0, %v2832_v20  ;;  %v2609_v26 = vadd.f32 0.2548296, %v2577_v55  ;;  %v2418_v30 = vadd.f32 -1.4531521, %v2386_v12  ;;  %v2286_v47 = vmul.f32 %v6066_v40, %v10806_v3 }
 0x45e   :  { %v6068_v34 = vpop.eup %6067  ;;  %6071 = vpow2.f32 %v2764_v16  ;;  %v2294_v13 = vand.u32 2147483647, %v10806_v3  ;;  %v2707_v52 = vmul.f32 %v2675_v60, %v10790_v7  ;;  %v2296_v8 = vand.u32 2147483648, %v10806_v3  ;;  %v6267_v16 = vld [vmem:[%s12249_s0 + $0xf0] sm:$0xff] }
 0x45f   :  { %v2928_v46 = vsel %vm2864_vm8, %v2896_v50, %v2832_v20  ;;  %v2641_v56 = vmul.f32 %v2609_v26, %v10780_v43  ;;  %v2450_v32 = vmul.f32 %v2418_v30, %v10824_v11  ;;  %v2287_v42 = vsub.f32 1.0, %v2286_v47 }
 0x460   :  { %v2960_v28 = vadd.f32 1.0, %v2928_v46  ;;  %v10850_v10 = vadd.f32 %v6266_v9, %v1683_v29  ;;  %v1621_v27 = vadd.f32 %v1620_v17, %v10842_v15  ;;  %vm2291_vm2 = vweird.f32 %v6066_v40  ;;  %v1685_v29 = vpop.f32.mrf.mxu3 }
 0x461   :  { %v2801_v7 = vmul.f32 %v6068_v34, %v2641_v56  ;;  %v2482_v37 = vadd.f32 1.4214138, %v2450_v32  ;;  %v2288_v23 = vmul.f32 %v6066_v40, %v2287_v42  ;;  %vm2290_vm4 = vweird.f32 %v10806_v3 }
 0x462   :  { %v6070_v2 = vpop.eup %6069  ;;  %v2992_v43 = vmul.f32 %v2960_v28, %v1744_v53  ;;  %vm10854_vm14 = vcmp.eq.f32.partialorder %v2294_v13, 8.507059e+37  ;;  %v10859_v5 = vmul.f32 0.70710677, %v10850_v10  ;;  %vm2292_vm12 = vmor %vm2290_vm4, %vm2291_vm2  ;;  %v2297_v3 = vor.u32 1.1754944e-38, %v2296_v8 }
 0x463   :  { %v2833_v48 = vsub.f32 1.0, %v2801_v7  ;;  %v2514_v6 = vmul.f32 %v2482_v37, %v10824_v11  ;;  %v2289_v25 = vadd.f32 %v6066_v40, %v2288_v23  ;;  %v2301_v59 = vmul.f32 %v6070_v2, %v10827_v38 }
 0x464   :  { %v6072_v22 = vpop.eup %6071  ;;  %3024 = vst [vmem:[%s12256_s7 + $0xc0] sm:$0xff] %v2992_v43  ;;  %v2309_v58 = vand.u32 2147483647, %v10827_v38  ;;  %v10868_v62 = vand.u32 2147483647, %v10859_v5  ;;  %v10873_v60 = vadd.f32 %v6267_v16, %v1621_v27  ;;  %vm2306_vm0 = vweird.f32 %v6070_v2 }
 0x465   :  { %v2897_v53 = vsub.f32 0.0, %v2833_v48  ;;  %v2546_v20 = vadd.f32 -0.28449672, %v2514_v6  ;;  %v2293_v55 = vsel %vm2292_vm12, %v6066_v40, %v2289_v25  ;;  %v2302_v12 = vsub.f32 1.0, %v2301_v59 }
 0x466   :  { %v10877_v50 = vsel %vm10854_vm14, %v2297_v3, %v2293_v55  ;;  %v2311_v26 = vand.u32 2147483648, %v10827_v38  ;;  %v1845_v30 = vmul.f32 0.3275911, %v10868_v62  ;;  %v10888_v56 = vmul.f32 0.70710677, %v10873_v60 }
 0x467   :  { %v2929_v47 = vsel %vm2865_vm11, %v2897_v53, %v2833_v48  ;;  %v2578_v17 = vmul.f32 %v2546_v20, %v10824_v11  ;;  %v2387_v34 = vmul.f32 1.0614054, %v10877_v50  ;;  %v2303_v13 = vmul.f32 %v6070_v2, %v2302_v12 }
 0x468   :  { %v2961_v40 = vadd.f32 1.0, %v2929_v47  ;;  %v10885_v46 = vadd.f32 1.0, %v1845_v30  ;;  %v1686_v32 = vadd.f32 %v1685_v29, %v10842_v15  ;;  %vm2305_vm13 = vweird.f32 %v10827_v38 }
 0x469   :  { %v2610_v42 = vadd.f32 0.2548296, %v2578_v17  ;;  %v2419_v28 = vadd.f32 -1.4531521, %v2387_v34  ;;  %v2304_v8 = vadd.f32 %v6070_v2, %v2303_v13  ;;  %vm2307_vm5 = vmor %vm2305_vm13, %vm2306_vm0  ;;  %v2312_v9 = vor.u32 1.1754944e-38, %v2311_v26 }
 0x46a   :  { %v2993_v44 = vmul.f32 %v2961_v40, %v10834_v41  ;;  %v2676_v27 = vsub.f32 0.0, %v10809_v49  ;;  %6073 = vrcp.f32 %v10885_v46  ;;  %vm2310_vm3 = vcmp.eq.f32.partialorder %v2309_v58, 8.507059e+37 }
 0x46b   :  { %v2642_v7 = vmul.f32 %v2610_v42, %v10824_v11  ;;  %v2451_v37 = vmul.f32 %v2419_v28, %v10877_v50  ;;  %v2308_v23 = vsel %vm2307_vm5, %v6070_v2, %v2304_v8  ;;  %v2766_v38 = vmul.f32 1.442695, %v2707_v52 }
 0x46c   :  { %3025 = vst [vmem:[%s12256_s7 + $0xc8] sm:$0xff] %v2993_v44  ;;  %v10901_v43 = vsel %vm2310_vm3, %v2312_v9, %v2308_v23  ;;  %v10904_v41 = vand.u32 2147483647, %v10888_v56  ;;  %v10909_v48 = vadd.f32 %v6268_v57, %v1686_v32  ;;  %v2708_v25 = vmul.f32 %v2676_v27, %v10809_v49 }
 0x46d   :  { %v2802_v11 = vmul.f32 %v6072_v22, %v2642_v7  ;;  %v2483_v6 = vadd.f32 1.4214138, %v2451_v37  ;;  %v2388_v2 = vmul.f32 1.0614054, %v10901_v43  ;;  %6075 = vpow2.f32 %v2766_v38 }
 0x46e   :  { %v1846_v59 = vmul.f32 0.3275911, %v10904_v41  ;;  %v10918_v20 = vmul.f32 0.70710677, %v10909_v48  ;;  %v1746_v49 = vmul.f32 0.5, %v10725_v61  ;;  %vm2866_vm7 = vcmp.lt.f32.partialorder %v10734_v35, 0.0 }
 0x46f   :  { %v2834_v52 = vsub.f32 1.0, %v2802_v11  ;;  %v2515_v3 = vmul.f32 %v2483_v6, %v10877_v50  ;;  %v2420_v58 = vadd.f32 -1.4531521, %v2388_v2  ;;  %v2768_v26 = vmul.f32 1.442695, %v2708_v25 }
 0x470   :  { %v6074_v16 = vpop.eup %6073  ;;  %v10915_v53 = vadd.f32 1.0, %v1846_v59  ;;  %v2324_v40 = vand.u32 2147483647, %v10885_v46  ;;  %v2326_v32 = vand.u32 2147483648, %v10885_v46  ;;  %v10930_v35 = vand.u32 2147483647, %v10918_v20 }
 0x471   :  { %v2898_v55 = vsub.f32 0.0, %v2834_v52  ;;  %v2547_v22 = vadd.f32 -0.28449672, %v2515_v3  ;;  %v2452_v12 = vmul.f32 %v2420_v58, %v10901_v43  ;;  %v2316_v29 = vmul.f32 %v6074_v16, %v10885_v46 }
 0x472   :  { %6077 = vrcp.f32 %v10915_v53  ;;  %vm2321_vm9 = vweird.f32 %v6074_v16  ;;  %vm2320_vm1 = vweird.f32 %v10885_v46  ;;  %v1847_v37 = vmul.f32 0.3275911, %v10930_v35 }
 0x473   :  { %v2930_v30 = vsel %vm2866_vm7, %v2898_v55, %v2834_v52  ;;  %v2579_v47 = vmul.f32 %v2547_v22, %v10877_v50  ;;  %v2484_v17 = vadd.f32 1.4214138, %v2452_v12  ;;  %v2317_v34 = vsub.f32 1.0, %v2316_v29  ;;  %v6076_v8 = vpop.eup %6075  ;;  %vm2322_vm6 = vmor %vm2320_vm1, %vm2321_vm9 }
 0x474   :  { %v2962_v13 = vadd.f32 1.0, %v2930_v30  ;;  %6079 = vpow2.f32 %v2768_v26  ;;  %vm2325_vm15 = vcmp.eq.f32.partialorder %v2324_v40, 8.507059e+37  ;;  %v2327_v38 = vor.u32 1.1754944e-38, %v2326_v32 }
 0x475   :  { %v2611_v42 = vadd.f32 0.2548296, %v2579_v47  ;;  %v2516_v28 = vmul.f32 %v2484_v17, %v10901_v43  ;;  %v2318_v61 = vmul.f32 %v6074_v16, %v2317_v34  ;;  %v2677_v2 = vsub.f32 0.0, %v10868_v62 }
 0x476   :  { %v2994_v44 = vmul.f32 %v2962_v13, %v1746_v49  ;;  %v10944_v25 = vadd.f32 1.0, %v1847_v37  ;;  %v2339_v55 = vand.u32 2147483647, %v10915_v53  ;;  %v2341_v22 = vand.u32 2147483648, %v10915_v53 }
 0x477   :  { %v2643_v9 = vmul.f32 %v2611_v42, %v10877_v50  ;;  %v2548_v27 = vadd.f32 -0.28449672, %v2516_v28  ;;  %v2319_v7 = vadd.f32 %v6074_v16, %v2318_v61  ;;  %vm2867_vm8 = vcmp.lt.f32.partialorder %v10783_v54, 0.0 }
 0x478   :  { %v6078_v23 = vpop.eup %6077  ;;  %3026 = vst [vmem:[%s12256_s7 + $0xd0] sm:$0xff] %v2994_v44  ;;  %6081 = vrcp.f32 %v10944_v25  ;;  %v2709_v30 = vmul.f32 %v2677_v2, %v10868_v62  ;;  %vm2335_vm11 = vweird.f32 %v10915_v53  ;;  %v1747_v40 = vmul.f32 0.5, %v10769_v19 }
 0x479   :  { %v2803_v57 = vmul.f32 %v6076_v8, %v2643_v9  ;;  %v2580_v11 = vmul.f32 %v2548_v27, %v10901_v43  ;;  %v2323_v46 = vsel %vm2322_vm6, %v6074_v16, %v2319_v7  ;;  %v2331_v50 = vmul.f32 %v6078_v23, %v10915_v53 }
 0x47a   :  { %v10941_v6 = vsel %vm2325_vm15, %v2327_v38, %v2323_v46  ;;  %vm2336_vm10 = vweird.f32 %v6078_v23  ;;  %v6080_v26 = vpop.eup %6079  ;;  %v2678_v42 = vsub.f32 0.0, %v10904_v41  ;;  %vm2340_vm4 = vcmp.eq.f32.partialorder %v2339_v55, 8.507059e+37 }
 0x47b   :  { %v2835_v59 = vsub.f32 1.0, %v2803_v57  ;;  %v2612_v52 = vadd.f32 0.2548296, %v2580_v11  ;;  %v2389_v3 = vmul.f32 1.0614054, %v10941_v6  ;;  %v2332_v58 = vsub.f32 1.0, %v2331_v50  ;;  %vm2337_vm2 = vmor %vm2335_vm11, %vm2336_vm10 }
 0x47c   :  { %v2770_v53 = vmul.f32 1.442695, %v2709_v30  ;;  %v1748_v37 = vmul.f32 0.5, %v10776_v33  ;;  %vm2868_vm14 = vcmp.lt.f32.partialorder %v10793_v14, 0.0  ;;  %v2354_v2 = vand.u32 2147483647, %v10944_v25  ;;  %v4188_v33 = vpop.f32.mrf.mxu0  ;;  %v4253_v14 = vpop.f32.mrf.mxu1 }
 0x47d   :  { %v2899_v16 = vsub.f32 0.0, %v2835_v59  ;;  %v2644_v12 = vmul.f32 %v2612_v52, %v10901_v43  ;;  %v2421_v29 = vadd.f32 -1.4531521, %v2389_v3  ;;  %v2333_v49 = vmul.f32 %v6078_v23, %v2332_v58 }
 0x47e   :  { %v2342_v43 = vor.u32 1.1754944e-38, %v2341_v22  ;;  %v6082_v62 = vpop.eup %6081  ;;  %6083 = vpow2.f32 %v2770_v53  ;;  %v12849_v22 = vld [vmem:[#allocation11_spill] sm:$0xff]  ;;  %vm2350_vm0 = vweird.f32 %v10944_v25  ;;  %vm2355_vm5 = vcmp.eq.f32.partialorder %v2354_v2, 8.507059e+37 }
 0x47f   :  { %v2931_v47 = vsel %vm2867_vm8, %v2899_v16, %v2835_v59  ;;  %v2804_v17 = vmul.f32 %v6080_v26, %v2644_v12  ;;  %v2453_v34 = vmul.f32 %v2421_v29, %v10941_v6  ;;  %v2334_v13 = vadd.f32 %v6078_v23, %v2333_v49 }
 0x480   :  { %v2963_v32 = vadd.f32 1.0, %v2931_v47  ;;  %v2346_v7 = vmul.f32 %v6082_v62, %v10944_v25  ;;  %v2356_v59 = vand.u32 2147483648, %v10944_v25  ;;  %vm2351_vm12 = vweird.f32 %v6082_v62 }
 0x481   :  { %v2836_v28 = vsub.f32 1.0, %v2804_v17  ;;  %v2485_v61 = vadd.f32 1.4214138, %v2453_v34  ;;  %v2338_v54 = vsel %vm2337_vm2, %v6078_v23, %v2334_v13  ;;  %v2710_v23 = vmul.f32 %v2678_v42, %v10904_v41  ;;  %vm2352_vm13 = vmor %vm2350_vm0, %vm2351_vm12  ;;  %v6269_v17 = vld [vmem:[%s12249_s0 + $0x100] sm:$0xff]  ;;  %v6270_v13 = vld [vmem:[%s12249_s0 + $0x108] sm:$0xff] }
 0x482   :  { %v2995_v8 = vmul.f32 %v2963_v32, %v1747_v40  ;;  %v10958_v44 = vsel %vm2340_vm4, %v2342_v43, %v2338_v54  ;;  %v2347_v46 = vsub.f32 1.0, %v2346_v7  ;;  %v4189_v16 = vadd.f32 %v4188_v33, %v12849_v22 }
 0x483   :  { %v2900_v9 = vsub.f32 0.0, %v2836_v28  ;;  %v2517_v27 = vmul.f32 %v2485_v61, %v10941_v6  ;;  %v2390_v19 = vmul.f32 1.0614054, %v10958_v44  ;;  %v2772_v41 = vmul.f32 1.442695, %v2710_v23 }
 0x484   :  { %3027 = vst [vmem:[%s12256_s7 + $0xd8] sm:$0xff] %v2995_v8  ;;  %v2348_v58 = vmul.f32 %v6082_v62, %v2347_v46  ;;  %v4254_v12 = vadd.f32 %v4253_v14, %v12849_v22  ;;  %v2357_v30 = vor.u32 1.1754944e-38, %v2356_v59  ;;  %v2679_v47 = vsub.f32 0.0, %v10930_v35  ;;  %v6084_v42 = vpop.eup %6083 }
 0x485   :  { %v2932_v38 = vsel %vm2868_vm14, %v2900_v9, %v2836_v28  ;;  %v2549_v57 = vadd.f32 -0.28449672, %v2517_v27  ;;  %v2422_v11 = vadd.f32 -1.4531521, %v2390_v19  ;;  %v10983_v34 = vadd.f32 %v6269_v17, %v4189_v16  ;;  %v4221_v27 = vpop.f32.mrf.mxu2 }
 0x486   :  { %v2964_v50 = vadd.f32 1.0, %v2932_v38  ;;  %v2349_v26 = vadd.f32 %v6082_v62, %v2348_v58  ;;  %v10988_v40 = vadd.f32 %v6270_v13, %v4254_v12  ;;  %6085 = vpow2.f32 %v2772_v41 }
 0x487   :  { %v2581_v52 = vmul.f32 %v2549_v57, %v10941_v6  ;;  %v2454_v3 = vmul.f32 %v2422_v11, %v10958_v44  ;;  %v10995_v61 = vmul.f32 0.70710677, %v10983_v34  ;;  %v4222_v57 = vadd.f32 %v4221_v27, %v10521_v18 }
 0x488   :  { %v2996_v55 = vmul.f32 %v2964_v50, %v1748_v37  ;;  %v2353_v43 = vsel %vm2352_vm13, %v6082_v62, %v2349_v26  ;;  %v10999_v9 = vmul.f32 0.70710677, %v10988_v40  ;;  %vm2869_vm3 = vcmp.lt.f32.partialorder %v10859_v5, 0.0  ;;  %v4286_v26 = vpop.f32.mrf.mxu3 }
 0x489   :  { %v2613_v29 = vadd.f32 0.2548296, %v2581_v52  ;;  %v2486_v49 = vadd.f32 1.4214138, %v2454_v3  ;;  %v10992_v28 = vsel %vm2355_vm5, %v2357_v30, %v2353_v43  ;;  %v4397_v62 = vand.u32 2147483647, %v10995_v61 }
 0x48a   :  { %3028 = vst [vmem:[%s12256_s7 + $0xe0] sm:$0xff] %v2996_v55  ;;  %v2391_v53 = vmul.f32 1.0614054, %v10992_v28  ;;  %v11005_v23 = vand.u32 2147483647, %v10999_v9  ;;  %v1750_v17 = vmul.f32 0.5, %v10873_v60 }
 0x48b   :  { %v2645_v25 = vmul.f32 %v2613_v29, %v10941_v6  ;;  %v2518_v32 = vmul.f32 %v2486_v49, %v10958_v44  ;;  %v2711_v6 = vmul.f32 %v2679_v47, %v10930_v35  ;;  %v4429_v38 = vmul.f32 0.3275911, %v4397_v62 }
 0x48c   :  { %v2423_v37 = vadd.f32 -1.4531521, %v2391_v53  ;;  %v4430_v2 = vmul.f32 0.3275911, %v11005_v23  ;;  %v1749_v35 = vmul.f32 0.5, %v10850_v10  ;;  %v6086_v55 = vpop.eup %6085  ;;  %v5261_v22 = vsub.f32 0.0, %v4397_v62 }
 0x48d   :  { %v2805_v54 = vmul.f32 %v6084_v42, %v2645_v25  ;;  %v2550_v8 = vadd.f32 -0.28449672, %v2518_v32  ;;  %v2774_v59 = vmul.f32 1.442695, %v2711_v6  ;;  %v11012_v52 = vadd.f32 1.0, %v4429_v38  ;;  %v6271_v10 = vld [vmem:[%s12249_s0 + $0x1b0] sm:$0xff] }
 0x48e   :  { %v2455_v50 = vmul.f32 %v2423_v37, %v10992_v28  ;;  %v11015_v14 = vadd.f32 1.0, %v4430_v2  ;;  %v11021_v16 = vadd.f32 %v6271_v10, %v4222_v57  ;;  %v5293_v30 = vmul.f32 %v5261_v22, %v4397_v62 }
 0x48f   :  { %v2837_v19 = vsub.f32 1.0, %v2805_v54  ;;  %v2582_v7 = vmul.f32 %v2550_v8, %v10958_v44  ;;  %6087 = vrcp.f32 %v11012_v52  ;;  %vm2870_vm7 = vcmp.lt.f32.partialorder %v10888_v56, 0.0  ;;  %v4191_v56 = vpop.f32.mrf.mxu0 }
 0x490   :  { %v2487_v33 = vadd.f32 1.4214138, %v2455_v50  ;;  %6089 = vrcp.f32 %v11015_v14  ;;  %v11029_v47 = vmul.f32 0.70710677, %v11021_v16  ;;  %vm4498_vm9 = vweird.f32 %v11012_v52 }
 0x491   :  { %v2901_v11 = vsub.f32 0.0, %v2837_v19  ;;  %v2614_v46 = vadd.f32 0.2548296, %v2582_v7  ;;  %6091 = vpow2.f32 %v2774_v59  ;;  %v5262_v43 = vsub.f32 0.0, %v11005_v23 }
 0x492   :  { %v2519_v12 = vmul.f32 %v2487_v33, %v10992_v28  ;;  %v11037_v42 = vand.u32 2147483647, %v11029_v47  ;;  %v4287_v54 = vadd.f32 %v4286_v26, %v10521_v18  ;;  %v4502_v60 = vand.u32 2147483647, %v11012_v52  ;;  %v6273_v26 = vld [vmem:[%s12249_s0 + $0x110] sm:$0xff] }
 0x493   :  { %v2933_v3 = vsel %vm2869_vm3, %v2901_v11, %v2837_v19  ;;  %v2646_v58 = vmul.f32 %v2614_v46, %v10958_v44  ;;  %vm2871_vm1 = vcmp.lt.f32.partialorder %v10918_v20, 0.0  ;;  %v4504_v19 = vand.u32 2147483648, %v11012_v52 }
 0x494   :  { %v2965_v41 = vadd.f32 1.0, %v2933_v3  ;;  %v2551_v49 = vadd.f32 -0.28449672, %v2519_v12  ;;  %v5325_v7 = vmul.f32 1.442695, %v5293_v30  ;;  %v12850_v3 = vld [vmem:[#allocation45_spill] sm:$0xff]  ;;  %vm4513_vm10 = vweird.f32 %v11015_v14 }
 0x495   :  { %v2806_v5 = vmul.f32 %v6086_v55, %v2646_v58  ;;  %v6088_v32 = vpop.eup %6087  ;;  %v4451_v37 = vmul.f32 0.3275911, %v11037_v42  ;;  %v4517_v11 = vand.u32 2147483647, %v11015_v14  ;;  %v4192_v58 = vadd.f32 %v4191_v56, %v12850_v3 }
 0x496   :  { %v2997_v29 = vmul.f32 %v2965_v41, %v1749_v35  ;;  %v2583_v25 = vmul.f32 %v2551_v49, %v10992_v28  ;;  %v4494_v27 = vmul.f32 %v6088_v32, %v11012_v52  ;;  %v6090_v6 = vpop.eup %6089  ;;  %v6272_v35 = vld [vmem:[%s12249_s0 + $0x1b8] sm:$0xff]  ;;  %vm4499_vm6 = vweird.f32 %v6088_v32 }
 0x497   :  { %v2838_v44 = vsub.f32 1.0, %v2806_v5  ;;  %v4509_v18 = vmul.f32 %v6090_v6, %v11015_v14  ;;  %v6092_v46 = vpop.eup %6091  ;;  %v11048_v2 = vadd.f32 1.0, %v4451_v37  ;;  %v11053_v59 = vadd.f32 %v6272_v35, %v4287_v54  ;;  %vm4500_vm11 = vmor %vm4498_vm9, %vm4499_vm6 }
 0x498   :  { %3029 = vst [vmem:[%s12256_s7 + $0xe8] sm:$0xff] %v2997_v29  ;;  %v2615_v53 = vadd.f32 0.2548296, %v2583_v25  ;;  %v4495_v57 = vsub.f32 1.0, %v4494_v27  ;;  %vm11059_vm15 = vcmp.eq.f32.partialorder %v4502_v60, 8.507059e+37  ;;  %v4519_v22 = vand.u32 2147483648, %v11015_v14 }
 0x499   :  { %v2902_v13 = vsub.f32 0.0, %v2838_v44  ;;  %6093 = vrcp.f32 %v11048_v2  ;;  %vm4514_vm8 = vweird.f32 %v6090_v6  ;;  %v4505_v29 = vor.u32 1.1754944e-38, %v4504_v19 }
 0x49a   :  { %v2647_v38 = vmul.f32 %v2615_v53, %v10992_v28  ;;  %v4496_v55 = vmul.f32 %v6088_v32, %v4495_v57  ;;  %v4510_v28 = vsub.f32 1.0, %v4509_v18  ;;  %v11070_v49 = vmul.f32 0.70710677, %v11053_v59  ;;  %vm4515_vm4 = vmor %vm4513_vm10, %vm4514_vm8 }
 0x49b   :  { %v2934_v8 = vsel %vm2870_vm7, %v2902_v13, %v2838_v44  ;;  %v5294_v44 = vmul.f32 %v5262_v43, %v11005_v23  ;;  %v11075_v30 = vadd.f32 %v6273_v26, %v4192_v58  ;;  %vm4518_vm2 = vcmp.eq.f32.partialorder %v4517_v11, 8.507059e+37 }
 0x49c   :  { %v2966_v62 = vadd.f32 1.0, %v2934_v8  ;;  %v2807_v33 = vmul.f32 %v6092_v46, %v2647_v38  ;;  %v4497_v5 = vadd.f32 %v6088_v32, %v4496_v55  ;;  %v4511_v12 = vmul.f32 %v6090_v6, %v4510_v28 }
 0x49d   :  { %v4520_v23 = vor.u32 1.1754944e-38, %v4519_v22  ;;  %v5283_v43 = vsub.f32 0.0, %v11037_v42  ;;  %v11085_v54 = vand.u32 2147483647, %v11070_v49  ;;  %v11091_v27 = vmul.f32 0.70710677, %v11075_v30 }
 0x49e   :  { %v2998_v50 = vmul.f32 %v2966_v62, %v1750_v17  ;;  %v2839_v10 = vsub.f32 1.0, %v2807_v33  ;;  %v4501_v13 = vsel %vm4500_vm11, %v6088_v32, %v4497_v5  ;;  %v4512_v25 = vadd.f32 %v6090_v6, %v4511_v12 }
 0x49f   :  { %v11079_v52 = vsel %vm11059_vm15, %v4505_v29, %v4501_v13  ;;  %v6094_v60 = vpop.eup %6093  ;;  %v1751_v56 = vmul.f32 0.5, %v10909_v48  ;;  %v4452_v19 = vmul.f32 0.3275911, %v11085_v54  ;;  %6095 = vpow2.f32 %v5325_v7 }
 0x4a0   :  { %3030 = vst [vmem:[%s12256_s7 + $0xf0] sm:$0xff] %v2998_v50  ;;  %v2903_v17 = vsub.f32 0.0, %v2839_v10  ;;  %v4973_v32 = vmul.f32 1.0614054, %v11079_v52  ;;  %v4516_v53 = vsel %vm4515_vm4, %v6090_v6, %v4512_v25  ;;  %v4824_v20 = vmul.f32 %v6094_v60, %v11048_v2 }
 0x4a1   :  { %v11094_v62 = vsel %vm4518_vm2, %v4520_v23, %v4516_v53  ;;  %v5327_v18 = vmul.f32 1.442695, %v5294_v44  ;;  %v11099_v6 = vadd.f32 1.0, %v4452_v19  ;;  %v11102_v11 = vand.u32 2147483647, %v11091_v27  ;;  %v4256_v44 = vpop.f32.mrf.mxu1 }
 0x4a2   :  { %v2935_v8 = vsel %vm2871_vm1, %v2903_v17, %v2839_v10  ;;  %v5005_v37 = vadd.f32 -1.4531521, %v4973_v32  ;;  %v4974_v38 = vmul.f32 1.0614054, %v11094_v62  ;;  %v4825_v50 = vsub.f32 1.0, %v4824_v20 }
 0x4a3   :  { %v2967_v14 = vadd.f32 1.0, %v2935_v8  ;;  %v5315_v35 = vmul.f32 %v5283_v43, %v11037_v42  ;;  %v11110_v7 = vmul.f32 0.5, %v10983_v34  ;;  %v4832_v58 = vand.u32 2147483647, %v11048_v2  ;;  %v4224_v43 = vpop.f32.mrf.mxu2 }
 0x4a4   :  { %v5037_v48 = vmul.f32 %v5005_v37, %v11079_v52  ;;  %v5006_v46 = vadd.f32 -1.4531521, %v4974_v38  ;;  %v4834_v33 = vand.u32 2147483648, %v11048_v2  ;;  %6097 = vrcp.f32 %v11099_v6 }
 0x4a5   :  { %v2999_v57 = vmul.f32 %v2967_v14, %v1751_v56  ;;  %v4826_v41 = vmul.f32 %v6094_v60, %v4825_v50  ;;  %vm4829_vm14 = vweird.f32 %v6094_v60  ;;  %v11117_v42 = vmul.f32 0.5, %v10988_v40  ;;  %v6096_v22 = vpop.eup %6095  ;;  %v4289_v50 = vpop.f32.mrf.mxu3 }
 0x4a6   :  { %v5069_v55 = vadd.f32 1.4214138, %v5037_v48  ;;  %v5038_v28 = vmul.f32 %v5006_v46, %v11094_v62  ;;  %6099 = vpow2.f32 %v5327_v18  ;;  %vm4828_vm12 = vweird.f32 %v11048_v2 }
 0x4a7   :  { %3031 = vst [vmem:[%s12256_s7 + $0xf8] sm:$0xff] %v2999_v57  ;;  %v4431_v34 = vmul.f32 0.3275911, %v11102_v11  ;;  %v4827_v12 = vadd.f32 %v6094_v60, %v4826_v41  ;;  %v5369_v29 = vmul.f32 1.442695, %v5315_v35  ;;  %vm4830_vm0 = vmor %vm4828_vm12, %vm4829_vm14  ;;  %vm4833_vm13 = vcmp.eq.f32.partialorder %v4832_v58, 8.507059e+37 }
 0x4a8   :  { %v5101_v10 = vmul.f32 %v5069_v55, %v11079_v52  ;;  %v5070_v5 = vadd.f32 1.4214138, %v5038_v28  ;;  %v4835_v26 = vor.u32 1.1754944e-38, %v4834_v33  ;;  %v5284_v17 = vsub.f32 0.0, %v11085_v54 }
 0x4a9   :  { %v11123_v13 = vadd.f32 1.0, %v4431_v34  ;;  %v4831_v2 = vsel %vm4830_vm0, %v6094_v60, %v4827_v12  ;;  %v4847_v23 = vand.u32 2147483647, %v11099_v6  ;;  %v4849_v53 = vand.u32 2147483648, %v11099_v6 }
 0x4aa   :  { %v5133_v40 = vadd.f32 -0.28449672, %v5101_v10  ;;  %v5102_v25 = vmul.f32 %v5070_v5, %v11094_v62  ;;  %v6098_v8 = vpop.eup %6097  ;;  %v11127_v32 = vsel %vm4833_vm13, %v4835_v26, %v4831_v2  ;;  %v4257_v56 = vadd.f32 %v4256_v44, %v12850_v3 }
 0x4ab   :  { %6101 = vrcp.f32 %v11123_v13  ;;  %v4995_v37 = vmul.f32 1.0614054, %v11127_v32  ;;  %v4839_v38 = vmul.f32 %v6098_v8, %v11099_v6  ;;  %vm4843_vm5 = vweird.f32 %v11099_v6 }
 0x4ac   :  { %v5165_v14 = vmul.f32 %v5133_v40, %v11079_v52  ;;  %v5134_v19 = vadd.f32 -0.28449672, %v5102_v25  ;;  %v6100_v60 = vpop.eup %6099  ;;  %6103 = vpow2.f32 %v5369_v29  ;;  %v11137_v20 = vmul.f32 %v5284_v17, %v11085_v54  ;;  %v6274_v54 = vld [vmem:[%s12249_s0 + $0x118] sm:$0xff]  ;;  %v6275_v29 = vld [vmem:[%s12249_s0 + $0x1c0] sm:$0xff] }
 0x4ad   :  { %v4225_v57 = vadd.f32 %v4224_v43, %v10598_v45  ;;  %v5027_v3 = vadd.f32 -1.4531521, %v4995_v37  ;;  %v4840_v46 = vsub.f32 1.0, %v4839_v38  ;;  %vm5453_vm3 = vcmp.lt.f32.partialorder %v10995_v61, 0.0 }
 0x4ae   :  { %v5197_v18 = vadd.f32 0.2548296, %v5165_v14  ;;  %v5166_v48 = vmul.f32 %v5134_v19, %v11094_v62  ;;  %vm4844_vm7 = vweird.f32 %v6098_v8  ;;  %vm11142_vm9 = vcmp.eq.f32.partialorder %v4847_v23, 8.507059e+37 }
 0x4af   :  { %v4850_v58 = vor.u32 1.1754944e-38, %v4849_v53  ;;  %v11149_v33 = vadd.f32 %v6274_v54, %v4257_v56  ;;  %v5059_v41 = vmul.f32 %v5027_v3, %v11127_v32  ;;  %v4841_v34 = vmul.f32 %v6098_v8, %v4840_v46  ;;  %vm4845_vm6 = vmor %vm4843_vm5, %vm4844_vm7 }
 0x4b0   :  { %v5229_v55 = vmul.f32 %v5197_v18, %v11079_v52  ;;  %v5198_v28 = vadd.f32 0.2548296, %v5166_v48  ;;  %vm5454_vm1 = vcmp.lt.f32.partialorder %v10999_v9, 0.0  ;;  %v5263_v5 = vsub.f32 0.0, %v11102_v11 }
 0x4b1   :  { %v6102_v10 = vpop.eup %6101  ;;  %v11156_v12 = vmul.f32 0.70710677, %v11149_v33  ;;  %v11161_v44 = vadd.f32 %v6275_v29, %v4225_v57  ;;  %v4290_v52 = vadd.f32 %v4289_v50, %v10598_v45  ;;  %v5091_v40 = vadd.f32 1.4214138, %v5059_v41 }
 0x4b2   :  { %v5389_v26 = vmul.f32 %v6096_v22, %v5229_v55  ;;  %v5230_v17 = vmul.f32 %v5198_v28, %v11094_v62  ;;  %v4842_v25 = vadd.f32 %v6098_v8, %v4841_v34  ;;  %v6104_v2 = vpop.eup %6103  ;;  %v4524_v23 = vmul.f32 %v6102_v10, %v11123_v13 }
 0x4b3   :  { %vm4528_vm15 = vweird.f32 %v11123_v13  ;;  %v4534_v43 = vand.u32 2147483648, %v11123_v13  ;;  %v11172_v53 = vand.u32 2147483647, %v11156_v12  ;;  %v5123_v62 = vmul.f32 %v5091_v40, %v11127_v32 }
 0x4b4   :  { %v5421_v45 = vsub.f32 1.0, %v5389_v26  ;;  %v5390_v22 = vmul.f32 %v6100_v60, %v5230_v17  ;;  %v4846_v56 = vsel %vm4845_vm6, %v6098_v8, %v4842_v25  ;;  %v4525_v6 = vsub.f32 1.0, %v4524_v23 }
 0x4b5   :  { %v11177_v14 = vsel %vm11142_vm9, %v4850_v58, %v4846_v56  ;;  %v4432_v19 = vmul.f32 0.3275911, %v11172_v53  ;;  %v11181_v37 = vmul.f32 0.70710677, %v11161_v44  ;;  %v5155_v18 = vadd.f32 -0.28449672, %v5123_v62 }
 0x4b6   :  { %v5485_v38 = vsub.f32 0.0, %v5421_v45  ;;  %v5422_v57 = vsub.f32 1.0, %v5390_v22  ;;  %v4996_v48 = vmul.f32 1.0614054, %v11177_v14  ;;  %v4526_v3 = vmul.f32 %v6102_v10, %v4525_v6 }
 0x4b7   :  { %vm4529_vm10 = vweird.f32 %v6102_v10  ;;  %v4532_v60 = vand.u32 2147483647, %v11123_v13  ;;  %v11185_v8 = vadd.f32 1.0, %v4432_v19  ;;  %v5187_v35 = vmul.f32 %v5155_v18, %v11127_v32 }
 0x4b8   :  { %v5517_v46 = vsel %vm5453_vm3, %v5485_v38, %v5421_v45  ;;  %v5486_v50 = vsub.f32 0.0, %v5422_v57  ;;  %v5028_v58 = vadd.f32 -1.4531521, %v4996_v48  ;;  %v4527_v55 = vadd.f32 %v6102_v10, %v4526_v3  ;;  %vm4530_vm8 = vmor %vm4528_vm15, %vm4529_vm10 }
 0x4b9   :  { %v5549_v54 = vadd.f32 1.0, %v5517_v46  ;;  %v4535_v28 = vor.u32 1.1754944e-38, %v4534_v43  ;;  %6105 = vrcp.f32 %v11185_v8  ;;  %v5219_v34 = vadd.f32 0.2548296, %v5187_v35 }
 0x4ba   :  { %v5518_v41 = vsel %vm5454_vm1, %v5486_v50, %v5422_v57  ;;  %v5060_v29 = vmul.f32 %v5028_v58, %v11177_v14  ;;  %v11197_v61 = vand.u32 2147483647, %v11181_v37  ;;  %v4531_v40 = vsel %vm4530_vm8, %v6102_v10, %v4527_v55 }
 0x4bb   :  { %v5581_v26 = vmul.f32 %v5549_v54, %v11110_v7  ;;  %v5550_v17 = vadd.f32 1.0, %v5518_v41  ;;  %vm4533_vm11 = vcmp.eq.f32.partialorder %v4532_v60, 8.507059e+37  ;;  %v5251_v25 = vmul.f32 %v5219_v34, %v11127_v32 }
 0x4bc   :  { %v5092_v23 = vadd.f32 1.4214138, %v5060_v29  ;;  %v5371_v9 = vmul.f32 1.442695, %v11137_v20  ;;  %v11202_v43 = vsel %vm4533_vm11, %v4535_v28, %v4531_v40  ;;  %v5295_v7 = vmul.f32 %v5263_v5, %v11102_v11 }
 0x4bd   :  { %5746 = vst [vmem:[%s12256_s7 + $0x100] sm:$0xff] %v5581_v26  ;;  %v5582_v13 = vmul.f32 %v5550_v17, %v11117_v42  ;;  %v4975_v45 = vmul.f32 1.0614054, %v11202_v43  ;;  %v4355_v10 = vmul.f32 0.5, %v11021_v16  ;;  %v5411_v22 = vmul.f32 %v6104_v2, %v5251_v25  ;;  %v6276_v16 = vld [vmem:[%s12249_s0 + $0x1c8] sm:$0xff] }
 0x4be   :  { %v5124_v32 = vmul.f32 %v5092_v23, %v11177_v14  ;;  %v4453_v62 = vmul.f32 0.3275911, %v11197_v61  ;;  %vm5475_vm2 = vcmp.lt.f32.partialorder %v11029_v47, 0.0  ;;  %v11218_v42 = vmul.f32 0.5, %v11053_v59  ;;  %v4194_v47 = vpop.f32.mrf.mxu0 }
 0x4bf   :  { %v6106_v20 = vpop.eup %6105  ;;  %5747 = vst [vmem:[%s12256_s7 + $0x108] sm:$0xff] %v5582_v13  ;;  %v5007_v56 = vadd.f32 -1.4531521, %v4975_v45  ;;  %v11223_v11 = vadd.f32 %v6276_v16, %v4290_v52  ;;  %v5443_v5 = vsub.f32 1.0, %v5411_v22  ;;  %6107 = vpow2.f32 %v5371_v9  ;;  %v4259_v9 = vpop.f32.mrf.mxu1  ;;  %v12855_v22 = vld [vmem:[#allocation43_spill] sm:$0xff] }
 0x4c0   :  { %v5156_v2 = vadd.f32 -0.28449672, %v5124_v32  ;;  %v4539_v6 = vmul.f32 %v6106_v20, %v11185_v8  ;;  %v5329_v38 = vmul.f32 1.442695, %v5295_v7  ;;  %v5264_v57 = vsub.f32 0.0, %v11172_v53 }
 0x4c1   :  { %v5039_v19 = vmul.f32 %v5007_v56, %v11202_v43  ;;  %v11228_v18 = vadd.f32 1.0, %v4453_v62  ;;  %v5507_v59 = vsub.f32 0.0, %v5443_v5  ;;  %v11232_v60 = vmul.f32 0.70710677, %v11223_v11 }
 0x4c2   :  { %v5188_v48 = vmul.f32 %v5156_v2, %v11177_v14  ;;  %v4540_v3 = vsub.f32 1.0, %v4539_v6  ;;  %v4547_v46 = vand.u32 2147483647, %v11185_v8  ;;  %v4549_v50 = vand.u32 2147483648, %v11185_v8 }
 0x4c3   :  { %v5071_v52 = vadd.f32 1.4214138, %v5039_v19  ;;  %6109 = vrcp.f32 %v11228_v18  ;;  %v5539_v35 = vsel %vm5475_vm2, %v5507_v59, %v5443_v5  ;;  %vm4544_vm4 = vweird.f32 %v6106_v20 }
 0x4c4   :  { %v5220_v58 = vadd.f32 0.2548296, %v5188_v48  ;;  %v4541_v54 = vmul.f32 %v6106_v20, %v4540_v3  ;;  %v5571_v55 = vadd.f32 1.0, %v5539_v35  ;;  %vm5476_vm14 = vcmp.lt.f32.partialorder %v11070_v49, 0.0 }
 0x4c5   :  { %v5103_v28 = vmul.f32 %v5071_v52, %v11202_v43  ;;  %v5296_v41 = vmul.f32 %v5264_v57, %v11172_v53  ;;  %v6108_v34 = vpop.eup %6107  ;;  %vm4543_vm12 = vweird.f32 %v11185_v8  ;;  %v11245_v17 = vand.u32 2147483647, %v11232_v60 }
 0x4c6   :  { %v5252_v29 = vmul.f32 %v5220_v58, %v11177_v14  ;;  %v4542_v26 = vadd.f32 %v6106_v20, %v4541_v54  ;;  %v5603_v40 = vmul.f32 %v5571_v55, %v4355_v10  ;;  %6111 = vpow2.f32 %v5329_v38  ;;  %vm4545_vm0 = vmor %vm4543_vm12, %vm4544_vm4  ;;  %v6278_v54 = vld [vmem:[%s12249_s0 + $0x128] sm:$0xff] }
 0x4c7   :  { %v5135_v25 = vadd.f32 -0.28449672, %v5103_v28  ;;  %v4550_v23 = vor.u32 1.1754944e-38, %v4549_v50  ;;  %vm4548_vm13 = vcmp.eq.f32.partialorder %v4547_v46, 8.507059e+37  ;;  %v4454_v53 = vmul.f32 0.3275911, %v11245_v17 }
 0x4c8   :  { %v5412_v13 = vmul.f32 %v6108_v34, %v5252_v29  ;;  %v4546_v45 = vsel %vm4545_vm0, %v6106_v20, %v4542_v26  ;;  %5768 = vst [vmem:[%s12256_s7 + $0x1b0] sm:$0xff] %v5603_v40  ;;  %v5331_v10 = vmul.f32 1.442695, %v5296_v41  ;;  %v4195_v32 = vadd.f32 %v4194_v47, %v12855_v22 }
 0x4c9   :  { %v6110_v7 = vpop.eup %6109  ;;  %v5167_v14 = vmul.f32 %v5135_v25, %v11202_v43  ;;  %v11252_v8 = vsel %vm4548_vm13, %v4550_v23, %v4546_v45  ;;  %v4260_v16 = vadd.f32 %v4259_v9, %v12855_v22  ;;  %v4335_v5 = vmul.f32 0.5, %v11075_v30  ;;  %v6277_v30 = vld [vmem:[%s12249_s0 + $0x120] sm:$0xff] }
 0x4ca   :  { %v5444_v62 = vsub.f32 1.0, %v5412_v13  ;;  %v4976_v56 = vmul.f32 1.0614054, %v11252_v8  ;;  %v4854_v20 = vmul.f32 %v6110_v7, %v11228_v18  ;;  %v4862_v6 = vand.u32 2147483647, %v11228_v18 }
 0x4cb   :  { %v5199_v2 = vadd.f32 0.2548296, %v5167_v14  ;;  %v11260_v19 = vadd.f32 1.0, %v4454_v53  ;;  %vm5455_vm5 = vcmp.lt.f32.partialorder %v11091_v27, 0.0  ;;  %v4864_v48 = vand.u32 2147483648, %v11228_v18 }
 0x4cc   :  { %v5508_v38 = vsub.f32 0.0, %v5444_v62  ;;  %v5008_v57 = vadd.f32 -1.4531521, %v4976_v56  ;;  %v4855_v59 = vsub.f32 1.0, %v4854_v20  ;;  %v6112_v3 = vpop.eup %6111  ;;  %vm4859_vm3 = vweird.f32 %v6110_v7 }
 0x4cd   :  { %v5231_v52 = vmul.f32 %v5199_v2, %v11202_v43  ;;  %6113 = vrcp.f32 %v11260_v19  ;;  %v11269_v46 = vadd.f32 %v6277_v30, %v4195_v32  ;;  %v11277_v43 = vadd.f32 %v6278_v54, %v4260_v16 }
 0x4ce   :  { %v5540_v50 = vsel %vm5476_vm14, %v5508_v38, %v5444_v62  ;;  %v5040_v35 = vmul.f32 %v5008_v57, %v11252_v8  ;;  %v4856_v58 = vmul.f32 %v6110_v7, %v4855_v59  ;;  %6115 = vpow2.f32 %v5331_v10 }
 0x4cf   :  { %v5572_v55 = vadd.f32 1.0, %v5540_v50  ;;  %v5391_v28 = vmul.f32 %v6112_v3, %v5231_v52  ;;  %v5285_v41 = vsub.f32 0.0, %v11197_v61  ;;  %vm4858_vm7 = vweird.f32 %v11228_v18 }
 0x4d0   :  { %v5072_v34 = vadd.f32 1.4214138, %v5040_v35  ;;  %v4857_v29 = vadd.f32 %v6110_v7, %v4856_v58  ;;  %v5286_v49 = vsub.f32 0.0, %v11245_v17  ;;  %vm4860_vm9 = vmor %vm4858_vm7, %vm4859_vm3  ;;  %v4865_v40 = vor.u32 1.1754944e-38, %v4864_v48 }
 0x4d1   :  { %v5604_v26 = vmul.f32 %v5572_v55, %v11218_v42  ;;  %v5423_v47 = vsub.f32 1.0, %v5391_v28  ;;  %v11285_v25 = vmul.f32 0.70710677, %v11269_v46  ;;  %vm4863_vm1 = vcmp.eq.f32.partialorder %v4862_v6, 8.507059e+37 }
 0x4d2   :  { %v5104_v23 = vmul.f32 %v5072_v34, %v11252_v8  ;;  %v4861_v9 = vsel %vm4860_vm9, %v6110_v7, %v4857_v29  ;;  %v11289_v13 = vmul.f32 0.70710677, %v11277_v43  ;;  %v5317_v53 = vmul.f32 %v5285_v41, %v11197_v61 }
 0x4d3   :  { %v6114_v45 = vpop.eup %6113  ;;  %5769 = vst [vmem:[%s12256_s7 + $0x1b8] sm:$0xff] %v5604_v26  ;;  %v5487_v42 = vsub.f32 0.0, %v5423_v47  ;;  %v11294_v18 = vsel %vm4863_vm1, %v4865_v40, %v4861_v9  ;;  %v4401_v14 = vand.u32 2147483647, %v11285_v25  ;;  %v5318_v32 = vmul.f32 %v5286_v49, %v11245_v17  ;;  %v4227_v26 = vpop.f32.mrf.mxu2 }
 0x4d4   :  { %v5136_v10 = vadd.f32 -0.28449672, %v5104_v23  ;;  %v4997_v22 = vmul.f32 1.0614054, %v11294_v18  ;;  %v4869_v7 = vmul.f32 %v6114_v45, %v11260_v19  ;;  %v6116_v62 = vpop.eup %6115  ;;  %v4877_v20 = vand.u32 2147483647, %v11260_v19 }
 0x4d5   :  { %v5519_v56 = vsel %vm5455_vm5, %v5487_v42, %v5423_v47  ;;  %v4433_v16 = vmul.f32 0.3275911, %v4401_v14  ;;  %v11305_v2 = vand.u32 2147483647, %v11289_v13  ;;  %vm4874_vm6 = vweird.f32 %v6114_v45 }
 0x4d6   :  { %v5551_v61 = vadd.f32 1.0, %v5519_v56  ;;  %v5168_v6 = vmul.f32 %v5136_v10, %v11252_v8  ;;  %v5029_v38 = vadd.f32 -1.4531521, %v4997_v22  ;;  %v4870_v57 = vsub.f32 1.0, %v4869_v7 }
 0x4d7   :  { %v4879_v59 = vand.u32 2147483648, %v11260_v19  ;;  %v11309_v48 = vadd.f32 1.0, %v4433_v16  ;;  %v4434_v17 = vmul.f32 0.3275911, %v11305_v2  ;;  %v4336_v50 = vmul.f32 0.5, %v11149_v33 }
 0x4d8   :  { %v5583_v27 = vmul.f32 %v5551_v61, %v4335_v5  ;;  %v5200_v3 = vadd.f32 0.2548296, %v5168_v6  ;;  %v5061_v52 = vmul.f32 %v5029_v38, %v11294_v18  ;;  %v4871_v30 = vmul.f32 %v6114_v45, %v4870_v57 }
 0x4d9   :  { %v5373_v35 = vmul.f32 1.442695, %v5317_v53  ;;  %6117 = vrcp.f32 %v11309_v48  ;;  %vm4873_vm15 = vweird.f32 %v11260_v19  ;;  %v4880_v5 = vor.u32 1.1754944e-38, %v4879_v59 }
 0x4da   :  { %5748 = vst [vmem:[%s12256_s7 + $0x110] sm:$0xff] %v5583_v27  ;;  %v5232_v58 = vmul.f32 %v5200_v3, %v11252_v8  ;;  %v5093_v54 = vadd.f32 1.4214138, %v5061_v52  ;;  %v4872_v55 = vadd.f32 %v6114_v45, %v4871_v30  ;;  %vm4875_vm10 = vmor %vm4873_vm15, %vm4874_vm6  ;;  %v5375_v28 = vmul.f32 1.442695, %v5318_v32 }
 0x4db   :  { %v5265_v41 = vsub.f32 0.0, %v4401_v14  ;;  %v11321_v34 = vadd.f32 1.0, %v4434_v17  ;;  %vm4878_vm8 = vcmp.eq.f32.partialorder %v4877_v20, 8.507059e+37  ;;  %vm5456_vm11 = vcmp.lt.f32.partialorder %v11156_v12, 0.0 }
 0x4dc   :  { %v5392_v33 = vmul.f32 %v6116_v62, %v5232_v58  ;;  %v5125_v29 = vmul.f32 %v5093_v54, %v11294_v18  ;;  %v4876_v49 = vsel %vm4875_vm10, %v6114_v45, %v4872_v55  ;;  %v4562_v47 = vand.u32 2147483647, %v11309_v48  ;;  %v4292_v58 = vpop.f32.mrf.mxu3 }
 0x4dd   :  { %v11325_v8 = vsel %vm4878_vm8, %v4880_v5, %v4876_v49  ;;  %6119 = vrcp.f32 %v11321_v34  ;;  %v4564_v42 = vand.u32 2147483648, %v11309_v48  ;;  %v11331_v45 = vmul.f32 %v5265_v41, %v4401_v14  ;;  %v6279_v14 = vld [vmem:[%s12249_s0 + $0x1d0] sm:$0xff] }
 0x4de   :  { %v5424_v19 = vsub.f32 1.0, %v5392_v33  ;;  %v5157_v40 = vadd.f32 -0.28449672, %v5125_v29  ;;  %6121 = vpow2.f32 %v5373_v35  ;;  %v4998_v23 = vmul.f32 1.0614054, %v11325_v8 }
 0x4df   :  { %v6118_v9 = vpop.eup %6117  ;;  %6123 = vpow2.f32 %v5375_v28  ;;  %v4228_v53 = vadd.f32 %v4227_v26, %v10701_v24  ;;  %vm4558_vm2 = vweird.f32 %v11309_v48  ;;  %vm11337_vm4 = vcmp.eq.f32.partialorder %v4562_v47, 8.507059e+37 }
 0x4e0   :  { %v5488_v10 = vsub.f32 0.0, %v5424_v19  ;;  %v5189_v22 = vmul.f32 %v5157_v40, %v11294_v18  ;;  %v5030_v7 = vadd.f32 -1.4531521, %v4998_v23  ;;  %v4554_v32 = vmul.f32 %v6118_v9, %v11309_v48 }
 0x4e1   :  { %v5266_v56 = vsub.f32 0.0, %v11305_v2  ;;  %v11345_v20 = vadd.f32 %v6279_v14, %v4228_v53  ;;  %vm5477_vm14 = vcmp.lt.f32.partialorder %v11181_v37, 0.0  ;;  %vm4559_vm12 = vweird.f32 %v6118_v9 }
 0x4e2   :  { %v5520_v16 = vsel %vm5456_vm11, %v5488_v10, %v5424_v19  ;;  %v5221_v61 = vadd.f32 0.2548296, %v5189_v22  ;;  %v5062_v6 = vmul.f32 %v5030_v7, %v11325_v8  ;;  %v4555_v38 = vsub.f32 1.0, %v4554_v32  ;;  %vm4560_vm0 = vmor %vm4558_vm2, %vm4559_vm12 }
 0x4e3   :  { %v6120_v57 = vpop.eup %6119  ;;  %v5552_v59 = vadd.f32 1.0, %v5520_v16  ;;  %v4565_v17 = vor.u32 1.1754944e-38, %v4564_v42  ;;  %v11352_v27 = vmul.f32 0.70710677, %v11345_v20  ;;  %v4577_v5 = vand.u32 2147483647, %v11321_v34  ;;  %v4197_v42 = vpop.f32.mrf.mxu0 }
 0x4e4   :  { %v6122_v3 = vpop.eup %6121  ;;  %v5253_v52 = vmul.f32 %v5221_v61, %v11294_v18  ;;  %v5094_v30 = vadd.f32 1.4214138, %v5062_v6  ;;  %v4556_v35 = vmul.f32 %v6118_v9, %v4555_v38  ;;  %v4569_v12 = vmul.f32 %v6120_v57, %v11321_v34 }
 0x4e5   :  { %v6124_v54 = vpop.eup %6123  ;;  %v5584_v55 = vmul.f32 %v5552_v59, %v4336_v50  ;;  %v5298_v28 = vmul.f32 %v5266_v56, %v11305_v2  ;;  %v11359_v41 = vand.u32 2147483647, %v11352_v27  ;;  %vm4574_vm13 = vweird.f32 %v6120_v57 }
 0x4e6   :  { %v5413_v33 = vmul.f32 %v6122_v3, %v5253_v52  ;;  %v5126_v29 = vmul.f32 %v5094_v30, %v11325_v8  ;;  %v4557_v49 = vadd.f32 %v6118_v9, %v4556_v35  ;;  %v4570_v26 = vsub.f32 1.0, %v4569_v12 }
 0x4e7   :  { %5749 = vst [vmem:[%s12256_s7 + $0x118] sm:$0xff] %v5584_v55  ;;  %v4579_v18 = vand.u32 2147483648, %v11321_v34  ;;  %v4455_v2 = vmul.f32 0.3275911, %v11359_v41  ;;  %v4293_v50 = vadd.f32 %v4292_v58, %v10701_v24  ;;  %vm4573_vm5 = vweird.f32 %v11321_v34  ;;  %v6280_v34 = vld [vmem:[%s12249_s0 + $0x1d8] sm:$0xff] }
 0x4e8   :  { %v5445_v47 = vsub.f32 1.0, %v5413_v33  ;;  %v5158_v19 = vadd.f32 -0.28449672, %v5126_v29  ;;  %v4561_v40 = vsel %vm4560_vm0, %v6118_v9, %v4557_v49  ;;  %v4571_v23 = vmul.f32 %v6120_v57, %v4570_v26  ;;  %vm4575_vm7 = vmor %vm4573_vm5, %vm4574_vm13 }
 0x4e9   :  { %v11373_v53 = vsel %vm11337_vm4, %v4565_v17, %v4561_v40  ;;  %vm11376_vm3 = vcmp.eq.f32.partialorder %v4577_v5, 8.507059e+37  ;;  %v11380_v10 = vadd.f32 1.0, %v4455_v2  ;;  %v4580_v32 = vor.u32 1.1754944e-38, %v4579_v18 }
 0x4ea   :  { %v5509_v22 = vsub.f32 0.0, %v5445_v47  ;;  %v5190_v24 = vmul.f32 %v5158_v19, %v11325_v8  ;;  %v4977_v7 = vmul.f32 1.0614054, %v11373_v53  ;;  %v4572_v9 = vadd.f32 %v6120_v57, %v4571_v23 }
 0x4eb   :  { %6125 = vrcp.f32 %v11380_v10  ;;  %v11389_v62 = vadd.f32 %v6280_v34, %v4293_v50  ;;  %v4198_v56 = vadd.f32 %v4197_v42, %v9512_v1  ;;  %v4357_v38 = vmul.f32 0.5, %v11161_v44  ;;  %v6281_v44 = vld [vmem:[%s12249_s0 + $0x130] sm:$0xff]  ;;  %v4262_v34 = vpop.f32.mrf.mxu1 }
 0x4ec   :  { %v5541_v14 = vsel %vm5477_vm14, %v5509_v22, %v5445_v47  ;;  %v5222_v16 = vadd.f32 0.2548296, %v5190_v24  ;;  %v5009_v61 = vadd.f32 -1.4531521, %v4977_v7  ;;  %v4576_v6 = vsel %vm4575_vm7, %v6120_v57, %v4572_v9 }
 0x4ed   :  { %v5573_v59 = vadd.f32 1.0, %v5541_v14  ;;  %v5333_v17 = vmul.f32 1.442695, %v11331_v45  ;;  %v11398_v3 = vsel %vm11376_vm3, %v4580_v32, %v4576_v6  ;;  %v5335_v12 = vmul.f32 1.442695, %v5298_v28 }
 0x4ee   :  { %v5254_v52 = vmul.f32 %v5222_v16, %v11325_v8  ;;  %v5041_v30 = vmul.f32 %v5009_v61, %v11373_v53  ;;  %v4978_v35 = vmul.f32 1.0614054, %v11398_v3  ;;  %v11404_v58 = vmul.f32 0.70710677, %v11389_v62 }
 0x4ef   :  { %v5605_v37 = vmul.f32 %v5573_v59, %v4357_v38  ;;  %v11409_v45 = vadd.f32 %v6281_v44, %v4198_v56  ;;  %v4358_v57 = vmul.f32 0.5, %v11223_v11  ;;  %vm5478_vm9 = vcmp.lt.f32.partialorder %v11232_v60, 0.0 }
 0x4f0   :  { %v5414_v55 = vmul.f32 %v6124_v54, %v5254_v52  ;;  %v5073_v5 = vadd.f32 1.4214138, %v5041_v30  ;;  %v5010_v8 = vadd.f32 -1.4531521, %v4978_v35  ;;  %6127 = vpow2.f32 %v5333_v17 }
 0x4f1   :  { %v6126_v33 = vpop.eup %6125  ;;  %5770 = vst [vmem:[%s12256_s7 + $0x1c0] sm:$0xff] %v5605_v37  ;;  %v5287_v28 = vsub.f32 0.0, %v11359_v41  ;;  %v11418_v29 = vand.u32 2147483647, %v11404_v58  ;;  %6129 = vpow2.f32 %v5335_v12  ;;  %v4892_v18 = vand.u32 2147483647, %v11380_v10 }
 0x4f2   :  { %v5446_v49 = vsub.f32 1.0, %v5414_v55  ;;  %v5105_v26 = vmul.f32 %v5073_v5, %v11373_v53  ;;  %v5042_v11 = vmul.f32 %v5010_v8, %v11398_v3  ;;  %v4884_v54 = vmul.f32 %v6126_v33, %v11380_v10 }
 0x4f3   :  { %v4456_v2 = vmul.f32 0.3275911, %v11418_v29  ;;  %v11426_v50 = vmul.f32 0.70710677, %v11409_v45  ;;  %vm4889_vm1 = vweird.f32 %v6126_v33  ;;  %v4894_v42 = vand.u32 2147483648, %v11380_v10 }
 0x4f4   :  { %v5510_v47 = vsub.f32 0.0, %v5446_v49  ;;  %v5137_v19 = vadd.f32 -0.28449672, %v5105_v26  ;;  %v5074_v40 = vadd.f32 1.4214138, %v5042_v11  ;;  %v4885_v23 = vsub.f32 1.0, %v4884_v54 }
 0x4f5   :  { %v11429_v48 = vadd.f32 1.0, %v4456_v2  ;;  %v11432_v22 = vand.u32 2147483647, %v11426_v50  ;;  %v11439_v16 = vmul.f32 0.5, %v11269_v46  ;;  %v5319_v61 = vmul.f32 %v5287_v28, %v11359_v41  ;;  %v6282_v28 = vld [vmem:[%s12249_s0 + $0x138] sm:$0xff] }
 0x4f6   :  { %v5542_v24 = vsel %vm5478_vm9, %v5510_v47, %v5446_v49  ;;  %v5169_v7 = vmul.f32 %v5137_v19, %v11373_v53  ;;  %v5106_v9 = vmul.f32 %v5074_v40, %v11398_v3  ;;  %v4886_v32 = vmul.f32 %v6126_v33, %v4885_v23  ;;  %v6128_v56 = vpop.eup %6127 }
 0x4f7   :  { %v5574_v14 = vadd.f32 1.0, %v5542_v24  ;;  %6131 = vrcp.f32 %v11429_v48  ;;  %vm4888_vm6 = vweird.f32 %v11380_v10  ;;  %v6130_v60 = vpop.eup %6129  ;;  %v4895_v52 = vor.u32 1.1754944e-38, %v4894_v42 }
 0x4f8   :  { %v5201_v6 = vadd.f32 0.2548296, %v5169_v7  ;;  %v5138_v38 = vadd.f32 -0.28449672, %v5106_v9  ;;  %v4887_v59 = vadd.f32 %v6126_v33, %v4886_v32  ;;  %vm4890_vm15 = vmor %vm4888_vm6, %vm4889_vm1  ;;  %v4435_v30 = vmul.f32 0.3275911, %v11432_v22  ;;  %v4230_v32 = vpop.f32.mrf.mxu2 }
 0x4f9   :  { %v5606_v17 = vmul.f32 %v5574_v14, %v4358_v57  ;;  %v4263_v35 = vadd.f32 %v4262_v34, %v9512_v1  ;;  %vm4893_vm10 = vcmp.eq.f32.partialorder %v4892_v18, 8.507059e+37  ;;  %v5377_v12 = vmul.f32 1.442695, %v5319_v61 }
 0x4fa   :  { %v5233_v46 = vmul.f32 %v5201_v6, %v11373_v53  ;;  %v5170_v41 = vmul.f32 %v5138_v38, %v11398_v3  ;;  %v4891_v37 = vsel %vm4890_vm15, %v6126_v33, %v4887_v59  ;;  %v5288_v44 = vsub.f32 0.0, %v11418_v29 }
 0x4fb   :  { %5771 = vst [vmem:[%s12256_s7 + $0x1c8] sm:$0xff] %v5606_v17  ;;  %v11452_v10 = vsel %vm4893_vm10, %v4895_v52, %v4891_v37  ;;  %v11455_v57 = vadd.f32 1.0, %v4435_v30  ;;  %v4338_v1 = vmul.f32 0.5, %v11277_v43  ;;  %vm5457_vm8 = vcmp.lt.f32.partialorder %v11285_v25, 0.0  ;;  %v4295_v52 = vpop.f32.mrf.mxu3 }
 0x4fc   :  { %v5393_v55 = vmul.f32 %v6128_v56, %v5233_v46  ;;  %v5202_v5 = vadd.f32 0.2548296, %v5170_v41  ;;  %v4999_v53 = vmul.f32 1.0614054, %v11452_v10  ;;  %v4907_v33 = vand.u32 2147483647, %v11429_v48 }
 0x4fd   :  { %v6132_v8 = vpop.eup %6131  ;;  %6133 = vrcp.f32 %v11455_v57  ;;  %v11465_v49 = vadd.f32 %v6282_v28, %v4263_v35  ;;  %vm5458_vm11 = vcmp.lt.f32.partialorder %v11289_v13, 0.0  ;;  %v4909_v18 = vand.u32 2147483648, %v11429_v48 }
 0x4fe   :  { %v5425_v26 = vsub.f32 1.0, %v5393_v55  ;;  %v5234_v11 = vmul.f32 %v5202_v5, %v11398_v3  ;;  %v5031_v43 = vadd.f32 -1.4531521, %v4999_v53  ;;  %v4899_v54 = vmul.f32 %v6132_v8, %v11429_v48 }
 0x4ff   :  { %6135 = vpow2.f32 %v5377_v12  ;;  %v5320_v2 = vmul.f32 %v5288_v44, %v11418_v29  ;;  %vm4903_vm2 = vweird.f32 %v11429_v48  ;;  %vm4904_vm4 = vweird.f32 %v6132_v8 }
 0x500   :  { %v5489_v47 = vsub.f32 0.0, %v5425_v26  ;;  %v5394_v19 = vmul.f32 %v6130_v60, %v5234_v11  ;;  %v5063_v40 = vmul.f32 %v5031_v43, %v11452_v10  ;;  %v4900_v23 = vsub.f32 1.0, %v4899_v54  ;;  %vm4905_vm12 = vmor %vm4903_vm2, %vm4904_vm4 }
 0x501   :  { %vm11474_vm14 = vcmp.eq.f32.partialorder %v4907_v33, 8.507059e+37  ;;  %v11479_v42 = vmul.f32 0.70710677, %v11465_v49  ;;  %v4910_v14 = vor.u32 1.1754944e-38, %v4909_v18  ;;  %v4592_v61 = vand.u32 2147483647, %v11455_v57 }
 0x502   :  { %v5521_v24 = vsel %vm5457_vm8, %v5489_v47, %v5425_v26  ;;  %v5426_v7 = vsub.f32 1.0, %v5394_v19  ;;  %v5095_v29 = vadd.f32 1.4214138, %v5063_v40  ;;  %v4901_v9 = vmul.f32 %v6132_v8, %v4900_v23  ;;  %v6283_v26 = vld [vmem:[%s12249_s0 + $0x1e0] sm:$0xff]  ;;  %v6284_v19 = vld [vmem:[%s12249_s0 + $0x1e8] sm:$0xff] }
 0x503   :  { %v6134_v34 = vpop.eup %6133  ;;  %v5553_v56 = vadd.f32 1.0, %v5521_v24  ;;  %v4404_v6 = vand.u32 2147483647, %v11479_v42  ;;  %v4594_v35 = vand.u32 2147483648, %v11455_v57  ;;  %v4231_v41 = vadd.f32 %v4230_v32, %v10754_v63 }
 0x504   :  { %v5490_v38 = vsub.f32 0.0, %v5426_v7  ;;  %v5127_v59 = vmul.f32 %v5095_v29, %v11452_v10  ;;  %v4902_v60 = vadd.f32 %v6132_v8, %v4901_v9  ;;  %v4584_v17 = vmul.f32 %v6134_v34, %v11455_v57 }
 0x505   :  { %v6136_v25 = vpop.eup %6135  ;;  %v5585_v30 = vmul.f32 %v5553_v56, %v11439_v16  ;;  %v4436_v46 = vmul.f32 0.3275911, %v4404_v6  ;;  %v4296_v53 = vadd.f32 %v4295_v52, %v10754_v63  ;;  %vm4589_vm0 = vweird.f32 %v6134_v34 }
 0x506   :  { %v5522_v37 = vsel %vm5458_vm11, %v5490_v38, %v5426_v7  ;;  %v5159_v12 = vadd.f32 -0.28449672, %v5127_v59  ;;  %v4906_v44 = vsel %vm4905_vm12, %v6132_v8, %v4902_v60  ;;  %v4585_v55 = vsub.f32 1.0, %v4584_v17 }
 0x507   :  { %5750 = vst [vmem:[%s12256_s7 + $0x120] sm:$0xff] %v5585_v30  ;;  %v5554_v16 = vadd.f32 1.0, %v5522_v37  ;;  %v11500_v48 = vsel %vm11474_vm14, %v4910_v14, %v4906_v44  ;;  %v11502_v5 = vadd.f32 1.0, %v4436_v46  ;;  %v11511_v11 = vadd.f32 %v6283_v26, %v4231_v41 }
 0x508   :  { %v5191_v33 = vmul.f32 %v5159_v12, %v11452_v10  ;;  %v5000_v13 = vmul.f32 1.0614054, %v11500_v48  ;;  %v4586_v28 = vmul.f32 %v6134_v34, %v4585_v55  ;;  %vm4588_vm13 = vweird.f32 %v11455_v57 }
 0x509   :  { %v5586_v8 = vmul.f32 %v5554_v16, %v4338_v1  ;;  %6137 = vrcp.f32 %v11502_v5  ;;  %v5379_v63 = vmul.f32 1.442695, %v5320_v2  ;;  %vm4590_vm5 = vmor %vm4588_vm13, %vm4589_vm0  ;;  %v4595_v1 = vor.u32 1.1754944e-38, %v4594_v35 }
 0x50a   :  { %v5223_v43 = vadd.f32 0.2548296, %v5191_v33  ;;  %v5032_v54 = vadd.f32 -1.4531521, %v5000_v13  ;;  %v4587_v18 = vadd.f32 %v6134_v34, %v4586_v28  ;;  %v5267_v47 = vsub.f32 0.0, %v11432_v22 }
 0x50b   :  { %5751 = vst [vmem:[%s12256_s7 + $0x128] sm:$0xff] %v5586_v8  ;;  %v11521_v40 = vadd.f32 %v6284_v19, %v4296_v53  ;;  %vm4593_vm3 = vcmp.eq.f32.partialorder %v4592_v61, 8.507059e+37  ;;  %v4359_v24 = vmul.f32 0.5, %v11345_v20  ;;  %v5268_v2 = vsub.f32 0.0, %v4404_v6 }
 0x50c   :  { %v5255_v23 = vmul.f32 %v5223_v43, %v11452_v10  ;;  %v5064_v3 = vmul.f32 %v5032_v54, %v11500_v48  ;;  %v4591_v57 = vsel %vm4590_vm5, %v6134_v34, %v4587_v18  ;;  %v11529_v29 = vmul.f32 0.70710677, %v11511_v11 }
 0x50d   :  { %v11526_v7 = vsel %vm4593_vm3, %v4595_v1, %v4591_v57  ;;  %v11533_v14 = vmul.f32 0.70710677, %v11521_v40  ;;  %vm5479_vm7 = vcmp.lt.f32.partialorder %v11352_v27, 0.0  ;;  %6139 = vpow2.f32 %v5379_v63  ;;  %v4200_v27 = vpop.f32.mrf.mxu0 }
 0x50e   :  { %v5415_v9 = vmul.f32 %v6136_v25, %v5255_v23  ;;  %v5096_v32 = vadd.f32 1.4214138, %v5064_v3  ;;  %v4979_v56 = vmul.f32 1.0614054, %v11526_v7  ;;  %v5299_v34 = vmul.f32 %v5267_v47, %v11432_v22  ;;  %v4265_v3 = vpop.f32.mrf.mxu1 }
 0x50f   :  { %v6138_v10 = vpop.eup %6137  ;;  %v4425_v20 = vand.u32 2147483647, %v11529_v29  ;;  %v4607_v17 = vand.u32 2147483647, %v11502_v5  ;;  %v5300_v52 = vmul.f32 %v5268_v2, %v4404_v6  ;;  %v11542_v30 = vand.u32 2147483647, %v11533_v14 }
 0x510   :  { %v5447_v61 = vsub.f32 1.0, %v5415_v9  ;;  %v5128_v38 = vmul.f32 %v5096_v32, %v11500_v48  ;;  %v5011_v59 = vadd.f32 -1.4531521, %v4979_v56  ;;  %v4599_v60 = vmul.f32 %v6138_v10, %v11502_v5 }
 0x511   :  { %v4457_v25 = vmul.f32 0.3275911, %v4425_v20  ;;  %vm4604_vm9 = vweird.f32 %v6138_v10  ;;  %v4609_v37 = vand.u32 2147483648, %v11502_v5  ;;  %v4458_v44 = vmul.f32 0.3275911, %v11542_v30 }
 0x512   :  { %v5511_v35 = vsub.f32 0.0, %v5447_v61  ;;  %v5160_v46 = vadd.f32 -0.28449672, %v5128_v38  ;;  %v5043_v41 = vmul.f32 %v5011_v59, %v11526_v7  ;;  %v4600_v22 = vsub.f32 1.0, %v4599_v60 }
 0x513   :  { %v11546_v12 = vadd.f32 1.0, %v4457_v25  ;;  %v6140_v33 = vpop.eup %6139  ;;  %v11553_v28 = vmul.f32 0.5, %v11389_v62  ;;  %v5337_v8 = vmul.f32 1.442695, %v5299_v34  ;;  %vm4603_vm1 = vweird.f32 %v11502_v5 }
 0x514   :  { %v5543_v55 = vsel %vm5479_vm7, %v5511_v35, %v5447_v61  ;;  %v5192_v6 = vmul.f32 %v5160_v46, %v11500_v48  ;;  %v5075_v16 = vadd.f32 1.4214138, %v5043_v41  ;;  %v4601_v53 = vmul.f32 %v6138_v10, %v4600_v22  ;;  %vm4605_vm15 = vmor %vm4603_vm1, %vm4604_vm9 }
 0x515   :  { %v5575_v13 = vadd.f32 1.0, %v5543_v55  ;;  %6141 = vrcp.f32 %v11546_v12  ;;  %vm5480_vm6 = vcmp.lt.f32.partialorder %v11404_v58, 0.0  ;;  %v4610_v63 = vor.u32 1.1754944e-38, %v4609_v37 }
 0x516   :  { %v5224_v26 = vadd.f32 0.2548296, %v5192_v6  ;;  %v5107_v43 = vmul.f32 %v5075_v16, %v11526_v7  ;;  %v4602_v54 = vadd.f32 %v6138_v10, %v4601_v53  ;;  %v5339_v1 = vmul.f32 1.442695, %v5300_v52 }
 0x517   :  { %v5607_v18 = vmul.f32 %v5575_v13, %v4359_v24  ;;  %v11560_v47 = vadd.f32 1.0, %v4458_v44  ;;  %vm4608_vm10 = vcmp.eq.f32.partialorder %v4607_v17, 8.507059e+37  ;;  %6143 = vpow2.f32 %v5337_v8 }
 0x518   :  { %v5256_v62 = vmul.f32 %v5224_v26, %v11500_v48  ;;  %v5139_v19 = vadd.f32 -0.28449672, %v5107_v43  ;;  %v4606_v23 = vsel %vm4605_vm15, %v6138_v10, %v4602_v54  ;;  %v5289_v57 = vsub.f32 0.0, %v4425_v20 }
 0x519   :  { %5772 = vst [vmem:[%s12256_s7 + $0x1d0] sm:$0xff] %v5607_v18  ;;  %v11566_v5 = vsel %vm4608_vm10, %v4610_v63, %v4606_v23  ;;  %v4201_v24 = vadd.f32 %v4200_v27, %v9615_v0  ;;  %6145 = vrcp.f32 %v11560_v47  ;;  %v11573_v56 = vmul.f32 0.5, %v11409_v45  ;;  %v6285_v45 = vld [vmem:[%s12249_s0 + $0x140] sm:$0xff] }
 0x51a   :  { %v5416_v2 = vmul.f32 %v6140_v33, %v5256_v62  ;;  %v5171_v9 = vmul.f32 %v5139_v19, %v11526_v7  ;;  %v4980_v32 = vmul.f32 1.0614054, %v11566_v5  ;;  %6147 = vpow2.f32 %v5339_v1  ;;  %v6286_v19 = vld [vmem:[%s12249_s0 + $0x148] sm:$0xff] }
 0x51b   :  { %v6142_v48 = vpop.eup %6141  ;;  %v4922_v10 = vand.u32 2147483647, %v11546_v12  ;;  %v4266_v34 = vadd.f32 %v4265_v3, %v9615_v0  ;;  %vm5459_vm8 = vcmp.lt.f32.partialorder %v11426_v50, 0.0  ;;  %v4924_v17 = vand.u32 2147483648, %v11546_v12 }
 0x51c   :  { %v5448_v61 = vsub.f32 1.0, %v5416_v2  ;;  %v5203_v38 = vadd.f32 0.2548296, %v5171_v9  ;;  %v5012_v59 = vadd.f32 -1.4531521, %v4980_v32  ;;  %v4914_v60 = vmul.f32 %v6142_v48, %v11546_v12  ;;  %v4233_v32 = vpop.f32.mrf.mxu2 }
 0x51d   :  { %v5321_v52 = vmul.f32 %v5289_v57, %v4425_v20  ;;  %v5290_v25 = vsub.f32 0.0, %v11542_v30  ;;  %v11584_v35 = vadd.f32 %v6285_v45, %v4201_v24  ;;  %v6144_v37 = vpop.eup %6143  ;;  %vm4918_vm11 = vweird.f32 %v11546_v12 }
 0x51e   :  { %v5512_v46 = vsub.f32 0.0, %v5448_v61  ;;  %v5235_v0 = vmul.f32 %v5203_v38, %v11526_v7  ;;  %v5044_v41 = vmul.f32 %v5012_v59, %v11566_v5  ;;  %v4915_v22 = vsub.f32 1.0, %v4914_v60 }
 0x51f   :  { %vm4919_vm2 = vweird.f32 %v6142_v48  ;;  %vm11589_vm4 = vcmp.eq.f32.partialorder %v4922_v10, 8.507059e+37  ;;  %v11594_v44 = vmul.f32 0.70710677, %v11584_v35  ;;  %v6146_v55 = vpop.eup %6145  ;;  %v4925_v8 = vor.u32 1.1754944e-38, %v4924_v17 }
 0x520   :  { %v5544_v6 = vsel %vm5480_vm6, %v5512_v46, %v5448_v61  ;;  %v5395_v16 = vmul.f32 %v6144_v37, %v5235_v0  ;;  %v5076_v7 = vadd.f32 1.4214138, %v5044_v41  ;;  %v4916_v53 = vmul.f32 %v6142_v48, %v4915_v22  ;;  %v6148_v33 = vpop.eup %6147  ;;  %vm4920_vm14 = vmor %vm4918_vm11, %vm4919_vm2 }
 0x521   :  { %v5576_v13 = vadd.f32 1.0, %v5544_v6  ;;  %v4929_v26 = vmul.f32 %v6146_v55, %v11560_v47  ;;  %v11600_v43 = vand.u32 2147483647, %v11594_v44  ;;  %v4937_v63 = vand.u32 2147483647, %v11560_v47 }
 0x522   :  { %v5427_v54 = vsub.f32 1.0, %v5395_v16  ;;  %v5108_v27 = vmul.f32 %v5076_v7, %v11566_v5  ;;  %v4917_v18 = vadd.f32 %v6142_v48, %v4916_v53  ;;  %v11612_v23 = vadd.f32 %v6286_v19, %v4266_v34 }
 0x523   :  { %v5608_v58 = vmul.f32 %v5576_v13, %v11553_v28  ;;  %v4930_v1 = vsub.f32 1.0, %v4929_v26  ;;  %v4437_v62 = vmul.f32 0.3275911, %v11600_v43  ;;  %v4939_v2 = vand.u32 2147483648, %v11560_v47 }
 0x524   :  { %v5491_v3 = vsub.f32 0.0, %v5427_v54  ;;  %v5140_v57 = vadd.f32 -0.28449672, %v5108_v27  ;;  %v4921_v24 = vsel %vm4920_vm14, %v6142_v48, %v4917_v18  ;;  %vm4934_vm12 = vweird.f32 %v6146_v55 }
 0x525   :  { %5773 = vst [vmem:[%s12256_s7 + $0x1d8] sm:$0xff] %v5608_v58  ;;  %v11620_v12 = vsel %vm11589_vm4, %v4925_v8, %v4921_v24  ;;  %v4931_v28 = vmul.f32 %v6146_v55, %v4930_v1  ;;  %v11622_v9 = vadd.f32 1.0, %v4437_v62  ;;  %vm4933_vm0 = vweird.f32 %v11560_v47  ;;  %v4298_v62 = vpop.f32.mrf.mxu3 }
 0x526   :  { %v5523_v10 = vsel %vm5459_vm8, %v5491_v3, %v5427_v54  ;;  %v5172_v48 = vmul.f32 %v5140_v57, %v11566_v5  ;;  %v5001_v34 = vmul.f32 1.0614054, %v11620_v12  ;;  %v11631_v59 = vmul.f32 0.70710677, %v11612_v23  ;;  %vm4935_vm13 = vmor %vm4933_vm0, %vm4934_vm12 }
 0x527   :  { %v5555_v61 = vadd.f32 1.0, %v5523_v10  ;;  %v4932_v38 = vadd.f32 %v6146_v55, %v4931_v28  ;;  %6149 = vrcp.f32 %v11622_v9  ;;  %v4940_v45 = vor.u32 1.1754944e-38, %v4939_v2 }
 0x528   :  { %v5204_v60 = vadd.f32 0.2548296, %v5172_v48  ;;  %v5033_v17 = vadd.f32 -1.4531521, %v5001_v34  ;;  %v4234_v50 = vadd.f32 %v4233_v32, %v10842_v15  ;;  %vm4938_vm5 = vcmp.eq.f32.partialorder %v4937_v63, 8.507059e+37 }
 0x529   :  { %v5587_v46 = vmul.f32 %v5555_v61, %v11573_v56  ;;  %v4936_v0 = vsel %vm4935_vm13, %v6146_v55, %v4932_v38  ;;  %v5381_v22 = vmul.f32 1.442695, %v5321_v52  ;;  %v5322_v6 = vmul.f32 %v5290_v25, %v11542_v30  ;;  %v6287_v52 = vld [vmem:[%s12249_s0 + $0x1f0] sm:$0xff] }
 0x52a   :  { %v5236_v41 = vmul.f32 %v5204_v60, %v11566_v5  ;;  %v5065_v47 = vmul.f32 %v5033_v17, %v11620_v12  ;;  %v11637_v37 = vsel %vm4938_vm5, %v4940_v45, %v4936_v0  ;;  %v11647_v56 = vand.u32 2147483647, %v11631_v59 }
 0x52b   :  { %5752 = vst [vmem:[%s12256_s7 + $0x130] sm:$0xff] %v5587_v46  ;;  %v5002_v20 = vmul.f32 1.0614054, %v11637_v37  ;;  %v4340_v5 = vmul.f32 0.5, %v11465_v49  ;;  %v11653_v7 = vadd.f32 %v6287_v52, %v4234_v50  ;;  %vm5460_vm3 = vcmp.lt.f32.partialorder %v11479_v42, 0.0 }
 0x52c   :  { %v5396_v55 = vmul.f32 %v6148_v33, %v5236_v41  ;;  %v5097_v16 = vadd.f32 1.4214138, %v5065_v47  ;;  %v11657_v13 = vmul.f32 0.5, %v11511_v11  ;;  %v4438_v25 = vmul.f32 0.3275911, %v11647_v56  ;;  %v6288_v47 = vld [vmem:[%s12249_s0 + $0x1f8] sm:$0xff] }
 0x52d   :  { %v6150_v53 = vpop.eup %6149  ;;  %v5034_v30 = vadd.f32 -1.4531521, %v5002_v20  ;;  %v11662_v33 = vmul.f32 0.5, %v11521_v40  ;;  %6151 = vpow2.f32 %v5381_v22  ;;  %v5383_v27 = vmul.f32 1.442695, %v5322_v6 }
 0x52e   :  { %v5428_v8 = vsub.f32 1.0, %v5396_v55  ;;  %v5129_v49 = vmul.f32 %v5097_v16, %v11620_v12  ;;  %v4614_v26 = vmul.f32 %v6150_v53, %v11622_v9  ;;  %v11666_v18 = vadd.f32 1.0, %v4438_v25 }
 0x52f   :  { %v5066_v54 = vmul.f32 %v5034_v30, %v11637_v37  ;;  %v11669_v1 = vmul.f32 0.70710677, %v11653_v7  ;;  %v4622_v3 = vand.u32 2147483647, %v11622_v9  ;;  %v4624_v40 = vand.u32 2147483648, %v11622_v9 }
 0x530   :  { %v5492_v63 = vsub.f32 0.0, %v5428_v8  ;;  %v5161_v11 = vadd.f32 -0.28449672, %v5129_v49  ;;  %v4615_v58 = vsub.f32 1.0, %v4614_v26  ;;  %6153 = vrcp.f32 %v11666_v18 }
 0x531   :  { %v5098_v19 = vadd.f32 1.4214138, %v5066_v54  ;;  %vm4619_vm7 = vweird.f32 %v6150_v53  ;;  %6155 = vpow2.f32 %v5383_v27  ;;  %v4299_v10 = vadd.f32 %v4298_v62, %v10842_v15 }
 0x532   :  { %v5524_v57 = vsel %vm5460_vm3, %v5492_v63, %v5428_v8  ;;  %v5193_v24 = vmul.f32 %v5161_v11, %v11620_v12  ;;  %v4616_v2 = vmul.f32 %v6150_v53, %v4615_v58  ;;  %vm4618_vm9 = vweird.f32 %v11622_v9 }
 0x533   :  { %v5556_v28 = vadd.f32 1.0, %v5524_v57  ;;  %v5130_v32 = vmul.f32 %v5098_v19, %v11637_v37  ;;  %v11681_v61 = vand.u32 2147483647, %v11669_v1  ;;  %v6152_v38 = vpop.eup %6151  ;;  %vm4620_vm1 = vmor %vm4618_vm9, %vm4619_vm7  ;;  %v4625_v17 = vor.u32 1.1754944e-38, %v4624_v40  ;;  %v4203_v40 = vpop.f32.mrf.mxu0 }
 0x534   :  { %v5225_v48 = vadd.f32 0.2548296, %v5193_v24  ;;  %v4617_v34 = vadd.f32 %v6150_v53, %v4616_v2  ;;  %v5269_v45 = vsub.f32 0.0, %v11600_v43  ;;  %vm4623_vm6 = vcmp.eq.f32.partialorder %v4622_v3, 8.507059e+37 }
 0x535   :  { %v5588_v42 = vmul.f32 %v5556_v28, %v4340_v5  ;;  %v5162_v60 = vadd.f32 -0.28449672, %v5130_v32  ;;  %v4459_v15 = vmul.f32 0.3275911, %v11681_v61  ;;  %vm5481_vm15 = vcmp.lt.f32.partialorder %v11529_v29, 0.0 }
 0x536   :  { %v5257_v50 = vmul.f32 %v5225_v48, %v11620_v12  ;;  %v4621_v46 = vsel %vm4620_vm1, %v6150_v53, %v4617_v34  ;;  %v6154_v0 = vpop.eup %6153  ;;  %v11696_v12 = vadd.f32 %v6288_v47, %v4299_v10  ;;  %v11699_v20 = vmul.f32 0.5, %v11584_v35 }
 0x537   :  { %5753 = vst [vmem:[%s12256_s7 + $0x138] sm:$0xff] %v5588_v42  ;;  %v5194_v9 = vmul.f32 %v5162_v60, %v11637_v37  ;;  %v11691_v41 = vsel %vm4623_vm6, %v4625_v17, %v4621_v46  ;;  %v4629_v5 = vmul.f32 %v6154_v0, %v11666_v18  ;;  %v6156_v55 = vpop.eup %6155  ;;  %v5301_v52 = vmul.f32 %v5269_v45, %v11600_v43 }
 0x538   :  { %v5417_v22 = vmul.f32 %v6152_v38, %v5257_v50  ;;  %v4981_v6 = vmul.f32 1.0614054, %v11691_v41  ;;  %v5270_v53 = vsub.f32 0.0, %v11647_v56  ;;  %v11705_v30 = vadd.f32 1.0, %v4459_v15 }
 0x539   :  { %v5226_v16 = vadd.f32 0.2548296, %v5194_v9  ;;  %vm5482_vm10 = vcmp.lt.f32.partialorder %v11533_v14, 0.0  ;;  %v4630_v49 = vsub.f32 1.0, %v4629_v5  ;;  %v11709_v35 = vmul.f32 0.70710677, %v11696_v12 }
 0x53a   :  { %v5449_v25 = vsub.f32 1.0, %v5417_v22  ;;  %v5013_v8 = vadd.f32 -1.4531521, %v4981_v6  ;;  %v4637_v54 = vand.u32 2147483647, %v11666_v18  ;;  %v4639_v27 = vand.u32 2147483648, %v11666_v18 }
 0x53b   :  { %v5258_v26 = vmul.f32 %v5226_v16, %v11637_v37  ;;  %6157 = vrcp.f32 %v11705_v30  ;;  %v4631_v11 = vmul.f32 %v6154_v0, %v4630_v49  ;;  %vm4634_vm8 = vweird.f32 %v6154_v0  ;;  %v6289_v14 = vld [vmem:[%s12249_s0 + $0x150] sm:$0xff] }
 0x53c   :  { %v5513_v43 = vsub.f32 0.0, %v5449_v25  ;;  %v5045_v63 = vmul.f32 %v5013_v8, %v11691_v41  ;;  %v5341_v62 = vmul.f32 1.442695, %v5301_v52  ;;  %v5302_v19 = vmul.f32 %v5270_v53, %v11647_v56 }
 0x53d   :  { %v5418_v58 = vmul.f32 %v6156_v55, %v5258_v26  ;;  %v11718_v3 = vand.u32 2147483647, %v11709_v35  ;;  %v4632_v24 = vadd.f32 %v6154_v0, %v4631_v11  ;;  %vm4633_vm11 = vweird.f32 %v11666_v18 }
 0x53e   :  { %v5545_v37 = vsel %vm5481_vm15, %v5513_v43, %v5449_v25  ;;  %v5077_v57 = vadd.f32 1.4214138, %v5045_v63  ;;  %vm4635_vm2 = vmor %vm4633_vm11, %vm4634_vm8  ;;  %v4640_v32 = vor.u32 1.1754944e-38, %v4639_v27  ;;  %vm4638_vm4 = vcmp.eq.f32.partialorder %v4637_v54, 8.507059e+37  ;;  %v4268_v43 = vpop.f32.mrf.mxu1 }
 0x53f   :  { %v5577_v2 = vadd.f32 1.0, %v5545_v37  ;;  %v5450_v28 = vsub.f32 1.0, %v5418_v58  ;;  %v4460_v10 = vmul.f32 0.3275911, %v11718_v3  ;;  %v4636_v56 = vsel %vm4635_vm2, %v6154_v0, %v4632_v24  ;;  %v4206_v37 = vpop.f32.mrf.mxu0 }
 0x540   :  { %v5109_v48 = vmul.f32 %v5077_v57, %v11691_v41  ;;  %v4204_v34 = vadd.f32 %v4203_v40, %v9791_v21  ;;  %v11727_v60 = vsel %vm4638_vm4, %v4640_v32, %v4636_v56  ;;  %6159 = vpow2.f32 %v5341_v62 }
 0x541   :  { %v6158_v38 = vpop.eup %6157  ;;  %v5609_v29 = vmul.f32 %v5577_v2, %v11657_v13  ;;  %v5514_v42 = vsub.f32 0.0, %v5450_v28  ;;  %v11729_v17 = vadd.f32 1.0, %v4460_v10  ;;  %v4982_v45 = vmul.f32 1.0614054, %v11727_v60 }
 0x542   :  { %v5141_v18 = vadd.f32 -0.28449672, %v5109_v48  ;;  %v4944_v50 = vmul.f32 %v6158_v38, %v11705_v30  ;;  %v5343_v15 = vmul.f32 1.442695, %v5302_v19  ;;  %v5291_v13 = vsub.f32 0.0, %v11681_v61 }
 0x543   :  { %5774 = vst [vmem:[%s12256_s7 + $0x1e0] sm:$0xff] %v5609_v29  ;;  %v5546_v46 = vsel %vm5482_vm10, %v5514_v42, %v5450_v28  ;;  %6161 = vrcp.f32 %v11729_v17  ;;  %v5014_v47 = vadd.f32 -1.4531521, %v4982_v45  ;;  %vm4949_vm14 = vweird.f32 %v6158_v38 }
 0x544   :  { %v5578_v0 = vadd.f32 1.0, %v5546_v46  ;;  %v5173_v9 = vmul.f32 %v5141_v18, %v11691_v41  ;;  %v4945_v22 = vsub.f32 1.0, %v4944_v50  ;;  %v4952_v6 = vand.u32 2147483647, %v11705_v30 }
 0x545   :  { %v4954_v5 = vand.u32 2147483648, %v11705_v30  ;;  %v11746_v55 = vadd.f32 %v6289_v14, %v4204_v34  ;;  %v5046_v53 = vmul.f32 %v5014_v47, %v11727_v60  ;;  %vm5461_vm12 = vcmp.lt.f32.partialorder %v11594_v44, 0.0 }
 0x546   :  { %v5610_v16 = vmul.f32 %v5578_v0, %v11662_v33  ;;  %v5205_v52 = vadd.f32 0.2548296, %v5173_v9  ;;  %v4946_v25 = vmul.f32 %v6158_v38, %v4945_v22  ;;  %v11752_v8 = vmul.f32 0.5, %v11612_v23  ;;  %v6160_v26 = vpop.eup %6159 }
 0x547   :  { %6163 = vpow2.f32 %v5343_v15  ;;  %v11755_v49 = vmul.f32 0.70710677, %v11746_v55  ;;  %v5078_v54 = vadd.f32 1.4214138, %v5046_v53  ;;  %vm4948_vm0 = vweird.f32 %v11705_v30 }
 0x548   :  { %5775 = vst [vmem:[%s12256_s7 + $0x1e8] sm:$0xff] %v5610_v16  ;;  %v5237_v33 = vmul.f32 %v5205_v52, %v11691_v41  ;;  %v4947_v27 = vadd.f32 %v6158_v38, %v4946_v25  ;;  %vm4950_vm13 = vmor %vm4948_vm0, %vm4949_vm14  ;;  %vm4953_vm5 = vcmp.eq.f32.partialorder %v4952_v6, 8.507059e+37  ;;  %v4955_v23 = vor.u32 1.1754944e-38, %v4954_v5  ;;  %v6291_v6 = vld [vmem:[%s12249_s0 + $0x160] sm:$0xff] }
 0x549   :  { %v6162_v63 = vpop.eup %6161  ;;  %v5323_v11 = vmul.f32 %v5291_v13, %v11681_v61  ;;  %v4407_v58 = vand.u32 2147483647, %v11755_v49  ;;  %v5110_v19 = vmul.f32 %v5078_v54, %v11727_v60  ;;  %v4967_v30 = vand.u32 2147483647, %v11729_v17 }
 0x54a   :  { %v5397_v62 = vmul.f32 %v6160_v26, %v5237_v33  ;;  %v4951_v40 = vsel %vm4950_vm13, %v6158_v38, %v4947_v27  ;;  %v4959_v41 = vmul.f32 %v6162_v63, %v11729_v17  ;;  %v4269_v2 = vadd.f32 %v4268_v43, %v9791_v21  ;;  %v6290_v21 = vld [vmem:[%s12249_s0 + $0x158] sm:$0xff] }
 0x54b   :  { %v11767_v57 = vsel %vm4953_vm5, %v4955_v23, %v4951_v40  ;;  %v4439_v24 = vmul.f32 0.3275911, %v4407_v58  ;;  %v5142_v32 = vadd.f32 -0.28449672, %v5110_v19  ;;  %vm4964_vm3 = vweird.f32 %v6162_v63 }
 0x54c   :  { %v5429_v28 = vsub.f32 1.0, %v5397_v62  ;;  %v5003_v61 = vmul.f32 1.0614054, %v11767_v57  ;;  %v4960_v10 = vsub.f32 1.0, %v4959_v41  ;;  %v4969_v56 = vand.u32 2147483648, %v11729_v17 }
 0x54d   :  { %v6164_v48 = vpop.eup %6163  ;;  %v11773_v34 = vadd.f32 1.0, %v4439_v24  ;;  %v4207_v38 = vadd.f32 %v4206_v37, %v10007_v31  ;;  %v5174_v42 = vmul.f32 %v5142_v32, %v11727_v60  ;;  %v5385_v50 = vmul.f32 1.442695, %v5323_v11 }
 0x54e   :  { %v5493_v29 = vsub.f32 0.0, %v5429_v28  ;;  %v5035_v18 = vadd.f32 -1.4531521, %v5003_v61  ;;  %v4961_v45 = vmul.f32 %v6162_v63, %v4960_v10  ;;  %vm4963_vm7 = vweird.f32 %v11729_v17 }
 0x54f   :  { %6165 = vrcp.f32 %v11773_v34  ;;  %v11782_v46 = vadd.f32 %v6290_v21, %v4269_v2  ;;  %v5206_v13 = vadd.f32 0.2548296, %v5174_v42  ;;  %vm5462_vm9 = vcmp.lt.f32.partialorder %v11631_v59, 0.0  ;;  %vm4965_vm1 = vmor %vm4963_vm7, %vm4964_vm3 }
 0x550   :  { %v5525_v15 = vsel %vm5461_vm12, %v5493_v29, %v5429_v28  ;;  %v5067_v0 = vmul.f32 %v5035_v18, %v11767_v57  ;;  %v4962_v9 = vadd.f32 %v6162_v63, %v4961_v45  ;;  %v4970_v17 = vor.u32 1.1754944e-38, %v4969_v56 }
 0x551   :  { %v5557_v47 = vadd.f32 1.0, %v5525_v15  ;;  %v5292_v22 = vsub.f32 0.0, %v11718_v3  ;;  %v11793_v5 = vadd.f32 %v6291_v6, %v4207_v38  ;;  %v5238_v44 = vmul.f32 %v5206_v13, %v11727_v60  ;;  %v4271_v15 = vpop.f32.mrf.mxu1 }
 0x552   :  { %v5099_v14 = vadd.f32 1.4214138, %v5067_v0  ;;  %v4966_v16 = vsel %vm4965_vm1, %v6162_v63, %v4962_v9  ;;  %vm4968_vm6 = vcmp.eq.f32.partialorder %v4967_v30, 8.507059e+37  ;;  %v5271_v25 = vsub.f32 0.0, %v4407_v58 }
 0x553   :  { %v5589_v52 = vmul.f32 %v5557_v47, %v11699_v20  ;;  %v11797_v53 = vsel %vm4968_vm6, %v4970_v17, %v4966_v16  ;;  %v11800_v26 = vmul.f32 0.70710677, %v11782_v46  ;;  %v5398_v33 = vmul.f32 %v6164_v48, %v5238_v44 }
 0x554   :  { %v11803_v54 = vmul.f32 0.5, %v11653_v7  ;;  %v5131_v27 = vmul.f32 %v5099_v14, %v11767_v57  ;;  %v5004_v43 = vmul.f32 1.0614054, %v11797_v53  ;;  %6167 = vpow2.f32 %v5385_v50 }
 0x555   :  { %v6166_v60 = vpop.eup %6165  ;;  %5754 = vst [vmem:[%s12256_s7 + $0x140] sm:$0xff] %v5589_v52  ;;  %v5324_v20 = vmul.f32 %v5292_v22, %v11718_v3  ;;  %v4408_v63 = vand.u32 2147483647, %v11800_v26  ;;  %v11813_v23 = vmul.f32 0.70710677, %v11793_v5  ;;  %v5430_v11 = vsub.f32 1.0, %v5398_v33 }
 0x556   :  { %v5163_v7 = vadd.f32 -0.28449672, %v5131_v27  ;;  %v5036_v62 = vadd.f32 -1.4531521, %v5004_v43  ;;  %v4644_v19 = vmul.f32 %v6166_v60, %v11773_v34  ;;  %v4652_v40 = vand.u32 2147483647, %v11773_v34 }
 0x557   :  { %v5303_v41 = vmul.f32 %v5271_v25, %v4407_v58  ;;  %v4440_v37 = vmul.f32 0.3275911, %v4408_v63  ;;  %v11818_v30 = vand.u32 2147483647, %v11813_v23  ;;  %v5494_v24 = vsub.f32 0.0, %v5430_v11 }
 0x558   :  { %v5195_v3 = vmul.f32 %v5163_v7, %v11767_v57  ;;  %v5068_v2 = vmul.f32 %v5036_v62, %v11797_v53  ;;  %v4645_v28 = vsub.f32 1.0, %v4644_v19  ;;  %vm4649_vm15 = vweird.f32 %v6166_v60 }
 0x559   :  { %v4654_v32 = vand.u32 2147483648, %v11773_v34  ;;  %v11823_v61 = vadd.f32 1.0, %v4440_v37  ;;  %v4441_v10 = vmul.f32 0.3275911, %v11818_v30  ;;  %v5526_v58 = vsel %vm5462_vm9, %v5494_v24, %v5430_v11 }
 0x55a   :  { %v5227_v48 = vadd.f32 0.2548296, %v5195_v3  ;;  %v5100_v56 = vadd.f32 1.4214138, %v5068_v2  ;;  %v4646_v38 = vmul.f32 %v6166_v60, %v4645_v28  ;;  %v6168_v29 = vpop.eup %6167  ;;  %v5558_v42 = vadd.f32 1.0, %v5526_v58  ;;  %v4209_v58 = vpop.f32.mrf.mxu0 }
 0x55b   :  { %vm5483_vm10 = vcmp.lt.f32.partialorder %v11669_v1, 0.0  ;;  %v5387_v18 = vmul.f32 1.442695, %v5324_v20  ;;  %6169 = vrcp.f32 %v11823_v61  ;;  %vm4648_vm8 = vweird.f32 %v11773_v34 }
 0x55c   :  { %v5259_v45 = vmul.f32 %v5227_v48, %v11767_v57  ;;  %v5132_v50 = vmul.f32 %v5100_v56, %v11797_v53  ;;  %v4647_v21 = vadd.f32 %v6166_v60, %v4646_v38  ;;  %v5590_v59 = vmul.f32 %v5558_v42, %v11752_v8  ;;  %vm4650_vm11 = vmor %vm4648_vm8, %vm4649_vm15 }
 0x55d   :  { %v4655_v13 = vor.u32 1.1754944e-38, %v4654_v32  ;;  %v5345_v0 = vmul.f32 1.442695, %v5303_v41  ;;  %v11835_v9 = vadd.f32 1.0, %v4441_v10  ;;  %vm4653_vm2 = vcmp.eq.f32.partialorder %v4652_v40, 8.507059e+37 }
 0x55e   :  { %v5419_v47 = vmul.f32 %v6168_v29, %v5259_v45  ;;  %v5164_v17 = vadd.f32 -0.28449672, %v5132_v50  ;;  %v4651_v22 = vsel %vm4650_vm11, %v6166_v60, %v4647_v21  ;;  %5755 = vst [vmem:[%s12256_s7 + $0x148] sm:$0xff] %v5590_v59  ;;  %6171 = vpow2.f32 %v5387_v18  ;;  %v4274_v29 = vpop.f32.mrf.mxu1 }
 0x55f   :  { %v11840_v57 = vsel %vm4653_vm2, %v4655_v13, %v4651_v22  ;;  %v5272_v34 = vsub.f32 0.0, %v4408_v63  ;;  %v4272_v8 = vadd.f32 %v4271_v15, %v10007_v31  ;;  %6173 = vrcp.f32 %v11835_v9 }
 0x560   :  { %v5451_v6 = vsub.f32 1.0, %v5419_v47  ;;  %v5196_v44 = vmul.f32 %v5164_v17, %v11797_v53  ;;  %v4983_v14 = vmul.f32 1.0614054, %v11840_v57  ;;  %v11847_v52 = vmul.f32 0.5, %v11696_v12  ;;  %v6292_v12 = vld [vmem:[%s12249_s0 + $0x168] sm:$0xff] }
 0x561   :  { %v6170_v16 = vpop.eup %6169  ;;  %6175 = vpow2.f32 %v5345_v0  ;;  %v4667_v25 = vand.u32 2147483647, %v11823_v61  ;;  %v4669_v33 = vand.u32 2147483648, %v11823_v61  ;;  %vm5484_vm4 = vcmp.lt.f32.partialorder %v11709_v35, 0.0 }
 0x562   :  { %v5515_v27 = vsub.f32 0.0, %v5451_v6  ;;  %v5228_v43 = vadd.f32 0.2548296, %v5196_v44  ;;  %v5015_v60 = vadd.f32 -1.4531521, %v4983_v14  ;;  %v4659_v31 = vmul.f32 %v6170_v16, %v11823_v61 }
 0x563   :  { %vm4663_vm14 = vweird.f32 %v11823_v61  ;;  %v5304_v20 = vmul.f32 %v5272_v34, %v4408_v63  ;;  %v5273_v11 = vsub.f32 0.0, %v11818_v30  ;;  %v11858_v7 = vadd.f32 %v6292_v12, %v4272_v8 }
 0x564   :  { %v5547_v62 = vsel %vm5483_vm10, %v5515_v27, %v5451_v6  ;;  %v5260_v19 = vmul.f32 %v5228_v43, %v11797_v53  ;;  %v5047_v40 = vmul.f32 %v5015_v60, %v11840_v57  ;;  %v4660_v41 = vsub.f32 1.0, %v4659_v31  ;;  %v6172_v37 = vpop.eup %6171 }
 0x565   :  { %v5579_v24 = vadd.f32 1.0, %v5547_v62  ;;  %vm11864_vm12 = vcmp.eq.f32.partialorder %v4667_v25, 8.507059e+37  ;;  %v4670_v3 = vor.u32 1.1754944e-38, %v4669_v33  ;;  %v11869_v2 = vmul.f32 0.70710677, %v11858_v7  ;;  %v6174_v28 = vpop.eup %6173 }
 0x566   :  { %v5420_v32 = vmul.f32 %v6172_v37, %v5260_v19  ;;  %v5079_v10 = vadd.f32 1.4214138, %v5047_v40  ;;  %v4661_v1 = vmul.f32 %v6170_v16, %v4660_v41  ;;  %vm4664_vm0 = vweird.f32 %v6170_v16 }
 0x567   :  { %v6176_v53 = vpop.eup %6175  ;;  %v5611_v48 = vmul.f32 %v5579_v24, %v11803_v54  ;;  %v4674_v56 = vmul.f32 %v6174_v28, %v11835_v9  ;;  %vm4678_vm13 = vweird.f32 %v11835_v9  ;;  %v11875_v38 = vand.u32 2147483647, %v11869_v2  ;;  %vm4665_vm5 = vmor %vm4663_vm14, %vm4664_vm0 }
 0x568   :  { %v5452_v42 = vsub.f32 1.0, %v5420_v32  ;;  %v5111_v18 = vmul.f32 %v5079_v10, %v11840_v57  ;;  %v4662_v45 = vadd.f32 %v6170_v16, %v4661_v1  ;;  %v4682_v50 = vand.u32 2147483647, %v11835_v9 }
 0x569   :  { %5776 = vst [vmem:[%s12256_s7 + $0x1f0] sm:$0xff] %v5611_v48  ;;  %v4675_v54 = vsub.f32 1.0, %v4674_v56  ;;  %v4684_v21 = vand.u32 2147483648, %v11835_v9  ;;  %v4442_v15 = vmul.f32 0.3275911, %v11875_v38  ;;  %v4210_v59 = vadd.f32 %v4209_v58, %v10068_v39 }
 0x56a   :  { %v5516_v13 = vsub.f32 0.0, %v5452_v42  ;;  %v5143_v0 = vadd.f32 -0.28449672, %v5111_v18  ;;  %v4666_v47 = vsel %vm4665_vm5, %v6170_v16, %v4662_v45  ;;  %v4275_v17 = vadd.f32 %v4274_v29, %v10068_v39  ;;  %v6293_v39 = vld [vmem:[%s12249_s0 + $0x170] sm:$0xff] }
 0x56b   :  { %v11890_v22 = vsel %vm11864_vm12, %v4670_v3, %v4666_v47  ;;  %v4676_v34 = vmul.f32 %v6174_v28, %v4675_v54  ;;  %vm4679_vm3 = vweird.f32 %v6174_v28  ;;  %v11892_v61 = vadd.f32 1.0, %v4442_v15  ;;  %v4212_v47 = vpop.f32.mrf.mxu0 }
 0x56c   :  { %v5548_v8 = vsel %vm5484_vm4, %v5516_v13, %v5452_v42  ;;  %v5175_v6 = vmul.f32 %v5143_v0, %v11840_v57  ;;  %v4984_v44 = vmul.f32 1.0614054, %v11890_v22  ;;  %v5305_v14 = vmul.f32 %v5273_v11, %v11818_v30  ;;  %vm4680_vm7 = vmor %vm4678_vm13, %vm4679_vm3  ;;  %v6294_v30 = vld [vmem:[%s12249_s0 + $0x178] sm:$0xff] }
 0x56d   :  { %v5580_v16 = vadd.f32 1.0, %v5548_v8  ;;  %v4677_v25 = vadd.f32 %v6174_v28, %v4676_v34  ;;  %6177 = vrcp.f32 %v11892_v61  ;;  %v11903_v33 = vadd.f32 %v6293_v39, %v4210_v59 }
 0x56e   :  { %v5207_v27 = vadd.f32 0.2548296, %v5175_v6  ;;  %v5016_v43 = vadd.f32 -1.4531521, %v4984_v44  ;;  %v4685_v35 = vor.u32 1.1754944e-38, %v4684_v21  ;;  %v11910_v60 = vadd.f32 %v6294_v30, %v4275_v17 }
 0x56f   :  { %v5612_v31 = vmul.f32 %v5580_v16, %v11847_v52  ;;  %v5347_v11 = vmul.f32 1.442695, %v5304_v20  ;;  %v4681_v12 = vsel %vm4680_vm7, %v6174_v28, %v4677_v25  ;;  %vm4683_vm9 = vcmp.eq.f32.partialorder %v4682_v50, 8.507059e+37 }
 0x570   :  { %v5239_v62 = vmul.f32 %v5207_v27, %v11840_v57  ;;  %v5048_v19 = vmul.f32 %v5016_v43, %v11890_v22  ;;  %v11915_v40 = vsel %vm4683_vm9, %v4685_v35, %v4681_v12  ;;  %v5349_v9 = vmul.f32 1.442695, %v5305_v14 }
 0x571   :  { %5777 = vst [vmem:[%s12256_s7 + $0x1f8] sm:$0xff] %v5612_v31  ;;  %v4343_v41 = vmul.f32 0.5, %v11746_v55  ;;  %v4985_v37 = vmul.f32 1.0614054, %v11915_v40  ;;  %v11923_v52 = vmul.f32 0.70710677, %v11903_v33  ;;  %6179 = vpow2.f32 %v5347_v11 }
 0x572   :  { %v5399_v20 = vmul.f32 %v6176_v53, %v5239_v62  ;;  %vm5463_vm1 = vcmp.lt.f32.partialorder %v11755_v49, 0.0  ;;  %v5080_v57 = vadd.f32 1.4214138, %v5048_v19  ;;  %v11927_v24 = vmul.f32 0.70710677, %v11910_v60 }
 0x573   :  { %v6178_v63 = vpop.eup %6177  ;;  %v5017_v3 = vadd.f32 -1.4531521, %v4985_v37  ;;  %v5274_v28 = vsub.f32 0.0, %v11875_v38  ;;  %v11931_v32 = vand.u32 2147483647, %v11923_v52  ;;  %6181 = vpow2.f32 %v5349_v9 }
 0x574   :  { %v5431_v55 = vsub.f32 1.0, %v5399_v20  ;;  %v5112_v10 = vmul.f32 %v5080_v57, %v11890_v22  ;;  %v4689_v1 = vmul.f32 %v6178_v63, %v11892_v61  ;;  %v4697_v53 = vand.u32 2147483647, %v11892_v61 }
 0x575   :  { %v5049_v58 = vmul.f32 %v5017_v3, %v11915_v40  ;;  %v4443_v48 = vmul.f32 0.3275911, %v11931_v32  ;;  %v11939_v56 = vand.u32 2147483647, %v11927_v24  ;;  %v4699_v45 = vand.u32 2147483648, %v11892_v61  ;;  %v4277_v3 = vpop.f32.mrf.mxu1 }
 0x576   :  { %v5495_v29 = vsub.f32 0.0, %v5431_v55  ;;  %v5144_v42 = vadd.f32 -0.28449672, %v5112_v10  ;;  %v4690_v18 = vsub.f32 1.0, %v4689_v1  ;;  %v5306_v54 = vmul.f32 %v5274_v28, %v11875_v38 }
 0x577   :  { %v5081_v50 = vadd.f32 1.4214138, %v5049_v58  ;;  %v11943_v21 = vadd.f32 1.0, %v4443_v48  ;;  %v4444_v15 = vmul.f32 0.3275911, %v11939_v56  ;;  %vm4694_vm6 = vweird.f32 %v6178_v63  ;;  %v6180_v17 = vpop.eup %6179 }
 0x578   :  { %v5527_v59 = vsel %vm5463_vm1, %v5495_v29, %v5431_v55  ;;  %v5176_v13 = vmul.f32 %v5144_v42, %v11890_v22  ;;  %v4691_v0 = vmul.f32 %v6178_v63, %v4690_v18  ;;  %v11950_v8 = vmul.f32 0.5, %v11782_v46 }
 0x579   :  { %v5559_v34 = vadd.f32 1.0, %v5527_v59  ;;  %v5113_v6 = vmul.f32 %v5081_v50, %v11915_v40  ;;  %6183 = vrcp.f32 %v11943_v21  ;;  %v6182_v38 = vpop.eup %6181  ;;  %vm4693_vm15 = vweird.f32 %v11892_v61 }
 0x57a   :  { %v5208_v44 = vadd.f32 0.2548296, %v5176_v13  ;;  %v4692_v14 = vadd.f32 %v6178_v63, %v4691_v0  ;;  %v4700_v49 = vor.u32 1.1754944e-38, %v4699_v45  ;;  %vm4695_vm10 = vmor %vm4693_vm15, %vm4694_vm6  ;;  %v11955_v39 = vadd.f32 1.0, %v4444_v15 }
 0x57b   :  { %v5591_v16 = vmul.f32 %v5559_v34, %v4343_v41  ;;  %v5145_v25 = vadd.f32 -0.28449672, %v5113_v6  ;;  %v4213_v27 = vadd.f32 %v4212_v47, %v10139_v4  ;;  %vm4698_vm8 = vcmp.eq.f32.partialorder %v4697_v53, 8.507059e+37  ;;  %v6295_v41 = vld [vmem:[%s12249_s0 + $0x180] sm:$0xff]  ;;  %v4215_v47 = vpop.f32.mrf.mxu0 }
 0x57c   :  { %v5240_v46 = vmul.f32 %v5208_v44, %v11890_v22  ;;  %v4696_v43 = vsel %vm4695_vm10, %v6178_v63, %v4692_v14  ;;  %v5351_v35 = vmul.f32 1.442695, %v5306_v54  ;;  %v11963_v30 = vmul.f32 0.5, %v11793_v5 }
 0x57d   :  { %5756 = vst [vmem:[%s12256_s7 + $0x150] sm:$0xff] %v5591_v16  ;;  %v5177_v61 = vmul.f32 %v5145_v25, %v11915_v40  ;;  %v11966_v31 = vsel %vm4698_vm8, %v4700_v49, %v4696_v43  ;;  %v5275_v11 = vsub.f32 0.0, %v11931_v32  ;;  %v4712_v22 = vand.u32 2147483647, %v11943_v21  ;;  %v6296_v49 = vld [vmem:[%s12249_s0 + $0x188] sm:$0xff] }
 0x57e   :  { %v5400_v12 = vmul.f32 %v6180_v17, %v5240_v46  ;;  %v4986_v62 = vmul.f32 1.0614054, %v11966_v31  ;;  %6185 = vrcp.f32 %v11955_v39  ;;  %vm5464_vm11 = vcmp.lt.f32.partialorder %v11800_v26, 0.0 }
 0x57f   :  { %v6184_v19 = vpop.eup %6183  ;;  %v5209_v9 = vadd.f32 0.2548296, %v5177_v61  ;;  %v4714_v5 = vand.u32 2147483648, %v11943_v21  ;;  %v11977_v37 = vadd.f32 %v6295_v41, %v4213_v27  ;;  %vm5465_vm2 = vcmp.lt.f32.partialorder %v11813_v23, 0.0 }
 0x580   :  { %v5432_v20 = vsub.f32 1.0, %v5400_v12  ;;  %v5018_v57 = vadd.f32 -1.4531521, %v4986_v62  ;;  %6187 = vpow2.f32 %v5351_v35  ;;  %v4704_v63 = vmul.f32 %v6184_v19, %v11943_v21 }
 0x581   :  { %v5241_v28 = vmul.f32 %v5209_v9, %v11915_v40  ;;  %vm4708_vm4 = vweird.f32 %v11943_v21  ;;  %v11984_v55 = vmul.f32 %v5275_v11, %v11931_v32  ;;  %v5276_v10 = vsub.f32 0.0, %v11939_v56 }
 0x582   :  { %v5496_v1 = vsub.f32 0.0, %v5432_v20  ;;  %v5050_v58 = vmul.f32 %v5018_v57, %v11966_v31  ;;  %v4705_v53 = vsub.f32 1.0, %v4704_v63  ;;  %vm11988_vm14 = vcmp.eq.f32.partialorder %v4712_v22, 8.507059e+37 }
 0x583   :  { %v5401_v29 = vmul.f32 %v6182_v38, %v5241_v28  ;;  %v4715_v42 = vor.u32 1.1754944e-38, %v4714_v5  ;;  %v11993_v18 = vmul.f32 0.70710677, %v11977_v37  ;;  %v4278_v40 = vadd.f32 %v4277_v3, %v10139_v4 }
 0x584   :  { %v6186_v45 = vpop.eup %6185  ;;  %v5528_v32 = vsel %vm5464_vm11, %v5496_v1, %v5432_v20  ;;  %v5082_v50 = vadd.f32 1.4214138, %v5050_v58  ;;  %v4706_v54 = vmul.f32 %v6184_v19, %v4705_v53  ;;  %vm4709_vm12 = vweird.f32 %v6184_v19 }
 0x585   :  { %v5560_v15 = vadd.f32 1.0, %v5528_v32  ;;  %v5433_v59 = vsub.f32 1.0, %v5401_v29  ;;  %v4719_v13 = vmul.f32 %v6186_v45, %v11955_v39  ;;  %v4727_v0 = vand.u32 2147483647, %v11955_v39  ;;  %vm4710_vm0 = vmor %vm4708_vm4, %vm4709_vm12 }
 0x586   :  { %v6188_v17 = vpop.eup %6187  ;;  %v5114_v34 = vmul.f32 %v5082_v50, %v11966_v31  ;;  %v4707_v6 = vadd.f32 %v6184_v19, %v4706_v54  ;;  %v4729_v4 = vand.u32 2147483648, %v11955_v39  ;;  %v12003_v38 = vand.u32 2147483647, %v11993_v18 }
 0x587   :  { %v5592_v26 = vmul.f32 %v5560_v15, %v11950_v8  ;;  %v5497_v44 = vsub.f32 0.0, %v5433_v59  ;;  %v4720_v14 = vsub.f32 1.0, %v4719_v13  ;;  %v12011_v16 = vadd.f32 %v6296_v49, %v4278_v40 }
 0x588   :  { %v5146_v25 = vadd.f32 -0.28449672, %v5114_v34  ;;  %v4711_v27 = vsel %vm4710_vm0, %v6184_v19, %v4707_v6  ;;  %v4445_v46 = vmul.f32 0.3275911, %v12003_v38  ;;  %v4216_v43 = vadd.f32 %v4215_v47, %v10247_v51 }
 0x589   :  { %5757 = vst [vmem:[%s12256_s7 + $0x158] sm:$0xff] %v5592_v26  ;;  %v5529_v21 = vsel %vm5465_vm2, %v5497_v44, %v5433_v59  ;;  %v12022_v8 = vsel %vm11988_vm14, %v4715_v42, %v4711_v27  ;;  %v4721_v35 = vmul.f32 %v6186_v45, %v4720_v14  ;;  %vm4724_vm13 = vweird.f32 %v6186_v45  ;;  %v4280_v14 = vpop.f32.mrf.mxu1 }
 0x58a   :  { %v5561_v61 = vadd.f32 1.0, %v5529_v21  ;;  %v5178_v11 = vmul.f32 %v5146_v25, %v11966_v31  ;;  %v4987_v12 = vmul.f32 1.0614054, %v12022_v8  ;;  %v12026_v62 = vadd.f32 1.0, %v4445_v46 }
 0x58b   :  { %v4722_v22 = vadd.f32 %v6186_v45, %v4721_v35  ;;  %vm4723_vm5 = vweird.f32 %v11955_v39  ;;  %v4730_v19 = vor.u32 1.1754944e-38, %v4729_v4  ;;  %v12030_v23 = vmul.f32 0.70710677, %v12011_v16 }
 0x58c   :  { %v5593_v9 = vmul.f32 %v5561_v61, %v11963_v30  ;;  %v5210_v5 = vadd.f32 0.2548296, %v5178_v11  ;;  %v5019_v41 = vadd.f32 -1.4531521, %v4987_v12  ;;  %vm4725_vm3 = vmor %vm4723_vm5, %vm4724_vm13  ;;  %6189 = vrcp.f32 %v12026_v62  ;;  %v6297_v30 = vld [vmem:[%s12249_s0 + $0x190] sm:$0xff] }
 0x58d   :  { %v4726_v20 = vsel %vm4725_vm3, %v6186_v45, %v4722_v22  ;;  %vm4728_vm7 = vcmp.eq.f32.partialorder %v4727_v0, 8.507059e+37  ;;  %v12044_v3 = vadd.f32 %v6297_v30, %v4216_v43  ;;  %v5308_v1 = vmul.f32 %v5276_v10, %v11939_v56 }
 0x58e   :  { %5758 = vst [vmem:[%s12256_s7 + $0x160] sm:$0xff] %v5593_v9  ;;  %v5242_v57 = vmul.f32 %v5210_v5, %v11966_v31  ;;  %v5051_v39 = vmul.f32 %v5019_v41, %v12022_v8  ;;  %v12039_v63 = vsel %vm4728_vm7, %v4730_v19, %v4726_v20  ;;  %v12049_v58 = vand.u32 2147483647, %v12030_v23 }
 0x58f   :  { %v4988_v28 = vmul.f32 1.0614054, %v12039_v63  ;;  %v4346_v53 = vmul.f32 0.5, %v11858_v7  ;;  %v5353_v29 = vmul.f32 1.442695, %v11984_v55  ;;  %vm5466_vm9 = vcmp.lt.f32.partialorder %v11869_v2, 0.0 }
 0x590   :  { %v5402_v31 = vmul.f32 %v6188_v17, %v5242_v57  ;;  %v5083_v48 = vadd.f32 1.4214138, %v5051_v39  ;;  %v5277_v40 = vsub.f32 0.0, %v12003_v38  ;;  %v4446_v45 = vmul.f32 0.3275911, %v12049_v58  ;;  %v6298_v39 = vld [vmem:[%s12249_s0 + $0x198] sm:$0xff] }
 0x591   :  { %v5020_v42 = vadd.f32 -1.4531521, %v4988_v28  ;;  %v12057_v56 = vmul.f32 0.5, %v11903_v33  ;;  %v12061_v7 = vmul.f32 0.70710677, %v12044_v3  ;;  %6191 = vpow2.f32 %v5353_v29  ;;  %v4218_v28 = vpop.f32.mrf.mxu0 }
 0x592   :  { %v6190_v32 = vpop.eup %6189  ;;  %v5434_v50 = vsub.f32 1.0, %v5402_v31  ;;  %v5115_v10 = vmul.f32 %v5083_v48, %v12022_v8  ;;  %v5355_v55 = vmul.f32 1.442695, %v5308_v1  ;;  %v12065_v59 = vadd.f32 1.0, %v4446_v45 }
 0x593   :  { %v5052_v54 = vmul.f32 %v5020_v42, %v12039_v63  ;;  %v4734_v15 = vmul.f32 %v6190_v32, %v12026_v62  ;;  %v12068_v47 = vand.u32 2147483647, %v12061_v7  ;;  %v5309_v34 = vmul.f32 %v5277_v40, %v12003_v38 }
 0x594   :  { %v5498_v13 = vsub.f32 0.0, %v5434_v50  ;;  %v5147_v0 = vadd.f32 -0.28449672, %v5115_v10  ;;  %6193 = vrcp.f32 %v12065_v59  ;;  %v4742_v26 = vand.u32 2147483647, %v12026_v62 }
 0x595   :  { %v5084_v33 = vadd.f32 1.4214138, %v5052_v54  ;;  %v4735_v17 = vsub.f32 1.0, %v4734_v15  ;;  %v4744_v44 = vand.u32 2147483648, %v12026_v62  ;;  %vm4739_vm1 = vweird.f32 %v6190_v32 }
 0x596   :  { %v5530_v6 = vsel %vm5466_vm9, %v5498_v13, %v5434_v50  ;;  %v5179_v4 = vmul.f32 %v5147_v0, %v12022_v8  ;;  %v12079_v38 = vmul.f32 0.5, %v11910_v60  ;;  %vm4738_vm6 = vweird.f32 %v12026_v62 }
 0x597   :  { %v5562_v49 = vadd.f32 1.0, %v5530_v6  ;;  %v5116_v25 = vmul.f32 %v5084_v33, %v12039_v63  ;;  %v4736_v27 = vmul.f32 %v6190_v32, %v4735_v17  ;;  %v4447_v2 = vmul.f32 0.3275911, %v12068_v47  ;;  %v6192_v11 = vpop.eup %6191  ;;  %vm4740_vm15 = vmor %vm4738_vm6, %vm4739_vm1 }
 0x598   :  { %v5211_v46 = vadd.f32 0.2548296, %v5179_v4  ;;  %v4281_v61 = vadd.f32 %v4280_v14, %v10247_v51  ;;  %6195 = vpow2.f32 %v5355_v55  ;;  %v4745_v22 = vor.u32 1.1754944e-38, %v4744_v44 }
 0x599   :  { %v5594_v43 = vmul.f32 %v5562_v49, %v4346_v53  ;;  %v5148_v21 = vadd.f32 -0.28449672, %v5116_v25  ;;  %v4737_v35 = vadd.f32 %v6190_v32, %v4736_v27  ;;  %v12085_v19 = vadd.f32 1.0, %v4447_v2  ;;  %v4283_v25 = vpop.f32.mrf.mxu1 }
 0x59a   :  { %v5243_v12 = vmul.f32 %v5211_v46, %v12022_v8  ;;  %v6194_v9 = vpop.eup %6193  ;;  %vm4743_vm10 = vcmp.eq.f32.partialorder %v4742_v26, 8.507059e+37  ;;  %v5357_v5 = vmul.f32 1.442695, %v5309_v34  ;;  %vm5467_vm8 = vcmp.lt.f32.partialorder %v11923_v52, 0.0  ;;  %v6299_v52 = vld [vmem:[%s12249_s0 + $0x1a0] sm:$0xff] }
 0x59b   :  { %5759 = vst [vmem:[%s12256_s7 + $0x168] sm:$0xff] %v5594_v43  ;;  %v5180_v60 = vmul.f32 %v5148_v21, %v12039_v63  ;;  %v4741_v62 = vsel %vm4740_vm15, %v6190_v32, %v4737_v35  ;;  %v4749_v8 = vmul.f32 %v6194_v9, %v12065_v59  ;;  %6197 = vrcp.f32 %v12085_v19 }
 0x59c   :  { %v5403_v41 = vmul.f32 %v6192_v11, %v5243_v12  ;;  %v12092_v51 = vsel %vm4743_vm10, %v4745_v22, %v4741_v62  ;;  %v12100_v30 = vadd.f32 %v6298_v39, %v4281_v61  ;;  %vm5468_vm11 = vcmp.lt.f32.partialorder %v11927_v24, 0.0 }
 0x59d   :  { %v5212_v20 = vadd.f32 0.2548296, %v5180_v60  ;;  %v4989_v57 = vmul.f32 1.0614054, %v12092_v51  ;;  %v4750_v53 = vsub.f32 1.0, %v4749_v8  ;;  %v4759_v48 = vand.u32 2147483648, %v12065_v59 }
 0x59e   :  { %v5435_v1 = vsub.f32 1.0, %v5403_v41  ;;  %v4757_v31 = vand.u32 2147483647, %v12065_v59  ;;  %6199 = vpow2.f32 %v5357_v5  ;;  %v5278_v40 = vsub.f32 0.0, %v12049_v58  ;;  %v6196_v45 = vpop.eup %6195 }
 0x59f   :  { %v5244_v29 = vmul.f32 %v5212_v20, %v12039_v63  ;;  %v5021_v42 = vadd.f32 -1.4531521, %v4989_v57  ;;  %v4751_v50 = vmul.f32 %v6194_v9, %v4750_v53  ;;  %vm4754_vm2 = vweird.f32 %v6194_v9 }
 0x5a0   :  { %v5499_v32 = vsub.f32 0.0, %v5435_v1  ;;  %v4219_v10 = vadd.f32 %v4218_v28, %v10399_v36  ;;  %vm4753_vm4 = vweird.f32 %v12065_v59  ;;  %v12111_v15 = vmul.f32 0.70710677, %v12100_v30 }
 0x5a1   :  { %v5404_v54 = vmul.f32 %v6196_v45, %v5244_v29  ;;  %v5053_v55 = vmul.f32 %v5021_v42, %v12092_v51  ;;  %v4752_v13 = vadd.f32 %v6194_v9, %v4751_v50  ;;  %vm12115_vm14 = vcmp.eq.f32.partialorder %v4757_v31, 8.507059e+37  ;;  %v6198_v17 = vpop.eup %6197  ;;  %vm4755_vm12 = vmor %vm4753_vm4, %vm4754_vm2 }
 0x5a2   :  { %v5531_v63 = vsel %vm5467_vm8, %v5499_v32, %v5435_v1  ;;  %v4760_v33 = vor.u32 1.1754944e-38, %v4759_v48  ;;  %v4772_v26 = vand.u32 2147483647, %v12085_v19  ;;  %v4764_v44 = vmul.f32 %v6198_v17, %v12085_v19 }
 0x5a3   :  { %v5563_v34 = vadd.f32 1.0, %v5531_v63  ;;  %v5436_v6 = vsub.f32 1.0, %v5404_v54  ;;  %v5085_v4 = vadd.f32 1.4214138, %v5053_v55  ;;  %v4756_v59 = vsel %vm4755_vm12, %v6194_v9, %v4752_v13 }
 0x5a4   :  { %v12122_v14 = vand.u32 2147483647, %v12111_v15  ;;  %v12127_v49 = vadd.f32 %v6299_v52, %v4219_v10  ;;  %v6200_v27 = vpop.eup %6199  ;;  %v12133_v21 = vsel %vm12115_vm14, %v4760_v33, %v4756_v59  ;;  %v4765_v61 = vsub.f32 1.0, %v4764_v44 }
 0x5a5   :  { %v5595_v46 = vmul.f32 %v5563_v34, %v12057_v56  ;;  %v5500_v2 = vsub.f32 0.0, %v5436_v6  ;;  %v5117_v43 = vmul.f32 %v5085_v4, %v12092_v51  ;;  %v4990_v35 = vmul.f32 1.0614054, %v12133_v21 }
 0x5a6   :  { %v4774_v11 = vand.u32 2147483648, %v12085_v19  ;;  %v4448_v12 = vmul.f32 0.3275911, %v12122_v14  ;;  %vm4769_vm0 = vweird.f32 %v6198_v17  ;;  %v4284_v9 = vadd.f32 %v4283_v25, %v10399_v36 }
 0x5a7   :  { %5760 = vst [vmem:[%s12256_s7 + $0x170] sm:$0xff] %v5595_v46  ;;  %v5532_v56 = vsel %vm5468_vm11, %v5500_v2, %v5436_v6  ;;  %v5149_v22 = vadd.f32 -0.28449672, %v5117_v43  ;;  %v5022_v62 = vadd.f32 -1.4531521, %v4990_v35  ;;  %v4766_v5 = vmul.f32 %v6198_v17, %v4765_v61 }
 0x5a8   :  { %v5564_v60 = vadd.f32 1.0, %v5532_v56  ;;  %v12144_v41 = vadd.f32 1.0, %v4448_v12  ;;  %v5310_v20 = vmul.f32 %v5278_v40, %v12049_v58  ;;  %vm4768_vm13 = vweird.f32 %v12085_v19  ;;  %v6300_v58 = vld [vmem:[%s12249_s0 + $0x1a8] sm:$0xff] }
 0x5a9   :  { %v5181_v8 = vmul.f32 %v5149_v22, %v12092_v51  ;;  %v12150_v57 = vmul.f32 0.70710677, %v12127_v49  ;;  %v5054_v39 = vmul.f32 %v5022_v62, %v12133_v21  ;;  %v4767_v28 = vadd.f32 %v6198_v17, %v4766_v5  ;;  %vm4770_vm5 = vmor %vm4768_vm13, %vm4769_vm0 }
 0x5aa   :  { %v5596_v24 = vmul.f32 %v5564_v60, %v12079_v38  ;;  %6201 = vrcp.f32 %v12144_v41  ;;  %v4775_v1 = vor.u32 1.1754944e-38, %v4774_v11  ;;  %v5279_v53 = vsub.f32 0.0, %v12068_v47 }
 0x5ab   :  { %v5213_v36 = vadd.f32 0.2548296, %v5181_v8  ;;  %v12160_v19 = vadd.f32 %v6300_v58, %v4284_v9  ;;  %v5086_v38 = vadd.f32 1.4214138, %v5054_v39  ;;  %v4771_v31 = vsel %vm4770_vm5, %v6198_v17, %v4767_v28 }
 0x5ac   :  { %5761 = vst [vmem:[%s12256_s7 + $0x178] sm:$0xff] %v5596_v24  ;;  %vm4773_vm3 = vcmp.eq.f32.partialorder %v4772_v26, 8.507059e+37  ;;  %v5359_v29 = vmul.f32 1.442695, %v5310_v20  ;;  %v12171_v32 = vand.u32 2147483647, %v12150_v57  ;;  %v5311_v10 = vmul.f32 %v5279_v53, %v12068_v47 }
 0x5ad   :  { %v5245_v48 = vmul.f32 %v5213_v36, %v12092_v51  ;;  %v12166_v42 = vsel %vm4773_vm3, %v4775_v1, %v4771_v31  ;;  %v5118_v40 = vmul.f32 %v5086_v38, %v12133_v21  ;;  %v12175_v54 = vmul.f32 0.70710677, %v12160_v19 }
 0x5ae   :  { %v4991_v45 = vmul.f32 1.0614054, %v12166_v42  ;;  %v4449_v51 = vmul.f32 0.3275911, %v12171_v32  ;;  %6203 = vpow2.f32 %v5359_v29  ;;  %vm5469_vm7 = vcmp.lt.f32.partialorder %v11993_v18, 0.0 }
 0x5af   :  { %v5405_v50 = vmul.f32 %v6200_v27, %v5245_v48  ;;  %v5150_v63 = vadd.f32 -0.28449672, %v5118_v40  ;;  %v5361_v4 = vmul.f32 1.442695, %v5311_v10  ;;  %v12185_v59 = vand.u32 2147483647, %v12175_v54 }
 0x5b0   :  { %v6202_v55 = vpop.eup %6201  ;;  %v5023_v13 = vadd.f32 -1.4531521, %v4991_v45  ;;  %v12182_v6 = vadd.f32 1.0, %v4449_v51  ;;  %v4789_v25 = vand.u32 2147483648, %v12144_v41  ;;  %v4787_v46 = vand.u32 2147483647, %v12144_v41 }
 0x5b1   :  { %v5437_v0 = vsub.f32 1.0, %v5405_v50  ;;  %v4779_v33 = vmul.f32 %v6202_v55, %v12144_v41  ;;  %v5182_v17 = vmul.f32 %v5150_v63, %v12133_v21  ;;  %vm4784_vm9 = vweird.f32 %v6202_v55 }
 0x5b2   :  { %v5055_v34 = vmul.f32 %v5023_v13, %v12166_v42  ;;  %6205 = vrcp.f32 %v12182_v6  ;;  %v4349_v2 = vmul.f32 0.5, %v11977_v37  ;;  %vm4783_vm1 = vweird.f32 %v12144_v41 }
 0x5b3   :  { %v5501_v47 = vsub.f32 0.0, %v5437_v0  ;;  %v4780_v26 = vsub.f32 1.0, %v4779_v33  ;;  %v5214_v44 = vadd.f32 0.2548296, %v5182_v17  ;;  %v5280_v56 = vsub.f32 0.0, %v12122_v14  ;;  %vm4785_vm6 = vmor %vm4783_vm1, %vm4784_vm9 }
 0x5b4   :  { %v5087_v52 = vadd.f32 1.4214138, %v5055_v34  ;;  %v6204_v11 = vpop.eup %6203  ;;  %v4450_v22 = vmul.f32 0.3275911, %v12185_v59  ;;  %v4790_v5 = vor.u32 1.1754944e-38, %v4789_v25  ;;  %6207 = vpow2.f32 %v5361_v4 }
 0x5b5   :  { %v5533_v27 = vsel %vm5469_vm7, %v5501_v47, %v5437_v0  ;;  %v4781_v18 = vmul.f32 %v6202_v55, %v4780_v26  ;;  %v5246_v35 = vmul.f32 %v5214_v44, %v12133_v21  ;;  %vm4788_vm15 = vcmp.eq.f32.partialorder %v4787_v46, 8.507059e+37 }
 0x5b6   :  { %v5565_v43 = vadd.f32 1.0, %v5533_v27  ;;  %v5119_v61 = vmul.f32 %v5087_v52, %v12166_v42  ;;  %v12196_v8 = vadd.f32 1.0, %v4450_v22  ;;  %v5312_v53 = vmul.f32 %v5280_v56, %v12122_v14 }
 0x5b7   :  { %v4782_v12 = vadd.f32 %v6202_v55, %v4781_v18  ;;  %v5406_v60 = vmul.f32 %v6204_v11, %v5246_v35  ;;  %v4350_v58 = vmul.f32 0.5, %v12011_v16  ;;  %vm5470_vm10 = vcmp.lt.f32.partialorder %v12030_v23, 0.0 }
 0x5b8   :  { %v5597_v9 = vmul.f32 %v5565_v43, %v4349_v2  ;;  %v5151_v62 = vadd.f32 -0.28449672, %v5119_v61  ;;  %v6206_v21 = vpop.eup %6205  ;;  %6209 = vrcp.f32 %v12196_v8  ;;  %v4802_v40 = vand.u32 2147483647, %v12182_v6 }
 0x5b9   :  { %v4786_v37 = vsel %vm4785_vm6, %v6202_v55, %v4782_v12  ;;  %v5438_v41 = vsub.f32 1.0, %v5406_v60  ;;  %v4794_v28 = vmul.f32 %v6206_v21, %v12182_v6  ;;  %v4804_v45 = vand.u32 2147483648, %v12182_v6 }
 0x5ba   :  { %5762 = vst [vmem:[%s12256_s7 + $0x180] sm:$0xff] %v5597_v9  ;;  %v5183_v20 = vmul.f32 %v5151_v62, %v12166_v42  ;;  %v12202_v24 = vsel %vm4788_vm15, %v4790_v5, %v4786_v37  ;;  %v6208_v50 = vpop.eup %6207  ;;  %vm4799_vm8 = vweird.f32 %v6206_v21  ;;  %v5363_v13 = vmul.f32 1.442695, %v5312_v53 }
 0x5bb   :  { %v4992_v39 = vmul.f32 1.0614054, %v12202_v24  ;;  %v5502_v36 = vsub.f32 0.0, %v5438_v41  ;;  %v4795_v31 = vsub.f32 1.0, %v4794_v28  ;;  %vm4798_vm11 = vweird.f32 %v12182_v6 }
 0x5bc   :  { %v5215_v1 = vadd.f32 0.2548296, %v5183_v20  ;;  %vm4800_vm2 = vmor %vm4798_vm11, %vm4799_vm8  ;;  %vm5471_vm4 = vcmp.lt.f32.partialorder %v12061_v7, 0.0  ;;  %vm4803_vm14 = vcmp.eq.f32.partialorder %v4802_v40, 8.507059e+37  ;;  %v5281_v44 = vsub.f32 0.0, %v12171_v32 }
 0x5bd   :  { %v5024_v38 = vadd.f32 -1.4531521, %v4992_v39  ;;  %v5534_v48 = vsel %vm5470_vm10, %v5502_v36, %v5438_v41  ;;  %v4796_v63 = vmul.f32 %v6206_v21, %v4795_v31  ;;  %6211 = vpow2.f32 %v5363_v13 }
 0x5be   :  { %v5247_v29 = vmul.f32 %v5215_v1, %v12166_v42  ;;  %v5566_v10 = vadd.f32 1.0, %v5534_v48  ;;  %v6210_v16 = vpop.eup %6209  ;;  %v4805_v42 = vor.u32 1.1754944e-38, %v4804_v45  ;;  %v4819_v27 = vand.u32 2147483648, %v12196_v8 }
 0x5bf   :  { %v5056_v55 = vmul.f32 %v5024_v38, %v12202_v24  ;;  %v4797_v0 = vadd.f32 %v6206_v21, %v4796_v63  ;;  %v4809_v17 = vmul.f32 %v6210_v16, %v12196_v8  ;;  %vm4814_vm12 = vweird.f32 %v6210_v16 }
 0x5c0   :  { %v5407_v14 = vmul.f32 %v6208_v50, %v5247_v29  ;;  %v5598_v51 = vmul.f32 %v5566_v10, %v4350_v58  ;;  %v4817_v2 = vand.u32 2147483647, %v12196_v8  ;;  %v4351_v7 = vmul.f32 0.5, %v12044_v3 }
 0x5c1   :  { %v5088_v23 = vadd.f32 1.4214138, %v5056_v55  ;;  %v4801_v47 = vsel %vm4800_vm2, %v6206_v21, %v4797_v0  ;;  %v4810_v6 = vsub.f32 1.0, %v4809_v17  ;;  %v5313_v11 = vmul.f32 %v5281_v44, %v12171_v32 }
 0x5c2   :  { %v5439_v33 = vsub.f32 1.0, %v5407_v14  ;;  %5763 = vst [vmem:[%s12256_s7 + $0x188] sm:$0xff] %v5598_v51  ;;  %v4806_v26 = vsel %vm4803_vm14, %v4805_v42, %v4801_v47  ;;  %vm4813_vm0 = vweird.f32 %v12196_v8  ;;  %v4820_v60 = vor.u32 1.1754944e-38, %v4819_v27 }
 0x5c3   :  { %v5120_v34 = vmul.f32 %v5088_v23, %v12202_v24  ;;  %v4993_v25 = vmul.f32 1.0614054, %v4806_v26  ;;  %v4811_v46 = vmul.f32 %v6210_v16, %v4810_v6  ;;  %vm4815_vm13 = vmor %vm4813_vm0, %vm4814_vm12  ;;  %vm4818_vm5 = vcmp.eq.f32.partialorder %v4817_v2, 8.507059e+37  ;;  %v6212_v5 = vpop.eup %6211 }
 0x5c4   :  { %v5503_v4 = vsub.f32 0.0, %v5439_v33  ;;  %v5282_v32 = vsub.f32 0.0, %v12185_v59  ;;  %v5365_v41 = vmul.f32 1.442695, %v5313_v11  ;;  %vm5472_vm3 = vcmp.lt.f32.partialorder %v12111_v15, 0.0 }
 0x5c5   :  { %v5152_v52 = vadd.f32 -0.28449672, %v5120_v34  ;;  %v5025_v61 = vadd.f32 -1.4531521, %v4993_v25  ;;  %v4812_v12 = vadd.f32 %v6210_v16, %v4811_v46  ;;  %v4352_v45 = vmul.f32 0.5, %v12100_v30 }
 0x5c6   :  { %v5535_v18 = vsel %vm5471_vm4, %v5503_v4, %v5439_v33  ;;  %v5314_v53 = vmul.f32 %v5282_v32, %v12185_v59  ;;  %6213 = vpow2.f32 %v5365_v41  ;;  %vm5473_vm7 = vcmp.lt.f32.partialorder %v12150_v57, 0.0 }
 0x5c7   :  { %v5567_v43 = vadd.f32 1.0, %v5535_v18  ;;  %v5184_v35 = vmul.f32 %v5152_v52, %v12202_v24  ;;  %v5057_v9 = vmul.f32 %v5025_v61, %v4806_v26  ;;  %v4816_v62 = vsel %vm4815_vm13, %v6210_v16, %v4812_v12 }
 0x5c8   :  { %v4821_v21 = vsel %vm4818_vm5, %v4820_v60, %v4816_v62  ;;  %v5367_v40 = vmul.f32 1.442695, %v5314_v53  ;;  %v4353_v42 = vmul.f32 0.5, %v12127_v49  ;;  %vm5474_vm9 = vcmp.lt.f32.partialorder %v12175_v54, 0.0 }
 0x5c9   :  { %v5599_v56 = vmul.f32 %v5567_v43, %v4351_v7  ;;  %v5216_v22 = vadd.f32 0.2548296, %v5184_v35  ;;  %v5089_v37 = vadd.f32 1.4214138, %v5057_v9  ;;  %v4994_v8 = vmul.f32 1.0614054, %v4821_v21 }
 0x5ca   :  { %6215 = vpow2.f32 %v5367_v40  ;;  %v4354_v6 = vmul.f32 0.5, %v12160_v19 }
 0x5cb   :  { %5764 = vst [vmem:[%s12256_s7 + $0x190] sm:$0xff] %v5599_v56  ;;  %v5248_v3 = vmul.f32 %v5216_v22, %v12202_v24  ;;  %v5121_v39 = vmul.f32 %v5089_v37, %v4806_v26  ;;  %v5026_v28 = vadd.f32 -1.4531521, %v4994_v8 }
 0x5cc   :  { %v6214_v63 = vpop.eup %6213 }
 0x5cd   :  { %v5408_v20 = vmul.f32 %v6212_v5, %v5248_v3  ;;  %v5153_v1 = vadd.f32 -0.28449672, %v5121_v39  ;;  %v5058_v58 = vmul.f32 %v5026_v28, %v4821_v21 }
 0x5cf   :  { %v5440_v36 = vsub.f32 1.0, %v5408_v20  ;;  %v5185_v31 = vmul.f32 %v5153_v1, %v4806_v26  ;;  %v5090_v24 = vadd.f32 1.4214138, %v5058_v58 }
 0x5d0   :  { %v6216_v30 = vpop.eup %6215 }
 0x5d1   :  { %v5504_v38 = vsub.f32 0.0, %v5440_v36  ;;  %v5217_v29 = vadd.f32 0.2548296, %v5185_v31  ;;  %v5122_v10 = vmul.f32 %v5090_v24, %v4821_v21 }
 0x5d3   :  { %v5536_v48 = vsel %vm5472_vm3, %v5504_v38, %v5440_v36  ;;  %v5249_v55 = vmul.f32 %v5217_v29, %v4806_v26  ;;  %v5154_v13 = vadd.f32 -0.28449672, %v5122_v10 }
 0x5d4   :  { %v5568_v50 = vadd.f32 1.0, %v5536_v48 }
 0x5d5   :  { %v5409_v16 = vmul.f32 %v6214_v63, %v5249_v55  ;;  %v5186_v59 = vmul.f32 %v5154_v13, %v4821_v21 }
 0x5d6   :  { %v5600_v14 = vmul.f32 %v5568_v50, %v4352_v45 }
 0x5d7   :  { %v5441_v15 = vsub.f32 1.0, %v5409_v16  ;;  %v5218_v51 = vadd.f32 0.2548296, %v5186_v59 }
 0x5d8   :  { %5765 = vst [vmem:[%s12256_s7 + $0x198] sm:$0xff] %v5600_v14 }
 0x5d9   :  { %v5505_v23 = vsub.f32 0.0, %v5441_v15  ;;  %v5250_v0 = vmul.f32 %v5218_v51, %v4821_v21 }
 0x5db   :  { %v5537_v33 = vsel %vm5473_vm7, %v5505_v23, %v5441_v15  ;;  %v5410_v34 = vmul.f32 %v6216_v30, %v5250_v0 }
 0x5dc   :  { %v5569_v17 = vadd.f32 1.0, %v5537_v33 }
 0x5dd   :  { %v5442_v4 = vsub.f32 1.0, %v5410_v34 }
 0x5de   :  { %v5601_v47 = vmul.f32 %v5569_v17, %v4353_v42 }
 0x5df   :  { %v5506_v26 = vsub.f32 0.0, %v5442_v4 }
 0x5e0   :  { %5766 = vst [vmem:[%s12256_s7 + $0x1a0] sm:$0xff] %v5601_v47 }
 0x5e1   :  { %v5538_v44 = vsel %vm5474_vm9, %v5506_v26, %v5442_v4 }
 0x5e2   :  { %v5570_v57 = vadd.f32 1.0, %v5538_v44 }
 0x5e4   :  { %v5602_v52 = vmul.f32 %v5570_v57, %v4354_v6 }
 0x5e6   :  { %5767 = vst [vmem:[%s12256_s7 + $0x1a8] sm:$0xff] %v5602_v52 }

</bundles_post_ra>
